<compile_context>
chip_gen: v7x
topology: tpu7x:2x2x1
jax: 0.10.0
libtpu: 0.0.40
codegen_flags: <defaults>
</compile_context>

<pallas_src>
import math

import jax
import jax.numpy as jnp
from jax.experimental import pallas as pl
from jax.experimental.pallas import tpu as pltpu


# ----------------------------------------------------------------------------
# Tiling helpers
# ----------------------------------------------------------------------------
def _round_up(x, m):
    return (x + m - 1) // m * m


def _pick_tile(dim, prefs=(256, 128, 64, 32, 16, 8)):
    for t in prefs:
        if dim % t == 0:
            return t
    return dim


def _k_tiling(kdim, target=2048):
    """Pick (tk, kpad): contraction tile (multiple of 128) and padded K size."""
    if kdim <= 2 * target:
        return kdim, kdim                      # single full-K block, no padding
    nsteps = -(-kdim // target)                # ceil
    tk = _round_up(-(-kdim // nsteps), 128)
    return tk, tk * nsteps


def _mxu_tile_n():
    # v6e / v7x MXUs are 256 wide; v5e's are 128 wide.
    try:
        kind = jax.devices()[0].device_kind.lower()
        if "v5 lite" in kind or "v5e" in kind or "v5litepod" in kind:
            return 128
    except Exception:
        pass
    return 256


_MXU_N = _mxu_tile_n()
_VMEM_LIMIT = 32 * 1024 * 1024   # sized for v7x's 64 MiB VMEM (32 MiB scoped)


# ----------------------------------------------------------------------------
# Pallas kernels
# ----------------------------------------------------------------------------
def conv_mm_kernel(p_ref, w_ref, scale_ref, shift_ref, o_ref, acc_ref):
    """K-tiled (patches @ W) with f32 accumulation; BN fold + ReLU epilogue."""
    kk = pl.program_id(2)

    @pl.when(kk == 0)
    def _():
        acc_ref[...] = jnp.zeros_like(acc_ref)

    acc_ref[...] += jnp.dot(p_ref[...], w_ref[...],
                            preferred_element_type=jnp.float32)

    @pl.when(kk == pl.num_programs(2) - 1)
    def _():
        y = acc_ref[...] * scale_ref[...] + shift_ref[...]
        o_ref[...] = jnp.maximum(y, 0.0).astype(o_ref.dtype)


def conv_head_kernel(p_ref, w_ref, scale_ref, shift_ref, w5_ref, b5_ref,
                     f_ref, seg_ref, acc_ref, seg_acc_ref):
    """Layer4 conv+BN+ReLU fused with layer5 (1024->1 conv + ReLU).

    seg is accumulated across the cout grid axis as a VPU multiply +
    cross-lane sum (no cout=1 matmul, no re-read of x4).
    """
    j = pl.program_id(1)
    kk = pl.program_id(2)
    last_k = pl.num_programs(2) - 1
    last_j = pl.num_programs(1) - 1

    @pl.when(kk == 0)
    def _():
        acc_ref[...] = jnp.zeros_like(acc_ref)

    @pl.when(jnp.logical_and(j == 0, kk == 0))
    def _():
        seg_acc_ref[...] = jnp.zeros_like(seg_acc_ref)

    acc_ref[...] += jnp.dot(p_ref[...], w_ref[...],
                            preferred_element_type=jnp.float32)

    @pl.when(kk == last_k)
    def _():
        y = jnp.maximum(acc_ref[...] * scale_ref[...] + shift_ref[...], 0.0)
        f_ref[...] = y.astype(f_ref.dtype)
        seg_acc_ref[...] += jnp.sum(y * w5_ref[...], axis=1, keepdims=True)

    @pl.when(jnp.logical_and(kk == last_k, j == last_j))
    def _():
        seg_ref[...] = jnp.maximum(seg_acc_ref[...] + b5_ref[...],
                                   0.0).astype(seg_ref.dtype)


def maxpool_kernel(x_ref, o_ref):
    """x_ref: (4, tm, C) -- the 4 corners of each 2x2 pooling window."""
    x = x_ref[...]
    o_ref[...] = jnp.maximum(jnp.maximum(x[0], x[1]), jnp.maximum(x[2], x[3]))


def se_gate_kernel(x_ref, w1_ref, b1_ref, w2_ref, b2_ref, g_ref):
    """Squeeze-excite gate only: avg-pool -> fc1 -> ReLU -> fc2 -> sigmoid."""
    m = jnp.mean(x_ref[...].astype(jnp.float32), axis=1)          # (N, C)
    h = jnp.dot(m, w1_ref[...], preferred_element_type=jnp.float32) + b1_ref[...]
    h = jnp.maximum(h, 0.0)
    s = jnp.dot(h, w2_ref[...], preferred_element_type=jnp.float32) + b2_ref[...]
    g_ref[...] = jax.nn.sigmoid(s).astype(g_ref.dtype)             # (N, C)


# ----------------------------------------------------------------------------
# Wrappers (glue: padding, im2col, reshapes)
# ----------------------------------------------------------------------------
def _extract_patches(x_nhwc, k, pad, kpad):
    """im2col: (N,H,W,C) -> (N*H*W, kpad), column order (dy, dx, cin)."""
    n, h, w, c = x_nhwc.shape
    kdim = k * k * c
    xp = jnp.pad(x_nhwc, ((0, 0), (pad, pad), (pad, pad), (0, 0)))
    cols = [xp[:, dy:dy + h, dx:dx + w, :] for dy in range(k) for dx in range(k)]
    patches = jnp.concatenate(cols, axis=-1).reshape(n * h * w, kdim)
    if kpad > kdim:
        patches = jnp.pad(patches, ((0, 0), (0, kpad - kdim)))
    return patches


def _conv_grid_specs(m, kpad, cout, tm, tk, tn):
    grid = (m // tm, cout // tn, kpad // tk)
    in_specs = [
        pl.BlockSpec((tm, tk), lambda i, j, kk: (i, kk)),
        pl.BlockSpec((tk, tn), lambda i, j, kk: (kk, j)),
        pl.BlockSpec((1, tn), lambda i, j, kk: (0, j)),
        pl.BlockSpec((1, tn), lambda i, j, kk: (0, j)),
    ]
    out_spec = pl.BlockSpec((tm, tn), lambda i, j, kk: (i, j))
    return grid, in_specs, out_spec


def conv_bn_relu(x_nhwc, w_flat, scale, shift, *, k, pad,
                 out_dtype=jnp.bfloat16):
    """Conv2d(k,stride=1,padding=pad) + folded BN + ReLU as a tiled matmul."""
    n, h, w, c = x_nhwc.shape
    kdim = k * k * c
    tk, kpad = _k_tiling(kdim)
    assert w_flat.shape[0] == kpad, (w_flat.shape, kpad)
    cout = w_flat.shape[1]
    m = n * h * w
    tm = _pick_tile(m)
    tn = _MXU_N if cout % _MXU_N == 0 else cout

    patches = _extract_patches(x_nhwc.astype(jnp.bfloat16), k, pad, kpad)
    grid, in_specs, out_spec = _conv_grid_specs(m, kpad, cout, tm, tk, tn)

    out = pl.pallas_call(
        conv_mm_kernel,
        out_shape=jax.ShapeDtypeStruct((m, cout), out_dtype),
        grid=grid,
        in_specs=in_specs,
        out_specs=out_spec,
        scratch_shapes=[pltpu.VMEM((tm, tn), jnp.float32)],
        compiler_params=pltpu.CompilerParams(
            dimension_semantics=("parallel", "parallel", "arbitrary"),
            vmem_limit_bytes=_VMEM_LIMIT,
        ),
    )(patches, w_flat, scale.reshape(1, cout), shift.reshape(1, cout))
    return out.reshape(n, h, w, cout)


def conv_bn_relu_head(x_nhwc, w_flat, scale, shift, w5, b5, *, k, pad):
    """Layer4 (conv+BN+ReLU) fused with layer5 (1x1 conv -> 1 channel + ReLU)."""
    n, h, w, c = x_nhwc.shape
    kdim = k * k * c
    tk, kpad = _k_tiling(kdim)
    assert w_flat.shape[0] == kpad, (w_flat.shape, kpad)
    cout = w_flat.shape[1]
    m = n * h * w
    tm = _pick_tile(m)
    tn = _MXU_N if cout % _MXU_N == 0 else cout

    patches = _extract_patches(x_nhwc.astype(jnp.bfloat16), k, pad, kpad)
    grid, in_specs, f_spec = _conv_grid_specs(m, kpad, cout, tm, tk, tn)
    in_specs = in_specs + [
        pl.BlockSpec((1, tn), lambda i, j, kk: (0, j)),    # w5 row (1, cout)
        pl.BlockSpec((1, 1), lambda i, j, kk: (0, 0)),     # b5
    ]
    seg_spec = pl.BlockSpec((tm, 1), lambda i, j, kk: (i, 0))

    f_out, seg_out = pl.pallas_call(
        conv_head_kernel,
        out_shape=(jax.ShapeDtypeStruct((m, cout), jnp.float32),
                   jax.ShapeDtypeStruct((m, 1), jnp.float32)),
        grid=grid,
        in_specs=in_specs,
        out_specs=[f_spec, seg_spec],
        scratch_shapes=[pltpu.VMEM((tm, tn), jnp.float32),
                        pltpu.VMEM((tm, 1), jnp.float32)],
        compiler_params=pltpu.CompilerParams(
            # seg accumulates across the cout axis -> 'arbitrary'.
            dimension_semantics=("parallel", "arbitrary", "arbitrary"),
            vmem_limit_bytes=_VMEM_LIMIT,
        ),
    )(patches, w_flat, scale.reshape(1, cout), shift.reshape(1, cout),
      w5.reshape(1, cout), b5.reshape(1, 1))
    return f_out.reshape(n, h, w, cout), seg_out.reshape(n, h, w, 1)


def maxpool2(x_nhwc):
    n, h, w, c = x_nhwc.shape
    ho, wo = h // 2, w // 2
    m = n * ho * wo
    slabs = jnp.stack(
        [
            x_nhwc[:, 0::2, 0::2, :].reshape(m, c),
            x_nhwc[:, 0::2, 1::2, :].reshape(m, c),
            x_nhwc[:, 1::2, 0::2, :].reshape(m, c),
            x_nhwc[:, 1::2, 1::2, :].reshape(m, c),
        ],
        axis=0,
    )  # (4, M, C)
    tm = _pick_tile(m)
    out = pl.pallas_call(
        maxpool_kernel,
        out_shape=jax.ShapeDtypeStruct((m, c), x_nhwc.dtype),
        grid=(m // tm,),
        in_specs=[pl.BlockSpec((4, tm, c), lambda i: (0, i, 0))],
        out_specs=pl.BlockSpec((tm, c), lambda i: (i, 0)),
        compiler_params=pltpu.CompilerParams(
            dimension_semantics=("parallel",),
            vmem_limit_bytes=_VMEM_LIMIT,
        ),
    )(slabs)
    return out.reshape(n, ho, wo, c)


def se_gate(x_nhwc, w1, b1, w2, b2):
    """Compute only the (N, C) squeeze-excite gate (scale applied by consumer)."""
    n, h, w, c = x_nhwc.shape
    x_flat = x_nhwc.reshape(n, h * w, c)
    gate = pl.pallas_call(
        se_gate_kernel,
        out_shape=jax.ShapeDtypeStruct((n, c), jnp.float32),
    )(x_flat, w1, b1.reshape(1, -1), w2, b2.reshape(1, -1))
    return gate


# ----------------------------------------------------------------------------
# Deterministic parameter construction (synthetic weights)
# ----------------------------------------------------------------------------
def _init_bn(key, c):
    k1, k2, k3, k4 = jax.random.split(key, 4)
    gamma = jax.random.uniform(k1, (c,), jnp.float32, 0.5, 1.5)
    beta = jax.random.normal(k2, (c,), jnp.float32) * 0.1
    mean = jax.random.normal(k3, (c,), jnp.float32) * 0.1
    var = jax.random.uniform(k4, (c,), jnp.float32, 0.5, 1.5)
    return gamma, beta, mean, var


def _fold_bn(bias, gamma, beta, mean, var, eps=1e-5):
    scale = gamma / jnp.sqrt(var + eps)
    shift = beta + scale * (bias - mean)
    return scale, shift


def _conv_bn_params(key, k, cin, cout):
    kw, kbias, kbn = jax.random.split(key, 3)
    kdim = k * k * cin
    _, kpad = _k_tiling(kdim)
    w = jax.random.normal(kw, (kdim, cout), jnp.float32) / math.sqrt(kdim)
    b = jax.random.normal(kbias, (cout,), jnp.float32) * 0.01
    gamma, beta, mean, var = _init_bn(kbn, cout)
    scale, shift = _fold_bn(b, gamma, beta, mean, var)
    if kpad > kdim:
        w = jnp.pad(w, ((0, kpad - kdim), (0, 0)))   # zero rows: no-op in matmul
    return {"w": w.astype(jnp.bfloat16), "scale": scale, "shift": shift}


def _init_fc(key, cin, cout):
    kw, kb = jax.random.split(key)
    w = jax.random.normal(kw, (cin, cout), jnp.float32) / math.sqrt(cin)
    b = jax.random.normal(kb, (cout,), jnp.float32) * 0.01
    return w, b


def init_segmentnet_params(key, in_channels=3):
    keys = jax.random.split(key, 16)
    p = {}
    p["l1"] = [_conv_bn_params(keys[0], 5, in_channels, 32),
               _conv_bn_params(keys[1], 5, 32, 32)]
    p["l2"] = [_conv_bn_params(keys[2], 5, 32, 64),
               _conv_bn_params(keys[3], 5, 64, 64),
               _conv_bn_params(keys[4], 5, 64, 64)]
    p["l3"] = [_conv_bn_params(keys[5], 5, 64, 64),
               _conv_bn_params(keys[6], 5, 64, 64),
               _conv_bn_params(keys[7], 5, 64, 64),
               _conv_bn_params(keys[8], 5, 64, 64)]
    # squeeze-excite 1x1 convs (fc1: 64->4, fc2: 4->64)
    p["fc1"] = _init_fc(keys[9], 64, 64 // 16)
    p["fc2"] = _init_fc(keys[10], 64 // 16, 64)
    # layer4: 15x15 conv, 64 -> 1024 (weights K-padded to the tiling)
    p["l4"] = _conv_bn_params(keys[11], 15, 64, 1024)
    # layer5: 1x1 conv, 1024 -> 1 (bias + ReLU), fused into the layer4 kernel
    kw5, kb5 = jax.random.split(keys[12])
    p["l5"] = (jax.random.normal(kw5, (1024,), jnp.float32) / math.sqrt(1024.0),
               jax.random.normal(kb5, (1,), jnp.float32) * 0.01)
    return p


# ----------------------------------------------------------------------------
# Forward pass
# ----------------------------------------------------------------------------
def segmentnet_forward(x_nchw, params):
    # NCHW -> NHWC, bf16 activations (MXU native; epilogues stay f32 in-kernel).
    x = jnp.transpose(x_nchw, (0, 2, 3, 1)).astype(jnp.bfloat16)

    for p in params["l1"]:
        x = conv_bn_relu(x, p["w"], p["scale"], p["shift"], k=5, pad=2)
    x = maxpool2(x)

    for p in params["l2"]:
        x = conv_bn_relu(x, p["w"], p["scale"], p["shift"], k=5, pad=2)
    x = maxpool2(x)

    for p in params["l3"]:
        x = conv_bn_relu(x, p["w"], p["scale"], p["shift"], k=5, pad=2)
    x3 = maxpool2(x)

    # squeeze-excite: only the (N, C) gate is computed in Pallas; the scale is
    # fused into the layer4 patch producer (the consumer of x3).
    fc1_w, fc1_b = params["fc1"]
    fc2_w, fc2_b = params["fc2"]
    gate = se_gate(x3, fc1_w, fc1_b, fc2_w, fc2_b)                    # (N, C)
    x3s = (x3.astype(jnp.float32) * gate[:, None, None, :]).astype(jnp.bfloat16)

    # layer4 (15x15 conv + BN + ReLU) fused with layer5 (1x1 conv -> 1 + ReLU)
    p4 = params["l4"]
    w5, b5 = params["l5"]
    f_nhwc, seg_nhwc = conv_bn_relu_head(
        x3s, p4["w"], p4["scale"], p4["shift"], w5, b5, k=15, pad=7)

    f = jnp.transpose(f_nhwc, (0, 3, 1, 2))
    seg = jnp.transpose(seg_nhwc, (0, 3, 1, 2))
    return {"f": f, "seg": seg}


# ----------------------------------------------------------------------------
# Main
# ----------------------------------------------------------------------------
if __name__ == "__main__":
    key = jax.random.PRNGKey(0)
    kparams, kx = jax.random.split(key)

    params = init_segmentnet_params(kparams, in_channels=3)
    x = jax.random.normal(kx, (2, 3, 16, 16), jnp.float32)  # NCHW like PyTorch

    fwd = jax.jit(segmentnet_forward)   # lets XLA fuse the wrapper glue
    out = fwd(x, params)
    jax.block_until_ready(out)

    assert out["f"].shape == (2, 1024, 2, 2), out["f"].shape
    assert out["seg"].shape == (2, 1, 2, 2), out["seg"].shape
    assert out["f"].dtype == jnp.float32 and out["seg"].dtype == jnp.float32

    print("KERNEL_OK")
</pallas_src>

<mosaic_0001>
module attributes {stable_mosaic.version = 11 : i64} {
  func.func @conv_mm_kernel(%arg0: i32, %arg1: i32, %arg2: i32, %arg3: memref<256x75xbf16, #tpu.memory_space<vmem>>, %arg4: memref<75x32xbf16, #tpu.memory_space<vmem>>, %arg5: memref<1x32xf32, #tpu.memory_space<vmem>>, %arg6: memref<1x32xf32, #tpu.memory_space<vmem>>, %arg7: memref<256x32xbf16, #tpu.memory_space<vmem>>, %arg8: memref<256x32xf32, #tpu.memory_space<vmem>>) attributes {dimension_semantics = [#tpu.dimension_semantics<parallel>, #tpu.dimension_semantics<parallel>, #tpu.dimension_semantics<arbitrary>], iteration_bounds = array<i64: 2, 1, 1>, scalar_prefetch = 0 : i64, scratch_operands = 1 : i64, tpu.core_type = #tpu.core_type<tc>, window_params = [{transform_indices = @transform_0, window_bounds = array<i64: 256, 75>}, {transform_indices = @transform_1, window_bounds = array<i64: 75, 32>}, {transform_indices = @transform_2, window_bounds = array<i64: 1, 32>}, {transform_indices = @transform_3, window_bounds = array<i64: 1, 32>}, {transform_indices = @transform_4, window_bounds = array<i64: 256, 32>}]} {
    %c0_i32 = arith.constant 0 : i32
    %0 = arith.cmpi eq, %arg2, %c0_i32 : i32
    %1 = arith.extui %0 : i1 to i32
    %c0_i32_0 = arith.constant 0 : i32
    %2 = arith.cmpi ne, %1, %c0_i32_0 : i32
    scf.if %2 {
      %cst_10 = arith.constant 0.000000e+00 : f32
      %12 = vector.broadcast %cst_10 : f32 to vector<256x32xf32>
      %c0_11 = arith.constant 0 : index
      %c0_12 = arith.constant 0 : index
      %13 = vector.load %arg8[%c0_11, %c0_12] : memref<256x32xf32, #tpu.memory_space<vmem>>, vector<256x32xf32>
      tpu.vector_store %arg8[%c0_11, %c0_12], %12 {strides = array<i32>} : memref<256x32xf32, #tpu.memory_space<vmem>>, vector<256x32xf32>,
    } else {
    }
    %c0 = arith.constant 0 : index
    %c0_1 = arith.constant 0 : index
    %3 = vector.load %arg8[%c0, %c0_1] : memref<256x32xf32, #tpu.memory_space<vmem>>, vector<256x32xf32>
    %c0_2 = arith.constant 0 : index
    %c0_3 = arith.constant 0 : index
    %4 = vector.load %arg3[%c0_2, %c0_3] : memref<256x75xbf16, #tpu.memory_space<vmem>>, vector<256x75xbf16>
    %c0_4 = arith.constant 0 : index
    %c0_5 = arith.constant 0 : index
    %5 = vector.load %arg4[%c0_4, %c0_5] : memref<75x32xbf16, #tpu.memory_space<vmem>>, vector<75x32xbf16>
    %cst = arith.constant dense<0.000000e+00> : vector<256x32xf32>
    %6 = tpu.matmul %4, %5, %cst {dimension_numbers = #tpu.dot_dimension_numbers<[1], [0], [0], [1], [0, 0, 1, 1], [], []>} : vector<256x75xbf16>, vector<75x32xbf16>, vector<256x32xf32> -> vector<256x32xf32>
    %7 = arith.addf %3, %6 : vector<256x32xf32>
    %c0_6 = arith.constant 0 : index
    %c0_7 = arith.constant 0 : index
    %8 = vector.load %arg8[%c0_6, %c0_7] : memref<256x32xf32, #tpu.memory_space<vmem>>, vector<256x32xf32>
    tpu.vector_store %arg8[%c0_6, %c0_7], %7 {strides = array<i32>} : memref<256x32xf32, #tpu.memory_space<vmem>>, vector<256x32xf32>,
    %c0_i32_8 = arith.constant 0 : i32
    %9 = arith.cmpi eq, %arg2, %c0_i32_8 : i32
    %10 = arith.extui %9 : i1 to i32
    %c0_i32_9 = arith.constant 0 : i32
    %11 = arith.cmpi ne, %10, %c0_i32_9 : i32
    scf.if %11 {
      %c0_10 = arith.constant 0 : index
      %c0_11 = arith.constant 0 : index
      %12 = vector.load %arg8[%c0_10, %c0_11] : memref<256x32xf32, #tpu.memory_space<vmem>>, vector<256x32xf32>
      %c0_12 = arith.constant 0 : index
      %c0_13 = arith.constant 0 : index
      %13 = vector.load %arg5[%c0_12, %c0_13] : memref<1x32xf32, #tpu.memory_space<vmem>>, vector<1x32xf32>
      %14 = vector.broadcast %13 : vector<1x32xf32> to vector<256x32xf32>
      %15 = arith.mulf %12, %14 : vector<256x32xf32>
      %c0_14 = arith.constant 0 : index
      %c0_15 = arith.constant 0 : index
      %16 = vector.load %arg6[%c0_14, %c0_15] : memref<1x32xf32, #tpu.memory_space<vmem>>, vector<1x32xf32>
      %17 = vector.broadcast %16 : vector<1x32xf32> to vector<256x32xf32>
      %18 = arith.addf %15, %17 : vector<256x32xf32>
      %cst_16 = arith.constant 0.000000e+00 : f32
      %19 = vector.broadcast %cst_16 : f32 to vector<256x32xf32>
      %20 = arith.maximumf %18, %19 : vector<256x32xf32>
      %21 = arith.truncf %20 : vector<256x32xf32> to vector<256x32xbf16>
      %c0_17 = arith.constant 0 : index
      %c0_18 = arith.constant 0 : index
      %22 = vector.load %arg7[%c0_17, %c0_18] : memref<256x32xbf16, #tpu.memory_space<vmem>>, vector<256x32xbf16>
      tpu.vector_store %arg7[%c0_17, %c0_18], %21 {strides = array<i32>} : memref<256x32xbf16, #tpu.memory_space<vmem>>, vector<256x32xbf16>,
    } else {
    }
    return
  }
  func.func @transform_0(%arg0: i32, %arg1: i32, %arg2: i32) -> (i32, i32) {
    %c0_i32 = arith.constant 0 : i32
    return %arg0, %arg2 : i32, i32
  }
  func.func @transform_1(%arg0: i32, %arg1: i32, %arg2: i32) -> (i32, i32) {
    %c0_i32 = arith.constant 0 : i32
    return %arg2, %arg1 : i32, i32
  }
  func.func @transform_2(%arg0: i32, %arg1: i32, %arg2: i32) -> (i32, i32) {
    %c0_i32 = arith.constant 0 : i32
    %c0_i32_0 = arith.constant 0 : i32
    return %c0_i32, %arg1 : i32, i32
  }
  func.func @transform_3(%arg0: i32, %arg1: i32, %arg2: i32) -> (i32, i32) {
    %c0_i32 = arith.constant 0 : i32
    %c0_i32_0 = arith.constant 0 : i32
    return %c0_i32, %arg1 : i32, i32
  }
  func.func @transform_4(%arg0: i32, %arg1: i32, %arg2: i32) -> (i32, i32) {
    %c0_i32 = arith.constant 0 : i32
    return %arg0, %arg1 : i32, i32
  }
}

module attributes {stable_mosaic.version = 11 : i64} {
  func.func @conv_mm_kernel(%arg0: i32, %arg1: i32, %arg2: i32, %arg3: memref<256x800xbf16, #tpu.memory_space<vmem>>, %arg4: memref<800x32xbf16, #tpu.memory_space<vmem>>, %arg5: memref<1x32xf32, #tpu.memory_space<vmem>>, %arg6: memref<1x32xf32, #tpu.memory_space<vmem>>, %arg7: memref<256x32xbf16, #tpu.memory_space<vmem>>, %arg8: memref<256x32xf32, #tpu.memory_space<vmem>>) attributes {dimension_semantics = [#tpu.dimension_semantics<parallel>, #tpu.dimension_semantics<parallel>, #tpu.dimension_semantics<arbitrary>], iteration_bounds = array<i64: 2, 1, 1>, scalar_prefetch = 0 : i64, scratch_operands = 1 : i64, tpu.core_type = #tpu.core_type<tc>, window_params = [{transform_indices = @transform_0, window_bounds = array<i64: 256, 800>}, {transform_indices = @transform_1, window_bounds = array<i64: 800, 32>}, {transform_indices = @transform_2, window_bounds = array<i64: 1, 32>}, {transform_indices = @transform_3, window_bounds = array<i64: 1, 32>}, {transform_indices = @transform_4, window_bounds = array<i64: 256, 32>}]} {
    %c0_i32 = arith.constant 0 : i32
    %0 = arith.cmpi eq, %arg2, %c0_i32 : i32
    %1 = arith.extui %0 : i1 to i32
    %c0_i32_0 = arith.constant 0 : i32
    %2 = arith.cmpi ne, %1, %c0_i32_0 : i32
    scf.if %2 {
      %cst_10 = arith.constant 0.000000e+00 : f32
      %12 = vector.broadcast %cst_10 : f32 to vector<256x32xf32>
      %c0_11 = arith.constant 0 : index
      %c0_12 = arith.constant 0 : index
      %13 = vector.load %arg8[%c0_11, %c0_12] : memref<256x32xf32, #tpu.memory_space<vmem>>, vector<256x32xf32>
      tpu.vector_store %arg8[%c0_11, %c0_12], %12 {strides = array<i32>} : memref<256x32xf32, #tpu.memory_space<vmem>>, vector<256x32xf32>,
    } else {
    }
    %c0 = arith.constant 0 : index
    %c0_1 = arith.constant 0 : index
    %3 = vector.load %arg8[%c0, %c0_1] : memref<256x32xf32, #tpu.memory_space<vmem>>, vector<256x32xf32>
    %c0_2 = arith.constant 0 : index
    %c0_3 = arith.constant 0 : index
    %4 = vector.load %arg3[%c0_2, %c0_3] : memref<256x800xbf16, #tpu.memory_space<vmem>>, vector<256x800xbf16>
    %c0_4 = arith.constant 0 : index
    %c0_5 = arith.constant 0 : index
    %5 = vector.load %arg4[%c0_4, %c0_5] : memref<800x32xbf16, #tpu.memory_space<vmem>>, vector<800x32xbf16>
    %cst = arith.constant dense<0.000000e+00> : vector<256x32xf32>
    %6 = tpu.matmul %4, %5, %cst {dimension_numbers = #tpu.dot_dimension_numbers<[1], [0], [0], [1], [0, 0, 1, 1], [], []>} : vector<256x800xbf16>, vector<800x32xbf16>, vector<256x32xf32> -> vector<256x32xf32>
    %7 = arith.addf %3, %6 : vector<256x32xf32>
    %c0_6 = arith.constant 0 : index
    %c0_7 = arith.constant 0 : index
    %8 = vector.load %arg8[%c0_6, %c0_7] : memref<256x32xf32, #tpu.memory_space<vmem>>, vector<256x32xf32>
    tpu.vector_store %arg8[%c0_6, %c0_7], %7 {strides = array<i32>} : memref<256x32xf32, #tpu.memory_space<vmem>>, vector<256x32xf32>,
    %c0_i32_8 = arith.constant 0 : i32
    %9 = arith.cmpi eq, %arg2, %c0_i32_8 : i32
    %10 = arith.extui %9 : i1 to i32
    %c0_i32_9 = arith.constant 0 : i32
    %11 = arith.cmpi ne, %10, %c0_i32_9 : i32
    scf.if %11 {
      %c0_10 = arith.constant 0 : index
      %c0_11 = arith.constant 0 : index
      %12 = vector.load %arg8[%c0_10, %c0_11] : memref<256x32xf32, #tpu.memory_space<vmem>>, vector<256x32xf32>
      %c0_12 = arith.constant 0 : index
      %c0_13 = arith.constant 0 : index
      %13 = vector.load %arg5[%c0_12, %c0_13] : memref<1x32xf32, #tpu.memory_space<vmem>>, vector<1x32xf32>
      %14 = vector.broadcast %13 : vector<1x32xf32> to vector<256x32xf32>
      %15 = arith.mulf %12, %14 : vector<256x32xf32>
      %c0_14 = arith.constant 0 : index
      %c0_15 = arith.constant 0 : index
      %16 = vector.load %arg6[%c0_14, %c0_15] : memref<1x32xf32, #tpu.memory_space<vmem>>, vector<1x32xf32>
      %17 = vector.broadcast %16 : vector<1x32xf32> to vector<256x32xf32>
      %18 = arith.addf %15, %17 : vector<256x32xf32>
      %cst_16 = arith.constant 0.000000e+00 : f32
      %19 = vector.broadcast %cst_16 : f32 to vector<256x32xf32>
      %20 = arith.maximumf %18, %19 : vector<256x32xf32>
      %21 = arith.truncf %20 : vector<256x32xf32> to vector<256x32xbf16>
      %c0_17 = arith.constant 0 : index
      %c0_18 = arith.constant 0 : index
      %22 = vector.load %arg7[%c0_17, %c0_18] : memref<256x32xbf16, #tpu.memory_space<vmem>>, vector<256x32xbf16>
      tpu.vector_store %arg7[%c0_17, %c0_18], %21 {strides = array<i32>} : memref<256x32xbf16, #tpu.memory_space<vmem>>, vector<256x32xbf16>,
    } else {
    }
    return
  }
  func.func @transform_0(%arg0: i32, %arg1: i32, %arg2: i32) -> (i32, i32) {
    %c0_i32 = arith.constant 0 : i32
    return %arg0, %arg2 : i32, i32
  }
  func.func @transform_1(%arg0: i32, %arg1: i32, %arg2: i32) -> (i32, i32) {
    %c0_i32 = arith.constant 0 : i32
    return %arg2, %arg1 : i32, i32
  }
  func.func @transform_2(%arg0: i32, %arg1: i32, %arg2: i32) -> (i32, i32) {
    %c0_i32 = arith.constant 0 : i32
    %c0_i32_0 = arith.constant 0 : i32
    return %c0_i32, %arg1 : i32, i32
  }
  func.func @transform_3(%arg0: i32, %arg1: i32, %arg2: i32) -> (i32, i32) {
    %c0_i32 = arith.constant 0 : i32
    %c0_i32_0 = arith.constant 0 : i32
    return %c0_i32, %arg1 : i32, i32
  }
  func.func @transform_4(%arg0: i32, %arg1: i32, %arg2: i32) -> (i32, i32) {
    %c0_i32 = arith.constant 0 : i32
    return %arg0, %arg1 : i32, i32
  }
}

module attributes {stable_mosaic.version = 11 : i64} {
  func.func @maxpool_kernel(%arg0: i32, %arg1: memref<4x128x32xbf16, #tpu.memory_space<vmem>>, %arg2: memref<128x32xbf16, #tpu.memory_space<vmem>>) attributes {dimension_semantics = [#tpu.dimension_semantics<parallel>], iteration_bounds = array<i64: 1>, scalar_prefetch = 0 : i64, scratch_operands = 0 : i64, tpu.core_type = #tpu.core_type<tc>, window_params = [{transform_indices = @transform_0, window_bounds = array<i64: 4, 128, 32>}, {transform_indices = @transform_1, window_bounds = array<i64: 128, 32>}]} {
    %c0 = arith.constant 0 : index
    %c0_0 = arith.constant 0 : index
    %c0_1 = arith.constant 0 : index
    %0 = vector.load %arg1[%c0, %c0_0, %c0_1] : memref<4x128x32xbf16, #tpu.memory_space<vmem>>, vector<4x128x32xbf16>
    %1 = vector.extract_strided_slice %0 {offsets = [0, 0, 0], sizes = [1, 128, 32], strides = [1, 1, 1]} : vector<4x128x32xbf16> to vector<1x128x32xbf16>
    %2 = vector.shape_cast %1 : vector<1x128x32xbf16> to vector<128x32xbf16>
    %3 = vector.extract_strided_slice %0 {offsets = [1, 0, 0], sizes = [1, 128, 32], strides = [1, 1, 1]} : vector<4x128x32xbf16> to vector<1x128x32xbf16>
    %4 = vector.shape_cast %3 : vector<1x128x32xbf16> to vector<128x32xbf16>
    %5 = arith.maximumf %2, %4 : vector<128x32xbf16>
    %6 = vector.extract_strided_slice %0 {offsets = [2, 0, 0], sizes = [1, 128, 32], strides = [1, 1, 1]} : vector<4x128x32xbf16> to vector<1x128x32xbf16>
    %7 = vector.shape_cast %6 : vector<1x128x32xbf16> to vector<128x32xbf16>
    %8 = vector.extract_strided_slice %0 {offsets = [3, 0, 0], sizes = [1, 128, 32], strides = [1, 1, 1]} : vector<4x128x32xbf16> to vector<1x128x32xbf16>
    %9 = vector.shape_cast %8 : vector<1x128x32xbf16> to vector<128x32xbf16>
    %10 = arith.maximumf %7, %9 : vector<128x32xbf16>
    %11 = arith.maximumf %5, %10 : vector<128x32xbf16>
    %c0_2 = arith.constant 0 : index
    %c0_3 = arith.constant 0 : index
    %12 = vector.load %arg2[%c0_2, %c0_3] : memref<128x32xbf16, #tpu.memory_space<vmem>>, vector<128x32xbf16>
    tpu.vector_store %arg2[%c0_2, %c0_3], %11 {strides = array<i32>} : memref<128x32xbf16, #tpu.memory_space<vmem>>, vector<128x32xbf16>,
    return
  }
  func.func @transform_0(%arg0: i32) -> (i32, i32, i32) {
    %c0_i32 = arith.constant 0 : i32
    %c0_i32_0 = arith.constant 0 : i32
    %c0_i32_1 = arith.constant 0 : i32
    return %c0_i32, %arg0, %c0_i32_0 : i32, i32, i32
  }
  func.func @transform_1(%arg0: i32) -> (i32, i32) {
    %c0_i32 = arith.constant 0 : i32
    %c0_i32_0 = arith.constant 0 : i32
    return %arg0, %c0_i32 : i32, i32
  }
}

module attributes {stable_mosaic.version = 11 : i64} {
  func.func @conv_mm_kernel(%arg0: i32, %arg1: i32, %arg2: i32, %arg3: memref<128x800xbf16, #tpu.memory_space<vmem>>, %arg4: memref<800x64xbf16, #tpu.memory_space<vmem>>, %arg5: memref<1x64xf32, #tpu.memory_space<vmem>>, %arg6: memref<1x64xf32, #tpu.memory_space<vmem>>, %arg7: memref<128x64xbf16, #tpu.memory_space<vmem>>, %arg8: memref<128x64xf32, #tpu.memory_space<vmem>>) attributes {dimension_semantics = [#tpu.dimension_semantics<parallel>, #tpu.dimension_semantics<parallel>, #tpu.dimension_semantics<arbitrary>], iteration_bounds = array<i64: 1, 1, 1>, scalar_prefetch = 0 : i64, scratch_operands = 1 : i64, tpu.core_type = #tpu.core_type<tc>, window_params = [{transform_indices = @transform_0, window_bounds = array<i64: 128, 800>}, {transform_indices = @transform_1, window_bounds = array<i64: 800, 64>}, {transform_indices = @transform_2, window_bounds = array<i64: 1, 64>}, {transform_indices = @transform_3, window_bounds = array<i64: 1, 64>}, {transform_indices = @transform_4, window_bounds = array<i64: 128, 64>}]} {
    %c0_i32 = arith.constant 0 : i32
    %0 = arith.cmpi eq, %arg2, %c0_i32 : i32
    %1 = arith.extui %0 : i1 to i32
    %c0_i32_0 = arith.constant 0 : i32
    %2 = arith.cmpi ne, %1, %c0_i32_0 : i32
    scf.if %2 {
      %cst_10 = arith.constant 0.000000e+00 : f32
      %12 = vector.broadcast %cst_10 : f32 to vector<128x64xf32>
      %c0_11 = arith.constant 0 : index
      %c0_12 = arith.constant 0 : index
      %13 = vector.load %arg8[%c0_11, %c0_12] : memref<128x64xf32, #tpu.memory_space<vmem>>, vector<128x64xf32>
      tpu.vector_store %arg8[%c0_11, %c0_12], %12 {strides = array<i32>} : memref<128x64xf32, #tpu.memory_space<vmem>>, vector<128x64xf32>,
    } else {
    }
    %c0 = arith.constant 0 : index
    %c0_1 = arith.constant 0 : index
    %3 = vector.load %arg8[%c0, %c0_1] : memref<128x64xf32, #tpu.memory_space<vmem>>, vector<128x64xf32>
    %c0_2 = arith.constant 0 : index
    %c0_3 = arith.constant 0 : index
    %4 = vector.load %arg3[%c0_2, %c0_3] : memref<128x800xbf16, #tpu.memory_space<vmem>>, vector<128x800xbf16>
    %c0_4 = arith.constant 0 : index
    %c0_5 = arith.constant 0 : index
    %5 = vector.load %arg4[%c0_4, %c0_5] : memref<800x64xbf16, #tpu.memory_space<vmem>>, vector<800x64xbf16>
    %cst = arith.constant dense<0.000000e+00> : vector<128x64xf32>
    %6 = tpu.matmul %4, %5, %cst {dimension_numbers = #tpu.dot_dimension_numbers<[1], [0], [0], [1], [0, 0, 1, 1], [], []>} : vector<128x800xbf16>, vector<800x64xbf16>, vector<128x64xf32> -> vector<128x64xf32>
    %7 = arith.addf %3, %6 : vector<128x64xf32>
    %c0_6 = arith.constant 0 : index
    %c0_7 = arith.constant 0 : index
    %8 = vector.load %arg8[%c0_6, %c0_7] : memref<128x64xf32, #tpu.memory_space<vmem>>, vector<128x64xf32>
    tpu.vector_store %arg8[%c0_6, %c0_7], %7 {strides = array<i32>} : memref<128x64xf32, #tpu.memory_space<vmem>>, vector<128x64xf32>,
    %c0_i32_8 = arith.constant 0 : i32
    %9 = arith.cmpi eq, %arg2, %c0_i32_8 : i32
    %10 = arith.extui %9 : i1 to i32
    %c0_i32_9 = arith.constant 0 : i32
    %11 = arith.cmpi ne, %10, %c0_i32_9 : i32
    scf.if %11 {
      %c0_10 = arith.constant 0 : index
      %c0_11 = arith.constant 0 : index
      %12 = vector.load %arg8[%c0_10, %c0_11] : memref<128x64xf32, #tpu.memory_space<vmem>>, vector<128x64xf32>
      %c0_12 = arith.constant 0 : index
      %c0_13 = arith.constant 0 : index
      %13 = vector.load %arg5[%c0_12, %c0_13] : memref<1x64xf32, #tpu.memory_space<vmem>>, vector<1x64xf32>
      %14 = vector.broadcast %13 : vector<1x64xf32> to vector<128x64xf32>
      %15 = arith.mulf %12, %14 : vector<128x64xf32>
      %c0_14 = arith.constant 0 : index
      %c0_15 = arith.constant 0 : index
      %16 = vector.load %arg6[%c0_14, %c0_15] : memref<1x64xf32, #tpu.memory_space<vmem>>, vector<1x64xf32>
      %17 = vector.broadcast %16 : vector<1x64xf32> to vector<128x64xf32>
      %18 = arith.addf %15, %17 : vector<128x64xf32>
      %cst_16 = arith.constant 0.000000e+00 : f32
      %19 = vector.broadcast %cst_16 : f32 to vector<128x64xf32>
      %20 = arith.maximumf %18, %19 : vector<128x64xf32>
      %21 = arith.truncf %20 : vector<128x64xf32> to vector<128x64xbf16>
      %c0_17 = arith.constant 0 : index
      %c0_18 = arith.constant 0 : index
      %22 = vector.load %arg7[%c0_17, %c0_18] : memref<128x64xbf16, #tpu.memory_space<vmem>>, vector<128x64xbf16>
      tpu.vector_store %arg7[%c0_17, %c0_18], %21 {strides = array<i32>} : memref<128x64xbf16, #tpu.memory_space<vmem>>, vector<128x64xbf16>,
    } else {
    }
    return
  }
  func.func @transform_0(%arg0: i32, %arg1: i32, %arg2: i32) -> (i32, i32) {
    %c0_i32 = arith.constant 0 : i32
    return %arg0, %arg2 : i32, i32
  }
  func.func @transform_1(%arg0: i32, %arg1: i32, %arg2: i32) -> (i32, i32) {
    %c0_i32 = arith.constant 0 : i32
    return %arg2, %arg1 : i32, i32
  }
  func.func @transform_2(%arg0: i32, %arg1: i32, %arg2: i32) -> (i32, i32) {
    %c0_i32 = arith.constant 0 : i32
    %c0_i32_0 = arith.constant 0 : i32
    return %c0_i32, %arg1 : i32, i32
  }
  func.func @transform_3(%arg0: i32, %arg1: i32, %arg2: i32) -> (i32, i32) {
    %c0_i32 = arith.constant 0 : i32
    %c0_i32_0 = arith.constant 0 : i32
    return %c0_i32, %arg1 : i32, i32
  }
  func.func @transform_4(%arg0: i32, %arg1: i32, %arg2: i32) -> (i32, i32) {
    %c0_i32 = arith.constant 0 : i32
    return %arg0, %arg1 : i32, i32
  }
}

module attributes {stable_mosaic.version = 11 : i64} {
  func.func @conv_mm_kernel(%arg0: i32, %arg1: i32, %arg2: i32, %arg3: memref<128x1600xbf16, #tpu.memory_space<vmem>>, %arg4: memref<1600x64xbf16, #tpu.memory_space<vmem>>, %arg5: memref<1x64xf32, #tpu.memory_space<vmem>>, %arg6: memref<1x64xf32, #tpu.memory_space<vmem>>, %arg7: memref<128x64xbf16, #tpu.memory_space<vmem>>, %arg8: memref<128x64xf32, #tpu.memory_space<vmem>>) attributes {dimension_semantics = [#tpu.dimension_semantics<parallel>, #tpu.dimension_semantics<parallel>, #tpu.dimension_semantics<arbitrary>], iteration_bounds = array<i64: 1, 1, 1>, scalar_prefetch = 0 : i64, scratch_operands = 1 : i64, tpu.core_type = #tpu.core_type<tc>, window_params = [{transform_indices = @transform_0, window_bounds = array<i64: 128, 1600>}, {transform_indices = @transform_1, window_bounds = array<i64: 1600, 64>}, {transform_indices = @transform_2, window_bounds = array<i64: 1, 64>}, {transform_indices = @transform_3, window_bounds = array<i64: 1, 64>}, {transform_indices = @transform_4, window_bounds = array<i64: 128, 64>}]} {
    %c0_i32 = arith.constant 0 : i32
    %0 = arith.cmpi eq, %arg2, %c0_i32 : i32
    %1 = arith.extui %0 : i1 to i32
    %c0_i32_0 = arith.constant 0 : i32
    %2 = arith.cmpi ne, %1, %c0_i32_0 : i32
    scf.if %2 {
      %cst_10 = arith.constant 0.000000e+00 : f32
      %12 = vector.broadcast %cst_10 : f32 to vector<128x64xf32>
      %c0_11 = arith.constant 0 : index
      %c0_12 = arith.constant 0 : index
      %13 = vector.load %arg8[%c0_11, %c0_12] : memref<128x64xf32, #tpu.memory_space<vmem>>, vector<128x64xf32>
      tpu.vector_store %arg8[%c0_11, %c0_12], %12 {strides = array<i32>} : memref<128x64xf32, #tpu.memory_space<vmem>>, vector<128x64xf32>,
    } else {
    }
    %c0 = arith.constant 0 : index
    %c0_1 = arith.constant 0 : index
    %3 = vector.load %arg8[%c0, %c0_1] : memref<128x64xf32, #tpu.memory_space<vmem>>, vector<128x64xf32>
    %c0_2 = arith.constant 0 : index
    %c0_3 = arith.constant 0 : index
    %4 = vector.load %arg3[%c0_2, %c0_3] : memref<128x1600xbf16, #tpu.memory_space<vmem>>, vector<128x1600xbf16>
    %c0_4 = arith.constant 0 : index
    %c0_5 = arith.constant 0 : index
    %5 = vector.load %arg4[%c0_4, %c0_5] : memref<1600x64xbf16, #tpu.memory_space<vmem>>, vector<1600x64xbf16>
    %cst = arith.constant dense<0.000000e+00> : vector<128x64xf32>
    %6 = tpu.matmul %4, %5, %cst {dimension_numbers = #tpu.dot_dimension_numbers<[1], [0], [0], [1], [0, 0, 1, 1], [], []>} : vector<128x1600xbf16>, vector<1600x64xbf16>, vector<128x64xf32> -> vector<128x64xf32>
    %7 = arith.addf %3, %6 : vector<128x64xf32>
    %c0_6 = arith.constant 0 : index
    %c0_7 = arith.constant 0 : index
    %8 = vector.load %arg8[%c0_6, %c0_7] : memref<128x64xf32, #tpu.memory_space<vmem>>, vector<128x64xf32>
    tpu.vector_store %arg8[%c0_6, %c0_7], %7 {strides = array<i32>} : memref<128x64xf32, #tpu.memory_space<vmem>>, vector<128x64xf32>,
    %c0_i32_8 = arith.constant 0 : i32
    %9 = arith.cmpi eq, %arg2, %c0_i32_8 : i32
    %10 = arith.extui %9 : i1 to i32
    %c0_i32_9 = arith.constant 0 : i32
    %11 = arith.cmpi ne, %10, %c0_i32_9 : i32
    scf.if %11 {
      %c0_10 = arith.constant 0 : index
      %c0_11 = arith.constant 0 : index
      %12 = vector.load %arg8[%c0_10, %c0_11] : memref<128x64xf32, #tpu.memory_space<vmem>>, vector<128x64xf32>
      %c0_12 = arith.constant 0 : index
      %c0_13 = arith.constant 0 : index
      %13 = vector.load %arg5[%c0_12, %c0_13] : memref<1x64xf32, #tpu.memory_space<vmem>>, vector<1x64xf32>
      %14 = vector.broadcast %13 : vector<1x64xf32> to vector<128x64xf32>
      %15 = arith.mulf %12, %14 : vector<128x64xf32>
      %c0_14 = arith.constant 0 : index
      %c0_15 = arith.constant 0 : index
      %16 = vector.load %arg6[%c0_14, %c0_15] : memref<1x64xf32, #tpu.memory_space<vmem>>, vector<1x64xf32>
      %17 = vector.broadcast %16 : vector<1x64xf32> to vector<128x64xf32>
      %18 = arith.addf %15, %17 : vector<128x64xf32>
      %cst_16 = arith.constant 0.000000e+00 : f32
      %19 = vector.broadcast %cst_16 : f32 to vector<128x64xf32>
      %20 = arith.maximumf %18, %19 : vector<128x64xf32>
      %21 = arith.truncf %20 : vector<128x64xf32> to vector<128x64xbf16>
      %c0_17 = arith.constant 0 : index
      %c0_18 = arith.constant 0 : index
      %22 = vector.load %arg7[%c0_17, %c0_18] : memref<128x64xbf16, #tpu.memory_space<vmem>>, vector<128x64xbf16>
      tpu.vector_store %arg7[%c0_17, %c0_18], %21 {strides = array<i32>} : memref<128x64xbf16, #tpu.memory_space<vmem>>, vector<128x64xbf16>,
    } else {
    }
    return
  }
  func.func @transform_0(%arg0: i32, %arg1: i32, %arg2: i32) -> (i32, i32) {
    %c0_i32 = arith.constant 0 : i32
    return %arg0, %arg2 : i32, i32
  }
  func.func @transform_1(%arg0: i32, %arg1: i32, %arg2: i32) -> (i32, i32) {
    %c0_i32 = arith.constant 0 : i32
    return %arg2, %arg1 : i32, i32
  }
  func.func @transform_2(%arg0: i32, %arg1: i32, %arg2: i32) -> (i32, i32) {
    %c0_i32 = arith.constant 0 : i32
    %c0_i32_0 = arith.constant 0 : i32
    return %c0_i32, %arg1 : i32, i32
  }
  func.func @transform_3(%arg0: i32, %arg1: i32, %arg2: i32) -> (i32, i32) {
    %c0_i32 = arith.constant 0 : i32
    %c0_i32_0 = arith.constant 0 : i32
    return %c0_i32, %arg1 : i32, i32
  }
  func.func @transform_4(%arg0: i32, %arg1: i32, %arg2: i32) -> (i32, i32) {
    %c0_i32 = arith.constant 0 : i32
    return %arg0, %arg1 : i32, i32
  }
}

module attributes {stable_mosaic.version = 11 : i64} {
  func.func @maxpool_kernel(%arg0: i32, %arg1: memref<4x32x64xbf16, #tpu.memory_space<vmem>>, %arg2: memref<32x64xbf16, #tpu.memory_space<vmem>>) attributes {dimension_semantics = [#tpu.dimension_semantics<parallel>], iteration_bounds = array<i64: 1>, scalar_prefetch = 0 : i64, scratch_operands = 0 : i64, tpu.core_type = #tpu.core_type<tc>, window_params = [{transform_indices = @transform_0, window_bounds = array<i64: 4, 32, 64>}, {transform_indices = @transform_1, window_bounds = array<i64: 32, 64>}]} {
    %c0 = arith.constant 0 : index
    %c0_0 = arith.constant 0 : index
    %c0_1 = arith.constant 0 : index
    %0 = vector.load %arg1[%c0, %c0_0, %c0_1] : memref<4x32x64xbf16, #tpu.memory_space<vmem>>, vector<4x32x64xbf16>
    %1 = vector.extract_strided_slice %0 {offsets = [0, 0, 0], sizes = [1, 32, 64], strides = [1, 1, 1]} : vector<4x32x64xbf16> to vector<1x32x64xbf16>
    %2 = vector.shape_cast %1 : vector<1x32x64xbf16> to vector<32x64xbf16>
    %3 = vector.extract_strided_slice %0 {offsets = [1, 0, 0], sizes = [1, 32, 64], strides = [1, 1, 1]} : vector<4x32x64xbf16> to vector<1x32x64xbf16>
    %4 = vector.shape_cast %3 : vector<1x32x64xbf16> to vector<32x64xbf16>
    %5 = arith.maximumf %2, %4 : vector<32x64xbf16>
    %6 = vector.extract_strided_slice %0 {offsets = [2, 0, 0], sizes = [1, 32, 64], strides = [1, 1, 1]} : vector<4x32x64xbf16> to vector<1x32x64xbf16>
    %7 = vector.shape_cast %6 : vector<1x32x64xbf16> to vector<32x64xbf16>
    %8 = vector.extract_strided_slice %0 {offsets = [3, 0, 0], sizes = [1, 32, 64], strides = [1, 1, 1]} : vector<4x32x64xbf16> to vector<1x32x64xbf16>
    %9 = vector.shape_cast %8 : vector<1x32x64xbf16> to vector<32x64xbf16>
    %10 = arith.maximumf %7, %9 : vector<32x64xbf16>
    %11 = arith.maximumf %5, %10 : vector<32x64xbf16>
    %c0_2 = arith.constant 0 : index
    %c0_3 = arith.constant 0 : index
    %12 = vector.load %arg2[%c0_2, %c0_3] : memref<32x64xbf16, #tpu.memory_space<vmem>>, vector<32x64xbf16>
    tpu.vector_store %arg2[%c0_2, %c0_3], %11 {strides = array<i32>} : memref<32x64xbf16, #tpu.memory_space<vmem>>, vector<32x64xbf16>,
    return
  }
  func.func @transform_0(%arg0: i32) -> (i32, i32, i32) {
    %c0_i32 = arith.constant 0 : i32
    %c0_i32_0 = arith.constant 0 : i32
    %c0_i32_1 = arith.constant 0 : i32
    return %c0_i32, %arg0, %c0_i32_0 : i32, i32, i32
  }
  func.func @transform_1(%arg0: i32) -> (i32, i32) {
    %c0_i32 = arith.constant 0 : i32
    %c0_i32_0 = arith.constant 0 : i32
    return %arg0, %c0_i32 : i32, i32
  }
}

module attributes {stable_mosaic.version = 11 : i64} {
  func.func @conv_mm_kernel(%arg0: i32, %arg1: i32, %arg2: i32, %arg3: memref<32x1600xbf16, #tpu.memory_space<vmem>>, %arg4: memref<1600x64xbf16, #tpu.memory_space<vmem>>, %arg5: memref<1x64xf32, #tpu.memory_space<vmem>>, %arg6: memref<1x64xf32, #tpu.memory_space<vmem>>, %arg7: memref<32x64xbf16, #tpu.memory_space<vmem>>, %arg8: memref<32x64xf32, #tpu.memory_space<vmem>>) attributes {dimension_semantics = [#tpu.dimension_semantics<parallel>, #tpu.dimension_semantics<parallel>, #tpu.dimension_semantics<arbitrary>], iteration_bounds = array<i64: 1, 1, 1>, scalar_prefetch = 0 : i64, scratch_operands = 1 : i64, tpu.core_type = #tpu.core_type<tc>, window_params = [{transform_indices = @transform_0, window_bounds = array<i64: 32, 1600>}, {transform_indices = @transform_1, window_bounds = array<i64: 1600, 64>}, {transform_indices = @transform_2, window_bounds = array<i64: 1, 64>}, {transform_indices = @transform_3, window_bounds = array<i64: 1, 64>}, {transform_indices = @transform_4, window_bounds = array<i64: 32, 64>}]} {
    %c0_i32 = arith.constant 0 : i32
    %0 = arith.cmpi eq, %arg2, %c0_i32 : i32
    %1 = arith.extui %0 : i1 to i32
    %c0_i32_0 = arith.constant 0 : i32
    %2 = arith.cmpi ne, %1, %c0_i32_0 : i32
    scf.if %2 {
      %cst_10 = arith.constant 0.000000e+00 : f32
      %12 = vector.broadcast %cst_10 : f32 to vector<32x64xf32>
      %c0_11 = arith.constant 0 : index
      %c0_12 = arith.constant 0 : index
      %13 = vector.load %arg8[%c0_11, %c0_12] : memref<32x64xf32, #tpu.memory_space<vmem>>, vector<32x64xf32>
      tpu.vector_store %arg8[%c0_11, %c0_12], %12 {strides = array<i32>} : memref<32x64xf32, #tpu.memory_space<vmem>>, vector<32x64xf32>,
    } else {
    }
    %c0 = arith.constant 0 : index
    %c0_1 = arith.constant 0 : index
    %3 = vector.load %arg8[%c0, %c0_1] : memref<32x64xf32, #tpu.memory_space<vmem>>, vector<32x64xf32>
    %c0_2 = arith.constant 0 : index
    %c0_3 = arith.constant 0 : index
    %4 = vector.load %arg3[%c0_2, %c0_3] : memref<32x1600xbf16, #tpu.memory_space<vmem>>, vector<32x1600xbf16>
    %c0_4 = arith.constant 0 : index
    %c0_5 = arith.constant 0 : index
    %5 = vector.load %arg4[%c0_4, %c0_5] : memref<1600x64xbf16, #tpu.memory_space<vmem>>, vector<1600x64xbf16>
    %cst = arith.constant dense<0.000000e+00> : vector<32x64xf32>
    %6 = tpu.matmul %4, %5, %cst {dimension_numbers = #tpu.dot_dimension_numbers<[1], [0], [0], [1], [0, 0, 1, 1], [], []>} : vector<32x1600xbf16>, vector<1600x64xbf16>, vector<32x64xf32> -> vector<32x64xf32>
    %7 = arith.addf %3, %6 : vector<32x64xf32>
    %c0_6 = arith.constant 0 : index
    %c0_7 = arith.constant 0 : index
    %8 = vector.load %arg8[%c0_6, %c0_7] : memref<32x64xf32, #tpu.memory_space<vmem>>, vector<32x64xf32>
    tpu.vector_store %arg8[%c0_6, %c0_7], %7 {strides = array<i32>} : memref<32x64xf32, #tpu.memory_space<vmem>>, vector<32x64xf32>,
    %c0_i32_8 = arith.constant 0 : i32
    %9 = arith.cmpi eq, %arg2, %c0_i32_8 : i32
    %10 = arith.extui %9 : i1 to i32
    %c0_i32_9 = arith.constant 0 : i32
    %11 = arith.cmpi ne, %10, %c0_i32_9 : i32
    scf.if %11 {
      %c0_10 = arith.constant 0 : index
      %c0_11 = arith.constant 0 : index
      %12 = vector.load %arg8[%c0_10, %c0_11] : memref<32x64xf32, #tpu.memory_space<vmem>>, vector<32x64xf32>
      %c0_12 = arith.constant 0 : index
      %c0_13 = arith.constant 0 : index
      %13 = vector.load %arg5[%c0_12, %c0_13] : memref<1x64xf32, #tpu.memory_space<vmem>>, vector<1x64xf32>
      %14 = vector.broadcast %13 : vector<1x64xf32> to vector<32x64xf32>
      %15 = arith.mulf %12, %14 : vector<32x64xf32>
      %c0_14 = arith.constant 0 : index
      %c0_15 = arith.constant 0 : index
      %16 = vector.load %arg6[%c0_14, %c0_15] : memref<1x64xf32, #tpu.memory_space<vmem>>, vector<1x64xf32>
      %17 = vector.broadcast %16 : vector<1x64xf32> to vector<32x64xf32>
      %18 = arith.addf %15, %17 : vector<32x64xf32>
      %cst_16 = arith.constant 0.000000e+00 : f32
      %19 = vector.broadcast %cst_16 : f32 to vector<32x64xf32>
      %20 = arith.maximumf %18, %19 : vector<32x64xf32>
      %21 = arith.truncf %20 : vector<32x64xf32> to vector<32x64xbf16>
      %c0_17 = arith.constant 0 : index
      %c0_18 = arith.constant 0 : index
      %22 = vector.load %arg7[%c0_17, %c0_18] : memref<32x64xbf16, #tpu.memory_space<vmem>>, vector<32x64xbf16>
      tpu.vector_store %arg7[%c0_17, %c0_18], %21 {strides = array<i32>} : memref<32x64xbf16, #tpu.memory_space<vmem>>, vector<32x64xbf16>,
    } else {
    }
    return
  }
  func.func @transform_0(%arg0: i32, %arg1: i32, %arg2: i32) -> (i32, i32) {
    %c0_i32 = arith.constant 0 : i32
    return %arg0, %arg2 : i32, i32
  }
  func.func @transform_1(%arg0: i32, %arg1: i32, %arg2: i32) -> (i32, i32) {
    %c0_i32 = arith.constant 0 : i32
    return %arg2, %arg1 : i32, i32
  }
  func.func @transform_2(%arg0: i32, %arg1: i32, %arg2: i32) -> (i32, i32) {
    %c0_i32 = arith.constant 0 : i32
    %c0_i32_0 = arith.constant 0 : i32
    return %c0_i32, %arg1 : i32, i32
  }
  func.func @transform_3(%arg0: i32, %arg1: i32, %arg2: i32) -> (i32, i32) {
    %c0_i32 = arith.constant 0 : i32
    %c0_i32_0 = arith.constant 0 : i32
    return %c0_i32, %arg1 : i32, i32
  }
  func.func @transform_4(%arg0: i32, %arg1: i32, %arg2: i32) -> (i32, i32) {
    %c0_i32 = arith.constant 0 : i32
    return %arg0, %arg1 : i32, i32
  }
}

module attributes {stable_mosaic.version = 11 : i64} {
  func.func @maxpool_kernel(%arg0: i32, %arg1: memref<4x8x64xbf16, #tpu.memory_space<vmem>>, %arg2: memref<8x64xbf16, #tpu.memory_space<vmem>>) attributes {dimension_semantics = [#tpu.dimension_semantics<parallel>], iteration_bounds = array<i64: 1>, scalar_prefetch = 0 : i64, scratch_operands = 0 : i64, tpu.core_type = #tpu.core_type<tc>, window_params = [{transform_indices = @transform_0, window_bounds = array<i64: 4, 8, 64>}, {transform_indices = @transform_1, window_bounds = array<i64: 8, 64>}]} {
    %c0 = arith.constant 0 : index
    %c0_0 = arith.constant 0 : index
    %c0_1 = arith.constant 0 : index
    %0 = vector.load %arg1[%c0, %c0_0, %c0_1] : memref<4x8x64xbf16, #tpu.memory_space<vmem>>, vector<4x8x64xbf16>
    %1 = vector.extract_strided_slice %0 {offsets = [0, 0, 0], sizes = [1, 8, 64], strides = [1, 1, 1]} : vector<4x8x64xbf16> to vector<1x8x64xbf16>
    %2 = vector.shape_cast %1 : vector<1x8x64xbf16> to vector<8x64xbf16>
    %3 = vector.extract_strided_slice %0 {offsets = [1, 0, 0], sizes = [1, 8, 64], strides = [1, 1, 1]} : vector<4x8x64xbf16> to vector<1x8x64xbf16>
    %4 = vector.shape_cast %3 : vector<1x8x64xbf16> to vector<8x64xbf16>
    %5 = arith.maximumf %2, %4 : vector<8x64xbf16>
    %6 = vector.extract_strided_slice %0 {offsets = [2, 0, 0], sizes = [1, 8, 64], strides = [1, 1, 1]} : vector<4x8x64xbf16> to vector<1x8x64xbf16>
    %7 = vector.shape_cast %6 : vector<1x8x64xbf16> to vector<8x64xbf16>
    %8 = vector.extract_strided_slice %0 {offsets = [3, 0, 0], sizes = [1, 8, 64], strides = [1, 1, 1]} : vector<4x8x64xbf16> to vector<1x8x64xbf16>
    %9 = vector.shape_cast %8 : vector<1x8x64xbf16> to vector<8x64xbf16>
    %10 = arith.maximumf %7, %9 : vector<8x64xbf16>
    %11 = arith.maximumf %5, %10 : vector<8x64xbf16>
    %c0_2 = arith.constant 0 : index
    %c0_3 = arith.constant 0 : index
    %12 = vector.load %arg2[%c0_2, %c0_3] : memref<8x64xbf16, #tpu.memory_space<vmem>>, vector<8x64xbf16>
    tpu.vector_store %arg2[%c0_2, %c0_3], %11 {strides = array<i32>} : memref<8x64xbf16, #tpu.memory_space<vmem>>, vector<8x64xbf16>,
    return
  }
  func.func @transform_0(%arg0: i32) -> (i32, i32, i32) {
    %c0_i32 = arith.constant 0 : i32
    %c0_i32_0 = arith.constant 0 : i32
    %c0_i32_1 = arith.constant 0 : i32
    return %c0_i32, %arg0, %c0_i32_0 : i32, i32, i32
  }
  func.func @transform_1(%arg0: i32) -> (i32, i32) {
    %c0_i32 = arith.constant 0 : i32
    %c0_i32_0 = arith.constant 0 : i32
    return %arg0, %c0_i32 : i32, i32
  }
}

module attributes {stable_mosaic.version = 11 : i64} {
  func.func @se_gate_kernel(%arg0: memref<2x4x64xbf16, #tpu.memory_space<vmem>>, %arg1: memref<64x4xf32, #tpu.memory_space<vmem>>, %arg2: memref<1x4xf32, #tpu.memory_space<vmem>>, %arg3: memref<4x64xf32, #tpu.memory_space<vmem>>, %arg4: memref<1x64xf32, #tpu.memory_space<vmem>>, %arg5: memref<2x64xf32, #tpu.memory_space<vmem>>) attributes {dimension_semantics = [], scalar_prefetch = 0 : i64, scratch_operands = 0 : i64, tpu.core_type = #tpu.core_type<tc>} {
    %c0 = arith.constant 0 : index
    %c0_0 = arith.constant 0 : index
    %c0_1 = arith.constant 0 : index
    %0 = vector.load %arg0[%c0, %c0_0, %c0_1] : memref<2x4x64xbf16, #tpu.memory_space<vmem>>, vector<2x4x64xbf16>
    %1 = arith.extf %0 : vector<2x4x64xbf16> to vector<2x4x64xf32>
    %cst = arith.constant dense<0.000000e+00> : vector<2x64xf32>
    %2 = vector.multi_reduction <add>, %1, %cst [1] : vector<2x4x64xf32> to vector<2x64xf32>
    %cst_2 = arith.constant 4.000000e+00 : f32
    %3 = vector.broadcast %cst_2 : f32 to vector<2x64xf32>
    %4 = arith.divf %2, %3 : vector<2x64xf32>
    %c0_3 = arith.constant 0 : index
    %c0_4 = arith.constant 0 : index
    %5 = vector.load %arg1[%c0_3, %c0_4] : memref<64x4xf32, #tpu.memory_space<vmem>>, vector<64x4xf32>
    %cst_5 = arith.constant dense<0.000000e+00> : vector<2x4xf32>
    %6 = tpu.matmul %4, %5, %cst_5 {dimension_numbers = #tpu.dot_dimension_numbers<[1], [0], [0], [1], [0, 0, 1, 1], [], []>} : vector<2x64xf32>, vector<64x4xf32>, vector<2x4xf32> -> vector<2x4xf32>
    %c0_6 = arith.constant 0 : index
    %c0_7 = arith.constant 0 : index
    %7 = vector.load %arg2[%c0_6, %c0_7] : memref<1x4xf32, #tpu.memory_space<vmem>>, vector<1x4xf32>
    %8 = vector.broadcast %7 : vector<1x4xf32> to vector<2x4xf32>
    %9 = arith.addf %6, %8 : vector<2x4xf32>
    %cst_8 = arith.constant 0.000000e+00 : f32
    %10 = vector.broadcast %cst_8 : f32 to vector<2x4xf32>
    %11 = arith.maximumf %9, %10 : vector<2x4xf32>
    %c0_9 = arith.constant 0 : index
    %c0_10 = arith.constant 0 : index
    %12 = vector.load %arg3[%c0_9, %c0_10] : memref<4x64xf32, #tpu.memory_space<vmem>>, vector<4x64xf32>
    %cst_11 = arith.constant dense<0.000000e+00> : vector<2x64xf32>
    %13 = tpu.matmul %11, %12, %cst_11 {dimension_numbers = #tpu.dot_dimension_numbers<[1], [0], [0], [1], [0, 0, 1, 1], [], []>} : vector<2x4xf32>, vector<4x64xf32>, vector<2x64xf32> -> vector<2x64xf32>
    %c0_12 = arith.constant 0 : index
    %c0_13 = arith.constant 0 : index
    %14 = vector.load %arg4[%c0_12, %c0_13] : memref<1x64xf32, #tpu.memory_space<vmem>>, vector<1x64xf32>
    %15 = vector.broadcast %14 : vector<1x64xf32> to vector<2x64xf32>
    %16 = arith.addf %13, %15 : vector<2x64xf32>
    %17 = arith.negf %16 : vector<2x64xf32>
    %18 = math.exp %17 : vector<2x64xf32>
    %cst_14 = arith.constant 1.000000e+00 : f32
    %19 = vector.broadcast %cst_14 : f32 to vector<2x64xf32>
    %20 = arith.addf %19, %18 : vector<2x64xf32>
    %21 = arith.divf %19, %20 : vector<2x64xf32>
    %c0_15 = arith.constant 0 : index
    %c0_16 = arith.constant 0 : index
    %22 = vector.load %arg5[%c0_15, %c0_16] : memref<2x64xf32, #tpu.memory_space<vmem>>, vector<2x64xf32>
    tpu.vector_store %arg5[%c0_15, %c0_16], %21 {strides = array<i32>} : memref<2x64xf32, #tpu.memory_space<vmem>>, vector<2x64xf32>,
    return
  }
}

module attributes {stable_mosaic.version = 11 : i64} {
  func.func @conv_head_kernel(%arg0: i32, %arg1: i32, %arg2: i32, %arg3: memref<8x1920xbf16, #tpu.memory_space<vmem>>, %arg4: memref<1920x256xbf16, #tpu.memory_space<vmem>>, %arg5: memref<1x256xf32, #tpu.memory_space<vmem>>, %arg6: memref<1x256xf32, #tpu.memory_space<vmem>>, %arg7: memref<1x256xf32, #tpu.memory_space<vmem>>, %arg8: memref<1x1xf32, #tpu.memory_space<vmem>>, %arg9: memref<8x256xf32, #tpu.memory_space<vmem>>, %arg10: memref<8x1xf32, #tpu.memory_space<vmem>>, %arg11: memref<8x256xf32, #tpu.memory_space<vmem>>, %arg12: memref<8x1xf32, #tpu.memory_space<vmem>>) attributes {dimension_semantics = [#tpu.dimension_semantics<parallel>, #tpu.dimension_semantics<arbitrary>, #tpu.dimension_semantics<arbitrary>], iteration_bounds = array<i64: 1, 4, 8>, scalar_prefetch = 0 : i64, scratch_operands = 2 : i64, tpu.core_type = #tpu.core_type<tc>, window_params = [{transform_indices = @transform_0, window_bounds = array<i64: 8, 1920>}, {transform_indices = @transform_1, window_bounds = array<i64: 1920, 256>}, {transform_indices = @transform_2, window_bounds = array<i64: 1, 256>}, {transform_indices = @transform_3, window_bounds = array<i64: 1, 256>}, {transform_indices = @transform_4, window_bounds = array<i64: 1, 256>}, {pipeline_mode = #tpu.pipeline_mode<synchronous>, transform_indices = @transform_5, window_bounds = array<i64: 1, 1>}, {transform_indices = @transform_6, window_bounds = array<i64: 8, 256>}, {transform_indices = @transform_7, window_bounds = array<i64: 8, 1>}]} {
    %c0_i32 = arith.constant 0 : i32
    %0 = arith.cmpi eq, %arg2, %c0_i32 : i32
    %1 = arith.extui %0 : i1 to i32
    %c0_i32_0 = arith.constant 0 : i32
    %2 = arith.cmpi ne, %1, %c0_i32_0 : i32
    scf.if %2 {
      %cst_14 = arith.constant 0.000000e+00 : f32
      %22 = vector.broadcast %cst_14 : f32 to vector<8x256xf32>
      %c0_15 = arith.constant 0 : index
      %c0_16 = arith.constant 0 : index
      %23 = vector.load %arg11[%c0_15, %c0_16] : memref<8x256xf32, #tpu.memory_space<vmem>>, vector<8x256xf32>
      tpu.vector_store %arg11[%c0_15, %c0_16], %22 {strides = array<i32>} : memref<8x256xf32, #tpu.memory_space<vmem>>, vector<8x256xf32>,
    } else {
    }
    %c0_i32_1 = arith.constant 0 : i32
    %3 = arith.cmpi eq, %arg1, %c0_i32_1 : i32
    %c0_i32_2 = arith.constant 0 : i32
    %4 = arith.cmpi eq, %arg2, %c0_i32_2 : i32
    %5 = arith.andi %3, %4 : i1
    %6 = arith.extui %5 : i1 to i32
    %c0_i32_3 = arith.constant 0 : i32
    %7 = arith.cmpi ne, %6, %c0_i32_3 : i32
    scf.if %7 {
      %cst_14 = arith.constant 0.000000e+00 : f32
      %22 = vector.broadcast %cst_14 : f32 to vector<8x1xf32>
      %c0_15 = arith.constant 0 : index
      %c0_16 = arith.constant 0 : index
      %23 = vector.load %arg12[%c0_15, %c0_16] : memref<8x1xf32, #tpu.memory_space<vmem>>, vector<8x1xf32>
      tpu.vector_store %arg12[%c0_15, %c0_16], %22 {strides = array<i32>} : memref<8x1xf32, #tpu.memory_space<vmem>>, vector<8x1xf32>,
    } else {
    }
    %c0 = arith.constant 0 : index
    %c0_4 = arith.constant 0 : index
    %8 = vector.load %arg11[%c0, %c0_4] : memref<8x256xf32, #tpu.memory_space<vmem>>, vector<8x256xf32>
    %c0_5 = arith.constant 0 : index
    %c0_6 = arith.constant 0 : index
    %9 = vector.load %arg3[%c0_5, %c0_6] : memref<8x1920xbf16, #tpu.memory_space<vmem>>, vector<8x1920xbf16>
    %c0_7 = arith.constant 0 : index
    %c0_8 = arith.constant 0 : index
    %10 = vector.load %arg4[%c0_7, %c0_8] : memref<1920x256xbf16, #tpu.memory_space<vmem>>, vector<1920x256xbf16>
    %cst = arith.constant dense<0.000000e+00> : vector<8x256xf32>
    %11 = tpu.matmul %9, %10, %cst {dimension_numbers = #tpu.dot_dimension_numbers<[1], [0], [0], [1], [0, 0, 1, 1], [], []>} : vector<8x1920xbf16>, vector<1920x256xbf16>, vector<8x256xf32> -> vector<8x256xf32>
    %12 = arith.addf %8, %11 : vector<8x256xf32>
    %c0_9 = arith.constant 0 : index
    %c0_10 = arith.constant 0 : index
    %13 = vector.load %arg11[%c0_9, %c0_10] : memref<8x256xf32, #tpu.memory_space<vmem>>, vector<8x256xf32>
    tpu.vector_store %arg11[%c0_9, %c0_10], %12 {strides = array<i32>} : memref<8x256xf32, #tpu.memory_space<vmem>>, vector<8x256xf32>,
    %c7_i32 = arith.constant 7 : i32
    %14 = arith.cmpi eq, %arg2, %c7_i32 : i32
    %15 = arith.extui %14 : i1 to i32
    %c0_i32_11 = arith.constant 0 : i32
    %16 = arith.cmpi ne, %15, %c0_i32_11 : i32
    scf.if %16 {
      %c0_14 = arith.constant 0 : index
      %c0_15 = arith.constant 0 : index
      %22 = vector.load %arg11[%c0_14, %c0_15] : memref<8x256xf32, #tpu.memory_space<vmem>>, vector<8x256xf32>
      %c0_16 = arith.constant 0 : index
      %c0_17 = arith.constant 0 : index
      %23 = vector.load %arg5[%c0_16, %c0_17] : memref<1x256xf32, #tpu.memory_space<vmem>>, vector<1x256xf32>
      %24 = vector.broadcast %23 : vector<1x256xf32> to vector<8x256xf32>
      %25 = arith.mulf %22, %24 : vector<8x256xf32>
      %c0_18 = arith.constant 0 : index
      %c0_19 = arith.constant 0 : index
      %26 = vector.load %arg6[%c0_18, %c0_19] : memref<1x256xf32, #tpu.memory_space<vmem>>, vector<1x256xf32>
      %27 = vector.broadcast %26 : vector<1x256xf32> to vector<8x256xf32>
      %28 = arith.addf %25, %27 : vector<8x256xf32>
      %cst_20 = arith.constant 0.000000e+00 : f32
      %29 = vector.broadcast %cst_20 : f32 to vector<8x256xf32>
      %30 = arith.maximumf %28, %29 : vector<8x256xf32>
      %c0_21 = arith.constant 0 : index
      %c0_22 = arith.constant 0 : index
      %31 = vector.load %arg9[%c0_21, %c0_22] : memref<8x256xf32, #tpu.memory_space<vmem>>, vector<8x256xf32>
      tpu.vector_store %arg9[%c0_21, %c0_22], %30 {strides = array<i32>} : memref<8x256xf32, #tpu.memory_space<vmem>>, vector<8x256xf32>,
      %c0_23 = arith.constant 0 : index
      %c0_24 = arith.constant 0 : index
      %32 = vector.load %arg12[%c0_23, %c0_24] : memref<8x1xf32, #tpu.memory_space<vmem>>, vector<8x1xf32>
      %c0_25 = arith.constant 0 : index
      %c0_26 = arith.constant 0 : index
      %33 = vector.load %arg7[%c0_25, %c0_26] : memref<1x256xf32, #tpu.memory_space<vmem>>, vector<1x256xf32>
      %34 = vector.broadcast %33 : vector<1x256xf32> to vector<8x256xf32>
      %35 = arith.mulf %30, %34 : vector<8x256xf32>
      %cst_27 = arith.constant dense<0.000000e+00> : vector<8xf32>
      %36 = vector.multi_reduction <add>, %35, %cst_27 [1] : vector<8x256xf32> to vector<8xf32>
      %37 = vector.shape_cast %36 : vector<8xf32> to vector<8x1xf32>
      %38 = arith.addf %32, %37 : vector<8x1xf32>
      %c0_28 = arith.constant 0 : index
      %c0_29 = arith.constant 0 : index
      %39 = vector.load %arg12[%c0_28, %c0_29] : memref<8x1xf32, #tpu.memory_space<vmem>>, vector<8x1xf32>
      tpu.vector_store %arg12[%c0_28, %c0_29], %38 {strides = array<i32>} : memref<8x1xf32, #tpu.memory_space<vmem>>, vector<8x1xf32>,
    } else {
    }
    %c7_i32_12 = arith.constant 7 : i32
    %17 = arith.cmpi eq, %arg2, %c7_i32_12 : i32
    %c3_i32 = arith.constant 3 : i32
    %18 = arith.cmpi eq, %arg1, %c3_i32 : i32
    %19 = arith.andi %17, %18 : i1
    %20 = arith.extui %19 : i1 to i32
    %c0_i32_13 = arith.constant 0 : i32
    %21 = arith.cmpi ne, %20, %c0_i32_13 : i32
    scf.if %21 {
      %c0_14 = arith.constant 0 : index
      %c0_15 = arith.constant 0 : index
      %22 = vector.load %arg12[%c0_14, %c0_15] : memref<8x1xf32, #tpu.memory_space<vmem>>, vector<8x1xf32>
      %c0_16 = arith.constant 0 : index
      %c0_17 = arith.constant 0 : index
      %23 = vector.load %arg8[%c0_16, %c0_17] : memref<1x1xf32, #tpu.memory_space<vmem>>, vector<1x1xf32>
      %24 = vector.broadcast %23 : vector<1x1xf32> to vector<8x1xf32>
      %25 = arith.addf %22, %24 : vector<8x1xf32>
      %cst_18 = arith.constant 0.000000e+00 : f32
      %26 = vector.broadcast %cst_18 : f32 to vector<8x1xf32>
      %27 = arith.maximumf %25, %26 : vector<8x1xf32>
      %c0_19 = arith.constant 0 : index
      %c0_20 = arith.constant 0 : index
      %28 = vector.load %arg10[%c0_19, %c0_20] : memref<8x1xf32, #tpu.memory_space<vmem>>, vector<8x1xf32>
      tpu.vector_store %arg10[%c0_19, %c0_20], %27 {strides = array<i32>} : memref<8x1xf32, #tpu.memory_space<vmem>>, vector<8x1xf32>,
    } else {
    }
    return
  }
  func.func @transform_0(%arg0: i32, %arg1: i32, %arg2: i32) -> (i32, i32) {
    %c0_i32 = arith.constant 0 : i32
    return %arg0, %arg2 : i32, i32
  }
  func.func @transform_1(%arg0: i32, %arg1: i32, %arg2: i32) -> (i32, i32) {
    %c0_i32 = arith.constant 0 : i32
    return %arg2, %arg1 : i32, i32
  }
  func.func @transform_2(%arg0: i32, %arg1: i32, %arg2: i32) -> (i32, i32) {
    %c0_i32 = arith.constant 0 : i32
    %c0_i32_0 = arith.constant 0 : i32
    return %c0_i32, %arg1 : i32, i32
  }
  func.func @transform_3(%arg0: i32, %arg1: i32, %arg2: i32) -> (i32, i32) {
    %c0_i32 = arith.constant 0 : i32
    %c0_i32_0 = arith.constant 0 : i32
    return %c0_i32, %arg1 : i32, i32
  }
  func.func @transform_4(%arg0: i32, %arg1: i32, %arg2: i32) -> (i32, i32) {
    %c0_i32 = arith.constant 0 : i32
    %c0_i32_0 = arith.constant 0 : i32
    return %c0_i32, %arg1 : i32, i32
  }
  func.func @transform_5(%arg0: i32, %arg1: i32, %arg2: i32) -> (i32, i32) {
    %c0_i32 = arith.constant 0 : i32
    %c0_i32_0 = arith.constant 0 : i32
    %c0_i32_1 = arith.constant 0 : i32
    return %c0_i32, %c0_i32_0 : i32, i32
  }
  func.func @transform_6(%arg0: i32, %arg1: i32, %arg2: i32) -> (i32, i32) {
    %c0_i32 = arith.constant 0 : i32
    return %arg0, %arg1 : i32, i32
  }
  func.func @transform_7(%arg0: i32, %arg1: i32, %arg2: i32) -> (i32, i32) {
    %c0_i32 = arith.constant 0 : i32
    %c0_i32_0 = arith.constant 0 : i32
    return %arg0, %c0_i32 : i32, i32
  }
}

</mosaic_0001>

<bundles_post_ra>
// kernel: segmentnet_forward.14
= control target key start
LH: loop header
LB: loop body
LE: loop exit
PB: predicated region body
PF: predicated region fallthrough
CT: control target
= control target key end

     0   :  { %9 = vsyncpa [#allocation4], 0  ;;  %s2202_s0 = inlined_call_operand.hbm [shape: bf16[512,75], index: 0, kind: input, shape index: {}]   ;;  %s2203_s1 = inlined_call_operand.vmem [shape: bf16[75,32], index: 1, kind: input, shape index: {}]   ;;  %s2204_s2 = inlined_call_operand.hbm [shape: f32[1,32], index: 2, kind: input, shape index: {}]   ;;  %s2205_s3 = inlined_call_operand.hbm [shape: f32[1,32], index: 3, kind: input, shape index: {}]   ;;  %s2206_s4 = inlined_call_operand.vmem [shape: bf16[512,32], index: 4, kind: output, shape index: {}]  }
   0x1   :  { %11 = vsyncpa [#allocation4 + $0x1], 0 }
   0x2   :  { %12 = vsyncpa [#allocation6], 0  ;;  %s1733_s15 = smov 0   ;;  %s1735_s16 = smov 0  }
   0x3   :  { %s1737_s17 = smov 0   ;;  %s1739_s18 = smov 0  }
   0x4   :  { %s1741_s19 = smov 0   ;;  %s1743_s20 = smov 0  }
   0x5 LB: > { %s1263_s21 = sadd.s32 4294967295, %s1699_s20   ;;  %s46_s22 = sadd.s32 1, %s1687_s17  ;;  %s1699_s20 = sphi %s1743_s20, %s18_s20   ;;  %s1695_s19 = sphi %s1741_s19, %s2226_s19   ;;  %s1691_s18 = sphi %s1739_s18, %s2225_s18   ;;  %s1687_s17 = sphi %s1737_s17, %s2224_s17   ;;  %s1683_s16 = sphi %s1735_s16, %s2223_s16   ;;  %s1679_s15 = sphi %s1733_s15, %s2222_s15  }
   0x6   : > { %p53_p0 = scmp.ne.s32.totalorder %s1687_s17, %s1683_s16  ;;  %p54_p1 = scmp.eq.s32.totalorder %s1699_s20, 0 }
   0x7   : > { %p59_p2 = scmp.ne.s32.totalorder %s1683_s16, %s1679_s15  ;;  %p1767_p3 = scmp.eq.s32.totalorder %s1263_s21, 0 }
   0x8   : > { %p55_p4 = por %p54_p1, %p53_p0  ;;  %p1265_p5 = scmp.ge.s32.totalorder %s1699_s20, 1 }
   0x9   : > { %s2212_s23 = scalar_select %p1767_p3, 1, 0 }
   0xa   : > { %p1774_p6 = por %p1767_p3, %p59_p2  ;;  %p178_p7 = scmp.lt.s32.totalorder %s1699_s20, 3 }
   0xb   : > { %s1701_s26 = smov [#allocation5]   ;;  %p1481_p10 = scmp.lt.s32.totalorder %s1699_s20, 2 }
   0xc   : > { %s2213_s24 = scalar_select %p1774_p6, 1, 0 }
   0xd   : > { %p1779_p8 = pnand %p1265_p5, %p178_p7  ;;  %s205_s27 = sshll.u32 %s1701_s26, 4  ;;  %s206_s27 = int_to_ptr.vmem [resolvable:$true] %s205_s27 }
   0xe   : > { %p1792_p12 = pnand %p1481_p10, %p55_p4  ;;  %s1702_s30 = smov [#allocation7]  }
   0xf   : > { %s2214_s25 = scalar_select %p1779_p8, 1, 0 }
  0x10   : > { %p1468_p9 = pneg %p1779_p8  ;;  %s218_s5 = sshll.u32 %s1702_s30, 4  ;;  %s219_s5 = int_to_ptr.vmem [resolvable:$true] %s218_s5 }
  0x11   : > { %s2216_s29 = scalar_select %p1792_p12, 1, 0 }
  0x12   : > { %p1788_p11 = pnand %p1468_p9, %p1767_p3  ;;  %s1559_s8 = scalar_lea.hbm %s2204_s2, 16 }
  0x13   : > { %p1560_p13 = scmp.ne.s32.totalorder %s2204_s2, %s1559_s8  ;;  %p1566_p4 = scmp.lt.u32.totalorder %s1559_s8, %s2204_s2 }
  0x14   : > { %p1561_p0 = pneg %p1788_p11 }
  0x16   : > { %p1562_p1 = pnand %p1561_p0, %p1560_p13 }
  0x18   : > { %p1563_p2 = pneg %p1562_p1 }
  0x1a   : > { %p1568_p5 = pnand %p1566_p4, %p1563_p2 }
  0x1c   : > { %1571 = shalt.err (!%p1568_p5)
}
  0x1d   : > { %s1572_s13 = scalar_lea.vmem %s206_s27, 16  ;;  %s1579_s14 = scalar_lea.vmem %s206_s27, 32 }
  0x1e   : > { %p1573_p7 = scmp.ne.s32.totalorder %s206_s27, %s1572_s13  ;;  %p1580_p3 = scmp.lt.s32.totalorder %s206_s27, %s206_s27 }
  0x1f   : > { %p1581_p6 = scmp.lt.s32.totalorder %s1579_s14, %s1572_s13 }
  0x20   : > { %p1575_p9 = pnand %p1573_p7, %p1561_p0 }
  0x21   : > { %p1582_p8 = por %p1581_p6, %p1580_p3 }
  0x22   : > { %p1576_p10 = pneg %p1575_p9 }
  0x24   : > { %p1583_p12 = pnand %p1582_p8, %p1576_p10 }
  0x26   : > { %1586 = shalt.err (!%p1583_p12)
}
  0x27   : > { %1471 = dma.hbm_to_vmem [thread:$0]  (!%p1788_p11), %s2204_s2, 16, %s206_s27, [#allocation6]  }
  0x28   : > { %s37_s26 = sadd.s32 1, %s1695_s19  ;;  %s1587_s7 = scalar_lea.hbm %s2205_s3, 16 }
  0x29   : > { %p1588_p3 = scmp.ne.s32.totalorder %s2205_s3, %s1587_s7  ;;  %p1594_p12 = scmp.lt.u32.totalorder %s1587_s7, %s2205_s3 }
  0x2b   : > { %p1590_p6 = pnand %p1588_p3, %p1561_p0 }
  0x2d   : > { %p1591_p8 = pneg %p1590_p6 }
  0x2f   : > { %p1596_p13 = pnand %p1594_p12, %p1591_p8 }
  0x31   : > { %1599 = shalt.err (!%p1596_p13)
}
  0x32   : > { %s1600_s27 = scalar_lea.vmem %s219_s5, 16  ;;  %s1607_s12 = scalar_lea.vmem %s219_s5, 32 }
  0x33   : > { %p1601_p1 = scmp.ne.s32.totalorder %s219_s5, %s1600_s27  ;;  %p1608_p5 = scmp.lt.s32.totalorder %s219_s5, %s219_s5 }
  0x34   : > { %p1609_p7 = scmp.lt.s32.totalorder %s1607_s12, %s1600_s27 }
  0x35   : > { %p1603_p2 = pnand %p1601_p1, %p1561_p0 }
  0x36   : > { %p1610_p9 = por %p1609_p7, %p1608_p5 }
  0x37   : > { %p1604_p4 = pneg %p1603_p2 }
  0x39   : > { %p1611_p10 = pnand %p1610_p9, %p1604_p4 }
  0x3b   : > { %1614 = shalt.err (!%p1611_p10)
}
  0x3c   : > { %1474 = dma.hbm_to_vmem [thread:$0]  (!%p1788_p11), %s2205_s3, 16, %s219_s5, [#allocation6]  }
  0x3d   : > { %p39_p0 = scmp.ge.s32.totalorder %s37_s26, 2  ;;  %s229_s15 = sand.u32 1, %s1687_s17  }
  0x3e   : > { %s1270_s21 = sshll.u32 %s229_s15, 7  ;;  %s1352_s30 = sshll.u32 %s1695_s19, 11 }
  0x3f   : > { %s2228_s26 = smov (%p39_p0, %s37_s26), 0  ;;  %s1848_s8 = scalar_lea.hbm %s2202_s0, %s1352_s30 }
  0x40   : > { %s41_s6 = ssub.s32 %s1695_s19, %s2228_s26  ;;  %s233_s5 = scalar_lea.vmem [#allocation3], %s1270_s21 }
  0x41   : > { %p44_p11 = scmp.eq.s32.totalorder %s41_s6, 0  ;;  %s241_s9 = sshll.u32 %s233_s5, 4  ;;  %s1850_s9 = int_to_ptr.vmem [resolvable:$true] %s241_s9 }
  0x42   : > { %s1857_s11 = scalar_lea.sflag [#allocation4], %s229_s15  ;;  %s1615_s27 = scalar_lea.hbm %s1848_s8, 2048 }
  0x43   : > { %s1855_s10 = scalar_select %p44_p11, %s1687_s17, %s46_s22  }
  0x44   : > { %p1616_p3 = scmp.ne.s32.totalorder %s1848_s8, %s1615_s27  ;;  %p2217_p6 = scmp.ne.s32.totalorder %s2216_s29, 0 }
  0x45   : > { %s1620_s14 = scalar_lea.hbm %s2202_s0, 4096  ;;  %p1621_p1 = scmp.lt.u32.totalorder %s1848_s8, %s2202_s0 }
  0x46   : > { %p1617_p8 = pneg %p2217_p6  ;;  %p1622_p2 = scmp.lt.u32.totalorder %s1620_s14, %s1615_s27 }
  0x47   : > { %p1624_p5 = scmp.lt.u32.totalorder %s1615_s27, %s1848_s8 }
  0x48   : > { %p1618_p12 = pnand %p1617_p8, %p1616_p3  ;;  %p1623_p4 = por %p1622_p2, %p1621_p1 }
  0x4a   : > { %p1619_p13 = pneg %p1618_p12  ;;  %p1625_p7 = por %p1624_p5, %p1623_p4 }
  0x4c   : > { %p1626_p9 = pnand %p1625_p7, %p1619_p13 }
  0x4e   : > { %1629 = shalt.err (!%p1626_p9)
}
  0x4f   : > { %s1630_s22 = scalar_lea.vmem %s1850_s9, 2048  ;;  %s1703_s15 = smov [#allocation3]  }
  0x50   : > { %p1631_p10 = scmp.ne.s32.totalorder %s1850_s9, %s1630_s22  ;;  %s1635_s6 = sshll.u32 %s1703_s15, 4  ;;  %s1636_s6 = int_to_ptr.vmem [resolvable:$false] %s1635_s6 }
  0x51   : > { %s1637_s28 = scalar_lea.vmem %s1636_s6, 4096  ;;  %p1638_p3 = scmp.lt.s32.totalorder %s1850_s9, %s1636_s6 }
  0x52   : > { %p1633_p0 = pnand %p1631_p10, %p1617_p8  ;;  %p1639_p12 = scmp.lt.s32.totalorder %s1637_s28, %s1630_s22 }
  0x54   : > { %p1634_p11 = pneg %p1633_p0  ;;  %p1640_p1 = por %p1639_p12, %p1638_p3 }
  0x56   : > { %p1641_p2 = pnand %p1640_p1, %p1634_p11 }
  0x58   : > { %1644 = shalt.err (!%p1641_p2)
}
  0x59   : > { %s1704_s7 = smov 64   ;;  %s1705_s5 = smov 4  }
  0x5a   : > { %1478 = dma.hbm_to_vmem [thread:$0]  (!%p2217_p6), %s1848_s8, 2048, %s1850_s9, %s1857_s11, %s1704_s7, %s1704_s7, %s1705_s5  }
  0x5b   : > { %p2218_p8 = scmp.ne.s32.totalorder %s2214_s25, 0 }
  0x5c   : > { %s255_s27 = sand.u32 (!%p2218_p8), 1, %s1683_s16   ;;  %p2219_p13 = scmp.ne.s32.totalorder (!%p2218_p8), %s2213_s24, 0 }
  0x5d   : > { %253 = sbr.rel (%p2218_p8) target bundleno = 398 (0x18e), region = 36  ;;  %s1274_s12 = sshll.u32 (!%p2218_p8), %s255_s27, 7 }
  0x5e   : > { %s256_s13 = scalar_lea.sflag (!%p2218_p8), [#allocation4], %s255_s27  ;;  %s1888_s14 = scalar_lea.vmem (!%p2218_p8), [#allocation3], %s1274_s12 }
  0x64   : > { %1670 = dma.done.wait (%p2219_p13), %s256_s13, 2048  }
  0x65   : > { %1672 = vsyncadd (%p2219_p13), %s256_s13, 4294965248  ;;  %p2220_p4 = scmp.ne.s32.totalorder %s2212_s23, 0 }
  0x67   : > { %1674 = dma.done.wait (%p2220_p4), [#allocation6], 32  }
  0x68   : > { %1676 = vsyncadd (%p2220_p4), [#allocation6], 4294967264  ;;  %vm327_vm0 = vcmask 261120   ;;  %v1706_v0 = vmov 0.0   ;;  %v1538_v1 = vld [vmem:[%s2203_s1] sm:$0xff]   ;;  %v1539_v2 = vld [vmem:[%s2203_s1 + $0x8] sm:$0xff]  }
  0x69   : > { %330 = vst.msk [vmem:[#allocation2 + $0x10] sm:$0xff] %vm327_vm0, %v1706_v0  ;;  %328 = vst.msk [vmem:[#allocation2] sm:$0xff] %vm327_vm0, %v1706_v0  ;;  %1406 = vmatprep.subr.bf16.mxu0 %v1538_v1  ;;  %1448 = vmatprep.subr.bf16.mxu1 %v1538_v1  ;;  %vm592_vm1 = vcmask 1044480   ;;  %v1540_v3 = vld [vmem:[%s2203_s1 + $0x10] sm:$0xff]   ;;  %vm593_vm2 = vcmask 1045504   ;;  %v1543_v4 = vld [vmem:[%s1888_s14] sm:$0xff]  }
  0x6a   : > { %329 = vst.msk [vmem:[#allocation2 + $0x8] sm:$0xff] %vm327_vm0, %v1706_v0  ;;  %331 = vst.msk [vmem:[#allocation2 + $0x18] sm:$0xff] %vm327_vm0, %v1706_v0  ;;  %1407 = vmatpush3.bf16.msra.mxu0 %v1538_v1  ;;  %1453 = vmatpush3.bf16.msra.mxu1 %v1538_v1  ;;  %vm543_vm3 = vcmask 613376   ;;  %v1707_v5 = vmov 65535   ;;  %v1544_v7 = vld [vmem:[%s1888_s14 + $0x40] sm:$0xff]   ;;  %v1541_v8 = vld [vmem:[%s2203_s1 + $0x18] sm:$0xff]  }
  0x6b   : > { %332 = vst.msk [vmem:[#allocation2 + $0x20] sm:$0xff] %vm327_vm0, %v1706_v0  ;;  %333 = vst.msk [vmem:[#allocation2 + $0x28] sm:$0xff] %vm327_vm0, %v1706_v0  ;;  %1408 = vmatprep.subr.bf16.mxu0 %v1539_v2  ;;  %1449 = vmatprep.subr.bf16.mxu1 %v1539_v2  ;;  %v594_v6 = vsel %vm592_vm1, 4294967295, %v1707_v5  ;;  %v1542_v9 = vld [vmem:[%s2203_s1 + $0x20] sm:$0x3f]   ;;  %v1545_v12 = vld [vmem:[%s1888_s14 + $0x8] sm:$0xff]  }
  0x6c   : > { %334 = vst.msk [vmem:[#allocation2 + $0x30] sm:$0xff] %vm327_vm0, %v1706_v0  ;;  %335 = vst.msk [vmem:[#allocation2 + $0x38] sm:$0xff] %vm327_vm0, %v1706_v0  ;;  %v595_v10 = vsel %vm593_vm2, %v594_v6, 0  ;;  %1416 = vmatprep.mubr.msk.bf16.mxu0 %vm543_vm3, %v1543_v4  ;;  %1432 = vmatprep.mubr.msk.bf16.mxu1 %vm543_vm3, %v1544_v7  ;;  %v1546_v13 = vld [vmem:[%s1888_s14 + $0x48] sm:$0xff]   ;;  %v1547_v14 = vld [vmem:[%s1888_s14 + $0x10] sm:$0xff]   ;;  %s1277_s15 = sshll.u32 %s1691_s18, 5 }
  0x6d   : > { %336 = vst.msk [vmem:[#allocation2 + $0x40] sm:$0xff] %vm327_vm0, %v1706_v0  ;;  %337 = vst.msk [vmem:[#allocation2 + $0x48] sm:$0xff] %vm327_vm0, %v1706_v0  ;;  %v597_v11 = vand.u32 %v1542_v9, %v595_v10  ;;  %v1548_v15 = vld [vmem:[%s1888_s14 + $0x50] sm:$0xff]   ;;  %v1549_v16 = vld [vmem:[%s1888_s14 + $0x18] sm:$0xff]   ;;  %p1980_p6 = scmp.lt.s32.totalorder %s1277_s15, 63  ;;  %vm1098_vm4 = vcmask 257024  }
  0x6e   : > { %338 = vst.msk [vmem:[#allocation2 + $0x50] sm:$0xff] %vm327_vm0, %v1706_v0  ;;  %339 = vst.msk [vmem:[#allocation2 + $0x58] sm:$0xff] %vm327_vm0, %v1706_v0  ;;  %1409 = vmatpush3.bf16.msra.mxu0 %v1539_v2  ;;  %1454 = vmatpush3.bf16.msra.mxu1 %v1539_v2  ;;  %v1550_v17 = vld [vmem:[%s1888_s14 + $0x58] sm:$0xff]   ;;  %v1551_v18 = vld [vmem:[%s1888_s14 + $0x20] sm:$0xff]  }
  0x6f   : > { %340 = vst.msk [vmem:[#allocation2 + $0x60] sm:$0xff] %vm327_vm0, %v1706_v0  ;;  %341 = vst.msk [vmem:[#allocation2 + $0x68] sm:$0xff] %vm327_vm0, %v1706_v0  ;;  %1410 = vmatprep.subr.bf16.mxu0 %v1540_v3  ;;  %1450 = vmatprep.subr.bf16.mxu1 %v1540_v3  ;;  %v1552_v19 = vld [vmem:[%s1888_s14 + $0x60] sm:$0xff]   ;;  %v1553_v20 = vld [vmem:[%s1888_s14 + $0x28] sm:$0xff]   ;;  %s2230_s15 = smov (!%p1980_p6, %s1277_s15), 63 }
  0x70   : > { %342 = vst.msk [vmem:[#allocation2 + $0x70] sm:$0xff] %vm327_vm0, %v1706_v0  ;;  %343 = vst.msk [vmem:[#allocation2 + $0x78] sm:$0xff] %vm327_vm0, %v1706_v0  ;;  %v1554_v21 = vld [vmem:[%s1888_s14 + $0x68] sm:$0xff]   ;;  %v1555_v22 = vld [vmem:[%s1888_s14 + $0x30] sm:$0xff]   ;;  %s1278_s18 = sshll.u32 %s2230_s15, 2 }
  0x71   : > { %344 = vst.msk [vmem:[#allocation2 + $0x80] sm:$0xff] %vm327_vm0, %v1706_v0  ;;  %345 = vst.msk [vmem:[#allocation2 + $0x88] sm:$0xff] %vm327_vm0, %v1706_v0  ;;  %v1556_v23 = vld [vmem:[%s1888_s14 + $0x70] sm:$0xff]   ;;  %v1557_v24 = vld [vmem:[%s1888_s14 + $0x38] sm:$0xff]   ;;  %s2028_s5 = scalar_lea.vmem %s2206_s4, %s1278_s18 }
  0x72   : > { %346 = vst.msk [vmem:[#allocation2 + $0x90] sm:$0xff] %vm327_vm0, %v1706_v0  ;;  %347 = vst.msk [vmem:[#allocation2 + $0x98] sm:$0xff] %vm327_vm0, %v1706_v0  ;;  %1411 = vmatpush3.bf16.msra.mxu0 %v1540_v3  ;;  %1455 = vmatpush3.bf16.msra.mxu1 %v1540_v3  ;;  %v1558_v25 = vld [vmem:[%s1888_s14 + $0x78] sm:$0xff]   ;;  %v362_v26 = vld [vmem:[#allocation2 + $0x10] sm:$0xff] }
  0x73   : > { %348 = vst.msk [vmem:[#allocation2 + $0xa0] sm:$0xff] %vm327_vm0, %v1706_v0  ;;  %349 = vst.msk [vmem:[#allocation2 + $0xa8] sm:$0xff] %vm327_vm0, %v1706_v0  ;;  %1412 = vmatprep.subr.bf16.mxu0 %v1541_v8  ;;  %1451 = vmatprep.subr.bf16.mxu1 %v1541_v8  ;;  %v360_v28 = vld [vmem:[#allocation2] sm:$0xff]  ;;  %v363_v32 = vld [vmem:[#allocation2 + $0x18] sm:$0xff] }
  0x74   : > { %350 = vst.msk [vmem:[#allocation2 + $0xb0] sm:$0xff] %vm327_vm0, %v1706_v0  ;;  %351 = vst.msk [vmem:[#allocation2 + $0xb8] sm:$0xff] %vm327_vm0, %v1706_v0  ;;  %v361_v38 = vld [vmem:[#allocation2 + $0x8] sm:$0xff]  ;;  %v366_v50 = vld [vmem:[#allocation2 + $0x30] sm:$0xff] }
  0x75   : > { %352 = vst.msk [vmem:[#allocation2 + $0xc0] sm:$0xff] %vm327_vm0, %v1706_v0  ;;  %353 = vst.msk [vmem:[#allocation2 + $0xc8] sm:$0xff] %vm327_vm0, %v1706_v0  ;;  %v364_v52 = vld [vmem:[#allocation2 + $0x20] sm:$0xff]  ;;  %v367_v57 = vld [vmem:[#allocation2 + $0x38] sm:$0xff] }
  0x76   : > { %354 = vst.msk [vmem:[#allocation2 + $0xd0] sm:$0xff] %vm327_vm0, %v1706_v0  ;;  %355 = vst.msk [vmem:[#allocation2 + $0xd8] sm:$0xff] %vm327_vm0, %v1706_v0  ;;  %1413 = vmatpush3.bf16.msra.mxu0 %v1541_v8  ;;  %1456 = vmatpush3.bf16.msra.mxu1 %v1541_v8  ;;  %v1998_v54 = vld [vmem:[#allocation5] ss:$0 sm:$0xff]  ;;  %v2000_v59 = vld [vmem:[#allocation7] ss:$0 sm:$0xff] }
  0x77   : > { %356 = vst.msk [vmem:[#allocation2 + $0xe0] sm:$0xff] %vm327_vm0, %v1706_v0  ;;  %357 = vst.msk [vmem:[#allocation2 + $0xe8] sm:$0xff] %vm327_vm0, %v1706_v0  ;;  %1414 = vmatprep.subr.bf16.mxu0 %v597_v11  ;;  %1452 = vmatprep.subr.bf16.mxu1 %v597_v11 }
  0x78   : > { %358 = vst.msk [vmem:[#allocation2 + $0xf0] sm:$0xff] %vm327_vm0, %v1706_v0  ;;  %359 = vst.msk [vmem:[#allocation2 + $0xf8] sm:$0xff] %vm327_vm0, %v1706_v0  ;;  %v376_v29 = vld [vmem:[#allocation2 + $0x80] sm:$0xff]  ;;  %v377_v39 = vld [vmem:[#allocation2 + $0x88] sm:$0xff] }
  0x79   : > { %v378_v27 = vld [vmem:[#allocation2 + $0x90] sm:$0xff]  ;;  %v379_v33 = vld [vmem:[#allocation2 + $0x98] sm:$0xff]  ;;  %v365_v0 = vld [vmem:[#allocation2 + $0x28] sm:$0xff] }
  0x7a   : > { %1415 = vmatpush3.bf16.msra.mxu0 %v597_v11  ;;  %1457 = vmatpush3.bf16.msra.mxu1 %v597_v11  ;;  %v380_v53 = vld [vmem:[#allocation2 + $0xa0] sm:$0xff]  ;;  %v381_v1 = vld [vmem:[#allocation2 + $0xa8] sm:$0xff] }
  0x7b   : > { %v382_v51 = vld [vmem:[#allocation2 + $0xb0] sm:$0xff]  ;;  %v383_v58 = vld [vmem:[#allocation2 + $0xb8] sm:$0xff] }
  0x7d   : > { %1417 = vmatmul.mubr.msk.bf16.vlgmr.msra.gmra.mrb[0].mxu0 %vm543_vm3, %v1545_v12  ;;  %1433 = vmatmul.mubr.msk.bf16.vlgmr.msra.gmra.mrb[0].mxu1 %vm543_vm3, %v1546_v13 }
  0x7e   : > { %1420 = vmatprep.mubr.msk.bf16.mxu0 %vm543_vm3, %v1547_v14  ;;  %1436 = vmatprep.mubr.msk.bf16.mxu1 %vm543_vm3, %v1548_v15 }
  0x85   : > { %1421 = vmatmul.mubr.msk.bf16.gmra.mrb[4].mxu0 %vm543_vm3, %v1549_v16  ;;  %1437 = vmatmul.mubr.msk.bf16.gmra.mrb[4].mxu1 %vm543_vm3, %v1550_v17 }
  0x86   : > { %1424 = vmatprep.mubr.msk.bf16.mxu0 %vm543_vm3, %v1551_v18  ;;  %1440 = vmatprep.mubr.msk.bf16.mxu1 %vm543_vm3, %v1552_v19 }
  0x8d   : > { %1425 = vmatmul.mubr.msk.bf16.gmra.mrb[8].mxu0 %vm543_vm3, %v1553_v20  ;;  %1441 = vmatmul.mubr.msk.bf16.gmra.mrb[8].mxu1 %vm543_vm3, %v1554_v21 }
  0x8e   : > { %1428 = vmatprep.mubr.msk.bf16.mxu0 %vm543_vm3, %v1555_v22  ;;  %1444 = vmatprep.mubr.msk.bf16.mxu1 %vm543_vm3, %v1556_v23 }
  0x95   : > { %1429 = vmatmul.mubr.msk.bf16.gmra.mrb[12].mxu0 %vm543_vm3, %v1557_v24  ;;  %1445 = vmatmul.mubr.msk.bf16.gmra.mrb[12].mxu1 %vm543_vm3, %v1558_v25 }
 0x150   : > { %v1418_v30 = vpop.f32.mrb[0].mxu0  ;;  %v1434_v31 = vpop.f32.mrb[0].mxu1 }
 0x151   : > { %v762_v34 = vadd.f32 %v1418_v30, %v362_v26  ;;  %v778_v35 = vadd.f32 %v1434_v31, %v378_v27  ;;  %v633_v36 = vpop.f32.mrb[1].mxu0  ;;  %v697_v37 = vpop.f32.mrb[1].mxu1 }
 0x152   : > { %v760_v40 = vadd.f32 %v633_v36, %v360_v28  ;;  %v776_v41 = vadd.f32 %v697_v37, %v376_v29  ;;  %v1419_v42 = vpop.f32.mrb[2].mxu0  ;;  %v1435_v43 = vpop.f32.mrb[2].mxu1 }
 0x153   : > { %795 = vst.msk [vmem:[#allocation2 + $0x10] sm:$0xff] %vm327_vm0, %v762_v34  ;;  %811 = vst.msk [vmem:[#allocation2 + $0x90] sm:$0xff] %vm327_vm0, %v778_v35  ;;  %v763_v44 = vadd.f32 %v1419_v42, %v363_v32  ;;  %v779_v45 = vadd.f32 %v1435_v43, %v379_v33  ;;  %v636_v46 = vpop.f32.mrb[3].mxu0  ;;  %v700_v47 = vpop.f32.mrb[3].mxu1 }
 0x154   : > { %793 = vst.msk [vmem:[#allocation2] sm:$0xff] %vm327_vm0, %v760_v40  ;;  %809 = vst.msk [vmem:[#allocation2 + $0x80] sm:$0xff] %vm327_vm0, %v776_v41  ;;  %v761_v48 = vadd.f32 %v636_v46, %v361_v38  ;;  %v777_v49 = vadd.f32 %v700_v47, %v377_v39 }
 0x155   : > { %796 = vst.msk [vmem:[#allocation2 + $0x18] sm:$0xff] %vm327_vm0, %v763_v44  ;;  %812 = vst.msk [vmem:[#allocation2 + $0x98] sm:$0xff] %vm327_vm0, %v779_v45 }
 0x156   : > { %794 = vst.msk [vmem:[#allocation2 + $0x8] sm:$0xff] %vm327_vm0, %v761_v48  ;;  %810 = vst.msk [vmem:[#allocation2 + $0x88] sm:$0xff] %vm327_vm0, %v777_v49 }
 0x158   : > { %v1422_v55 = vpop.f32.mrb[4].mxu0  ;;  %v1438_v56 = vpop.f32.mrb[4].mxu1 }
 0x159   : > { %v766_v60 = vadd.f32 %v1422_v55, %v366_v50  ;;  %v782_v61 = vadd.f32 %v1438_v56, %v382_v51  ;;  %v649_v62 = vpop.f32.mrb[5].mxu0  ;;  %v713_v63 = vpop.f32.mrb[5].mxu1 }
 0x15a   : > { %v830_v2 = vld [vmem:[#allocation2 + $0x10] sm:$0xff]  ;;  %v764_v4 = vadd.f32 %v649_v62, %v364_v52  ;;  %v780_v5 = vadd.f32 %v713_v63, %v380_v53  ;;  %v1423_v6 = vpop.f32.mrb[6].mxu0  ;;  %v1439_v7 = vpop.f32.mrb[6].mxu1 }
 0x15b   : > { %v846_v3 = vld [vmem:[#allocation2 + $0x90] sm:$0xff]  ;;  %v869_v8 = vmul.f32 %v1998_v54, %v830_v2  ;;  %v828_v10 = vld [vmem:[#allocation2] sm:$0xff]  ;;  %799 = vst.msk [vmem:[#allocation2 + $0x30] sm:$0xff] %vm327_vm0, %v766_v60  ;;  %815 = vst.msk [vmem:[#allocation2 + $0xb0] sm:$0xff] %vm327_vm0, %v782_v61  ;;  %v767_v12 = vadd.f32 %v1423_v6, %v367_v57  ;;  %v783_v13 = vadd.f32 %v1439_v7, %v383_v58  ;;  %v652_v14 = vpop.f32.mrb[7].mxu0  ;;  %v716_v15 = vpop.f32.mrb[7].mxu1 }
 0x15c   : > { %v885_v9 = vmul.f32 %v1998_v54, %v846_v3  ;;  %v844_v11 = vld [vmem:[#allocation2 + $0x80] sm:$0xff]  ;;  %v867_v16 = vmul.f32 %v1998_v54, %v828_v10  ;;  %v831_v18 = vld [vmem:[#allocation2 + $0x18] sm:$0xff]  ;;  %797 = vst.msk [vmem:[#allocation2 + $0x20] sm:$0xff] %vm327_vm0, %v764_v4  ;;  %813 = vst.msk [vmem:[#allocation2 + $0xa0] sm:$0xff] %vm327_vm0, %v780_v5  ;;  %v765_v20 = vadd.f32 %v652_v14, %v365_v0 }
 0x15d   : > { %v883_v17 = vmul.f32 %v1998_v54, %v844_v11  ;;  %v847_v19 = vld [vmem:[#allocation2 + $0x98] sm:$0xff]  ;;  %v781_v21 = vadd.f32 %v716_v15, %v381_v1  ;;  %v908_v22 = vadd.f32 %v2000_v59, %v869_v8  ;;  %v870_v24 = vmul.f32 %v1998_v54, %v831_v18  ;;  %v829_v26 = vld [vmem:[#allocation2 + $0x8] sm:$0xff]  ;;  %800 = vst.msk [vmem:[#allocation2 + $0x38] sm:$0xff] %vm327_vm0, %v767_v12  ;;  %v370_v18 = vld [vmem:[#allocation2 + $0x50] sm:$0xff] }
 0x15e   : > { %v924_v23 = vadd.f32 %v2000_v59, %v885_v9  ;;  %v886_v25 = vmul.f32 %v1998_v54, %v847_v19  ;;  %v845_v27 = vld [vmem:[#allocation2 + $0x88] sm:$0xff]  ;;  %816 = vst.msk [vmem:[#allocation2 + $0xb8] sm:$0xff] %vm327_vm0, %v783_v13  ;;  %v906_v28 = vadd.f32 %v2000_v59, %v867_v16  ;;  %v868_v30 = vmul.f32 %v1998_v54, %v829_v26 }
 0x15f   : > { %v922_v29 = vadd.f32 %v2000_v59, %v883_v17  ;;  %v884_v31 = vmul.f32 %v1998_v54, %v845_v27  ;;  %798 = vst.msk [vmem:[#allocation2 + $0x28] sm:$0xff] %vm327_vm0, %v765_v20  ;;  %814 = vst.msk [vmem:[#allocation2 + $0xa8] sm:$0xff] %vm327_vm0, %v781_v21  ;;  %v940_v32 = vmax.f32 %v908_v22, 0.0  ;;  %v909_v34 = vadd.f32 %v2000_v59, %v870_v24  ;;  %v368_v24 = vld [vmem:[#allocation2 + $0x40] sm:$0xff] }
 0x160   : > { %v956_v33 = vmax.f32 %v924_v23, 0.0  ;;  %v925_v35 = vadd.f32 %v2000_v59, %v886_v25  ;;  %v938_v36 = vmax.f32 %v906_v28, 0.0  ;;  %v907_v38 = vadd.f32 %v2000_v59, %v868_v30  ;;  %v2032_v40 = vpop.f32.mrb[8].mxu0  ;;  %v2034_v41 = vpop.f32.mrb[8].mxu1  ;;  %v386_v23 = vld [vmem:[#allocation2 + $0xd0] sm:$0xff]  ;;  %v384_v25 = vld [vmem:[#allocation2 + $0xc0] sm:$0xff] }
 0x161   : > { %v954_v37 = vmax.f32 %v922_v29, 0.0  ;;  %v923_v39 = vadd.f32 %v2000_v59, %v884_v31  ;;  %v1355_v42 = vpack.c.bf16 %v940_v32, %v940_v32  ;;  %v941_v44 = vmax.f32 %v909_v34, 0.0  ;;  %v2036_v46 = vpop.f32.mrb[9].mxu0  ;;  %v2038_v47 = vpop.f32.mrb[9].mxu1  ;;  %v371_v30 = vld [vmem:[#allocation2 + $0x58] sm:$0xff] }
 0x162   : > { %v1371_v43 = vpack.c.bf16 %v956_v33, %v956_v33  ;;  %v957_v45 = vmax.f32 %v925_v35, 0.0  ;;  %v1353_v48 = vpack.c.bf16 %v938_v36, %v938_v36  ;;  %v939_v50 = vmax.f32 %v907_v38, 0.0  ;;  %v834_v52 = vld [vmem:[#allocation2 + $0x30] sm:$0xff]  ;;  %v2040_v55 = vpop.f32.mrb[10].mxu0  ;;  %v2042_v56 = vpop.f32.mrb[10].mxu1  ;;  %v387_v31 = vld [vmem:[#allocation2 + $0xd8] sm:$0xff] }
 0x163   : > { %v1369_v49 = vpack.c.bf16 %v954_v37, %v954_v37  ;;  %v955_v51 = vmax.f32 %v923_v39, 0.0  ;;  %v850_v53 = vld [vmem:[#allocation2 + $0xb0] sm:$0xff]  ;;  %1101 = vst.msk [vmem:[%s2028_s5 + $0x8] sm:$0xf] %vm1098_vm4, %v1355_v42  ;;  %v1356_v57 = vpack.c.bf16 %v941_v44, %v941_v44  ;;  %v873_v60 = vmul.f32 %v1998_v54, %v834_v52  ;;  %v832_v62 = vld [vmem:[#allocation2 + $0x20] sm:$0xff]  ;;  %v2050_v0 = vpop.f32.mrb[11].mxu0 }
 0x164   : > { %1117 = vst.msk [vmem:[%s2028_s5 + $0x48] sm:$0xf] %vm1098_vm4, %v1371_v43  ;;  %v1372_v58 = vpack.c.bf16 %v957_v45, %v957_v45  ;;  %v889_v61 = vmul.f32 %v1998_v54, %v850_v53  ;;  %v848_v63 = vld [vmem:[#allocation2 + $0xa0] sm:$0xff]  ;;  %v2052_v1 = vpop.f32.mrb[11].mxu1  ;;  %1099 = vst.msk [vmem:[%s2028_s5] sm:$0xf] %vm1098_vm4, %v1353_v48  ;;  %v1354_v2 = vpack.c.bf16 %v939_v50, %v939_v50 }
 0x165   : > { %1115 = vst.msk [vmem:[%s2028_s5 + $0x40] sm:$0xf] %vm1098_vm4, %v1369_v49  ;;  %v1370_v3 = vpack.c.bf16 %v955_v51, %v955_v51  ;;  %v871_v4 = vmul.f32 %v1998_v54, %v832_v62  ;;  %v887_v5 = vmul.f32 %v1998_v54, %v848_v63  ;;  %v835_v6 = vld [vmem:[#allocation2 + $0x38] sm:$0xff]  ;;  %1102 = vst.msk [vmem:[%s2028_s5 + $0xc] sm:$0xf] %vm1098_vm4, %v1356_v57  ;;  %v369_v38 = vld [vmem:[#allocation2 + $0x48] sm:$0xff] }
 0x166   : > { %v851_v7 = vld [vmem:[#allocation2 + $0xb8] sm:$0xff]  ;;  %1118 = vst.msk [vmem:[%s2028_s5 + $0x4c] sm:$0xf] %vm1098_vm4, %v1372_v58  ;;  %v912_v8 = vadd.f32 %v2000_v59, %v873_v60  ;;  %v928_v9 = vadd.f32 %v2000_v59, %v889_v61  ;;  %v874_v10 = vmul.f32 %v1998_v54, %v835_v6  ;;  %v833_v12 = vld [vmem:[#allocation2 + $0x28] sm:$0xff]  ;;  %1100 = vst.msk [vmem:[%s2028_s5 + $0x4] sm:$0xf] %vm1098_vm4, %v1354_v2 }
 0x167   : > { %v890_v11 = vmul.f32 %v1998_v54, %v851_v7  ;;  %v849_v13 = vld [vmem:[#allocation2 + $0xa8] sm:$0xff]  ;;  %1116 = vst.msk [vmem:[%s2028_s5 + $0x44] sm:$0xf] %vm1098_vm4, %v1370_v3  ;;  %v910_v14 = vadd.f32 %v2000_v59, %v871_v4  ;;  %v926_v15 = vadd.f32 %v2000_v59, %v887_v5  ;;  %v872_v16 = vmul.f32 %v1998_v54, %v833_v12  ;;  %v374_v50 = vld [vmem:[#allocation2 + $0x70] sm:$0xff]  ;;  %v372_v62 = vld [vmem:[#allocation2 + $0x60] sm:$0xff] }
 0x168   : > { %v888_v17 = vmul.f32 %v1998_v54, %v849_v13  ;;  %v944_v19 = vmax.f32 %v912_v8, 0.0  ;;  %v960_v20 = vmax.f32 %v928_v9, 0.0  ;;  %v913_v21 = vadd.f32 %v2000_v59, %v874_v10  ;;  %v1430_v32 = vpop.f32.mrb[12].mxu0  ;;  %v1446_v33 = vpop.f32.mrb[12].mxu1  ;;  %v385_v39 = vld [vmem:[#allocation2 + $0xc8] sm:$0xff]  ;;  %v390_v51 = vld [vmem:[#allocation2 + $0xf0] sm:$0xff] }
 0x169   : > { %v929_v22 = vadd.f32 %v2000_v59, %v890_v11  ;;  %v942_v26 = vmax.f32 %v910_v14, 0.0  ;;  %v958_v27 = vmax.f32 %v926_v15, 0.0  ;;  %v911_v28 = vadd.f32 %v2000_v59, %v872_v16  ;;  %v681_v42 = vpop.f32.mrb[13].mxu0  ;;  %v745_v43 = vpop.f32.mrb[13].mxu1  ;;  %v388_v63 = vld [vmem:[#allocation2 + $0xe0] sm:$0xff]  ;;  %v375_v2 = vld [vmem:[#allocation2 + $0x78] sm:$0xff] }
 0x16a   : > { %v927_v29 = vadd.f32 %v2000_v59, %v888_v17  ;;  %v1359_v34 = vpack.c.bf16 %v944_v19, %v944_v19  ;;  %v1375_v35 = vpack.c.bf16 %v960_v20, %v960_v20  ;;  %v945_v36 = vmax.f32 %v913_v21, 0.0  ;;  %v1431_v52 = vpop.f32.mrb[14].mxu0  ;;  %v1447_v53 = vpop.f32.mrb[14].mxu1  ;;  %v391_v8 = vld [vmem:[#allocation2 + $0xf8] sm:$0xff]  ;;  %v389_v9 = vld [vmem:[#allocation2 + $0xe8] sm:$0xff] }
 0x16b   : > { %v961_v37 = vmax.f32 %v929_v22, 0.0  ;;  %v1357_v44 = vpack.c.bf16 %v942_v26, %v942_v26  ;;  %v1373_v45 = vpack.c.bf16 %v958_v27, %v958_v27  ;;  %v943_v48 = vmax.f32 %v911_v28, 0.0  ;;  %v684_v3 = vpop.f32.mrb[15].mxu0  ;;  %v748_v4 = vpop.f32.mrb[15].mxu1 }
 0x16c   : > { %v959_v49 = vmax.f32 %v927_v29, 0.0  ;;  %1105 = vst.msk [vmem:[%s2028_s5 + $0x18] sm:$0xf] %vm1098_vm4, %v1359_v34  ;;  %1121 = vst.msk [vmem:[%s2028_s5 + $0x58] sm:$0xf] %vm1098_vm4, %v1375_v35  ;;  %v1360_v57 = vpack.c.bf16 %v945_v36, %v945_v36  ;;  %v770_v60 = vadd.f32 %v2032_v40, %v370_v18  ;;  %v786_v61 = vadd.f32 %v2034_v41, %v386_v23  ;;  %v373_v41 = vld [vmem:[#allocation2 + $0x68] sm:$0xff] }
 0x16d   : > { %v1376_v58 = vpack.c.bf16 %v961_v37, %v961_v37  ;;  %1103 = vst.msk [vmem:[%s2028_s5 + $0x10] sm:$0xf] %vm1098_vm4, %v1357_v44  ;;  %1119 = vst.msk [vmem:[%s2028_s5 + $0x50] sm:$0xf] %vm1098_vm4, %v1373_v45  ;;  %v1358_v5 = vpack.c.bf16 %v943_v48, %v943_v48  ;;  %v768_v7 = vadd.f32 %v2036_v46, %v368_v24 }
 0x16e   : > { %v1374_v6 = vpack.c.bf16 %v959_v49, %v959_v49  ;;  %v784_v40 = vadd.f32 %v2038_v47, %v384_v25  ;;  %1106 = vst.msk [vmem:[%s2028_s5 + $0x1c] sm:$0xf] %vm1098_vm4, %v1360_v57  ;;  %v771_v10 = vadd.f32 %v2040_v55, %v371_v30  ;;  %v787_v11 = vadd.f32 %v2042_v56, %v387_v31 }
 0x16f   : > { %1122 = vst.msk [vmem:[%s2028_s5 + $0x5c] sm:$0xf] %vm1098_vm4, %v1376_v58  ;;  %v769_v12 = vadd.f32 %v2050_v0, %v369_v38  ;;  %v785_v46 = vadd.f32 %v2052_v1, %v385_v39  ;;  %1104 = vst.msk [vmem:[%s2028_s5 + $0x14] sm:$0xf] %vm1098_vm4, %v1358_v5  ;;  %v774_v47 = vadd.f32 %v1430_v32, %v374_v50 }
 0x170   : > { %803 = vst.msk [vmem:[#allocation2 + $0x50] sm:$0xff] %vm327_vm0, %v770_v60  ;;  %819 = vst.msk [vmem:[#allocation2 + $0xd0] sm:$0xff] %vm327_vm0, %v786_v61  ;;  %v790_v13 = vadd.f32 %v1446_v33, %v390_v51  ;;  %v772_v14 = vadd.f32 %v681_v42, %v372_v62  ;;  %v788_v15 = vadd.f32 %v745_v43, %v388_v63 }
 0x171   : > { %1120 = vst.msk [vmem:[%s2028_s5 + $0x54] sm:$0xf] %vm1098_vm4, %v1374_v6  ;;  %v775_v55 = vadd.f32 %v1431_v52, %v375_v2  ;;  %v791_v56 = vadd.f32 %v1447_v53, %v391_v8  ;;  %v773_v0 = vadd.f32 %v684_v3, %v373_v41  ;;  %v789_v1 = vadd.f32 %v748_v4, %v389_v9 }
 0x172   : > { %801 = vst.msk [vmem:[#allocation2 + $0x40] sm:$0xff] %vm327_vm0, %v768_v7  ;;  %817 = vst.msk [vmem:[#allocation2 + $0xc0] sm:$0xff] %vm327_vm0, %v784_v40 }
 0x173   : > { %804 = vst.msk [vmem:[#allocation2 + $0x58] sm:$0xff] %vm327_vm0, %v771_v10  ;;  %820 = vst.msk [vmem:[#allocation2 + $0xd8] sm:$0xff] %vm327_vm0, %v787_v11 }
 0x174   : > { %802 = vst.msk [vmem:[#allocation2 + $0x48] sm:$0xff] %vm327_vm0, %v769_v12  ;;  %818 = vst.msk [vmem:[#allocation2 + $0xc8] sm:$0xff] %vm327_vm0, %v785_v46 }
 0x175   : > { %807 = vst.msk [vmem:[#allocation2 + $0x70] sm:$0xff] %vm327_vm0, %v774_v47  ;;  %823 = vst.msk [vmem:[#allocation2 + $0xf0] sm:$0xff] %vm327_vm0, %v790_v13 }
 0x176   : > { %805 = vst.msk [vmem:[#allocation2 + $0x60] sm:$0xff] %vm327_vm0, %v772_v14  ;;  %821 = vst.msk [vmem:[#allocation2 + $0xe0] sm:$0xff] %vm327_vm0, %v788_v15 }
 0x177   : > { %808 = vst.msk [vmem:[#allocation2 + $0x78] sm:$0xff] %vm327_vm0, %v775_v55  ;;  %824 = vst.msk [vmem:[#allocation2 + $0xf8] sm:$0xff] %vm327_vm0, %v791_v56  ;;  %v838_v16 = vld [vmem:[#allocation2 + $0x50] sm:$0xff] }
 0x178   : > { %806 = vst.msk [vmem:[#allocation2 + $0x68] sm:$0xff] %vm327_vm0, %v773_v0  ;;  %822 = vst.msk [vmem:[#allocation2 + $0xe8] sm:$0xff] %vm327_vm0, %v789_v1  ;;  %v854_v17 = vld [vmem:[#allocation2 + $0xd0] sm:$0xff]  ;;  %v877_v18 = vmul.f32 %v1998_v54, %v838_v16 }
 0x179   : > { %v893_v19 = vmul.f32 %v1998_v54, %v854_v17  ;;  %v836_v20 = vld [vmem:[#allocation2 + $0x40] sm:$0xff] }
 0x17a   : > { %v852_v21 = vld [vmem:[#allocation2 + $0xc0] sm:$0xff]  ;;  %v875_v22 = vmul.f32 %v1998_v54, %v836_v20  ;;  %v839_v24 = vld [vmem:[#allocation2 + $0x58] sm:$0xff]  ;;  %v916_v27 = vadd.f32 %v2000_v59, %v877_v18 }
 0x17b   : > { %v891_v23 = vmul.f32 %v1998_v54, %v852_v21  ;;  %v855_v25 = vld [vmem:[#allocation2 + $0xd8] sm:$0xff]  ;;  %v837_v26 = vld [vmem:[#allocation2 + $0x48] sm:$0xff]  ;;  %v932_v28 = vadd.f32 %v2000_v59, %v893_v19  ;;  %v878_v29 = vmul.f32 %v1998_v54, %v839_v24 }
 0x17c   : > { %v894_v30 = vmul.f32 %v1998_v54, %v855_v25  ;;  %v853_v31 = vld [vmem:[#allocation2 + $0xc8] sm:$0xff]  ;;  %v914_v32 = vadd.f32 %v2000_v59, %v875_v22  ;;  %v876_v34 = vmul.f32 %v1998_v54, %v837_v26  ;;  %v948_v36 = vmax.f32 %v916_v27, 0.0  ;;  %v842_v48 = vld [vmem:[#allocation2 + $0x70] sm:$0xff] }
 0x17d   : > { %v930_v33 = vadd.f32 %v2000_v59, %v891_v23  ;;  %v892_v35 = vmul.f32 %v1998_v54, %v853_v31  ;;  %v964_v37 = vmax.f32 %v932_v28, 0.0  ;;  %v917_v38 = vadd.f32 %v2000_v59, %v878_v29  ;;  %v858_v49 = vld [vmem:[#allocation2 + $0xf0] sm:$0xff]  ;;  %v840_v57 = vld [vmem:[#allocation2 + $0x60] sm:$0xff] }
 0x17e   : > { %v933_v39 = vadd.f32 %v2000_v59, %v894_v30  ;;  %v946_v42 = vmax.f32 %v914_v32, 0.0  ;;  %v915_v44 = vadd.f32 %v2000_v59, %v876_v34  ;;  %v1363_v50 = vpack.c.bf16 %v948_v36, %v948_v36  ;;  %v856_v58 = vld [vmem:[#allocation2 + $0xe0] sm:$0xff]  ;;  %v843_v2 = vld [vmem:[#allocation2 + $0x78] sm:$0xff] }
 0x17f   : > { %v962_v43 = vmax.f32 %v930_v33, 0.0  ;;  %v931_v45 = vadd.f32 %v2000_v59, %v892_v35  ;;  %v1379_v51 = vpack.c.bf16 %v964_v37, %v964_v37  ;;  %v949_v52 = vmax.f32 %v917_v38, 0.0  ;;  %v859_v3 = vld [vmem:[#allocation2 + $0xf8] sm:$0xff]  ;;  %v841_v40 = vld [vmem:[#allocation2 + $0x68] sm:$0xff] }
 0x180   : > { %v965_v53 = vmax.f32 %v933_v39, 0.0  ;;  %v1361_v60 = vpack.c.bf16 %v946_v42, %v946_v42  ;;  %v947_v62 = vmax.f32 %v915_v44, 0.0  ;;  %1109 = vst.msk [vmem:[%s2028_s5 + $0x28] sm:$0xf] %vm1098_vm4, %v1363_v50  ;;  %v881_v6 = vmul.f32 %v1998_v54, %v842_v48  ;;  %v857_v8 = vld [vmem:[#allocation2 + $0xe8] sm:$0xff] }
 0x181   : > { %v1377_v61 = vpack.c.bf16 %v962_v43, %v962_v43  ;;  %v963_v63 = vmax.f32 %v931_v45, 0.0  ;;  %1125 = vst.msk [vmem:[%s2028_s5 + $0x68] sm:$0xf] %vm1098_vm4, %v1379_v51  ;;  %v1364_v4 = vpack.c.bf16 %v949_v52, %v949_v52  ;;  %v897_v7 = vmul.f32 %v1998_v54, %v858_v49 }
 0x182   : > { %v1380_v5 = vpack.c.bf16 %v965_v53, %v965_v53  ;;  %1107 = vst.msk [vmem:[%s2028_s5 + $0x20] sm:$0xf] %vm1098_vm4, %v1361_v60  ;;  %v1362_v41 = vpack.c.bf16 %v947_v62, %v947_v62  ;;  %v879_v10 = vmul.f32 %v1998_v54, %v840_v57  ;;  %v895_v11 = vmul.f32 %v1998_v54, %v856_v58 }
 0x183   : > { %1123 = vst.msk [vmem:[%s2028_s5 + $0x60] sm:$0xf] %vm1098_vm4, %v1377_v61  ;;  %v1378_v9 = vpack.c.bf16 %v963_v63, %v963_v63  ;;  %1110 = vst.msk [vmem:[%s2028_s5 + $0x2c] sm:$0xf] %vm1098_vm4, %v1364_v4  ;;  %v920_v12 = vadd.f32 %v2000_v59, %v881_v6  ;;  %v936_v46 = vadd.f32 %v2000_v59, %v897_v7 }
 0x184   : > { %1126 = vst.msk [vmem:[%s2028_s5 + $0x6c] sm:$0xf] %vm1098_vm4, %v1380_v5  ;;  %v882_v47 = vmul.f32 %v1998_v54, %v843_v2  ;;  %v898_v13 = vmul.f32 %v1998_v54, %v859_v3  ;;  %1108 = vst.msk [vmem:[%s2028_s5 + $0x24] sm:$0xf] %vm1098_vm4, %v1362_v41  ;;  %v918_v14 = vadd.f32 %v2000_v59, %v879_v10 }
 0x185   : > { %1124 = vst.msk [vmem:[%s2028_s5 + $0x64] sm:$0xf] %vm1098_vm4, %v1378_v9  ;;  %v934_v15 = vadd.f32 %v2000_v59, %v895_v11  ;;  %v880_v55 = vmul.f32 %v1998_v54, %v841_v40  ;;  %v896_v56 = vmul.f32 %v1998_v54, %v857_v8  ;;  %v952_v0 = vmax.f32 %v920_v12, 0.0 }
 0x186   : > { %v968_v1 = vmax.f32 %v936_v46, 0.0  ;;  %v921_v16 = vadd.f32 %v2000_v59, %v882_v47  ;;  %v937_v17 = vadd.f32 %v2000_v59, %v898_v13  ;;  %v950_v18 = vmax.f32 %v918_v14, 0.0 }
 0x187   : > { %v966_v19 = vmax.f32 %v934_v15, 0.0  ;;  %v919_v20 = vadd.f32 %v2000_v59, %v880_v55  ;;  %v935_v21 = vadd.f32 %v2000_v59, %v896_v56  ;;  %v1367_v22 = vpack.c.bf16 %v952_v0, %v952_v0 }
 0x188   : > { %v1383_v23 = vpack.c.bf16 %v968_v1, %v968_v1  ;;  %v953_v54 = vmax.f32 %v921_v16, 0.0  ;;  %v969_v24 = vmax.f32 %v937_v17, 0.0  ;;  %v1365_v25 = vpack.c.bf16 %v950_v18, %v950_v18 }
 0x189   : > { %v1381_v26 = vpack.c.bf16 %v966_v19, %v966_v19  ;;  %v951_v27 = vmax.f32 %v919_v20, 0.0  ;;  %v967_v28 = vmax.f32 %v935_v21, 0.0  ;;  %1113 = vst.msk [vmem:[%s2028_s5 + $0x38] sm:$0xf] %vm1098_vm4, %v1367_v22 }
 0x18a   : > { %1129 = vst.msk [vmem:[%s2028_s5 + $0x78] sm:$0xf] %vm1098_vm4, %v1383_v23  ;;  %v1368_v29 = vpack.c.bf16 %v953_v54, %v953_v54  ;;  %v1384_v30 = vpack.c.bf16 %v969_v24, %v969_v24  ;;  %1111 = vst.msk [vmem:[%s2028_s5 + $0x30] sm:$0xf] %vm1098_vm4, %v1365_v25 }
 0x18b   : > { %1127 = vst.msk [vmem:[%s2028_s5 + $0x70] sm:$0xf] %vm1098_vm4, %v1381_v26  ;;  %v1366_v59 = vpack.c.bf16 %v951_v27, %v951_v27  ;;  %v1382_v31 = vpack.c.bf16 %v967_v28, %v967_v28 }
 0x18c   : > { %1114 = vst.msk [vmem:[%s2028_s5 + $0x3c] sm:$0xf] %vm1098_vm4, %v1368_v29  ;;  %1130 = vst.msk [vmem:[%s2028_s5 + $0x7c] sm:$0xf] %vm1098_vm4, %v1384_v30 }
 0x18d   : > { %1112 = vst.msk [vmem:[%s2028_s5 + $0x34] sm:$0xf] %vm1098_vm4, %v1366_v59  ;;  %1128 = vst.msk [vmem:[%s2028_s5 + $0x74] sm:$0xf] %vm1098_vm4, %v1382_v31 }
 0x18e PF: > { %s18_s20 = sadd.s32 1, %s1699_s20   ;;  %s2222_s15 = smov %s1683_s16 }
 0x18f   : > { %p15_p5 = scmp.ge.s32.totalorder %s18_s20, 4   ;;  %s2223_s16 = smov %s1687_s17 }
 0x190   : > { %s2224_s17 = smov %s1855_s10  ;;  %s2225_s18 = smov %s1695_s19 }
 0x191   : > { %s2226_s19 = smov %s2228_s26  ;;  %17 = sbr.rel (!%p15_p5) target bundleno = 5 (0x5), region = 97 }
 0x198   :  { %1159 = vsyncpa [#allocation4], 1 }
 0x199   :  { %1161 = vsyncpa [#allocation4 + $0x1], 1 }
 0x19a   :  { %1162 = vsyncpa [#allocation6], 1 }

// kernel: segmentnet_forward.16
= control target key start
LH: loop header
LB: loop body
LE: loop exit
PB: predicated region body
PF: predicated region fallthrough
CT: control target
= control target key end

     0   :  { %vm120_vm0 = vcmask 257024   ;;  %s407_s0 = inlined_call_operand.vmem [shape: bf16[4,128,32], index: 0, kind: input, shape index: {}]   ;;  %s408_s1 = inlined_call_operand.vmem [shape: bf16[128,32], index: 1, kind: output, shape index: {}]  }
   0x1   :  { %v8_v0 = vld [vmem:[%s407_s0] sm:$0xf]  ;;  %v9_v5 = vld [vmem:[%s407_s0 + $0x4] sm:$0xf]  ;;  %v10_v11 = vld [vmem:[%s407_s0 + $0x8] sm:$0xf] }
   0x2   :  { %v24_v1 = vld [vmem:[%s407_s0 + $0x40] sm:$0xf]  ;;  %v25_v6 = vld [vmem:[%s407_s0 + $0x44] sm:$0xf]  ;;  %v26_v13 = vld [vmem:[%s407_s0 + $0x48] sm:$0xf] }
   0x3   :  { %v40_v2 = vld [vmem:[%s407_s0 + $0x80] sm:$0xf]  ;;  %v72_v4 = vmax.bf16 %v24_v1, %v8_v0  ;;  %v41_v8 = vld [vmem:[%s407_s0 + $0x84] sm:$0xf]  ;;  %v73_v10 = vmax.bf16 %v25_v6, %v9_v5  ;;  %v42_v14 = vld [vmem:[%s407_s0 + $0x88] sm:$0xf]  ;;  %v74_v17 = vmax.bf16 %v26_v13, %v10_v11 }
   0x4   :  { %v56_v3 = vld [vmem:[%s407_s0 + $0xc0] sm:$0xf]  ;;  %v57_v9 = vld [vmem:[%s407_s0 + $0xc4] sm:$0xf]  ;;  %v58_v15 = vld [vmem:[%s407_s0 + $0xc8] sm:$0xf] }
   0x5   :  { %v88_v7 = vmax.bf16 %v56_v3, %v40_v2  ;;  %v89_v12 = vmax.bf16 %v57_v9, %v41_v8  ;;  %v90_v18 = vmax.bf16 %v58_v15, %v42_v14  ;;  %v11_v19 = vld [vmem:[%s407_s0 + $0xc] sm:$0xf]  ;;  %v12_v25 = vld [vmem:[%s407_s0 + $0x10] sm:$0xf]  ;;  %v13_v32 = vld [vmem:[%s407_s0 + $0x14] sm:$0xf] }
   0x6   :  { %v27_v20 = vld [vmem:[%s407_s0 + $0x4c] sm:$0xf]  ;;  %v28_v26 = vld [vmem:[%s407_s0 + $0x50] sm:$0xf]  ;;  %v29_v34 = vld [vmem:[%s407_s0 + $0x54] sm:$0xf] }
   0x7   :  { %v104_v16 = vmax.bf16 %v88_v7, %v72_v4  ;;  %v43_v21 = vld [vmem:[%s407_s0 + $0x8c] sm:$0xf]  ;;  %v105_v22 = vmax.bf16 %v89_v12, %v73_v10  ;;  %v75_v24 = vmax.bf16 %v27_v20, %v11_v19  ;;  %v106_v27 = vmax.bf16 %v90_v18, %v74_v17  ;;  %v44_v29 = vld [vmem:[%s407_s0 + $0x90] sm:$0xf]  ;;  %v45_v35 = vld [vmem:[%s407_s0 + $0x94] sm:$0xf] }
   0x8   :  { %v59_v23 = vld [vmem:[%s407_s0 + $0xcc] sm:$0xf]  ;;  %v60_v30 = vld [vmem:[%s407_s0 + $0xd0] sm:$0xf]  ;;  %v76_v31 = vmax.bf16 %v28_v26, %v12_v25  ;;  %v61_v36 = vld [vmem:[%s407_s0 + $0xd4] sm:$0xf]  ;;  %v77_v38 = vmax.bf16 %v29_v34, %v13_v32 }
   0x9   :  { %121 = vst.msk [vmem:[%s408_s1] sm:$0xf] %vm120_vm0, %v104_v16  ;;  %v91_v28 = vmax.bf16 %v59_v23, %v43_v21  ;;  %122 = vst.msk [vmem:[%s408_s1 + $0x4] sm:$0xf] %vm120_vm0, %v105_v22  ;;  %v92_v33 = vmax.bf16 %v60_v30, %v44_v29  ;;  %v93_v39 = vmax.bf16 %v61_v36, %v45_v35  ;;  %v14_v40 = vld [vmem:[%s407_s0 + $0x18] sm:$0xf] }
   0xa   :  { %123 = vst.msk [vmem:[%s408_s1 + $0x8] sm:$0xf] %vm120_vm0, %v106_v27  ;;  %v30_v41 = vld [vmem:[%s407_s0 + $0x58] sm:$0xf]  ;;  %v15_v46 = vld [vmem:[%s407_s0 + $0x1c] sm:$0xf] }
   0xb   :  { %v107_v37 = vmax.bf16 %v91_v28, %v75_v24  ;;  %v46_v42 = vld [vmem:[%s407_s0 + $0x98] sm:$0xf]  ;;  %v108_v43 = vmax.bf16 %v92_v33, %v76_v31  ;;  %v78_v45 = vmax.bf16 %v30_v41, %v14_v40  ;;  %v31_v47 = vld [vmem:[%s407_s0 + $0x5c] sm:$0xf]  ;;  %v109_v48 = vmax.bf16 %v93_v39, %v77_v38  ;;  %v16_v53 = vld [vmem:[%s407_s0 + $0x20] sm:$0xf] }
   0xc   :  { %v62_v44 = vld [vmem:[%s407_s0 + $0xd8] sm:$0xf]  ;;  %v47_v50 = vld [vmem:[%s407_s0 + $0x9c] sm:$0xf]  ;;  %v79_v52 = vmax.bf16 %v31_v47, %v15_v46  ;;  %v32_v55 = vld [vmem:[%s407_s0 + $0x60] sm:$0xf] }
   0xd   :  { %124 = vst.msk [vmem:[%s408_s1 + $0xc] sm:$0xf] %vm120_vm0, %v107_v37  ;;  %v94_v49 = vmax.bf16 %v62_v44, %v46_v42  ;;  %v63_v51 = vld [vmem:[%s407_s0 + $0xdc] sm:$0xf]  ;;  %125 = vst.msk [vmem:[%s408_s1 + $0x10] sm:$0xf] %vm120_vm0, %v108_v43  ;;  %v80_v59 = vmax.bf16 %v32_v55, %v16_v53 }
   0xe   :  { %v95_v54 = vmax.bf16 %v63_v51, %v47_v50  ;;  %v48_v56 = vld [vmem:[%s407_s0 + $0xa0] sm:$0xf]  ;;  %126 = vst.msk [vmem:[%s408_s1 + $0x14] sm:$0xf] %vm120_vm0, %v109_v48  ;;  %v17_v61 = vld [vmem:[%s407_s0 + $0x24] sm:$0xf] }
   0xf   :  { %v64_v57 = vld [vmem:[%s407_s0 + $0xe0] sm:$0xf]  ;;  %v110_v58 = vmax.bf16 %v94_v49, %v78_v45  ;;  %v33_v62 = vld [vmem:[%s407_s0 + $0x64] sm:$0xf]  ;;  %v18_v3 = vld [vmem:[%s407_s0 + $0x28] sm:$0xf] }
  0x10   :  { %v96_v60 = vmax.bf16 %v64_v57, %v48_v56  ;;  %v49_v63 = vld [vmem:[%s407_s0 + $0xa4] sm:$0xf]  ;;  %v111_v0 = vmax.bf16 %v95_v54, %v79_v52  ;;  %v81_v2 = vmax.bf16 %v33_v62, %v17_v61  ;;  %v34_v4 = vld [vmem:[%s407_s0 + $0x68] sm:$0xf]  ;;  %v19_v10 = vld [vmem:[%s407_s0 + $0x2c] sm:$0xf] }
  0x11   :  { %v65_v1 = vld [vmem:[%s407_s0 + $0xe4] sm:$0xf]  ;;  %127 = vst.msk [vmem:[%s408_s1 + $0x18] sm:$0xf] %vm120_vm0, %v110_v58  ;;  %v50_v7 = vld [vmem:[%s407_s0 + $0xa8] sm:$0xf]  ;;  %v82_v9 = vmax.bf16 %v34_v4, %v18_v3 }
  0x12   :  { %v112_v5 = vmax.bf16 %v96_v60, %v80_v59  ;;  %v97_v6 = vmax.bf16 %v65_v1, %v49_v63  ;;  %v66_v8 = vld [vmem:[%s407_s0 + $0xe8] sm:$0xf]  ;;  %128 = vst.msk [vmem:[%s408_s1 + $0x1c] sm:$0xf] %vm120_vm0, %v111_v0  ;;  %v35_v12 = vld [vmem:[%s407_s0 + $0x6c] sm:$0xf] }
  0x13   :  { %v98_v11 = vmax.bf16 %v66_v8, %v50_v7  ;;  %v51_v13 = vld [vmem:[%s407_s0 + $0xac] sm:$0xf]  ;;  %v83_v16 = vmax.bf16 %v35_v12, %v19_v10  ;;  %v20_v18 = vld [vmem:[%s407_s0 + $0x30] sm:$0xf]  ;;  %v21_v24 = vld [vmem:[%s407_s0 + $0x34] sm:$0xf] }
  0x14   :  { %v67_v14 = vld [vmem:[%s407_s0 + $0xec] sm:$0xf]  ;;  %129 = vst.msk [vmem:[%s408_s1 + $0x20] sm:$0xf] %vm120_vm0, %v112_v5  ;;  %v113_v15 = vmax.bf16 %v97_v6, %v81_v2  ;;  %v36_v19 = vld [vmem:[%s407_s0 + $0x70] sm:$0xf] }
  0x15   :  { %v99_v17 = vmax.bf16 %v67_v14, %v51_v13  ;;  %v52_v20 = vld [vmem:[%s407_s0 + $0xb0] sm:$0xf]  ;;  %v114_v21 = vmax.bf16 %v98_v11, %v82_v9  ;;  %v84_v23 = vmax.bf16 %v36_v19, %v20_v18  ;;  %v37_v25 = vld [vmem:[%s407_s0 + $0x74] sm:$0xf]  ;;  %v22_v31 = vld [vmem:[%s407_s0 + $0x38] sm:$0xf] }
  0x16   :  { %v68_v22 = vld [vmem:[%s407_s0 + $0xf0] sm:$0xf]  ;;  %130 = vst.msk [vmem:[%s408_s1 + $0x24] sm:$0xf] %vm120_vm0, %v113_v15  ;;  %v53_v28 = vld [vmem:[%s407_s0 + $0xb4] sm:$0xf]  ;;  %v85_v30 = vmax.bf16 %v37_v25, %v21_v24 }
  0x17   :  { %v115_v26 = vmax.bf16 %v99_v17, %v83_v16  ;;  %v100_v27 = vmax.bf16 %v68_v22, %v52_v20  ;;  %v69_v29 = vld [vmem:[%s407_s0 + $0xf4] sm:$0xf]  ;;  %131 = vst.msk [vmem:[%s408_s1 + $0x28] sm:$0xf] %vm120_vm0, %v114_v21  ;;  %v38_v33 = vld [vmem:[%s407_s0 + $0x78] sm:$0xf] }
  0x18   :  { %v101_v32 = vmax.bf16 %v69_v29, %v53_v28  ;;  %v54_v34 = vld [vmem:[%s407_s0 + $0xb8] sm:$0xf]  ;;  %v86_v37 = vmax.bf16 %v38_v33, %v22_v31  ;;  %v23_v39 = vld [vmem:[%s407_s0 + $0x3c] sm:$0xf] }
  0x19   :  { %v70_v35 = vld [vmem:[%s407_s0 + $0xf8] sm:$0xf]  ;;  %132 = vst.msk [vmem:[%s408_s1 + $0x2c] sm:$0xf] %vm120_vm0, %v115_v26  ;;  %v116_v36 = vmax.bf16 %v100_v27, %v84_v23  ;;  %v39_v40 = vld [vmem:[%s407_s0 + $0x7c] sm:$0xf] }
  0x1a   :  { %v102_v38 = vmax.bf16 %v70_v35, %v54_v34  ;;  %v55_v41 = vld [vmem:[%s407_s0 + $0xbc] sm:$0xf]  ;;  %v117_v42 = vmax.bf16 %v101_v32, %v85_v30  ;;  %v87_v44 = vmax.bf16 %v39_v40, %v23_v39 }
  0x1b   :  { %v71_v43 = vld [vmem:[%s407_s0 + $0xfc] sm:$0xf]  ;;  %133 = vst.msk [vmem:[%s408_s1 + $0x30] sm:$0xf] %vm120_vm0, %v116_v36 }
  0x1c   :  { %v118_v45 = vmax.bf16 %v102_v38, %v86_v37  ;;  %v103_v46 = vmax.bf16 %v71_v43, %v55_v41  ;;  %134 = vst.msk [vmem:[%s408_s1 + $0x34] sm:$0xf] %vm120_vm0, %v117_v42 }
  0x1e   :  { %135 = vst.msk [vmem:[%s408_s1 + $0x38] sm:$0xf] %vm120_vm0, %v118_v45  ;;  %v119_v47 = vmax.bf16 %v103_v46, %v87_v44 }
  0x20   :  { %136 = vst.msk [vmem:[%s408_s1 + $0x3c] sm:$0xf] %vm120_vm0, %v119_v47 }

// kernel: segmentnet_forward.15
= control target key start
LH: loop header
LB: loop body
LE: loop exit
PB: predicated region body
PF: predicated region fallthrough
CT: control target
= control target key end

     0   :  { %9 = vsyncpa [#allocation4], 0  ;;  %s4537_s0 = inlined_call_operand.vmem [shape: bf16[512,800], index: 0, kind: input, shape index: {}]   ;;  %s4538_s1 = inlined_call_operand.vmem [shape: bf16[800,32], index: 1, kind: input, shape index: {}]   ;;  %s4539_s2 = inlined_call_operand.hbm [shape: f32[1,32], index: 2, kind: input, shape index: {}]   ;;  %s4540_s3 = inlined_call_operand.hbm [shape: f32[1,32], index: 3, kind: input, shape index: {}]   ;;  %s4541_s4 = inlined_call_operand.vmem [shape: bf16[512,32], index: 4, kind: output, shape index: {}]  }
   0x1   :  { %10 = vsyncpa [#allocation6], 0  ;;  %s3708_s15 = smov 0   ;;  %s3710_s16 = smov 0  }
   0x2   :  { %s3712_s17 = smov 0  }
   0x3 LB: > { %s2669_s18 = sadd.s32 4294967295, %s3678_s17   ;;  %s35_s19 = sadd.s32 1, %s3674_s16  ;;  %s3678_s17 = sphi %s3712_s17, %s16_s17   ;;  %s3674_s16 = sphi %s3710_s16, %s4551_s16   ;;  %s3670_s15 = sphi %s3708_s15, %s4550_s15  }
   0x4   : > { %p37_p0 = scmp.ge.s32.totalorder %s35_s19, 2  ;;  %p2671_p1 = scmp.ge.s32.totalorder %s3678_s17, 1 }
   0x5   : > { %p176_p2 = scmp.lt.s32.totalorder %s3678_s17, 3  ;;  %p3733_p4 = scmp.eq.s32.totalorder %s2669_s18, 0 }
   0x6   : > { %s4553_s19 = smov (%p37_p0, %s35_s19), 0  ;;  %s3680_s22 = smov [#allocation3]  }
   0x7   : > { %p3729_p3 = pnand %p2671_p1, %p176_p2  ;;  %s203_s23 = sshll.u32 %s3680_s22, 4  ;;  %s204_s23 = int_to_ptr.vmem [resolvable:$true] %s203_s23 }
   0x8   : > { %s4546_s21 = scalar_select %p3733_p4, 1, 0 }
   0x9   : > { %s4545_s20 = scalar_select %p3729_p3, 1, 0 }
   0xa   : > { %p3344_p5 = pneg %p3729_p3  ;;  %s3681_s24 = smov [#allocation5]  }
   0xb   : > { %s216_s25 = sshll.u32 %s3681_s24, 4  ;;  %s3592_s29 = scalar_lea.hbm %s4539_s2, 16  ;;  %s3745_s25 = int_to_ptr.vmem [resolvable:$true] %s216_s25 }
   0xc   : > { %p3741_p6 = pnand %p3733_p4, %p3344_p5  ;;  %p3593_p7 = scmp.ne.s32.totalorder %s4539_s2, %s3592_s29 }
   0xd   : > { %p3599_p11 = scmp.lt.u32.totalorder %s3592_s29, %s4539_s2 }
   0xe   : > { %p3594_p8 = pneg %p3741_p6 }
  0x10   : > { %p3595_p9 = pnand %p3594_p8, %p3593_p7 }
  0x12   : > { %p3596_p10 = pneg %p3595_p9 }
  0x14   : > { %p3601_p12 = pnand %p3599_p11, %p3596_p10 }
  0x16   : > { %3604 = shalt.err (!%p3601_p12)
}
  0x17   : > { %s3605_s8 = scalar_lea.vmem %s204_s23, 16  ;;  %s3612_s9 = scalar_lea.vmem %s204_s23, 32 }
  0x18   : > { %p3606_p13 = scmp.ne.s32.totalorder %s204_s23, %s3605_s8  ;;  %p3613_p2 = scmp.lt.s32.totalorder %s204_s23, %s204_s23 }
  0x19   : > { %p3614_p5 = scmp.lt.s32.totalorder %s3612_s9, %s3605_s8 }
  0x1a   : > { %p3608_p0 = pnand %p3606_p13, %p3594_p8 }
  0x1b   : > { %p3615_p4 = por %p3614_p5, %p3613_p2 }
  0x1c   : > { %p3609_p1 = pneg %p3608_p0 }
  0x1e   : > { %p3616_p3 = pnand %p3615_p4, %p3609_p1 }
  0x20   : > { %3619 = shalt.err (!%p3616_p3)
}
  0x21   : > { %3347 = dma.hbm_to_vmem [thread:$0]  (!%p3741_p6), %s4539_s2, 16, %s204_s23, [#allocation4]  }
  0x22   : > { %s3620_s14 = scalar_lea.hbm %s4540_s3, 16 }
  0x23   : > { %p3621_p7 = scmp.ne.s32.totalorder %s4540_s3, %s3620_s14  ;;  %p3627_p3 = scmp.lt.u32.totalorder %s3620_s14, %s4540_s3 }
  0x25   : > { %p3623_p9 = pnand %p3621_p7, %p3594_p8 }
  0x27   : > { %p3624_p4 = pneg %p3623_p9 }
  0x29   : > { %p3629_p10 = pnand %p3627_p3, %p3624_p4 }
  0x2b   : > { %3632 = shalt.err (!%p3629_p10)
}
  0x2c   : > { %s3633_s23 = scalar_lea.vmem %s3745_s25, 16  ;;  %s3640_s28 = scalar_lea.vmem %s3745_s25, 32 }
  0x2d   : > { %p3634_p11 = scmp.ne.s32.totalorder %s3745_s25, %s3633_s23  ;;  %p3641_p0 = scmp.lt.s32.totalorder %s3745_s25, %s3745_s25 }
  0x2e   : > { %p3642_p1 = scmp.lt.s32.totalorder %s3640_s28, %s3633_s23 }
  0x2f   : > { %p3636_p12 = pnand %p3634_p11, %p3594_p8 }
  0x30   : > { %p3643_p2 = por %p3642_p1, %p3641_p0 }
  0x31   : > { %p3637_p13 = pneg %p3636_p12 }
  0x33   : > { %p3644_p5 = pnand %p3643_p2, %p3637_p13 }
  0x35   : > { %3647 = shalt.err (!%p3644_p5)
}
  0x36   : > { %3350 = dma.hbm_to_vmem [thread:$0]  (!%p3741_p6), %s4540_s3, 16, %s3745_s25, [#allocation6]  }
  0x37   : > { %p4548_p7 = scmp.ne.s32.totalorder %s4545_s20, 0 }
  0x38   : > { %p4549_p8 = scmp.ne.s32.totalorder (!%p4548_p7), %s4546_s21, 0 }
  0x39   : > { %244 = sbr.rel (%p4548_p7) target bundleno = 557 (0x22d), region = 36 }
  0x40   : > { %3661 = dma.done.wait (%p4549_p8), [#allocation4], 16  }
  0x41   : > { %3663 = vsyncadd (%p4549_p8), [#allocation4], 4294967280 }
  0x42   : > { %3665 = dma.done.wait (%p4549_p8), [#allocation6], 16  }
  0x43   : > { %3667 = vsyncadd (%p4549_p8), [#allocation6], 4294967280  ;;  %s2679_s26 = sshll.u32 %s3670_s15, 5  ;;  %v3382_v0 = vld [vmem:[%s4538_s1 + $0x40] sm:$0xff]   ;;  %v3384_v2 = vld [vmem:[%s4538_s1 + $0x48] sm:$0xff]   ;;  %vm325_vm0 = vcmask 261120  }
  0x44   : > { %v3383_v1 = vld [vmem:[%s4538_s1] sm:$0xff]   ;;  %2929 = vmatprep.subr.bf16.mxu0 %v3382_v0  ;;  %3319 = vmatprep.subr.bf16.mxu1 %v3382_v0  ;;  %p292_p6 = scmp.lt.s32.totalorder %s2679_s26, 63  ;;  %v3385_v3 = vld [vmem:[%s4538_s1 + $0x8] sm:$0xff]   ;;  %v3386_v4 = vld [vmem:[%s4538_s1 + $0x50] sm:$0xff]   ;;  %vm2508_vm1 = vcmask 257024  }
  0x45   : > { %2930 = vmatpush3.bf16.msra.mxu0 %v3383_v1  ;;  %3327 = vmatpush3.bf16.msra.mxu1 %v3383_v1  ;;  %v3387_v5 = vld [vmem:[%s4538_s1 + $0x10] sm:$0xff]   ;;  %v3388_v6 = vld [vmem:[%s4538_s1 + $0x58] sm:$0xff]   ;;  %v3390_v8 = vld [vmem:[%s4538_s1 + $0x60] sm:$0xff]  }
  0x46   : > { %2931 = vmatprep.subr.bf16.mxu0 %v3384_v2  ;;  %3320 = vmatprep.subr.bf16.mxu1 %v3384_v2  ;;  %s4555_s26 = smov (!%p292_p6, %s2679_s26), 63  ;;  %v3389_v7 = vld [vmem:[%s4538_s1 + $0x18] sm:$0xff]   ;;  %v3391_v9 = vld [vmem:[%s4538_s1 + $0x20] sm:$0xff]   ;;  %v3392_v10 = vld [vmem:[%s4538_s1 + $0x68] sm:$0xff]  }
  0x47   : > { %s3335_s18 = smul.u32 28, %s4555_s26  ;;  %v3393_v13 = vld [vmem:[%s4538_s1 + $0x28] sm:$0xff]   ;;  %v3394_v14 = vld [vmem:[%s4538_s1 + $0x70] sm:$0xff]   ;;  %v3396_v16 = vld [vmem:[%s4538_s1 + $0x78] sm:$0xff]  }
  0x48   : > { %v3395_v15 = vld [vmem:[%s4538_s1 + $0x30] sm:$0xff]   ;;  %v3397_v17 = vld [vmem:[%s4538_s1 + $0x38] sm:$0xff]   ;;  %v3404_v18 = vld [vmem:[%s4538_s1 + $0xc0] sm:$0xff]  }
  0x49   : > { %2932 = vmatpush3.bf16.msra.mxu0 %v3385_v3  ;;  %3328 = vmatpush3.bf16.msra.mxu1 %v3385_v3  ;;  %s3839_s30 = scalar_lea.vmem %s4537_s0, %s3335_s18  ;;  %v3405_v21 = vld [vmem:[%s4538_s1 + $0x140] sm:$0xff]   ;;  %v3408_v24 = vld [vmem:[%s4538_s1 + $0xc8] sm:$0xff]   ;;  %v3416_v32 = vld [vmem:[%s4538_s1 + $0xd0] sm:$0xff]  }
  0x4a   : > { %2933 = vmatprep.subr.bf16.mxu0 %v3386_v4  ;;  %3321 = vmatprep.subr.bf16.mxu1 %v3386_v4  ;;  %v3400_v11 = vld [vmem:[%s3839_s30 + $0x4] ss:$28 sps:$4 sm:$0xff]   ;;  %v3410_v25 = vld [vmem:[%s3839_s30 + $0x3c] ss:$28 sps:$4 sm:$0xff]   ;;  %v3419_v27 = vld [vmem:[%s4538_s1 + $0x148] sm:$0xff]  }
  0x4b   : > { %v3403_v12 = vld [vmem:[%s3839_s30 + $0x2a4] ss:$28 sps:$4 sm:$0xff]   ;;  %1559 = vmatprep.mubr.bf16.mxu0 %v3400_v11  ;;  %v3412_v26 = vld [vmem:[%s3839_s30 + $0x2dc] ss:$28 sps:$4 sm:$0xff]   ;;  %v3409_v28 = vld [vmem:[%s4538_s1 + $0x88] sm:$0xff]  }
  0x4c   : > { %1655 = vmatprep.mubr.bf16.mxu1 %v3403_v12  ;;  %v3398_v19 = vld [vmem:[%s3839_s30] ss:$28 sps:$4 sm:$0xff]   ;;  %v3421_v29 = vld [vmem:[%s4538_s1 + $0x108] sm:$0xff]   ;;  %v3414_v30 = vld [vmem:[%s3839_s30 + $0x38] ss:$28 sps:$4 sm:$0xff]  }
  0x4d   : > { %2934 = vmatpush3.bf16.msra.mxu0 %v3387_v5  ;;  %3329 = vmatpush3.bf16.msra.mxu1 %v3387_v5  ;;  %v3401_v20 = vld [vmem:[%s3839_s30 + $0x2a0] ss:$28 sps:$4 sm:$0xff]   ;;  %v3415_v31 = vld [vmem:[%s3839_s30 + $0x2d8] ss:$28 sps:$4 sm:$0xff]   ;;  %v3426_v39 = vld [vmem:[%s3839_s30 + $0x70] ss:$28 sps:$4 sm:$0xff]  }
  0x4e   : > { %2935 = vmatprep.subr.bf16.mxu0 %v3388_v6  ;;  %3322 = vmatprep.subr.bf16.mxu1 %v3388_v6  ;;  %v3406_v22 = vld [vmem:[%s4538_s1 + $0x80] sm:$0xff]   ;;  %v3417_v33 = vld [vmem:[%s4538_s1 + $0x90] sm:$0xff]   ;;  %v3418_v34 = vld [vmem:[%s4538_s1 + $0xd8] sm:$0xff]  }
  0x4f   : > { %v3407_v23 = vld [vmem:[%s4538_s1 + $0x100] sm:$0xff]   ;;  %v3422_v35 = vld [vmem:[%s3839_s30 + $0x74] ss:$28 sps:$4 sm:$0xff]   ;;  %v3420_v37 = vld [vmem:[%s4538_s1 + $0x98] sm:$0xff]  }
  0x50   : > { %v3424_v36 = vld [vmem:[%s3839_s30 + $0x314] ss:$28 sps:$4 sm:$0xff]   ;;  %v3428_v38 = vld [vmem:[%s4538_s1 + $0xe0] sm:$0xff]   ;;  %v3430_v43 = vld [vmem:[%s4538_s1 + $0xe8] sm:$0xff]  }
  0x51   : > { %2936 = vmatpush3.bf16.msra.mxu0 %v3389_v7  ;;  %3330 = vmatpush3.bf16.msra.mxu1 %v3389_v7  ;;  %v3427_v40 = vld [vmem:[%s3839_s30 + $0x310] ss:$28 sps:$4 sm:$0xff]   ;;  %v3429_v42 = vld [vmem:[%s4538_s1 + $0xa0] sm:$0xff]   ;;  %v3450_v51 = vld [vmem:[%s4538_s1 + $0x158] sm:$0xff]  }
  0x52   : > { %2937 = vmatprep.subr.bf16.mxu0 %v3390_v8  ;;  %3323 = vmatprep.subr.bf16.mxu1 %v3390_v8  ;;  %v3439_v41 = vld [vmem:[%s4538_s1 + $0x150] sm:$0xff]   ;;  %v3432_v45 = vld [vmem:[%s3839_s30 + $0xac] ss:$28 sps:$4 sm:$0xff]   ;;  %v3452_v53 = vld [vmem:[%s4538_s1 + $0x118] sm:$0xff]  }
  0x53   : > { %v3441_v44 = vld [vmem:[%s4538_s1 + $0x110] sm:$0xff]   ;;  %v3434_v46 = vld [vmem:[%s3839_s30 + $0x34c] ss:$28 sps:$4 sm:$0xff]   ;;  %v3444_v54 = vld [vmem:[%s3839_s30 + $0xe4] ss:$28 sps:$4 sm:$0xff]  }
  0x54   : > { %v3431_v47 = vld [vmem:[%s4538_s1 + $0xa8] sm:$0xff]   ;;  %v3438_v48 = vld [vmem:[%s4538_s1 + $0xf0] sm:$0xff]   ;;  %v3442_v55 = vld [vmem:[%s4538_s1 + $0xf8] sm:$0xff]  }
  0x55   : > { %2938 = vmatpush3.bf16.msra.mxu0 %v3391_v9  ;;  %3331 = vmatpush3.bf16.msra.mxu1 %v3391_v9  ;;  %v3436_v49 = vld [vmem:[%s3839_s30 + $0xa8] ss:$28 sps:$4 sm:$0xff]   ;;  %v3440_v52 = vld [vmem:[%s4538_s1 + $0xb0] sm:$0xff]   ;;  %v3443_v57 = vld [vmem:[%s4538_s1 + $0xb8] sm:$0xff]  }
  0x56   : > { %2939 = vmatprep.subr.bf16.mxu0 %v3392_v10  ;;  %3324 = vmatprep.subr.bf16.mxu1 %v3392_v10  ;;  %v3437_v50 = vld [vmem:[%s3839_s30 + $0x348] ss:$28 sps:$4 sm:$0xff]   ;;  %v3449_v62 = vld [vmem:[%s3839_s30 + $0xe0] ss:$28 sps:$4 sm:$0xff]   ;;  %v3457_v3 = vld [vmem:[%s3839_s30 + $0x118] ss:$28 sps:$4 sm:$0xff]  }
  0x57   : > { %v3448_v56 = vld [vmem:[%s3839_s30 + $0xc] ss:$28 sps:$4 sm:$0xff]   ;;  %v3451_v58 = vld [vmem:[%s4538_s1 + $0x180] sm:$0xff]   ;;  %v3453_v63 = vld [vmem:[%s3839_s30 + $0x11c] ss:$28 sps:$4 sm:$0xff]  }
  0x58   : > { %v3446_v59 = vld [vmem:[%s3839_s30 + $0x8] ss:$28 sps:$4 sm:$0xff]   ;;  %v3458_v4 = vld [vmem:[%s3839_s30 + $0x40] ss:$28 sps:$4 sm:$0xff]   ;;  %v3459_v5 = vld [vmem:[%s3839_s30 + $0x154] ss:$28 sps:$4 sm:$0xff]  }
  0x59   : > { %2940 = vmatpush3.bf16.msra.mxu0 %v3393_v13  ;;  %3332 = vmatpush3.bf16.msra.mxu1 %v3393_v13  ;;  %v3465_v60 = vld [vmem:[%s4538_s1 + $0x160] sm:$0xff]   ;;  %v3473_v1 = vld [vmem:[%s4538_s1 + $0x168] sm:$0xff]   ;;  %v3461_v6 = vld [vmem:[%s3839_s30 + $0x7c] ss:$28 sps:$4 sm:$0xff]  }
  0x5a   : > { %2941 = vmatprep.subr.bf16.mxu0 %v3394_v14  ;;  %3325 = vmatprep.subr.bf16.mxu1 %v3394_v14  ;;  %v3466_v61 = vld [vmem:[%s4538_s1 + $0x120] sm:$0xff]   ;;  %v3474_v2 = vld [vmem:[%s4538_s1 + $0x128] sm:$0xff]   ;;  %v3487_v7 = vld [vmem:[%s4538_s1 + $0x170] sm:$0xff]  }
  0x5b   : > { %v3455_v0 = vld [vmem:[%s3839_s30 + $0x44] ss:$28 sps:$4 sm:$0xff]   ;;  %v3488_v8 = vld [vmem:[%s4538_s1 + $0x130] sm:$0xff]   ;;  %v3467_v11 = vld [vmem:[%s3839_s30 + $0x18c] ss:$28 sps:$4 sm:$0xff]  }
  0x5c   : > { %v3463_v9 = vld [vmem:[%s3839_s30 + $0x150] ss:$28 sps:$4 sm:$0xff]   ;;  %v3464_v10 = vld [vmem:[%s3839_s30 + $0x78] ss:$28 sps:$4 sm:$0xff]  }
  0x5d   : > { %2942 = vmatpush3.bf16.msra.mxu0 %v3395_v15  ;;  %3333 = vmatpush3.bf16.msra.mxu1 %v3395_v15  ;;  %v3495_v12 = vld [vmem:[%s4538_s1 + $0x178] sm:$0xff]   ;;  %v3469_v14 = vld [vmem:[%s3839_s30 + $0xb4] ss:$28 sps:$4 sm:$0xff]   ;;  %v3509_v15 = vld [vmem:[%s4538_s1 + $0x188] sm:$0xff]  }
  0x5e   : > { %2943 = vmatprep.subr.bf16.mxu0 %v3396_v16  ;;  %3326 = vmatprep.subr.bf16.mxu1 %v3396_v16  ;;  %v3496_v13 = vld [vmem:[%s4538_s1 + $0x138] sm:$0xff]   ;;  %v3471_v16 = vld [vmem:[%s3839_s30 + $0x188] ss:$28 sps:$4 sm:$0xff]  }
  0x61   : > { %2944 = vmatpush3.bf16.msra.mxu0 %v3397_v17  ;;  %3334 = vmatpush3.bf16.msra.mxu1 %v3397_v17  ;;  %v3472_v17 = vld [vmem:[%s3839_s30 + $0xb0] ss:$28 sps:$4 sm:$0xff]  }
  0x62   : > { %3041 = vmatprep.subr.bf16.mxu1 %v3404_v18  ;;  %3153 = vmatprep.subr.bf16.mxu0 %v3405_v21  ;;  %v3475_v18 = vld [vmem:[%s3839_s30 + $0x1c4] ss:$28 sps:$4 sm:$0xff]  }
  0x63   : > { %v3480_v21 = vld [vmem:[%s3839_s30 + $0xe8] ss:$28 sps:$4 sm:$0xff]  }
  0x64   : > { %1560 = vmatmul.mubr.bf16.vlgmr.msra.gmra.mrb[0].mxu0 %v3398_v19  ;;  %1656 = vmatmul.mubr.bf16.vlgmr.msra.gmra.mrb[0].mxu1 %v3401_v20  ;;  %v3477_v19 = vld [vmem:[%s3839_s30 + $0xec] ss:$28 sps:$4 sm:$0xff]   ;;  %v3479_v20 = vld [vmem:[%s3839_s30 + $0x1c0] ss:$28 sps:$4 sm:$0xff]  }
  0x65   : > { %3042 = vmatpush3.bf16.msra.mxu1 %v3406_v22  ;;  %3154 = vmatpush3.bf16.msra.mxu0 %v3407_v23  ;;  %v3481_v22 = vld [vmem:[%s3839_s30 + $0x1fc] ss:$28 sps:$4 sm:$0xff]   ;;  %v3483_v23 = vld [vmem:[%s3839_s30 + $0x124] ss:$28 sps:$4 sm:$0xff]  }
  0x66   : > { %3043 = vmatprep.subr.bf16.mxu1 %v3408_v24  ;;  %1567 = vmatprep.mubr.bf16.mxu0 %v3410_v25  ;;  %v3485_v24 = vld [vmem:[%s3839_s30 + $0x1f8] ss:$28 sps:$4 sm:$0xff]   ;;  %v3486_v25 = vld [vmem:[%s3839_s30 + $0x120] ss:$28 sps:$4 sm:$0xff]  }
  0x67   : > { %1663 = vmatprep.mubr.bf16.mxu1 %v3412_v26  ;;  %3155 = vmatprep.subr.bf16.mxu0 %v3419_v27  ;;  %v3489_v26 = vld [vmem:[%s3839_s30 + $0x234] ss:$28 sps:$4 sm:$0xff]   ;;  %v3491_v27 = vld [vmem:[%s3839_s30 + $0x15c] ss:$28 sps:$4 sm:$0xff]  }
  0x69   : > { %3044 = vmatpush3.bf16.msra.mxu1 %v3409_v28  ;;  %3156 = vmatpush3.bf16.msra.mxu0 %v3421_v29  ;;  %v3493_v28 = vld [vmem:[%s3839_s30 + $0x230] ss:$28 sps:$4 sm:$0xff]   ;;  %v3494_v29 = vld [vmem:[%s3839_s30 + $0x158] ss:$28 sps:$4 sm:$0xff]  }
  0x6a   : > { %3045 = vmatprep.subr.bf16.mxu1 %v3416_v32  ;;  %3157 = vmatprep.subr.bf16.mxu0 %v3439_v41  ;;  %v3501_v32 = vld [vmem:[%s3839_s30 + $0x268] ss:$28 sps:$4 sm:$0xff]  }
  0x6b   : > { %v3515_v41 = vld [vmem:[%s3839_s30 + $0x48] ss:$28 sps:$4 sm:$0xff]  }
  0x6c   : > { %1568 = vmatmul.mubr.bf16.gmra.mrb[4].mxu0 %v3414_v30  ;;  %1664 = vmatmul.mubr.bf16.gmra.mrb[4].mxu1 %v3415_v31  ;;  %v3497_v30 = vld [vmem:[%s3839_s30 + $0x26c] ss:$28 sps:$4 sm:$0xff]   ;;  %v3499_v31 = vld [vmem:[%s3839_s30 + $0x194] ss:$28 sps:$4 sm:$0xff]  }
  0x6d   : > { %3046 = vmatpush3.bf16.msra.mxu1 %v3417_v33  ;;  %1575 = vmatprep.mubr.bf16.mxu0 %v3422_v35  ;;  %v3502_v33 = vld [vmem:[%s3839_s30 + $0x190] ss:$28 sps:$4 sm:$0xff]  }
  0x6e   : > { %3047 = vmatprep.subr.bf16.mxu1 %v3418_v34  ;;  %1671 = vmatprep.mubr.bf16.mxu1 %v3424_v36  ;;  %v3503_v34 = vld [vmem:[%s3839_s30 + $0x1cc] ss:$28 sps:$4 sm:$0xff]   ;;  %v3507_v35 = vld [vmem:[%s3839_s30 + $0x14] ss:$28 sps:$4 sm:$0xff]  }
  0x6f   : > { %3158 = vmatpush3.bf16.msra.mxu0 %v3441_v44  ;;  %v3505_v36 = vld [vmem:[%s3839_s30 + $0x10] ss:$28 sps:$4 sm:$0xff]   ;;  %v3520_v44 = vld [vmem:[%s3839_s30 + $0x238] ss:$28 sps:$4 sm:$0xff]  }
  0x70   : > { %3159 = vmatprep.subr.bf16.mxu0 %v3450_v51  ;;  %v3530_v51 = vld [vmem:[%s3839_s30 + $0xf4] ss:$28 sps:$4 sm:$0xff]  }
  0x71   : > { %3048 = vmatpush3.bf16.msra.mxu1 %v3420_v37  ;;  %v3508_v37 = vld [vmem:[%s3839_s30 + $0x1c8] ss:$28 sps:$4 sm:$0xff]  }
  0x72   : > { %3049 = vmatprep.subr.bf16.mxu1 %v3428_v38  ;;  %v3510_v38 = vld [vmem:[%s3839_s30 + $0x204] ss:$28 sps:$4 sm:$0xff]  }
  0x73   : > { %3160 = vmatpush3.bf16.msra.mxu0 %v3452_v53  ;;  %v3533_v53 = vld [vmem:[%s3839_s30 + $0xf0] ss:$28 sps:$4 sm:$0xff]  }
  0x74   : > { %1576 = vmatmul.mubr.bf16.gmra.mrb[8].mxu0 %v3426_v39  ;;  %1672 = vmatmul.mubr.bf16.gmra.mrb[8].mxu1 %v3427_v40  ;;  %v3512_v39 = vld [vmem:[%s3839_s30 + $0x4c] ss:$28 sps:$4 sm:$0xff]   ;;  %v3514_v40 = vld [vmem:[%s3839_s30 + $0x200] ss:$28 sps:$4 sm:$0xff]  }
  0x75   : > { %3050 = vmatpush3.bf16.msra.mxu1 %v3429_v42  ;;  %1583 = vmatprep.mubr.bf16.mxu0 %v3432_v45  ;;  %v3516_v42 = vld [vmem:[%s3839_s30 + $0x23c] ss:$28 sps:$4 sm:$0xff]  }
  0x76   : > { %3051 = vmatprep.subr.bf16.mxu1 %v3430_v43  ;;  %1679 = vmatprep.mubr.bf16.mxu1 %v3434_v46  ;;  %v3518_v43 = vld [vmem:[%s3839_s30 + $0x84] ss:$28 sps:$4 sm:$0xff]   ;;  %v3522_v46 = vld [vmem:[%s3839_s30 + $0x274] ss:$28 sps:$4 sm:$0xff]  }
  0x77   : > { %3161 = vmatprep.subr.bf16.mxu0 %v3465_v60  ;;  %v3521_v45 = vld [vmem:[%s3839_s30 + $0x80] ss:$28 sps:$4 sm:$0xff]   ;;  %v3544_v60 = vld [vmem:[%s3839_s30 + $0x318] ss:$28 sps:$4 sm:$0xff]  }
  0x78   : > { %3162 = vmatpush3.bf16.msra.mxu0 %v3466_v61  ;;  %v3545_v61 = vld [vmem:[%s3839_s30 + $0x160] ss:$28 sps:$4 sm:$0xff]  }
  0x79   : > { %3052 = vmatpush3.bf16.msra.mxu1 %v3431_v47  ;;  %3163 = vmatprep.subr.bf16.mxu0 %v3473_v1  ;;  %v3524_v47 = vld [vmem:[%s3839_s30 + $0xbc] ss:$28 sps:$4 sm:$0xff]  }
  0x7a   : > { %3053 = vmatprep.subr.bf16.mxu1 %v3438_v48  ;;  %v3526_v48 = vld [vmem:[%s3839_s30 + $0x270] ss:$28 sps:$4 sm:$0xff]   ;;  %v3551_v1 = vld [vmem:[%s3839_s30 + $0x198] ss:$28 sps:$4 sm:$0xff]  }
  0x7c   : > { %1584 = vmatmul.mubr.bf16.gmra.mrb[12].mxu0 %v3436_v49  ;;  %1680 = vmatmul.mubr.bf16.gmra.mrb[12].mxu1 %v3437_v50  ;;  %v3527_v49 = vld [vmem:[%s3839_s30 + $0xb8] ss:$28 sps:$4 sm:$0xff]   ;;  %v3528_v50 = vld [vmem:[%s3839_s30 + $0x2ac] ss:$28 sps:$4 sm:$0xff]  }
  0x7d   : > { %3054 = vmatpush3.bf16.msra.mxu1 %v3440_v52  ;;  %1591 = vmatprep.mubr.bf16.mxu0 %v3444_v54  ;;  %v3532_v52 = vld [vmem:[%s3839_s30 + $0x2a8] ss:$28 sps:$4 sm:$0xff]  }
  0x7e   : > { %3055 = vmatprep.subr.bf16.mxu1 %v3442_v55  ;;  %1720 = vmatprep.mubr.bf16.mxu1 %v3448_v56  ;;  %v3534_v54 = vld [vmem:[%s3839_s30 + $0x2e4] ss:$28 sps:$4 sm:$0xff]   ;;  %v3536_v55 = vld [vmem:[%s3839_s30 + $0x12c] ss:$28 sps:$4 sm:$0xff]  }
  0x7f   : > { %3164 = vmatpush3.bf16.msra.mxu0 %v3474_v2  ;;  %v3538_v56 = vld [vmem:[%s3839_s30 + $0x2e0] ss:$28 sps:$4 sm:$0xff]   ;;  %v3552_v2 = vld [vmem:[%s3839_s30 + $0x1d4] ss:$28 sps:$4 sm:$0xff]  }
  0x80   : > { %3165 = vmatprep.subr.bf16.mxu0 %v3487_v7  ;;  %v3559_v7 = vld [vmem:[%s3839_s30 + $0x88] ss:$28 sps:$4 sm:$0xff]  }
  0x81   : > { %3056 = vmatpush3.bf16.msra.mxu1 %v3443_v57  ;;  %v3539_v57 = vld [vmem:[%s3839_s30 + $0x128] ss:$28 sps:$4 sm:$0xff]  }
  0x82   : > { %3283 = vmatprep.subr.bf16.mxu1 %v3451_v58 }
  0x83   : > { %3166 = vmatpush3.bf16.msra.mxu0 %v3488_v8  ;;  %v3560_v8 = vld [vmem:[%s3839_s30 + $0x208] ss:$28 sps:$4 sm:$0xff]  }
  0x84   : > { %1592 = vmatmul.mubr.bf16.gmra.mrb[16].mxu0 %v3449_v62  ;;  %1721 = vmatmul.mubr.bf16.vlgmr.msra.gmra.mrb[16].mxu1 %v3446_v59  ;;  %v3542_v59 = vld [vmem:[%s3839_s30 + $0x164] ss:$28 sps:$4 sm:$0xff]   ;;  %v3546_v62 = vld [vmem:[%s3839_s30 + $0x354] ss:$28 sps:$4 sm:$0xff]  }
  0x85   : > { %3284 = vmatpush3.bf16.msra.mxu1 %v3451_v58  ;;  %1599 = vmatprep.mubr.bf16.mxu0 %v3453_v63  ;;  %v3540_v58 = vld [vmem:[%s3839_s30 + $0x31c] ss:$28 sps:$4 sm:$0xff]  }
  0x86   : > { %1728 = vmatprep.mubr.bf16.mxu1 %v3455_v0  ;;  %3167 = vmatprep.subr.bf16.mxu0 %v3495_v12  ;;  %v3548_v63 = vld [vmem:[%s3839_s30 + $0x19c] ss:$28 sps:$4 sm:$0xff]   ;;  %v3550_v0 = vld [vmem:[%s3839_s30 + $0x350] ss:$28 sps:$4 sm:$0xff]  }
  0x87   : > { %3168 = vmatpush3.bf16.msra.mxu0 %v3496_v13  ;;  %3285 = vmatprep.subr.bf16.mxu1 %v3509_v15  ;;  %v3565_v12 = vld [vmem:[%s3839_s30 + $0x240] ss:$28 sps:$4 sm:$0xff]   ;;  %v3566_v13 = vld [vmem:[%s3839_s30 + $0x130] ss:$28 sps:$4 sm:$0xff]  }
  0x89   : > { %3286 = vmatpush3.bf16.msra.mxu1 %v3509_v15  ;;  %v3569_v15 = vld [vmem:[%s3839_s30 + $0x168] ss:$28 sps:$4 sm:$0xff]  }
  0x8c   : > { %1600 = vmatmul.mubr.bf16.gmra.mrb[20].mxu0 %v3457_v3  ;;  %1729 = vmatmul.mubr.bf16.gmra.mrb[20].mxu1 %v3458_v4  ;;  %v3554_v3 = vld [vmem:[%s3839_s30 + $0x18] ss:$28 sps:$4 sm:$0xff]   ;;  %v3555_v4 = vld [vmem:[%s3839_s30 + $0x1d0] ss:$28 sps:$4 sm:$0xff]  }
  0x8d   : > { %1607 = vmatprep.mubr.bf16.mxu0 %v3459_v5  ;;  %1736 = vmatprep.mubr.bf16.mxu1 %v3461_v6  ;;  %v3556_v5 = vld [vmem:[%s3839_s30 + $0x50] ss:$28 sps:$4 sm:$0xff]  }
  0x8e   : > { %v3557_v6 = vld [vmem:[%s3839_s30 + $0x20c] ss:$28 sps:$4 sm:$0xff]  }
  0x94   : > { %1608 = vmatmul.mubr.bf16.gmra.mrb[24].mxu0 %v3463_v9  ;;  %1737 = vmatmul.mubr.bf16.gmra.mrb[24].mxu1 %v3464_v10  ;;  %v3561_v9 = vld [vmem:[%s3839_s30 + $0xc0] ss:$28 sps:$4 sm:$0xff]  }
  0x95   : > { %1615 = vmatprep.mubr.bf16.mxu0 %v3467_v11  ;;  %1744 = vmatprep.mubr.bf16.mxu1 %v3469_v14  ;;  %v3562_v10 = vld [vmem:[%s3839_s30 + $0x244] ss:$28 sps:$4 sm:$0xff]   ;;  %v3564_v11 = vld [vmem:[%s3839_s30 + $0xf8] ss:$28 sps:$4 sm:$0xff]  }
  0x96   : > { %v3567_v14 = vld [vmem:[%s3839_s30 + $0x27c] ss:$28 sps:$4 sm:$0xff]  }
  0x9c   : > { %1616 = vmatmul.mubr.bf16.gmra.mrb[28].mxu0 %v3471_v16  ;;  %1745 = vmatmul.mubr.bf16.gmra.mrb[28].mxu1 %v3472_v17  ;;  %v3570_v16 = vld [vmem:[%s3839_s30 + $0x278] ss:$28 sps:$4 sm:$0xff]   ;;  %v3571_v17 = vld [vmem:[%s3839_s30 + $0x1a0] ss:$28 sps:$4 sm:$0xff]  }
  0x9d   : > { %1623 = vmatprep.mubr.bf16.mxu0 %v3475_v18  ;;  %1752 = vmatprep.mubr.bf16.mxu1 %v3477_v19  ;;  %v3572_v18 = vld [vmem:[%s3839_s30 + $0x2b4] ss:$28 sps:$4 sm:$0xff]  }
  0x9e   : > { %v3574_v19 = vld [vmem:[%s3839_s30 + $0x1d8] ss:$28 sps:$4 sm:$0xff]  }
  0xa4   : > { %1624 = vmatmul.mubr.bf16.gmra.mrb[32].mxu0 %v3479_v20  ;;  %1753 = vmatmul.mubr.bf16.gmra.mrb[32].mxu1 %v3480_v21  ;;  %v3575_v20 = vld [vmem:[%s3839_s30 + $0x2b0] ss:$28 sps:$4 sm:$0xff]  }
  0xa5   : > { %1631 = vmatprep.mubr.bf16.mxu0 %v3481_v22  ;;  %1760 = vmatprep.mubr.bf16.mxu1 %v3483_v23  ;;  %v3576_v21 = vld [vmem:[%s3839_s30 + $0x210] ss:$28 sps:$4 sm:$0xff]   ;;  %v3579_v23 = vld [vmem:[%s3839_s30 + $0x248] ss:$28 sps:$4 sm:$0xff]  }
  0xa6   : > { %v3577_v22 = vld [vmem:[%s3839_s30 + $0x2ec] ss:$28 sps:$4 sm:$0xff]  }
  0xac   : > { %1632 = vmatmul.mubr.bf16.gmra.mrb[36].mxu0 %v3485_v24  ;;  %1761 = vmatmul.mubr.bf16.gmra.mrb[36].mxu1 %v3486_v25  ;;  %v3580_v24 = vld [vmem:[%s3839_s30 + $0x2e8] ss:$28 sps:$4 sm:$0xff]   ;;  %v3581_v25 = vld [vmem:[%s3839_s30 + $0x280] ss:$28 sps:$4 sm:$0xff]  }
  0xad   : > { %1639 = vmatprep.mubr.bf16.mxu0 %v3489_v26  ;;  %1768 = vmatprep.mubr.bf16.mxu1 %v3491_v27  ;;  %v3582_v26 = vld [vmem:[%s3839_s30 + $0x324] ss:$28 sps:$4 sm:$0xff]   ;;  %v3584_v27 = vld [vmem:[%s3839_s30 + $0x2b8] ss:$28 sps:$4 sm:$0xff]  }
  0xb4   : > { %1640 = vmatmul.mubr.bf16.gmra.mrb[40].mxu0 %v3493_v28  ;;  %1769 = vmatmul.mubr.bf16.gmra.mrb[40].mxu1 %v3494_v29  ;;  %v3585_v28 = vld [vmem:[%s3839_s30 + $0x320] ss:$28 sps:$4 sm:$0xff]   ;;  %v3586_v29 = vld [vmem:[%s3839_s30 + $0x2f0] ss:$28 sps:$4 sm:$0xff]  }
  0xb5   : > { %1647 = vmatprep.mubr.bf16.mxu0 %v3497_v30  ;;  %1776 = vmatprep.mubr.bf16.mxu1 %v3499_v31  ;;  %v3587_v30 = vld [vmem:[%s3839_s30 + $0x35c] ss:$28 sps:$4 sm:$0xff]   ;;  %v3589_v31 = vld [vmem:[%s3839_s30 + $0x328] ss:$28 sps:$4 sm:$0xff]  }
  0xbc   : > { %1648 = vmatmul.mubr.bf16.gmra.mrb[44].mxu0 %v3501_v32  ;;  %1777 = vmatmul.mubr.bf16.gmra.mrb[44].mxu1 %v3502_v33 }
  0xbd   : > { %1784 = vmatprep.mubr.bf16.mxu1 %v3503_v34  ;;  %1881 = vmatprep.mubr.bf16.mxu0 %v3507_v35 }
  0xc4   : > { %1785 = vmatmul.mubr.bf16.gmra.mrb[48].mxu1 %v3508_v37  ;;  %1882 = vmatmul.mubr.bf16.vlgmr.msra.gmra.mrb[48].mxu0 %v3505_v36  ;;  %v3590_v36 = vld [vmem:[%s3839_s30 + $0x358] ss:$28 sps:$4 sm:$0xff]   ;;  %v3591_v37 = vld [vmem:[%s3839_s30 + $0x360] ss:$28 sps:$4 sm:$0xff]   ;;  %s2682_s30 = sshll.u32 %s4555_s26, 2 }
  0xc5   : > { %1792 = vmatprep.mubr.bf16.mxu1 %v3510_v38  ;;  %1889 = vmatprep.mubr.bf16.mxu0 %v3512_v39  ;;  %s4340_s29 = scalar_lea.vmem %s4541_s4, %s2682_s30 }
  0xcc   : > { %1793 = vmatmul.mubr.bf16.gmra.mrb[52].mxu1 %v3514_v40  ;;  %1890 = vmatmul.mubr.bf16.gmra.mrb[52].mxu0 %v3515_v41 }
  0xcd   : > { %1800 = vmatprep.mubr.bf16.mxu1 %v3516_v42  ;;  %1897 = vmatprep.mubr.bf16.mxu0 %v3518_v43 }
  0xd4   : > { %1801 = vmatmul.mubr.bf16.gmra.mrb[56].mxu1 %v3520_v44  ;;  %1898 = vmatmul.mubr.bf16.gmra.mrb[56].mxu0 %v3521_v45 }
  0xd5   : > { %1808 = vmatprep.mubr.bf16.mxu1 %v3522_v46  ;;  %1905 = vmatprep.mubr.bf16.mxu0 %v3524_v47 }
  0xdc   : > { %1809 = vmatmul.mubr.bf16.gmra.mrb[60].mxu1 %v3526_v48  ;;  %1906 = vmatmul.mubr.bf16.gmra.mrb[60].mxu0 %v3527_v49 }
  0xdd   : > { %1816 = vmatprep.mubr.bf16.mxu1 %v3528_v50  ;;  %1913 = vmatprep.mubr.bf16.mxu0 %v3530_v51 }
  0xe4   : > { %1817 = vmatmul.mubr.bf16.gmra.mrb[64].mxu1 %v3532_v52  ;;  %1914 = vmatmul.mubr.bf16.gmra.mrb[64].mxu0 %v3533_v53 }
  0xe5   : > { %1824 = vmatprep.mubr.bf16.mxu1 %v3534_v54  ;;  %1921 = vmatprep.mubr.bf16.mxu0 %v3536_v55 }
  0xec   : > { %1825 = vmatmul.mubr.bf16.gmra.mrb[68].mxu1 %v3538_v56  ;;  %1922 = vmatmul.mubr.bf16.gmra.mrb[68].mxu0 %v3539_v57 }
  0xed   : > { %1832 = vmatprep.mubr.bf16.mxu1 %v3540_v58  ;;  %1929 = vmatprep.mubr.bf16.mxu0 %v3542_v59 }
  0xf4   : > { %1833 = vmatmul.mubr.bf16.gmra.mrb[72].mxu1 %v3544_v60  ;;  %1930 = vmatmul.mubr.bf16.gmra.mrb[72].mxu0 %v3545_v61 }
  0xf5   : > { %1840 = vmatprep.mubr.bf16.mxu1 %v3546_v62  ;;  %1937 = vmatprep.mubr.bf16.mxu0 %v3548_v63 }
  0xfc   : > { %1841 = vmatmul.mubr.bf16.gmra.mrb[76].mxu1 %v3550_v0  ;;  %1938 = vmatmul.mubr.bf16.gmra.mrb[76].mxu0 %v3551_v1 }
  0xfd   : > { %1945 = vmatprep.mubr.bf16.mxu0 %v3552_v2  ;;  %3287 = vmatprep.mubr.msk.bf16.mxu1 %vm325_vm0, %v3554_v3 }
 0x104   : > { %1946 = vmatmul.mubr.bf16.gmra.mrb[80].mxu0 %v3555_v4  ;;  %3288 = vmatmul.mubr.msk.bf16.vlgmr.msra.gmra.mrb[80].mxu1 %vm325_vm0, %v3556_v5 }
 0x105   : > { %1953 = vmatprep.mubr.bf16.mxu0 %v3557_v6  ;;  %3291 = vmatprep.mubr.msk.bf16.mxu1 %vm325_vm0, %v3559_v7 }
 0x10c   : > { %1954 = vmatmul.mubr.bf16.gmra.mrb[84].mxu0 %v3560_v8  ;;  %3292 = vmatmul.mubr.msk.bf16.gmra.mrb[84].mxu1 %vm325_vm0, %v3561_v9 }
 0x10d   : > { %1961 = vmatprep.mubr.bf16.mxu0 %v3562_v10  ;;  %3295 = vmatprep.mubr.msk.bf16.mxu1 %vm325_vm0, %v3564_v11 }
 0x114   : > { %1962 = vmatmul.mubr.bf16.gmra.mrb[88].mxu0 %v3565_v12  ;;  %3296 = vmatmul.mubr.msk.bf16.gmra.mrb[88].mxu1 %vm325_vm0, %v3566_v13 }
 0x115   : > { %1969 = vmatprep.mubr.bf16.mxu0 %v3567_v14  ;;  %3299 = vmatprep.mubr.msk.bf16.mxu1 %vm325_vm0, %v3569_v15 }
 0x11c   : > { %1970 = vmatmul.mubr.bf16.gmra.mrb[92].mxu0 %v3570_v16  ;;  %3300 = vmatmul.mubr.msk.bf16.gmra.mrb[92].mxu1 %vm325_vm0, %v3571_v17  ;;  %v3682_v16 = vmov 0.0  }
 0x11d   : > { %1977 = vmatprep.mubr.bf16.mxu0 %v3572_v18  ;;  %3303 = vmatprep.mubr.msk.bf16.mxu1 %vm325_vm0, %v3574_v19  ;;  %328 = vst.msk [vmem:[#allocation2 + $0x10] sm:$0xff] %vm325_vm0, %v3682_v16  ;;  %326 = vst.msk [vmem:[#allocation2] sm:$0xff] %vm325_vm0, %v3682_v16 }
 0x11e   : > { %327 = vst.msk [vmem:[#allocation2 + $0x8] sm:$0xff] %vm325_vm0, %v3682_v16  ;;  %329 = vst.msk [vmem:[#allocation2 + $0x18] sm:$0xff] %vm325_vm0, %v3682_v16 }
 0x11f   : > { %330 = vst.msk [vmem:[#allocation2 + $0x20] sm:$0xff] %vm325_vm0, %v3682_v16  ;;  %331 = vst.msk [vmem:[#allocation2 + $0x28] sm:$0xff] %vm325_vm0, %v3682_v16 }
 0x120   : > { %332 = vst.msk [vmem:[#allocation2 + $0x30] sm:$0xff] %vm325_vm0, %v3682_v16  ;;  %333 = vst.msk [vmem:[#allocation2 + $0x38] sm:$0xff] %vm325_vm0, %v3682_v16 }
 0x121   : > { %334 = vst.msk [vmem:[#allocation2 + $0x40] sm:$0xff] %vm325_vm0, %v3682_v16  ;;  %335 = vst.msk [vmem:[#allocation2 + $0x48] sm:$0xff] %vm325_vm0, %v3682_v16 }
 0x122   : > { %336 = vst.msk [vmem:[#allocation2 + $0x50] sm:$0xff] %vm325_vm0, %v3682_v16  ;;  %337 = vst.msk [vmem:[#allocation2 + $0x58] sm:$0xff] %vm325_vm0, %v3682_v16 }
 0x123   : > { %338 = vst.msk [vmem:[#allocation2 + $0x60] sm:$0xff] %vm325_vm0, %v3682_v16  ;;  %339 = vst.msk [vmem:[#allocation2 + $0x68] sm:$0xff] %vm325_vm0, %v3682_v16 }
 0x124   : > { %1978 = vmatmul.mubr.bf16.gmra.mrb[96].mxu0 %v3575_v20  ;;  %3304 = vmatmul.mubr.msk.bf16.gmra.mrb[96].mxu1 %vm325_vm0, %v3576_v21  ;;  %340 = vst.msk [vmem:[#allocation2 + $0x70] sm:$0xff] %vm325_vm0, %v3682_v16  ;;  %341 = vst.msk [vmem:[#allocation2 + $0x78] sm:$0xff] %vm325_vm0, %v3682_v16 }
 0x125   : > { %1985 = vmatprep.mubr.bf16.mxu0 %v3577_v22  ;;  %3307 = vmatprep.mubr.msk.bf16.mxu1 %vm325_vm0, %v3579_v23  ;;  %342 = vst.msk [vmem:[#allocation2 + $0x80] sm:$0xff] %vm325_vm0, %v3682_v16  ;;  %343 = vst.msk [vmem:[#allocation2 + $0x88] sm:$0xff] %vm325_vm0, %v3682_v16 }
 0x126   : > { %344 = vst.msk [vmem:[#allocation2 + $0x90] sm:$0xff] %vm325_vm0, %v3682_v16  ;;  %345 = vst.msk [vmem:[#allocation2 + $0x98] sm:$0xff] %vm325_vm0, %v3682_v16 }
 0x127   : > { %346 = vst.msk [vmem:[#allocation2 + $0xa0] sm:$0xff] %vm325_vm0, %v3682_v16  ;;  %347 = vst.msk [vmem:[#allocation2 + $0xa8] sm:$0xff] %vm325_vm0, %v3682_v16 }
 0x128   : > { %348 = vst.msk [vmem:[#allocation2 + $0xb0] sm:$0xff] %vm325_vm0, %v3682_v16  ;;  %349 = vst.msk [vmem:[#allocation2 + $0xb8] sm:$0xff] %vm325_vm0, %v3682_v16 }
 0x129   : > { %350 = vst.msk [vmem:[#allocation2 + $0xc0] sm:$0xff] %vm325_vm0, %v3682_v16  ;;  %351 = vst.msk [vmem:[#allocation2 + $0xc8] sm:$0xff] %vm325_vm0, %v3682_v16 }
 0x12a   : > { %352 = vst.msk [vmem:[#allocation2 + $0xd0] sm:$0xff] %vm325_vm0, %v3682_v16  ;;  %353 = vst.msk [vmem:[#allocation2 + $0xd8] sm:$0xff] %vm325_vm0, %v3682_v16 }
 0x12b   : > { %354 = vst.msk [vmem:[#allocation2 + $0xe0] sm:$0xff] %vm325_vm0, %v3682_v16  ;;  %355 = vst.msk [vmem:[#allocation2 + $0xe8] sm:$0xff] %vm325_vm0, %v3682_v16 }
 0x12c   : > { %1986 = vmatmul.mubr.bf16.gmra.mrb[100].mxu0 %v3580_v24  ;;  %3308 = vmatmul.mubr.msk.bf16.gmra.mrb[100].mxu1 %vm325_vm0, %v3581_v25  ;;  %356 = vst.msk [vmem:[#allocation2 + $0xf0] sm:$0xff] %vm325_vm0, %v3682_v16  ;;  %357 = vst.msk [vmem:[#allocation2 + $0xf8] sm:$0xff] %vm325_vm0, %v3682_v16 }
 0x12d   : > { %1993 = vmatprep.mubr.bf16.mxu0 %v3582_v26  ;;  %3311 = vmatprep.mubr.msk.bf16.mxu1 %vm325_vm0, %v3584_v27 }
 0x134   : > { %1994 = vmatmul.mubr.bf16.gmra.mrb[104].mxu0 %v3585_v28  ;;  %3312 = vmatmul.mubr.msk.bf16.gmra.mrb[104].mxu1 %vm325_vm0, %v3586_v29 }
 0x135   : > { %2001 = vmatprep.mubr.bf16.mxu0 %v3587_v30  ;;  %3315 = vmatprep.mubr.msk.bf16.mxu1 %vm325_vm0, %v3589_v31 }
 0x137   : > { %v2945_v32 = vpop.f32.mrb[0].mxu0  ;;  %v3017_v33 = vpop.f32.mrb[0].mxu1 }
 0x138   : > { %v2946_v34 = vpop.f32.mrb[1].mxu0  ;;  %v3018_v35 = vpop.f32.mrb[1].mxu1 }
 0x139   : > { %v4091_v38 = vadd.f32 %v2946_v34, %v2945_v32  ;;  %v2948_v39 = vpop.f32.mrb[2].mxu0  ;;  %v4093_v40 = vadd.f32 %v3018_v35, %v3017_v33  ;;  %v3020_v41 = vpop.f32.mrb[2].mxu1 }
 0x13a   : > { %v2949_v42 = vpop.f32.mrb[3].mxu0  ;;  %v3021_v43 = vpop.f32.mrb[3].mxu1 }
 0x13b   : > { %v4095_v44 = vadd.f32 %v2949_v42, %v2948_v39  ;;  %v4097_v45 = vadd.f32 %v3021_v43, %v3020_v41 }
 0x13c   : > { %2002 = vmatmul.mubr.bf16.gmra.mrb[108].mxu0 %v3590_v36  ;;  %3316 = vmatmul.mubr.msk.bf16.gmra.mrb[108].mxu1 %vm325_vm0, %v3591_v37 }
 0x13f   : > { %v2951_v46 = vpop.f32.mrb[4].mxu0  ;;  %v3023_v47 = vpop.f32.mrb[4].mxu1 }
 0x140   : > { %v2952_v48 = vpop.f32.mrb[5].mxu0  ;;  %v3024_v49 = vpop.f32.mrb[5].mxu1 }
 0x141   : > { %v4100_v50 = vadd.f32 %v2952_v48, %v2951_v46  ;;  %v2954_v51 = vpop.f32.mrb[6].mxu0  ;;  %v4102_v52 = vadd.f32 %v3024_v49, %v3023_v47  ;;  %v3026_v53 = vpop.f32.mrb[6].mxu1 }
 0x142   : > { %v2955_v54 = vpop.f32.mrb[7].mxu0  ;;  %v3027_v55 = vpop.f32.mrb[7].mxu1 }
 0x143   : > { %v4104_v56 = vadd.f32 %v2955_v54, %v2954_v51  ;;  %v4106_v57 = vadd.f32 %v3027_v55, %v3026_v53 }
 0x147   : > { %v2957_v58 = vpop.f32.mrb[8].mxu0  ;;  %v3029_v59 = vpop.f32.mrb[8].mxu1 }
 0x148   : > { %v2958_v60 = vpop.f32.mrb[9].mxu0  ;;  %v3030_v61 = vpop.f32.mrb[9].mxu1 }
 0x149   : > { %v4108_v62 = vadd.f32 %v2958_v60, %v2957_v58  ;;  %v2960_v63 = vpop.f32.mrb[10].mxu0  ;;  %v4110_v0 = vadd.f32 %v3030_v61, %v3029_v59  ;;  %v3032_v1 = vpop.f32.mrb[10].mxu1 }
 0x14a   : > { %v2961_v2 = vpop.f32.mrb[11].mxu0  ;;  %v3033_v3 = vpop.f32.mrb[11].mxu1 }
 0x14b   : > { %v4112_v4 = vadd.f32 %v2961_v2, %v2960_v63  ;;  %v4114_v5 = vadd.f32 %v3033_v3, %v3032_v1 }
 0x14f   : > { %v2963_v6 = vpop.f32.mrb[12].mxu0  ;;  %v3035_v7 = vpop.f32.mrb[12].mxu1 }
 0x150   : > { %v2964_v8 = vpop.f32.mrb[13].mxu0  ;;  %v3036_v9 = vpop.f32.mrb[13].mxu1 }
 0x151   : > { %v4116_v10 = vadd.f32 %v2964_v8, %v2963_v6  ;;  %v2966_v11 = vpop.f32.mrb[14].mxu0  ;;  %v4118_v12 = vadd.f32 %v3036_v9, %v3035_v7  ;;  %v3038_v13 = vpop.f32.mrb[14].mxu1 }
 0x152   : > { %v2967_v14 = vpop.f32.mrb[15].mxu0  ;;  %v3039_v15 = vpop.f32.mrb[15].mxu1 }
 0x153   : > { %v2968_v17 = vadd.f32 %v2967_v14, %v2966_v11  ;;  %v4152_v18 = vadd.f32 %v3039_v15, %v3038_v13 }
 0x157   : > { %v2969_v19 = vpop.f32.mrb[16].mxu0  ;;  %v3057_v20 = vpop.f32.mrb[16].mxu1 }
 0x158   : > { %v2970_v21 = vpop.f32.mrb[17].mxu0  ;;  %v3058_v22 = vpop.f32.mrb[17].mxu1 }
 0x159   : > { %v2971_v23 = vadd.f32 %v2970_v21, %v2969_v19  ;;  %v3059_v24 = vadd.f32 %v3058_v22, %v3057_v20  ;;  %v2972_v25 = vpop.f32.mrb[18].mxu0  ;;  %v3060_v26 = vpop.f32.mrb[18].mxu1 }
 0x15a   : > { %v2973_v27 = vpop.f32.mrb[19].mxu0  ;;  %v3061_v28 = vpop.f32.mrb[19].mxu1 }
 0x15b   : > { %v4155_v29 = vadd.f32 %v3059_v24, %v4091_v38  ;;  %v2974_v30 = vadd.f32 %v2973_v27, %v2972_v25  ;;  %v3062_v31 = vadd.f32 %v3061_v28, %v3060_v26 }
 0x15d   : > { %v4158_v32 = vadd.f32 %v3062_v31, %v4095_v44 }
 0x15f   : > { %v2975_v33 = vpop.f32.mrb[20].mxu0  ;;  %v3063_v34 = vpop.f32.mrb[20].mxu1 }
 0x160   : > { %v2976_v35 = vpop.f32.mrb[21].mxu0  ;;  %v3064_v36 = vpop.f32.mrb[21].mxu1 }
 0x161   : > { %v2977_v37 = vadd.f32 %v2976_v35, %v2975_v33  ;;  %v3065_v39 = vadd.f32 %v3064_v36, %v3063_v34  ;;  %v2978_v41 = vpop.f32.mrb[22].mxu0  ;;  %v3066_v42 = vpop.f32.mrb[22].mxu1 }
 0x162   : > { %v2979_v43 = vpop.f32.mrb[23].mxu0  ;;  %v3067_v46 = vpop.f32.mrb[23].mxu1 }
 0x163   : > { %v4161_v47 = vadd.f32 %v3065_v39, %v4100_v50  ;;  %v2980_v38 = vadd.f32 %v2979_v43, %v2978_v41  ;;  %v3068_v48 = vadd.f32 %v3067_v46, %v3066_v42 }
 0x165   : > { %v4164_v49 = vadd.f32 %v3068_v48, %v4104_v56 }
 0x167   : > { %v2981_v44 = vpop.f32.mrb[24].mxu0  ;;  %v3069_v51 = vpop.f32.mrb[24].mxu1 }
 0x168   : > { %v2982_v53 = vpop.f32.mrb[25].mxu0  ;;  %v3070_v54 = vpop.f32.mrb[25].mxu1 }
 0x169   : > { %v2983_v55 = vadd.f32 %v2982_v53, %v2981_v44  ;;  %v3071_v58 = vadd.f32 %v3070_v54, %v3069_v51  ;;  %v2984_v59 = vpop.f32.mrb[26].mxu0  ;;  %v3072_v60 = vpop.f32.mrb[26].mxu1 }
 0x16a   : > { %v2985_v61 = vpop.f32.mrb[27].mxu0  ;;  %v3073_v63 = vpop.f32.mrb[27].mxu1 }
 0x16b   : > { %v4167_v1 = vadd.f32 %v3071_v58, %v4108_v62  ;;  %v2986_v50 = vadd.f32 %v2985_v61, %v2984_v59  ;;  %v3074_v2 = vadd.f32 %v3073_v63, %v3072_v60 }
 0x16d   : > { %v4170_v3 = vadd.f32 %v3074_v2, %v4112_v4 }
 0x16f   : > { %v2987_v56 = vpop.f32.mrb[28].mxu0  ;;  %v3075_v6 = vpop.f32.mrb[28].mxu1 }
 0x170   : > { %v2988_v7 = vpop.f32.mrb[29].mxu0  ;;  %v3076_v8 = vpop.f32.mrb[29].mxu1 }
 0x171   : > { %v2989_v9 = vadd.f32 %v2988_v7, %v2987_v56  ;;  %v3077_v11 = vadd.f32 %v3076_v8, %v3075_v6  ;;  %v2990_v13 = vpop.f32.mrb[30].mxu0  ;;  %v3078_v14 = vpop.f32.mrb[30].mxu1 }
 0x172   : > { %v2991_v15 = vpop.f32.mrb[31].mxu0  ;;  %v3079_v16 = vpop.f32.mrb[31].mxu1 }
 0x173   : > { %v4173_v19 = vadd.f32 %v3077_v11, %v4116_v10  ;;  %v2992_v62 = vadd.f32 %v2991_v15, %v2990_v13  ;;  %v3080_v20 = vadd.f32 %v3079_v16, %v3078_v14 }
 0x175   : > { %v4175_v21 = vadd.f32 %v3080_v20, %v2968_v17 }
 0x177   : > { %v2993_v22 = vpop.f32.mrb[32].mxu0  ;;  %v3081_v4 = vpop.f32.mrb[32].mxu1 }
 0x178   : > { %v2994_v24 = vpop.f32.mrb[33].mxu0  ;;  %v3082_v25 = vpop.f32.mrb[33].mxu1 }
 0x179   : > { %v2995_v26 = vadd.f32 %v2994_v24, %v2993_v22  ;;  %v3083_v27 = vadd.f32 %v3082_v25, %v3081_v4  ;;  %v2996_v28 = vpop.f32.mrb[34].mxu0  ;;  %v3084_v31 = vpop.f32.mrb[34].mxu1 }
 0x17a   : > { %v2997_v33 = vpop.f32.mrb[35].mxu0  ;;  %v3085_v34 = vpop.f32.mrb[35].mxu1 }
 0x17b   : > { %v4177_v35 = vadd.f32 %v3083_v27, %v2971_v23  ;;  %v2998_v36 = vadd.f32 %v2997_v33, %v2996_v28  ;;  %v3086_v39 = vadd.f32 %v3085_v34, %v3084_v31 }
 0x17d   : > { %v4179_v10 = vadd.f32 %v3086_v39, %v2974_v30 }
 0x17f   : > { %v2999_v41 = vpop.f32.mrb[36].mxu0  ;;  %v3087_v42 = vpop.f32.mrb[36].mxu1 }
 0x180   : > { %v3000_v17 = vpop.f32.mrb[37].mxu0  ;;  %v3088_v43 = vpop.f32.mrb[37].mxu1 }
 0x181   : > { %v4181_v46 = vadd.f32 %v3000_v17, %v2999_v41  ;;  %v3089_v48 = vadd.f32 %v3088_v43, %v3087_v42  ;;  %v3002_v44 = vpop.f32.mrb[38].mxu0  ;;  %v3090_v51 = vpop.f32.mrb[38].mxu1 }
 0x182   : > { %v3003_v53 = vpop.f32.mrb[39].mxu0  ;;  %v3091_v54 = vpop.f32.mrb[39].mxu1 }
 0x183   : > { %v4183_v58 = vadd.f32 %v3089_v48, %v2977_v37  ;;  %v3004_v59 = vadd.f32 %v3003_v53, %v3002_v44  ;;  %v3092_v23 = vadd.f32 %v3091_v54, %v3090_v51 }
 0x185   : > { %v4185_v60 = vadd.f32 %v3092_v23, %v2980_v38 }
 0x187   : > { %v3005_v61 = vpop.f32.mrb[40].mxu0  ;;  %v3093_v30 = vpop.f32.mrb[40].mxu1 }
 0x188   : > { %v3006_v63 = vpop.f32.mrb[41].mxu0  ;;  %v3094_v2 = vpop.f32.mrb[41].mxu1 }
 0x189   : > { %v4187_v56 = vadd.f32 %v3006_v63, %v3005_v61  ;;  %v3095_v6 = vadd.f32 %v3094_v2, %v3093_v30  ;;  %v3008_v7 = vpop.f32.mrb[42].mxu0  ;;  %v3096_v8 = vpop.f32.mrb[42].mxu1 }
 0x18a   : > { %v3009_v11 = vpop.f32.mrb[43].mxu0  ;;  %v3097_v13 = vpop.f32.mrb[43].mxu1 }
 0x18b   : > { %v4189_v14 = vadd.f32 %v3095_v6, %v2983_v55  ;;  %v4191_v15 = vadd.f32 %v3009_v11, %v3008_v7  ;;  %v3098_v37 = vadd.f32 %v3097_v13, %v3096_v8 }
 0x18d   : > { %v4193_v16 = vadd.f32 %v3098_v37, %v2986_v50 }
 0x18f   : > { %v3011_v38 = vpop.f32.mrb[44].mxu0  ;;  %v3099_v20 = vpop.f32.mrb[44].mxu1 }
 0x190   : > { %v3012_v22 = vpop.f32.mrb[45].mxu0  ;;  %v3100_v4 = vpop.f32.mrb[45].mxu1 }
 0x191   : > { %v4195_v24 = vadd.f32 %v3012_v22, %v3011_v38  ;;  %v3101_v25 = vadd.f32 %v3100_v4, %v3099_v20  ;;  %v3014_v27 = vpop.f32.mrb[46].mxu0  ;;  %v3102_v28 = vpop.f32.mrb[46].mxu1 }
 0x192   : > { %v3015_v31 = vpop.f32.mrb[47].mxu0  ;;  %v3103_v33 = vpop.f32.mrb[47].mxu1 }
 0x193   : > { %v4197_v34 = vadd.f32 %v3101_v25, %v2989_v9  ;;  %v4199_v55 = vadd.f32 %v3015_v31, %v3014_v27  ;;  %v3104_v39 = vadd.f32 %v3103_v33, %v3102_v28 }
 0x195   : > { %v4201_v41 = vadd.f32 %v3104_v39, %v2992_v62 }
 0x197   : > { %v3105_v50 = vpop.f32.mrb[48].mxu1  ;;  %v3169_v42 = vpop.f32.mrb[48].mxu0 }
 0x198   : > { %v3106_v17 = vpop.f32.mrb[49].mxu1  ;;  %v3170_v43 = vpop.f32.mrb[49].mxu0 }
 0x199   : > { %v3107_v48 = vadd.f32 %v3106_v17, %v3105_v50  ;;  %v3171_v44 = vadd.f32 %v3170_v43, %v3169_v42  ;;  %v3108_v51 = vpop.f32.mrb[50].mxu1  ;;  %v3172_v53 = vpop.f32.mrb[50].mxu0 }
 0x19a   : > { %v3109_v54 = vpop.f32.mrb[51].mxu1  ;;  %v3173_v23 = vpop.f32.mrb[51].mxu0 }
 0x19b   : > { %v4203_v61 = vadd.f32 %v3107_v48, %v2995_v26  ;;  %v3110_v30 = vadd.f32 %v3109_v54, %v3108_v51  ;;  %v3174_v9 = vadd.f32 %v3173_v23, %v3172_v53  ;;  %v4206_v63 = vadd.f32 %v3171_v44, %v4155_v29 }
 0x19d   : > { %v4208_v2 = vadd.f32 %v3110_v30, %v2998_v36  ;;  %v4211_v62 = vadd.f32 %v3174_v9, %v4158_v32 }
 0x19f   : > { %v3111_v6 = vpop.f32.mrb[52].mxu1  ;;  %v3175_v7 = vpop.f32.mrb[52].mxu0 }
 0x1a0   : > { %v3112_v8 = vpop.f32.mrb[53].mxu1  ;;  %v3176_v11 = vpop.f32.mrb[53].mxu0 }
 0x1a1   : > { %v3113_v13 = vadd.f32 %v3112_v8, %v3111_v6  ;;  %v3177_v37 = vadd.f32 %v3176_v11, %v3175_v7  ;;  %v3114_v38 = vpop.f32.mrb[54].mxu1  ;;  %v3178_v20 = vpop.f32.mrb[54].mxu0 }
 0x1a2   : > { %v3115_v26 = vpop.f32.mrb[55].mxu1  ;;  %v3179_v22 = vpop.f32.mrb[55].mxu0 }
 0x1a3   : > { %v4214_v4 = vadd.f32 %v3113_v13, %v4181_v46  ;;  %v3116_v29 = vadd.f32 %v3115_v26, %v3114_v38  ;;  %v3180_v25 = vadd.f32 %v3179_v22, %v3178_v20  ;;  %v4217_v36 = vadd.f32 %v3177_v37, %v4161_v47 }
 0x1a5   : > { %v4219_v32 = vadd.f32 %v3116_v29, %v3004_v59  ;;  %v4222_v27 = vadd.f32 %v3180_v25, %v4164_v49 }
 0x1a7   : > { %v3117_v28 = vpop.f32.mrb[56].mxu1  ;;  %v3181_v31 = vpop.f32.mrb[56].mxu0 }
 0x1a8   : > { %v3118_v33 = vpop.f32.mrb[57].mxu1  ;;  %v3182_v39 = vpop.f32.mrb[57].mxu0 }
 0x1a9   : > { %v3119_v50 = vadd.f32 %v3118_v33, %v3117_v28  ;;  %v3183_v42 = vadd.f32 %v3182_v39, %v3181_v31  ;;  %v3120_v17 = vpop.f32.mrb[58].mxu1  ;;  %v3184_v43 = vpop.f32.mrb[58].mxu0 }
 0x1aa   : > { %v3121_v46 = vpop.f32.mrb[59].mxu1  ;;  %v3185_v48 = vpop.f32.mrb[59].mxu0 }
 0x1ab   : > { %v4225_v44 = vadd.f32 %v3119_v50, %v4187_v56  ;;  %v3122_v47 = vadd.f32 %v3121_v46, %v3120_v17  ;;  %v3186_v51 = vadd.f32 %v3185_v48, %v3184_v43  ;;  %v4228_v59 = vadd.f32 %v3183_v42, %v4167_v1 }
 0x1ad   : > { %v4231_v49 = vadd.f32 %v3122_v47, %v4191_v15  ;;  %v4234_v53 = vadd.f32 %v3186_v51, %v4170_v3 }
 0x1af   : > { %v3123_v54 = vpop.f32.mrb[60].mxu1  ;;  %v3187_v23 = vpop.f32.mrb[60].mxu0 }
 0x1b0   : > { %v3124_v30 = vpop.f32.mrb[61].mxu1  ;;  %v3188_v9 = vpop.f32.mrb[61].mxu0 }
 0x1b1   : > { %v3125_v6 = vadd.f32 %v3124_v30, %v3123_v54  ;;  %v3189_v7 = vadd.f32 %v3188_v9, %v3187_v23  ;;  %v3126_v8 = vpop.f32.mrb[62].mxu1  ;;  %v3190_v56 = vpop.f32.mrb[62].mxu0 }
 0x1b2   : > { %v3127_v11 = vpop.f32.mrb[63].mxu1  ;;  %v3191_v13 = vpop.f32.mrb[63].mxu0 }
 0x1b3   : > { %v4237_v37 = vadd.f32 %v3125_v6, %v4195_v24  ;;  %v3128_v1 = vadd.f32 %v3127_v11, %v3126_v8  ;;  %v3192_v38 = vadd.f32 %v3191_v13, %v3190_v56  ;;  %v4240_v15 = vadd.f32 %v3189_v7, %v4173_v19 }
 0x1b5   : > { %v4243_v3 = vadd.f32 %v3128_v1, %v4199_v55  ;;  %v4246_v20 = vadd.f32 %v3192_v38, %v4175_v21 }
 0x1b7   : > { %v3129_v26 = vpop.f32.mrb[64].mxu1  ;;  %v3193_v22 = vpop.f32.mrb[64].mxu0 }
 0x1b8   : > { %v3130_v29 = vpop.f32.mrb[65].mxu1  ;;  %v3194_v25 = vpop.f32.mrb[65].mxu0 }
 0x1b9   : > { %v3131_v28 = vadd.f32 %v3130_v29, %v3129_v26  ;;  %v3195_v31 = vadd.f32 %v3194_v25, %v3193_v22  ;;  %v3132_v33 = vpop.f32.mrb[66].mxu1  ;;  %v3196_v24 = vpop.f32.mrb[66].mxu0 }
 0x1ba   : > { %v3133_v39 = vpop.f32.mrb[67].mxu1  ;;  %v3197_v50 = vpop.f32.mrb[67].mxu0 }
 0x1bb   : > { %v4249_v42 = vadd.f32 %v3131_v28, %v4093_v40  ;;  %v3134_v19 = vadd.f32 %v3133_v39, %v3132_v33  ;;  %v3198_v17 = vadd.f32 %v3197_v50, %v3196_v24  ;;  %v4252_v55 = vadd.f32 %v3195_v31, %v4177_v35 }
 0x1bd   : > { %v4255_v21 = vadd.f32 %v3134_v19, %v4097_v45  ;;  %v4258_v43 = vadd.f32 %v3198_v17, %v4179_v10 }
 0x1bf   : > { %v3135_v46 = vpop.f32.mrb[68].mxu1  ;;  %v3199_v48 = vpop.f32.mrb[68].mxu0 }
 0x1c0   : > { %v3136_v47 = vpop.f32.mrb[69].mxu1  ;;  %v3200_v51 = vpop.f32.mrb[69].mxu0 }
 0x1c1   : > { %v3137_v54 = vadd.f32 %v3136_v47, %v3135_v46  ;;  %v3201_v23 = vadd.f32 %v3200_v51, %v3199_v48  ;;  %v3138_v30 = vpop.f32.mrb[70].mxu1  ;;  %v3202_v40 = vpop.f32.mrb[70].mxu0 }
 0x1c2   : > { %v3139_v9 = vpop.f32.mrb[71].mxu1  ;;  %v3203_v6 = vpop.f32.mrb[71].mxu0 }
 0x1c3   : > { %v4261_v7 = vadd.f32 %v3137_v54, %v4102_v52  ;;  %v3140_v35 = vadd.f32 %v3139_v9, %v3138_v30  ;;  %v3204_v8 = vadd.f32 %v3203_v6, %v3202_v40  ;;  %v4264_v45 = vadd.f32 %v3201_v23, %v4183_v58  ;;  %v360_v6 = vld [vmem:[#allocation2 + $0x10] sm:$0xff] }
 0x1c5   : > { %v4267_v10 = vadd.f32 %v3140_v35, %v4106_v57  ;;  %v4270_v56 = vadd.f32 %v3204_v8, %v4185_v60 }
 0x1c7   : > { %v3141_v11 = vpop.f32.mrb[72].mxu1  ;;  %v3205_v13 = vpop.f32.mrb[72].mxu0 }
 0x1c8   : > { %v3142_v1 = vpop.f32.mrb[73].mxu1  ;;  %v3206_v38 = vpop.f32.mrb[73].mxu0 }
 0x1c9   : > { %v3143_v26 = vadd.f32 %v3142_v1, %v3141_v11  ;;  %v3207_v22 = vadd.f32 %v3206_v38, %v3205_v13  ;;  %v3144_v29 = vpop.f32.mrb[74].mxu1  ;;  %v3208_v52 = vpop.f32.mrb[74].mxu0  ;;  %v358_v13 = vld [vmem:[#allocation2] sm:$0xff] }
 0x1ca   : > { %v3145_v25 = vpop.f32.mrb[75].mxu1  ;;  %v3209_v28 = vpop.f32.mrb[75].mxu0 }
 0x1cb   : > { %v4273_v31 = vadd.f32 %v3143_v26, %v4110_v0  ;;  %v3146_v58 = vadd.f32 %v3145_v25, %v3144_v29  ;;  %v3210_v33 = vadd.f32 %v3209_v28, %v3208_v52  ;;  %v4276_v57 = vadd.f32 %v3207_v22, %v4189_v14 }
 0x1cd   : > { %v4279_v60 = vadd.f32 %v3146_v58, %v4114_v5  ;;  %v4282_v24 = vadd.f32 %v3210_v33, %v4193_v16 }
 0x1cf   : > { %v3147_v39 = vpop.f32.mrb[76].mxu1  ;;  %v3211_v50 = vpop.f32.mrb[76].mxu0 }
 0x1d0   : > { %v3148_v19 = vpop.f32.mrb[77].mxu1  ;;  %v3212_v17 = vpop.f32.mrb[77].mxu0 }
 0x1d1   : > { %v3149_v46 = vadd.f32 %v3148_v19, %v3147_v39  ;;  %v3213_v48 = vadd.f32 %v3212_v17, %v3211_v50  ;;  %v3150_v47 = vpop.f32.mrb[78].mxu1  ;;  %v3214_v0 = vpop.f32.mrb[78].mxu0  ;;  %v364_v19 = vld [vmem:[#allocation2 + $0x30] sm:$0xff] }
 0x1d2   : > { %v3151_v51 = vpop.f32.mrb[79].mxu1  ;;  %v3215_v54 = vpop.f32.mrb[79].mxu0 }
 0x1d3   : > { %v4285_v23 = vadd.f32 %v3149_v46, %v4118_v12  ;;  %v3152_v14 = vadd.f32 %v3151_v51, %v3150_v47  ;;  %v3216_v30 = vadd.f32 %v3215_v54, %v3214_v0  ;;  %v4288_v5 = vadd.f32 %v3213_v48, %v4197_v34  ;;  %v361_v34 = vld [vmem:[#allocation2 + $0x18] sm:$0xff]  ;;  %v362_v46 = vld [vmem:[#allocation2 + $0x20] sm:$0xff] }
 0x1d4   : > { %v4311_v47 = vld [vmem:[#allocation3] ss:$0 sm:$0xff] }
 0x1d5   : > { %v4291_v16 = vadd.f32 %v3152_v14, %v4152_v18  ;;  %v4294_v40 = vadd.f32 %v3216_v30, %v4201_v41  ;;  %v359_v41 = vld [vmem:[#allocation2 + $0x8] sm:$0xff] }
 0x1d7   : > { %v3217_v9 = vpop.f32.mrb[80].mxu0  ;;  %v3289_v35 = vpop.f32.mrb[80].mxu1 }
 0x1d8   : > { %v2053_v8 = vadd.f32 %v3289_v35, %v4217_v36  ;;  %v3218_v11 = vpop.f32.mrb[81].mxu0  ;;  %v2044_v12 = vpop.f32.mrb[81].mxu1  ;;  %v363_v35 = vld [vmem:[#allocation2 + $0x28] sm:$0xff] }
 0x1d9   : > { %v3219_v1 = vadd.f32 %v3218_v11, %v3217_v9  ;;  %v2045_v38 = vadd.f32 %v2044_v12, %v4206_v63  ;;  %v3220_v26 = vpop.f32.mrb[82].mxu0  ;;  %v3290_v22 = vpop.f32.mrb[82].mxu1 }
 0x1da   : > { %v2173_v29 = vadd.f32 %v2053_v8, %v360_v6  ;;  %v2056_v18 = vadd.f32 %v3290_v22, %v4222_v27  ;;  %v3221_v52 = vpop.f32.mrb[83].mxu0  ;;  %v2047_v25 = vpop.f32.mrb[83].mxu1 }
 0x1db   : > { %v2171_v28 = vadd.f32 %v2045_v38, %v358_v13  ;;  %v3222_v58 = vadd.f32 %v3221_v52, %v3220_v26  ;;  %v2048_v33 = vadd.f32 %v2047_v25, %v4211_v62  ;;  %v4301_v36 = vadd.f32 %v3219_v1, %v4203_v61 }
 0x1dc   : > { %2205 = vst.msk [vmem:[#allocation2 + $0x10] sm:$0xff] %vm325_vm0, %v2173_v29  ;;  %v2174_v39 = vadd.f32 %v2056_v18, %v361_v34 }
 0x1dd   : > { %2203 = vst.msk [vmem:[#allocation2] sm:$0xff] %vm325_vm0, %v2171_v28  ;;  %v2172_v63 = vadd.f32 %v2048_v33, %v359_v41  ;;  %v4306_v50 = vadd.f32 %v3222_v58, %v4208_v2  ;;  %v365_v2 = vld [vmem:[#allocation2 + $0x38] sm:$0xff]  ;;  %v368_v58 = vld [vmem:[#allocation2 + $0x50] sm:$0xff] }
 0x1de   : > { %2206 = vst.msk [vmem:[#allocation2 + $0x18] sm:$0xff] %vm325_vm0, %v2174_v39 }
 0x1df   : > { %2204 = vst.msk [vmem:[#allocation2 + $0x8] sm:$0xff] %vm325_vm0, %v2172_v63  ;;  %v3223_v27 = vpop.f32.mrb[84].mxu0  ;;  %v3293_v17 = vpop.f32.mrb[84].mxu1 }
 0x1e0   : > { %v2069_v62 = vadd.f32 %v3293_v17, %v4240_v15  ;;  %v3224_v61 = vpop.f32.mrb[85].mxu0  ;;  %v2060_v48 = vpop.f32.mrb[85].mxu1  ;;  %v4315_v15 = vld [vmem:[#allocation5] ss:$0 sm:$0xff] }
 0x1e1   : > { %v3225_v0 = vadd.f32 %v3224_v61, %v3223_v27  ;;  %v2061_v51 = vadd.f32 %v2060_v48, %v4228_v59  ;;  %v3226_v54 = vpop.f32.mrb[86].mxu0  ;;  %v3294_v14 = vpop.f32.mrb[86].mxu1 }
 0x1e2   : > { %v2177_v30 = vadd.f32 %v2069_v62, %v364_v19  ;;  %v2072_v9 = vadd.f32 %v3294_v14, %v4246_v20  ;;  %v3227_v6 = vpop.f32.mrb[87].mxu0  ;;  %v2063_v8 = vpop.f32.mrb[87].mxu1  ;;  %v366_v19 = vld [vmem:[#allocation2 + $0x40] sm:$0xff] }
 0x1e3   : > { %v2240_v11 = vld [vmem:[#allocation2 + $0x10] sm:$0xff]  ;;  %v2175_v13 = vadd.f32 %v2061_v51, %v362_v46  ;;  %v3228_v12 = vadd.f32 %v3227_v6, %v3226_v54  ;;  %v2064_v1 = vadd.f32 %v2063_v8, %v4234_v53  ;;  %v4319_v38 = vadd.f32 %v3225_v0, %v4214_v4  ;;  %v369_v51 = vld [vmem:[#allocation2 + $0x58] sm:$0xff] }
 0x1e4   : > { %v2279_v59 = vmul.f32 %v4311_v47, %v2240_v11  ;;  %v2238_v26 = vld [vmem:[#allocation2] sm:$0xff]  ;;  %2209 = vst.msk [vmem:[#allocation2 + $0x30] sm:$0xff] %vm325_vm0, %v2177_v30  ;;  %v2178_v20 = vadd.f32 %v2072_v9, %v365_v2 }
 0x1e5   : > { %v2277_v34 = vmul.f32 %v4311_v47, %v2238_v26  ;;  %v2241_v22 = vld [vmem:[#allocation2 + $0x18] sm:$0xff]  ;;  %2207 = vst.msk [vmem:[#allocation2 + $0x20] sm:$0xff] %vm325_vm0, %v2175_v13  ;;  %v2176_v29 = vadd.f32 %v2064_v1, %v363_v35  ;;  %v4326_v18 = vadd.f32 %v3228_v12, %v4219_v32  ;;  %v367_v1 = vld [vmem:[#allocation2 + $0x48] sm:$0xff] }
 0x1e6   : > { %v2318_v53 = vadd.f32 %v4315_v15, %v2279_v59  ;;  %v2280_v4 = vmul.f32 %v4311_v47, %v2241_v22  ;;  %v2239_v52 = vld [vmem:[#allocation2 + $0x8] sm:$0xff]  ;;  %2210 = vst.msk [vmem:[#allocation2 + $0x38] sm:$0xff] %vm325_vm0, %v2178_v20 }
 0x1e7   : > { %v2316_v41 = vadd.f32 %v4315_v15, %v2277_v34  ;;  %v2278_v25 = vmul.f32 %v4311_v47, %v2239_v52  ;;  %2208 = vst.msk [vmem:[#allocation2 + $0x28] sm:$0xff] %vm325_vm0, %v2176_v29  ;;  %v3229_v28 = vpop.f32.mrb[88].mxu0  ;;  %v3297_v33 = vpop.f32.mrb[88].mxu1 }
 0x1e8   : > { %v2350_v39 = vmax.f32 %v2318_v53, 0.0  ;;  %v2319_v32 = vadd.f32 %v4315_v15, %v2280_v4  ;;  %v2085_v63 = vadd.f32 %v3297_v33, %v4264_v45  ;;  %v3230_v27 = vpop.f32.mrb[89].mxu0  ;;  %v2076_v17 = vpop.f32.mrb[89].mxu1  ;;  %v372_v33 = vld [vmem:[#allocation2 + $0x70] sm:$0xff] }
 0x1e9   : > { %v2348_v62 = vmax.f32 %v2316_v41, 0.0  ;;  %v2317_v61 = vadd.f32 %v4315_v15, %v2278_v25  ;;  %v3231_v46 = vadd.f32 %v3230_v27, %v3229_v28  ;;  %v2077_v48 = vadd.f32 %v2076_v17, %v4252_v55  ;;  %v3232_v0 = vpop.f32.mrb[90].mxu0  ;;  %v3298_v54 = vpop.f32.mrb[90].mxu1 }
 0x1ea   : > { %v2899_v2 = vpack.c.bf16 %v2350_v39, %v2350_v39  ;;  %v2351_v45 = vmax.f32 %v2319_v32, 0.0  ;;  %v2181_v14 = vadd.f32 %v2085_v63, %v368_v58  ;;  %v2088_v30 = vadd.f32 %v3298_v54, %v4270_v56  ;;  %v3233_v9 = vpop.f32.mrb[91].mxu0  ;;  %v2079_v6 = vpop.f32.mrb[91].mxu1 }
 0x1eb   : > { %v2897_v35 = vpack.c.bf16 %v2348_v62, %v2348_v62  ;;  %v2349_v8 = vmax.f32 %v2317_v61, 0.0  ;;  %v2244_v11 = vld [vmem:[#allocation2 + $0x30] sm:$0xff]  ;;  %v2179_v13 = vadd.f32 %v2077_v48, %v366_v19  ;;  %v3234_v12 = vadd.f32 %v3233_v9, %v3232_v0  ;;  %v370_v19 = vld [vmem:[#allocation2 + $0x60] sm:$0xff] }
 0x1ec   : > { %2511 = vst.msk [vmem:[%s4340_s29 + $0x8] sm:$0xf] %vm2508_vm1, %v2899_v2  ;;  %v2900_v55 = vpack.c.bf16 %v2351_v45, %v2351_v45  ;;  %v2283_v59 = vmul.f32 %v4311_v47, %v2244_v11  ;;  %v2242_v26 = vld [vmem:[#allocation2 + $0x20] sm:$0xff]  ;;  %v2182_v56 = vadd.f32 %v2088_v30, %v369_v51  ;;  %v2080_v20 = vadd.f32 %v2079_v6, %v4258_v43  ;;  %v373_v51 = vld [vmem:[#allocation2 + $0x78] sm:$0xff] }
 0x1ed   : > { %2213 = vst.msk [vmem:[#allocation2 + $0x50] sm:$0xff] %vm325_vm0, %v2181_v14  ;;  %v2898_v34 = vpack.c.bf16 %v2349_v8, %v2349_v8  ;;  %v2281_v22 = vmul.f32 %v4311_v47, %v2242_v26  ;;  %v2245_v29 = vld [vmem:[#allocation2 + $0x38] sm:$0xff]  ;;  %2211 = vst.msk [vmem:[#allocation2 + $0x40] sm:$0xff] %vm325_vm0, %v2179_v13  ;;  %v4355_v53 = vadd.f32 %v3231_v46, %v4225_v44 }
 0x1ee   : > { %2509 = vst.msk [vmem:[%s4340_s29] sm:$0xf] %vm2508_vm1, %v2897_v35  ;;  %v4358_v4 = vadd.f32 %v3234_v12, %v4231_v49  ;;  %2512 = vst.msk [vmem:[%s4340_s29 + $0xc] sm:$0xf] %vm2508_vm1, %v2900_v55  ;;  %v2322_v52 = vadd.f32 %v4315_v15, %v2283_v59  ;;  %v2284_v43 = vmul.f32 %v4311_v47, %v2245_v29  ;;  %v2243_v41 = vld [vmem:[#allocation2 + $0x28] sm:$0xff] }
 0x1ef   : > { %2214 = vst.msk [vmem:[#allocation2 + $0x58] sm:$0xff] %vm325_vm0, %v2182_v56  ;;  %v2180_v25 = vadd.f32 %v2080_v20, %v367_v1  ;;  %v2320_v28 = vadd.f32 %v4315_v15, %v2281_v22  ;;  %v2282_v44 = vmul.f32 %v4311_v47, %v2243_v41  ;;  %v3235_v58 = vpop.f32.mrb[92].mxu0  ;;  %v3301_v49 = vpop.f32.mrb[92].mxu1  ;;  %v371_v12 = vld [vmem:[#allocation2 + $0x68] sm:$0xff] }
 0x1f0   : > { %2510 = vst.msk [vmem:[%s4340_s29 + $0x4] sm:$0xf] %vm2508_vm1, %v2898_v34  ;;  %v2354_v39 = vmax.f32 %v2322_v52, 0.0  ;;  %v2323_v32 = vadd.f32 %v4315_v15, %v2284_v43  ;;  %v2101_v63 = vadd.f32 %v3301_v49, %v4288_v5  ;;  %v3236_v27 = vpop.f32.mrb[93].mxu0  ;;  %v2092_v17 = vpop.f32.mrb[93].mxu1 }
 0x1f1   : > { %2212 = vst.msk [vmem:[#allocation2 + $0x48] sm:$0xff] %vm325_vm0, %v2180_v25  ;;  %v2352_v62 = vmax.f32 %v2320_v28, 0.0  ;;  %v2321_v61 = vadd.f32 %v4315_v15, %v2282_v44  ;;  %v3237_v46 = vadd.f32 %v3236_v27, %v3235_v58  ;;  %v2093_v48 = vadd.f32 %v2092_v17, %v4276_v57  ;;  %v3238_v0 = vpop.f32.mrb[94].mxu0  ;;  %v3302_v54 = vpop.f32.mrb[94].mxu1 }
 0x1f2   : > { %v2903_v2 = vpack.c.bf16 %v2354_v39, %v2354_v39  ;;  %v2355_v45 = vmax.f32 %v2323_v32, 0.0  ;;  %v2185_v14 = vadd.f32 %v2101_v63, %v372_v33  ;;  %v2104_v30 = vadd.f32 %v3302_v54, %v4294_v40  ;;  %v3239_v5 = vpop.f32.mrb[95].mxu0  ;;  %v2095_v9 = vpop.f32.mrb[95].mxu1  ;;  %v374_v39 = vld [vmem:[#allocation2 + $0x80] sm:$0xff] }
 0x1f3   : > { %v2901_v6 = vpack.c.bf16 %v2352_v62, %v2352_v62  ;;  %v2353_v35 = vmax.f32 %v2321_v61, 0.0  ;;  %v2183_v11 = vadd.f32 %v2093_v48, %v370_v19  ;;  %v3240_v13 = vadd.f32 %v3239_v5, %v3238_v0 }
 0x1f4   : > { %v2248_v8 = vld [vmem:[#allocation2 + $0x50] sm:$0xff]  ;;  %2515 = vst.msk [vmem:[%s4340_s29 + $0x18] sm:$0xf] %vm2508_vm1, %v2903_v2  ;;  %v2904_v57 = vpack.c.bf16 %v2355_v45, %v2355_v45  ;;  %v2246_v55 = vld [vmem:[#allocation2 + $0x40] sm:$0xff]  ;;  %v2186_v40 = vadd.f32 %v2104_v30, %v373_v51  ;;  %v2096_v59 = vadd.f32 %v2095_v9, %v4282_v24  ;;  %v4385_v34 = vadd.f32 %v3237_v46, %v4237_v37  ;;  %v377_v51 = vld [vmem:[#allocation2 + $0x98] sm:$0xff] }
 0x1f5   : > { %v2287_v1 = vmul.f32 %v4311_v47, %v2248_v8  ;;  %2217 = vst.msk [vmem:[#allocation2 + $0x70] sm:$0xff] %vm325_vm0, %v2185_v14  ;;  %v2902_v26 = vpack.c.bf16 %v2353_v35, %v2353_v35  ;;  %v2285_v56 = vmul.f32 %v4311_v47, %v2246_v55  ;;  %2215 = vst.msk [vmem:[#allocation2 + $0x60] sm:$0xff] %vm325_vm0, %v2183_v11  ;;  %v376_v37 = vld [vmem:[#allocation2 + $0x90] sm:$0xff] }
 0x1f6   : > { %2513 = vst.msk [vmem:[%s4340_s29 + $0x10] sm:$0xf] %vm2508_vm1, %v2901_v6  ;;  %v2249_v20 = vld [vmem:[#allocation2 + $0x58] sm:$0xff]  ;;  %v4388_v22 = vadd.f32 %v3240_v13, %v4243_v3  ;;  %2516 = vst.msk [vmem:[%s4340_s29 + $0x1c] sm:$0xf] %vm2508_vm1, %v2904_v57  ;;  %v2184_v52 = vadd.f32 %v2096_v59, %v371_v12 }
 0x1f7   : > { %v2326_v29 = vadd.f32 %v4315_v15, %v2287_v1  ;;  %v2288_v24 = vmul.f32 %v4311_v47, %v2249_v20  ;;  %2218 = vst.msk [vmem:[#allocation2 + $0x78] sm:$0xff] %vm325_vm0, %v2186_v40  ;;  %v2324_v43 = vadd.f32 %v4315_v15, %v2285_v56  ;;  %v3241_v25 = vpop.f32.mrb[96].mxu0  ;;  %v3305_v28 = vpop.f32.mrb[96].mxu1 }
 0x1f8   : > { %2514 = vst.msk [vmem:[%s4340_s29 + $0x14] sm:$0xf] %vm2508_vm1, %v2902_v26  ;;  %v2247_v41 = vld [vmem:[#allocation2 + $0x48] sm:$0xff]  ;;  %v2117_v33 = vadd.f32 %v3305_v28, %v4319_v38  ;;  %v3242_v49 = vpop.f32.mrb[97].mxu0  ;;  %v2108_v32 = vpop.f32.mrb[97].mxu1 }
 0x1f9   : > { %v2358_v44 = vmax.f32 %v2326_v29, 0.0  ;;  %v2327_v3 = vadd.f32 %v4315_v15, %v2288_v24  ;;  %v2286_v58 = vmul.f32 %v4311_v47, %v2247_v41  ;;  %2216 = vst.msk [vmem:[#allocation2 + $0x68] sm:$0xff] %vm325_vm0, %v2184_v52  ;;  %v2356_v63 = vmax.f32 %v2324_v43, 0.0  ;;  %v3244_v17 = vpop.f32.mrb[98].mxu0  ;;  %v3306_v62 = vpop.f32.mrb[98].mxu1  ;;  %v380_v29 = vld [vmem:[#allocation2 + $0xb0] sm:$0xff] }
 0x1fa   : > { %v3243_v27 = vadd.f32 %v3242_v49, %v3241_v25  ;;  %v2109_v19 = vadd.f32 %v2108_v32, %v4301_v36  ;;  %v2189_v0 = vadd.f32 %v2117_v33, %v376_v37  ;;  %v3245_v54 = vpop.f32.mrb[99].mxu0  ;;  %v2111_v2 = vpop.f32.mrb[99].mxu1  ;;  %v2120_v30 = vadd.f32 %v3306_v62, %v4326_v18  ;;  %v375_v36 = vld [vmem:[#allocation2 + $0x88] sm:$0xff]  ;;  %v378_v25 = vld [vmem:[#allocation2 + $0xa0] sm:$0xff] }
 0x1fb   : > { %v2907_v61 = vpack.c.bf16 %v2358_v44, %v2358_v44  ;;  %v2359_v46 = vmax.f32 %v2327_v3, 0.0  ;;  %v2325_v48 = vadd.f32 %v4315_v15, %v2286_v58  ;;  %v2905_v38 = vpack.c.bf16 %v2356_v63, %v2356_v63 }
 0x1fc   : > { %v2252_v45 = vld [vmem:[#allocation2 + $0x70] sm:$0xff]  ;;  %v2187_v14 = vadd.f32 %v2109_v19, %v374_v39  ;;  %v3246_v5 = vadd.f32 %v3245_v54, %v3244_v17  ;;  %v2250_v8 = vld [vmem:[#allocation2 + $0x60] sm:$0xff]  ;;  %2221 = vst.msk [vmem:[#allocation2 + $0x90] sm:$0xff] %vm325_vm0, %v2189_v0  ;;  %v2112_v11 = vadd.f32 %v2111_v2, %v4306_v50  ;;  %v2190_v18 = vadd.f32 %v2120_v30, %v377_v51 }
 0x1fd   : > { %2519 = vst.msk [vmem:[%s4340_s29 + $0x28] sm:$0xf] %vm2508_vm1, %v2907_v61  ;;  %v2908_v9 = vpack.c.bf16 %v2359_v46, %v2359_v46  ;;  %v2357_v6 = vmax.f32 %v2325_v48, 0.0  ;;  %v2291_v35 = vmul.f32 %v4311_v47, %v2252_v45  ;;  %2517 = vst.msk [vmem:[%s4340_s29 + $0x20] sm:$0xf] %vm2508_vm1, %v2905_v38  ;;  %v2289_v13 = vmul.f32 %v4311_v47, %v2250_v8 }
 0x1fe   : > { %v2253_v12 = vld [vmem:[#allocation2 + $0x78] sm:$0xff]  ;;  %2219 = vst.msk [vmem:[#allocation2 + $0x80] sm:$0xff] %vm325_vm0, %v2187_v14  ;;  %v4415_v57 = vadd.f32 %v3243_v27, %v4249_v42  ;;  %v4418_v1 = vadd.f32 %v3246_v5, %v4255_v21  ;;  %v2188_v59 = vadd.f32 %v2112_v11, %v375_v36  ;;  %2222 = vst.msk [vmem:[#allocation2 + $0x98] sm:$0xff] %vm325_vm0, %v2190_v18 }
 0x1ff   : > { %2520 = vst.msk [vmem:[%s4340_s29 + $0x2c] sm:$0xf] %vm2508_vm1, %v2908_v9  ;;  %v2906_v55 = vpack.c.bf16 %v2357_v6, %v2357_v6  ;;  %v2330_v50 = vadd.f32 %v4315_v15, %v2291_v35  ;;  %v2292_v40 = vmul.f32 %v4311_v47, %v2253_v12  ;;  %v2328_v26 = vadd.f32 %v4315_v15, %v2289_v13  ;;  %v3247_v20 = vpop.f32.mrb[100].mxu0  ;;  %v3309_v42 = vpop.f32.mrb[100].mxu1  ;;  %v381_v27 = vld [vmem:[#allocation2 + $0xb8] sm:$0xff]  ;;  %v384_v13 = vld [vmem:[#allocation2 + $0xd0] sm:$0xff] }
 0x200   : > { %v2251_v56 = vld [vmem:[#allocation2 + $0x68] sm:$0xff]  ;;  %2220 = vst.msk [vmem:[#allocation2 + $0x88] sm:$0xff] %vm325_vm0, %v2188_v59  ;;  %v2133_v43 = vadd.f32 %v3309_v42, %v4385_v34  ;;  %v3248_v41 = vpop.f32.mrb[101].mxu0  ;;  %v2124_v37 = vpop.f32.mrb[101].mxu1  ;;  %v385_v42 = vld [vmem:[#allocation2 + $0xd8] sm:$0xff] }
 0x201   : > { %2518 = vst.msk [vmem:[%s4340_s29 + $0x24] sm:$0xf] %vm2508_vm1, %v2906_v55  ;;  %v2362_v21 = vmax.f32 %v2330_v50, 0.0  ;;  %v2331_v24 = vadd.f32 %v4315_v15, %v2292_v40  ;;  %v2290_v52 = vmul.f32 %v4311_v47, %v2251_v56  ;;  %v2360_v28 = vmax.f32 %v2328_v26, 0.0  ;;  %v3250_v58 = vpop.f32.mrb[102].mxu0  ;;  %v3310_v33 = vpop.f32.mrb[102].mxu1 }
 0x202   : > { %v3249_v44 = vadd.f32 %v3248_v41, %v3247_v20  ;;  %v2125_v3 = vadd.f32 %v2124_v37, %v4355_v53  ;;  %v2193_v63 = vadd.f32 %v2133_v43, %v380_v29  ;;  %v3251_v19 = vpop.f32.mrb[103].mxu0  ;;  %v2127_v17 = vpop.f32.mrb[103].mxu1  ;;  %v2136_v46 = vadd.f32 %v3310_v33, %v4388_v22  ;;  %v379_v53 = vld [vmem:[#allocation2 + $0xa8] sm:$0xff]  ;;  %v382_v50 = vld [vmem:[#allocation2 + $0xc0] sm:$0xff] }
 0x203   : > { %v2911_v49 = vpack.c.bf16 %v2362_v21, %v2362_v21  ;;  %v2363_v39 = vmax.f32 %v2331_v24, 0.0  ;;  %v2329_v32 = vadd.f32 %v4315_v15, %v2290_v52  ;;  %v2909_v34 = vpack.c.bf16 %v2360_v28, %v2360_v28  ;;  %v2256_v62 = vld [vmem:[#allocation2 + $0x90] sm:$0xff] }
 0x204   : > { %v2191_v61 = vadd.f32 %v2125_v3, %v378_v25  ;;  %v3252_v48 = vadd.f32 %v3251_v19, %v3250_v58  ;;  %v2295_v54 = vmul.f32 %v4311_v47, %v2256_v62  ;;  %2225 = vst.msk [vmem:[#allocation2 + $0xb0] sm:$0xff] %vm325_vm0, %v2193_v63  ;;  %v2128_v38 = vadd.f32 %v2127_v17, %v4358_v4 }
 0x205   : > { %2523 = vst.msk [vmem:[%s4340_s29 + $0x38] sm:$0xf] %vm2508_vm1, %v2911_v49  ;;  %v2912_v0 = vpack.c.bf16 %v2363_v39, %v2363_v39  ;;  %v2361_v51 = vmax.f32 %v2329_v32, 0.0  ;;  %v2254_v2 = vld [vmem:[#allocation2 + $0x80] sm:$0xff]  ;;  %2521 = vst.msk [vmem:[%s4340_s29 + $0x30] sm:$0xf] %vm2508_vm1, %v2909_v34  ;;  %v2194_v22 = vadd.f32 %v2136_v46, %v381_v27  ;;  %v1988_v14 = vadd.f32 %v3249_v44, %v4261_v7 }
 0x206   : > { %v2293_v45 = vmul.f32 %v4311_v47, %v2254_v2  ;;  %2223 = vst.msk [vmem:[#allocation2 + $0xa0] sm:$0xff] %vm325_vm0, %v2191_v61  ;;  %v1991_v30 = vadd.f32 %v3252_v48, %v4267_v10  ;;  %v2334_v36 = vadd.f32 %v4315_v15, %v2295_v54  ;;  %v2257_v9 = vld [vmem:[#allocation2 + $0x98] sm:$0xff]  ;;  %v2192_v6 = vadd.f32 %v2128_v38, %v379_v53  ;;  %v383_v49 = vld [vmem:[#allocation2 + $0xc8] sm:$0xff] }
 0x207   : > { %2524 = vst.msk [vmem:[%s4340_s29 + $0x3c] sm:$0xf] %vm2508_vm1, %v2912_v0  ;;  %v2910_v5 = vpack.c.bf16 %v2361_v51, %v2361_v51  ;;  %v2296_v35 = vmul.f32 %v4311_v47, %v2257_v9  ;;  %v2255_v8 = vld [vmem:[#allocation2 + $0x88] sm:$0xff]  ;;  %v3253_v11 = vpop.f32.mrb[104].mxu0  ;;  %v3313_v12 = vpop.f32.mrb[104].mxu1 }
 0x208   : > { %v2332_v4 = vadd.f32 %v4315_v15, %v2293_v45  ;;  %2226 = vst.msk [vmem:[#allocation2 + $0xb8] sm:$0xff] %vm325_vm0, %v2194_v22  ;;  %v2366_v7 = vmax.f32 %v2334_v36, 0.0  ;;  %v2294_v10 = vmul.f32 %v4311_v47, %v2255_v8  ;;  %2224 = vst.msk [vmem:[#allocation2 + $0xa8] sm:$0xff] %vm325_vm0, %v2192_v6  ;;  %v2149_v18 = vadd.f32 %v3313_v12, %v1988_v14  ;;  %v3254_v55 = vpop.f32.mrb[105].mxu0  ;;  %v2140_v40 = vpop.f32.mrb[105].mxu1  ;;  %v386_v45 = vld [vmem:[#allocation2 + $0xe0] sm:$0xff] }
 0x209   : > { %2522 = vst.msk [vmem:[%s4340_s29 + $0x34] sm:$0xf] %vm2508_vm1, %v2910_v5  ;;  %v2335_v26 = vadd.f32 %v4315_v15, %v2296_v35  ;;  %v3255_v56 = vadd.f32 %v3254_v55, %v3253_v11  ;;  %v2141_v20 = vadd.f32 %v2140_v40, %v4415_v57  ;;  %v3256_v29 = vpop.f32.mrb[106].mxu0  ;;  %v3314_v21 = vpop.f32.mrb[106].mxu1 }
 0x20a   : > { %v2364_v59 = vmax.f32 %v2332_v4, 0.0  ;;  %v2915_v24 = vpack.c.bf16 %v2366_v7, %v2366_v7  ;;  %v2333_v52 = vadd.f32 %v4315_v15, %v2294_v10  ;;  %v2197_v43 = vadd.f32 %v2149_v18, %v384_v13  ;;  %v3257_v25 = vpop.f32.mrb[107].mxu0  ;;  %v2143_v37 = vpop.f32.mrb[107].mxu1 }
 0x20b   : > { %v2152_v41 = vadd.f32 %v3314_v21, %v1991_v30  ;;  %v2367_v44 = vmax.f32 %v2335_v26, 0.0  ;;  %v2260_v3 = vld [vmem:[#allocation2 + $0xb0] sm:$0xff]  ;;  %v2195_v58 = vadd.f32 %v2141_v20, %v382_v50  ;;  %v3258_v33 = vadd.f32 %v3257_v25, %v3256_v29 }
 0x20c   : > { %v2913_v28 = vpack.c.bf16 %v2364_v59, %v2364_v59  ;;  %2527 = vst.msk [vmem:[%s4340_s29 + $0x48] sm:$0xf] %vm2508_vm1, %v2915_v24  ;;  %v2365_v57 = vmax.f32 %v2333_v52, 0.0  ;;  %v2299_v39 = vmul.f32 %v4311_v47, %v2260_v3  ;;  %v2144_v27 = vadd.f32 %v2143_v37, %v4418_v1  ;;  %v388_v59 = vld [vmem:[#allocation2 + $0xf0] sm:$0xff] }
 0x20d   : > { %v2258_v32 = vld [vmem:[#allocation2 + $0xa0] sm:$0xff]  ;;  %2229 = vst.msk [vmem:[#allocation2 + $0xd0] sm:$0xff] %vm325_vm0, %v2197_v43  ;;  %v2198_v63 = vadd.f32 %v2152_v41, %v385_v42  ;;  %v2916_v19 = vpack.c.bf16 %v2367_v44, %v2367_v44  ;;  %2227 = vst.msk [vmem:[#allocation2 + $0xc0] sm:$0xff] %vm325_vm0, %v2195_v58  ;;  %v1996_v34 = vadd.f32 %v3255_v56, %v4273_v31  ;;  %v387_v56 = vld [vmem:[#allocation2 + $0xe8] sm:$0xff] }
 0x20e   : > { %2525 = vst.msk [vmem:[%s4340_s29 + $0x40] sm:$0xf] %vm2508_vm1, %v2913_v28  ;;  %v2297_v17 = vmul.f32 %v4311_v47, %v2258_v32  ;;  %v1999_v62 = vadd.f32 %v3258_v33, %v4279_v60  ;;  %v2914_v61 = vpack.c.bf16 %v2365_v57, %v2365_v57  ;;  %v2338_v46 = vadd.f32 %v4315_v15, %v2299_v39  ;;  %v389_v44 = vld [vmem:[#allocation2 + $0xf8] sm:$0xff] }
 0x20f   : > { %v2261_v48 = vld [vmem:[#allocation2 + $0xb8] sm:$0xff]  ;;  %2230 = vst.msk [vmem:[#allocation2 + $0xd8] sm:$0xff] %vm325_vm0, %v2198_v63  ;;  %v2196_v53 = vadd.f32 %v2144_v27, %v383_v49  ;;  %v2259_v51 = vld [vmem:[#allocation2 + $0xa8] sm:$0xff]  ;;  %v3259_v54 = vpop.f32.mrb[108].mxu0  ;;  %v3317_v2 = vpop.f32.mrb[108].mxu1 }
 0x210   : > { %2528 = vst.msk [vmem:[%s4340_s29 + $0x4c] sm:$0xf] %vm2508_vm1, %v2916_v19  ;;  %v2336_v1 = vadd.f32 %v4315_v15, %v2297_v17  ;;  %v2300_v0 = vmul.f32 %v4311_v47, %v2261_v48  ;;  %2526 = vst.msk [vmem:[%s4340_s29 + $0x44] sm:$0xf] %vm2508_vm1, %v2914_v61  ;;  %v2370_v31 = vmax.f32 %v2338_v46, 0.0  ;;  %v2298_v60 = vmul.f32 %v4311_v47, %v2259_v51  ;;  %v3260_v38 = vpop.f32.mrb[109].mxu0 }
 0x211   : > { %2228 = vst.msk [vmem:[#allocation2 + $0xc8] sm:$0xff] %vm325_vm0, %v2196_v53  ;;  %v2156_v22 = vpop.f32.mrb[109].mxu1  ;;  %v3261_v5 = vadd.f32 %v3260_v38, %v3259_v54  ;;  %v3262_v9 = vpop.f32.mrb[110].mxu0 }
 0x212   : > { %v2368_v14 = vmax.f32 %v2336_v1, 0.0  ;;  %v2339_v30 = vadd.f32 %v4315_v15, %v2300_v0  ;;  %v2157_v36 = vadd.f32 %v2156_v22, %v1996_v34  ;;  %v3318_v6 = vpop.f32.mrb[110].mxu1  ;;  %v2919_v4 = vpack.c.bf16 %v2370_v31, %v2370_v31  ;;  %v3263_v8 = vpop.f32.mrb[111].mxu0 }
 0x213   : > { %v2337_v35 = vadd.f32 %v4315_v15, %v2298_v60  ;;  %v2159_v11 = vpop.f32.mrb[111].mxu1  ;;  %v2004_v10 = vadd.f32 %v3261_v5, %v4285_v23  ;;  %v3264_v26 = vadd.f32 %v3263_v8, %v3262_v9 }
 0x214   : > { %v2917_v13 = vpack.c.bf16 %v2368_v14, %v2368_v14  ;;  %v2371_v12 = vmax.f32 %v2339_v30, 0.0  ;;  %v2264_v7 = vld [vmem:[#allocation2 + $0xd0] sm:$0xff]  ;;  %v2199_v18 = vadd.f32 %v2157_v36, %v386_v45  ;;  %2531 = vst.msk [vmem:[%s4340_s29 + $0x58] sm:$0xf] %vm2508_vm1, %v2919_v4  ;;  %v2262_v40 = vld [vmem:[#allocation2 + $0xc0] sm:$0xff]  ;;  %v2160_v20 = vadd.f32 %v2159_v11, %v1999_v62 }
 0x215   : > { %v2369_v55 = vmax.f32 %v2337_v35, 0.0  ;;  %v2303_v50 = vmul.f32 %v4311_v47, %v2264_v7  ;;  %v2301_v42 = vmul.f32 %v4311_v47, %v2262_v40  ;;  %v2165_v23 = vadd.f32 %v3317_v2, %v2004_v10 }
 0x216   : > { %2529 = vst.msk [vmem:[%s4340_s29 + $0x50] sm:$0xf] %vm2508_vm1, %v2917_v13  ;;  %v2920_v29 = vpack.c.bf16 %v2371_v12, %v2371_v12  ;;  %v2265_v21 = vld [vmem:[#allocation2 + $0xd8] sm:$0xff]  ;;  %v2007_v41 = vadd.f32 %v3264_v26, %v4291_v16  ;;  %v2200_v3 = vadd.f32 %v2160_v20, %v387_v56 }
 0x217   : > { %2231 = vst.msk [vmem:[#allocation2 + $0xe0] sm:$0xff] %vm325_vm0, %v2199_v18  ;;  %v2918_v24 = vpack.c.bf16 %v2369_v55, %v2369_v55  ;;  %v2342_v52 = vadd.f32 %v4315_v15, %v2303_v50  ;;  %v2304_v43 = vmul.f32 %v4311_v47, %v2265_v21  ;;  %v2340_v25 = vadd.f32 %v4315_v15, %v2301_v42 }
 0x218   : > { %2532 = vst.msk [vmem:[%s4340_s29 + $0x5c] sm:$0xf] %vm2508_vm1, %v2920_v29  ;;  %v2263_v37 = vld [vmem:[#allocation2 + $0xc8] sm:$0xff]  ;;  %v2201_v28 = vadd.f32 %v2165_v23, %v388_v59  ;;  %v2168_v57 = vadd.f32 %v3318_v6, %v2007_v41 }
 0x219   : > { %2530 = vst.msk [vmem:[%s4340_s29 + $0x54] sm:$0xf] %vm2508_vm1, %v2918_v24  ;;  %v2374_v58 = vmax.f32 %v2342_v52, 0.0  ;;  %v2343_v33 = vadd.f32 %v4315_v15, %v2304_v43  ;;  %v2302_v49 = vmul.f32 %v4311_v47, %v2263_v37  ;;  %v2372_v16 = vmax.f32 %v2340_v25, 0.0 }
 0x21a   : > { %2233 = vst.msk [vmem:[#allocation2 + $0xf0] sm:$0xff] %vm325_vm0, %v2201_v28  ;;  %2232 = vst.msk [vmem:[#allocation2 + $0xe8] sm:$0xff] %vm325_vm0, %v2200_v3  ;;  %v2202_v27 = vadd.f32 %v2168_v57, %v389_v44 }
 0x21b   : > { %v2923_v39 = vpack.c.bf16 %v2374_v58, %v2374_v58  ;;  %v2375_v32 = vmax.f32 %v2343_v33, 0.0  ;;  %v2341_v63 = vadd.f32 %v4315_v15, %v2302_v49  ;;  %v2921_v19 = vpack.c.bf16 %v2372_v16, %v2372_v16 }
 0x21c   : > { %2234 = vst.msk [vmem:[#allocation2 + $0xf8] sm:$0xff] %vm325_vm0, %v2202_v27 }
 0x21d   : > { %2535 = vst.msk [vmem:[%s4340_s29 + $0x68] sm:$0xf] %vm2508_vm1, %v2923_v39  ;;  %v2924_v17 = vpack.c.bf16 %v2375_v32, %v2375_v32  ;;  %v2373_v34 = vmax.f32 %v2341_v63, 0.0  ;;  %2533 = vst.msk [vmem:[%s4340_s29 + $0x60] sm:$0xf] %vm2508_vm1, %v2921_v19 }
 0x21e   : > { %v2266_v62 = vld [vmem:[#allocation2 + $0xe0] sm:$0xff] }
 0x21f   : > { %v2305_v61 = vmul.f32 %v4311_v47, %v2266_v62  ;;  %2536 = vst.msk [vmem:[%s4340_s29 + $0x6c] sm:$0xf] %vm2508_vm1, %v2924_v17  ;;  %v2922_v46 = vpack.c.bf16 %v2373_v34, %v2373_v34 }
 0x221   : > { %v2344_v48 = vadd.f32 %v4315_v15, %v2305_v61  ;;  %2534 = vst.msk [vmem:[%s4340_s29 + $0x64] sm:$0xf] %vm2508_vm1, %v2922_v46  ;;  %v2268_v53 = vld [vmem:[#allocation2 + $0xf0] sm:$0xff]  ;;  %v2267_v1 = vld [vmem:[#allocation2 + $0xe8] sm:$0xff] }
 0x222   : > { %v2307_v0 = vmul.f32 %v4311_v47, %v2268_v53  ;;  %v2306_v54 = vmul.f32 %v4311_v47, %v2267_v1 }
 0x223   : > { %v2376_v51 = vmax.f32 %v2344_v48, 0.0  ;;  %v2269_v60 = vld [vmem:[#allocation2 + $0xf8] sm:$0xff] }
 0x224   : > { %v2346_v2 = vadd.f32 %v4315_v15, %v2307_v0  ;;  %v2345_v38 = vadd.f32 %v4315_v15, %v2306_v54  ;;  %v2308_v45 = vmul.f32 %v4311_v47, %v2269_v60 }
 0x225   : > { %v2925_v31 = vpack.c.bf16 %v2376_v51, %v2376_v51 }
 0x226   : > { %v2378_v22 = vmax.f32 %v2346_v2, 0.0  ;;  %v2377_v14 = vmax.f32 %v2345_v38, 0.0  ;;  %v2347_v30 = vadd.f32 %v4315_v15, %v2308_v45 }
 0x227   : > { %2537 = vst.msk [vmem:[%s4340_s29 + $0x70] sm:$0xf] %vm2508_vm1, %v2925_v31 }
 0x228   : > { %v2927_v5 = vpack.c.bf16 %v2378_v22, %v2378_v22  ;;  %v2926_v36 = vpack.c.bf16 %v2377_v14, %v2377_v14  ;;  %v2379_v9 = vmax.f32 %v2347_v30, 0.0 }
 0x22a   : > { %2539 = vst.msk [vmem:[%s4340_s29 + $0x78] sm:$0xf] %vm2508_vm1, %v2927_v5  ;;  %2538 = vst.msk [vmem:[%s4340_s29 + $0x74] sm:$0xf] %vm2508_vm1, %v2926_v36  ;;  %v2928_v6 = vpack.c.bf16 %v2379_v9, %v2379_v9 }
 0x22c   : > { %2540 = vst.msk [vmem:[%s4340_s29 + $0x7c] sm:$0xf] %vm2508_vm1, %v2928_v6 }
 0x22d PF: > { %s16_s17 = sadd.s32 1, %s3678_s17   ;;  %s4550_s15 = smov %s3674_s16 }
 0x22e   : > { %p13_p9 = scmp.ge.s32.totalorder %s16_s17, 4   ;;  %s4551_s16 = smov %s4553_s19 }
 0x230   :  { %15 = sbr.rel (!%p13_p9) target bundleno = 3 (0x3), region = 88 }
 0x237   :  { %2569 = vsyncpa [#allocation4], 1 }
 0x238   :  { %2571 = vsyncpa [#allocation4 + $0x1], 1 }
 0x239   :  { %2572 = vsyncpa [#allocation6], 1 }

// kernel: segmentnet_forward.17
= control target key start
LH: loop header
LB: loop body
LE: loop exit
PB: predicated region body
PF: predicated region fallthrough
CT: control target
= control target key end

     0   :  { %9 = vsyncpa [#allocation4], 0  ;;  %s2568_s0 = inlined_call_operand.vmem [shape: bf16[128,800], index: 0, kind: input, shape index: {}]   ;;  %s2569_s1 = inlined_call_operand.vmem [shape: bf16[800,64], index: 1, kind: input, shape index: {}]   ;;  %s2570_s2 = inlined_call_operand.hbm [shape: f32[1,64], index: 2, kind: input, shape index: {}]   ;;  %s2571_s3 = inlined_call_operand.hbm [shape: f32[1,64], index: 3, kind: input, shape index: {}]   ;;  %s2572_s4 = inlined_call_operand.vmem [shape: bf16[128,64], index: 4, kind: output, shape index: {}]  }
   0x1   :  { %10 = vsyncpa [#allocation6], 0  ;;  %s2004_s15 = smov [#allocation3]   ;;  %s2005_s17 = smov [#allocation5]  }
   0x2   :  { %s21_s16 = sshll.u32 %s2004_s15, 4  ;;  %s31_s18 = sshll.u32 %s2005_s17, 4  ;;  %s22_s16 = int_to_ptr.vmem [resolvable:$true] %s21_s16  ;;  %s32_s18 = int_to_ptr.vmem [resolvable:$true] %s31_s18 }
   0x3   :  { %s1956_s21 = scalar_lea.hbm %s2570_s2, 16 }
   0x4   :  { %p1957_p0 = scmp.ne.s32.totalorder %s2570_s2, %s1956_s21  ;;  %p1960_p1 = scmp.lt.u32.totalorder %s1956_s21, %s2570_s2 }
   0x6   :  { %p1962_p2 = pnand %p1960_p1, %p1957_p0 }
   0x8   :  { %1965 = shalt.err (!%p1962_p2)
}
   0x9   :  { %s1966_s26 = scalar_lea.vmem %s22_s16, 16  ;;  %s1970_s27 = scalar_lea.vmem %s22_s16, 32 }
   0xa   :  { %p1967_p3 = scmp.ne.s32.totalorder %s22_s16, %s1966_s26  ;;  %p1971_p4 = scmp.lt.s32.totalorder %s22_s16, %s22_s16 }
   0xb   :  { %p1972_p5 = scmp.lt.s32.totalorder %s1970_s27, %s1966_s26 }
   0xd   :  { %p1973_p6 = por %p1972_p5, %p1971_p4 }
   0xf   :  { %p1974_p7 = pnand %p1973_p6, %p1967_p3 }
  0x11   :  { %1977 = shalt.err (!%p1974_p7)
}
  0x12   :  { %24 = dma.hbm_to_vmem [thread:$0]  %s2570_s2, 16, %s22_s16, [#allocation4]  }
  0x13   :  { %s1978_s6 = scalar_lea.hbm %s2571_s3, 16 }
  0x14   :  { %p1979_p8 = scmp.ne.s32.totalorder %s2571_s3, %s1978_s6  ;;  %p1982_p9 = scmp.lt.u32.totalorder %s1978_s6, %s2571_s3 }
  0x16   :  { %p1984_p10 = pnand %p1982_p9, %p1979_p8 }
  0x18   :  { %1987 = shalt.err (!%p1984_p10)
}
  0x19   :  { %s1988_s11 = scalar_lea.vmem %s32_s18, 16  ;;  %s1992_s12 = scalar_lea.vmem %s32_s18, 32 }
  0x1a   :  { %p1989_p11 = scmp.ne.s32.totalorder %s32_s18, %s1988_s11  ;;  %p1993_p12 = scmp.lt.s32.totalorder %s32_s18, %s32_s18 }
  0x1b   :  { %p1994_p13 = scmp.lt.s32.totalorder %s1992_s12, %s1988_s11 }
  0x1d   :  { %p1995_p0 = por %p1994_p13, %p1993_p12 }
  0x1f   :  { %p1996_p1 = pnand %p1995_p0, %p1989_p11 }
  0x21   :  { %1999 = shalt.err (!%p1996_p1)
}
  0x22   :  { %34 = dma.hbm_to_vmem [thread:$0]  %s2571_s3, 16, %s32_s18, [#allocation6]  }
  0x23   :  { %2000 = dma.done.wait [#allocation4], 16  }
  0x24   :  { %2001 = vsyncadd [#allocation4], 4294967280 }
  0x25   :  { %2002 = dma.done.wait [#allocation6], 16  }
  0x26   :  { %2003 = vsyncadd [#allocation6], 4294967280  ;;  %v1826_v0 = vld [vmem:[%s2569_s1 + $0x40] sm:$0xff]   ;;  %v1830_v4 = vld [vmem:[%s2569_s1 + $0x48] sm:$0xff]   ;;  %vm823_vm0 = vcmask 261120   ;;  %vm46_vm1 = vcmask 523264  }
  0x27   :  { %v1827_v1 = vld [vmem:[%s2569_s1 + $0xc0] sm:$0xff]   ;;  %1585 = vmatprep.subr.bf16.mxu0 %v1826_v0  ;;  %v1831_v5 = vld [vmem:[%s2569_s1 + $0xc8] sm:$0xff]   ;;  %v1834_v8 = vld [vmem:[%s2569_s1 + $0x50] sm:$0xff]   ;;  %vm1414_vm2 = vcmask 519168  }
  0x28   :  { %v1828_v2 = vld [vmem:[%s2569_s1] sm:$0xff]   ;;  %1649 = vmatprep.subr.bf16.mxu1 %v1827_v1  ;;  %v1832_v6 = vld [vmem:[%s2569_s1 + $0x8] sm:$0xff]   ;;  %v1835_v9 = vld [vmem:[%s2569_s1 + $0xd0] sm:$0xff]  }
  0x29   :  { %v1829_v3 = vld [vmem:[%s2569_s1 + $0x80] sm:$0xff]   ;;  %1586 = vmatpush3.bf16.msra.mxu0 %v1828_v2  ;;  %v1833_v7 = vld [vmem:[%s2569_s1 + $0x88] sm:$0xff]   ;;  %v1836_v10 = vld [vmem:[%s2569_s1 + $0x10] sm:$0xff]  }
  0x2a   :  { %1650 = vmatpush3.bf16.msra.mxu1 %v1829_v3  ;;  %1587 = vmatprep.subr.bf16.mxu0 %v1830_v4  ;;  %v1837_v11 = vld [vmem:[%s2569_s1 + $0x90] sm:$0xff]   ;;  %v1838_v12 = vld [vmem:[%s2569_s1 + $0x58] sm:$0xff]   ;;  %v1842_v16 = vld [vmem:[%s2569_s1 + $0x60] sm:$0xff]  }
  0x2b   :  { %1651 = vmatprep.subr.bf16.mxu1 %v1831_v5  ;;  %v1839_v13 = vld [vmem:[%s2569_s1 + $0xd8] sm:$0xff]   ;;  %v1843_v17 = vld [vmem:[%s2569_s1 + $0xe0] sm:$0xff]   ;;  %v1846_v20 = vld [vmem:[%s2569_s1 + $0x68] sm:$0xff]  }
  0x2c   :  { %v1840_v14 = vld [vmem:[%s2569_s1 + $0x18] sm:$0xff]   ;;  %v1844_v18 = vld [vmem:[%s2569_s1 + $0x20] sm:$0xff]   ;;  %v1847_v21 = vld [vmem:[%s2569_s1 + $0xe8] sm:$0xff]  }
  0x2d   :  { %1588 = vmatpush3.bf16.msra.mxu0 %v1832_v6  ;;  %v1841_v15 = vld [vmem:[%s2569_s1 + $0x98] sm:$0xff]   ;;  %v1845_v19 = vld [vmem:[%s2569_s1 + $0xa0] sm:$0xff]   ;;  %v1848_v22 = vld [vmem:[%s2569_s1 + $0x28] sm:$0xff]  }
  0x2e   :  { %1652 = vmatpush3.bf16.msra.mxu1 %v1833_v7  ;;  %1589 = vmatprep.subr.bf16.mxu0 %v1834_v8  ;;  %v1849_v23 = vld [vmem:[%s2569_s1 + $0xa8] sm:$0xff]   ;;  %v1850_v24 = vld [vmem:[%s2569_s1 + $0x70] sm:$0xff]   ;;  %v1854_v28 = vld [vmem:[%s2569_s1 + $0x78] sm:$0xff]  }
  0x2f   :  { %1653 = vmatprep.subr.bf16.mxu1 %v1835_v9  ;;  %v1851_v25 = vld [vmem:[%s2569_s1 + $0xf0] sm:$0xff]   ;;  %v1855_v29 = vld [vmem:[%s2569_s1 + $0xf8] sm:$0xff]   ;;  %v1860_v33 = vld [vmem:[%s2568_s0 + $0x4] ss:$28 sps:$4 sm:$0xff]  }
  0x30   :  { %v1852_v26 = vld [vmem:[%s2569_s1 + $0x30] sm:$0xff]   ;;  %v1856_v30 = vld [vmem:[%s2569_s1 + $0x38] sm:$0xff]   ;;  %v1861_v34 = vld [vmem:[%s2568_s0 + $0x8] ss:$28 sps:$4 sm:$0xff]   ;;  %880 = vmatprep.mubr.bf16.mxu0 %v1860_v33 }
  0x31   :  { %1590 = vmatpush3.bf16.msra.mxu0 %v1836_v10  ;;  %v1853_v27 = vld [vmem:[%s2569_s1 + $0xb0] sm:$0xff]   ;;  %v1857_v31 = vld [vmem:[%s2569_s1 + $0xb8] sm:$0xff]   ;;  %v1863_v35 = vld [vmem:[%s2568_s0 + $0xc] ss:$28 sps:$4 sm:$0xff]  }
  0x32   :  { %1654 = vmatpush3.bf16.msra.mxu1 %v1837_v11  ;;  %1591 = vmatprep.subr.bf16.mxu0 %v1838_v12  ;;  %v1858_v32 = vld [vmem:[%s2568_s0] ss:$28 sps:$4 sm:$0xff]   ;;  %v1870_v40 = vld [vmem:[%s2568_s0 + $0x38] ss:$28 sps:$4 sm:$0xff]   ;;  %v1872_v42 = vld [vmem:[%s2569_s1 + $0x148] sm:$0xff]  }
  0x33   :  { %1655 = vmatprep.subr.bf16.mxu1 %v1839_v13  ;;  %v1864_v36 = vld [vmem:[%s2569_s1 + $0x140] sm:$0xff]   ;;  %977 = vmatprep.mubr.bf16.mxu1 %v1863_v35  ;;  %v1866_v38 = vld [vmem:[%s2568_s0 + $0x3c] ss:$28 sps:$4 sm:$0xff]   ;;  %v1873_v43 = vld [vmem:[%s2569_s1 + $0x108] sm:$0xff]  }
  0x34   :  { %v1865_v37 = vld [vmem:[%s2569_s1 + $0x100] sm:$0xff]   ;;  %v1874_v44 = vld [vmem:[%s2568_s0 + $0x74] ss:$28 sps:$4 sm:$0xff]   ;;  %v1876_v45 = vld [vmem:[%s2568_s0 + $0x7c] ss:$28 sps:$4 sm:$0xff]  }
  0x35   :  { %1592 = vmatpush3.bf16.msra.mxu0 %v1840_v14  ;;  %v1868_v39 = vld [vmem:[%s2568_s0 + $0x44] ss:$28 sps:$4 sm:$0xff]   ;;  %v1880_v46 = vld [vmem:[%s2569_s1 + $0x150] sm:$0xff]   ;;  %v1882_v50 = vld [vmem:[%s2568_s0 + $0xac] ss:$28 sps:$4 sm:$0xff]  }
  0x36   :  { %1656 = vmatpush3.bf16.msra.mxu1 %v1841_v15  ;;  %1593 = vmatprep.subr.bf16.mxu0 %v1842_v16  ;;  %v1871_v41 = vld [vmem:[%s2568_s0 + $0x40] ss:$28 sps:$4 sm:$0xff]   ;;  %v1881_v47 = vld [vmem:[%s2569_s1 + $0x110] sm:$0xff]   ;;  %v1886_v56 = vld [vmem:[%s2568_s0 + $0xa8] ss:$28 sps:$4 sm:$0xff]  }
  0x37   :  { %1657 = vmatprep.subr.bf16.mxu1 %v1843_v17  ;;  %v1878_v48 = vld [vmem:[%s2568_s0 + $0x70] ss:$28 sps:$4 sm:$0xff]   ;;  %v1879_v49 = vld [vmem:[%s2568_s0 + $0x78] ss:$28 sps:$4 sm:$0xff]   ;;  %v1896_v54 = vld [vmem:[%s2569_s1 + $0x160] sm:$0xff]  }
  0x38   :  { %v1884_v51 = vld [vmem:[%s2568_s0 + $0xb4] ss:$28 sps:$4 sm:$0xff]   ;;  %v1888_v52 = vld [vmem:[%s2569_s1 + $0x158] sm:$0xff]   ;;  %v1897_v55 = vld [vmem:[%s2569_s1 + $0x120] sm:$0xff]  }
  0x39   :  { %1594 = vmatpush3.bf16.msra.mxu0 %v1844_v18  ;;  %v1889_v53 = vld [vmem:[%s2569_s1 + $0x118] sm:$0xff]   ;;  %v1887_v57 = vld [vmem:[%s2568_s0 + $0xb0] ss:$28 sps:$4 sm:$0xff]   ;;  %v1890_v58 = vld [vmem:[%s2568_s0 + $0xe4] ss:$28 sps:$4 sm:$0xff]  }
  0x3a   :  { %1658 = vmatpush3.bf16.msra.mxu1 %v1845_v19  ;;  %1595 = vmatprep.subr.bf16.mxu0 %v1846_v20  ;;  %v1892_v59 = vld [vmem:[%s2568_s0 + $0xec] ss:$28 sps:$4 sm:$0xff]   ;;  %v1894_v62 = vld [vmem:[%s2568_s0 + $0xe0] ss:$28 sps:$4 sm:$0xff]   ;;  %v1912_v0 = vld [vmem:[%s2569_s1 + $0x170] sm:$0xff]  }
  0x3b   :  { %1659 = vmatprep.subr.bf16.mxu1 %v1847_v21  ;;  %v1904_v60 = vld [vmem:[%s2569_s1 + $0x168] sm:$0xff]   ;;  %v1913_v1 = vld [vmem:[%s2569_s1 + $0x130] sm:$0xff]   ;;  %v1898_v2 = vld [vmem:[%s2568_s0 + $0x11c] ss:$28 sps:$4 sm:$0xff]  }
  0x3c   :  { %v1905_v61 = vld [vmem:[%s2569_s1 + $0x128] sm:$0xff]   ;;  %v1900_v3 = vld [vmem:[%s2568_s0 + $0x124] ss:$28 sps:$4 sm:$0xff]   ;;  %v1920_v4 = vld [vmem:[%s2569_s1 + $0x178] sm:$0xff]  }
  0x3d   :  { %1596 = vmatpush3.bf16.msra.mxu0 %v1848_v22  ;;  %v1895_v63 = vld [vmem:[%s2568_s0 + $0xe8] ss:$28 sps:$4 sm:$0xff]   ;;  %v1921_v5 = vld [vmem:[%s2569_s1 + $0x138] sm:$0xff]   ;;  %v1906_v9 = vld [vmem:[%s2568_s0 + $0x154] ss:$28 sps:$4 sm:$0xff]  }
  0x3e   :  { %1660 = vmatpush3.bf16.msra.mxu1 %v1849_v23  ;;  %1597 = vmatprep.subr.bf16.mxu0 %v1850_v24  ;;  %v1902_v6 = vld [vmem:[%s2568_s0 + $0x118] ss:$28 sps:$4 sm:$0xff]   ;;  %v1903_v7 = vld [vmem:[%s2568_s0 + $0x120] ss:$28 sps:$4 sm:$0xff]   ;;  %v1910_v11 = vld [vmem:[%s2568_s0 + $0x150] ss:$28 sps:$4 sm:$0xff]  }
  0x3f   :  { %1661 = vmatprep.subr.bf16.mxu1 %v1851_v25  ;;  %v1928_v8 = vld [vmem:[%s2569_s1 + $0x180] sm:$0xff]   ;;  %v1908_v10 = vld [vmem:[%s2568_s0 + $0x15c] ss:$28 sps:$4 sm:$0xff]   ;;  %v1914_v13 = vld [vmem:[%s2568_s0 + $0x18c] ss:$28 sps:$4 sm:$0xff]  }
  0x40   :  { %v1911_v12 = vld [vmem:[%s2568_s0 + $0x158] ss:$28 sps:$4 sm:$0xff]   ;;  %v1918_v15 = vld [vmem:[%s2568_s0 + $0x188] ss:$28 sps:$4 sm:$0xff]   ;;  %v1919_v16 = vld [vmem:[%s2568_s0 + $0x190] ss:$28 sps:$4 sm:$0xff]  }
  0x41   :  { %1598 = vmatpush3.bf16.msra.mxu0 %v1852_v26  ;;  %v1916_v14 = vld [vmem:[%s2568_s0 + $0x194] ss:$28 sps:$4 sm:$0xff]   ;;  %v1927_v18 = vld [vmem:[%s2568_s0 + $0x164] ss:$28 sps:$4 sm:$0xff]   ;;  %v1929_v21 = vld [vmem:[%s2568_s0 + $0x4c] ss:$28 sps:$4 sm:$0xff]  }
  0x42   :  { %1662 = vmatpush3.bf16.msra.mxu1 %v1853_v27  ;;  %1599 = vmatprep.subr.bf16.mxu0 %v1854_v28  ;;  %v1924_v17 = vld [vmem:[%s2568_s0 + $0x14] ss:$28 sps:$4 sm:$0xff]   ;;  %v1925_v20 = vld [vmem:[%s2568_s0 + $0x160] ss:$28 sps:$4 sm:$0xff]   ;;  %v1935_v23 = vld [vmem:[%s2569_s1 + $0x188] sm:$0xff]  }
  0x43   :  { %1663 = vmatprep.subr.bf16.mxu1 %v1855_v29  ;;  %v1922_v19 = vld [vmem:[%s2568_s0 + $0x10] ss:$28 sps:$4 sm:$0xff]   ;;  %v1931_v22 = vld [vmem:[%s2568_s0 + $0x19c] ss:$28 sps:$4 sm:$0xff]   ;;  %v1933_v24 = vld [vmem:[%s2568_s0 + $0x48] ss:$28 sps:$4 sm:$0xff]  }
  0x44   :  { %v1934_v25 = vld [vmem:[%s2568_s0 + $0x198] ss:$28 sps:$4 sm:$0xff]   ;;  %v1936_v26 = vld [vmem:[%s2568_s0 + $0x84] ss:$28 sps:$4 sm:$0xff]   ;;  %v1940_v29 = vld [vmem:[%s2568_s0 + $0x50] ss:$28 sps:$4 sm:$0xff]  }
  0x45   :  { %1600 = vmatpush3.bf16.msra.mxu0 %v1856_v30  ;;  %v1938_v27 = vld [vmem:[%s2568_s0 + $0x18] ss:$28 sps:$4 sm:$0xff]   ;;  %v1939_v28 = vld [vmem:[%s2568_s0 + $0x80] ss:$28 sps:$4 sm:$0xff]  }
  0x46   :  { %1664 = vmatpush3.bf16.msra.mxu1 %v1857_v31  ;;  %1713 = vmatprep.subr.bf16.mxu0 %v1864_v36  ;;  %v1941_v30 = vld [vmem:[%s2568_s0 + $0xbc] ss:$28 sps:$4 sm:$0xff]   ;;  %v1943_v31 = vld [vmem:[%s2568_s0 + $0x88] ss:$28 sps:$4 sm:$0xff]  }
  0x47   :  { %1807 = vmatprep.subr.bf16.mxu1 %v1864_v36  ;;  %v1945_v33 = vld [vmem:[%s2568_s0 + $0xc0] ss:$28 sps:$4 sm:$0xff]   ;;  %v1948_v35 = vld [vmem:[%s2568_s0 + $0xf8] ss:$28 sps:$4 sm:$0xff]   ;;  %v1949_v36 = vld [vmem:[%s2568_s0 + $0xf0] ss:$28 sps:$4 sm:$0xff]  }
  0x48   :  { %881 = vmatmul.mubr.bf16.vlgmr.msra.gmra.mrb[0].mxu0 %v1858_v32  ;;  %v1944_v32 = vld [vmem:[%s2568_s0 + $0xb8] ss:$28 sps:$4 sm:$0xff]  }
  0x49   :  { %978 = vmatmul.mubr.bf16.vlgmr.msra.gmra.mrb[0].mxu1 %v1861_v34  ;;  %1714 = vmatpush3.bf16.msra.mxu0 %v1865_v37  ;;  %v1946_v34 = vld [vmem:[%s2568_s0 + $0xf4] ss:$28 sps:$4 sm:$0xff]  }
  0x4a   :  { %1815 = vmatpush3.bf16.msra.mxu1 %v1865_v37  ;;  %888 = vmatprep.mubr.bf16.mxu0 %v1866_v38  ;;  %v1950_v37 = vld [vmem:[%s2568_s0 + $0x130] ss:$28 sps:$4 sm:$0xff]  }
  0x4b   :  { %985 = vmatprep.mubr.bf16.mxu1 %v1868_v39  ;;  %1715 = vmatprep.subr.bf16.mxu0 %v1872_v42  ;;  %v1951_v38 = vld [vmem:[%s2568_s0 + $0x12c] ss:$28 sps:$4 sm:$0xff]  }
  0x4c   :  { %1808 = vmatprep.subr.bf16.mxu1 %v1872_v42  ;;  %v1953_v39 = vld [vmem:[%s2568_s0 + $0x168] ss:$28 sps:$4 sm:$0xff]   ;;  %v2006_v42 = vmov 0.0  }
  0x4d   :  { %1716 = vmatpush3.bf16.msra.mxu0 %v1873_v43  ;;  %49 = vst.msk [vmem:[#allocation2 + $0x10] sm:$0xff] %vm46_vm1, %v2006_v42  ;;  %47 = vst.msk [vmem:[#allocation2] sm:$0xff] %vm46_vm1, %v2006_v42 }
  0x4e   :  { %1816 = vmatpush3.bf16.msra.mxu1 %v1873_v43  ;;  %1717 = vmatprep.subr.bf16.mxu0 %v1880_v46  ;;  %48 = vst.msk [vmem:[#allocation2 + $0x8] sm:$0xff] %vm46_vm1, %v2006_v42  ;;  %50 = vst.msk [vmem:[#allocation2 + $0x18] sm:$0xff] %vm46_vm1, %v2006_v42 }
  0x4f   :  { %1809 = vmatprep.subr.bf16.mxu1 %v1880_v46  ;;  %51 = vst.msk [vmem:[#allocation2 + $0x20] sm:$0xff] %vm46_vm1, %v2006_v42  ;;  %52 = vst.msk [vmem:[#allocation2 + $0x28] sm:$0xff] %vm46_vm1, %v2006_v42 }
  0x50   :  { %889 = vmatmul.mubr.bf16.gmra.mrb[4].mxu0 %v1870_v40  ;;  %v1954_v40 = vld [vmem:[%s2568_s0 + $0x128] ss:$28 sps:$4 sm:$0xff]   ;;  %53 = vst.msk [vmem:[#allocation2 + $0x30] sm:$0xff] %vm46_vm1, %v2006_v42  ;;  %54 = vst.msk [vmem:[#allocation2 + $0x38] sm:$0xff] %vm46_vm1, %v2006_v42 }
  0x51   :  { %986 = vmatmul.mubr.bf16.gmra.mrb[4].mxu1 %v1871_v41  ;;  %896 = vmatprep.mubr.bf16.mxu0 %v1874_v44  ;;  %v1955_v41 = vld [vmem:[%s2568_s0 + $0x1a0] ss:$28 sps:$4 sm:$0xff]   ;;  %55 = vst.msk [vmem:[#allocation2 + $0x40] sm:$0xff] %vm46_vm1, %v2006_v42  ;;  %56 = vst.msk [vmem:[#allocation2 + $0x48] sm:$0xff] %vm46_vm1, %v2006_v42 }
  0x52   :  { %993 = vmatprep.mubr.bf16.mxu1 %v1876_v45  ;;  %1718 = vmatpush3.bf16.msra.mxu0 %v1881_v47  ;;  %57 = vst.msk [vmem:[#allocation2 + $0x50] sm:$0xff] %vm46_vm1, %v2006_v42  ;;  %58 = vst.msk [vmem:[#allocation2 + $0x58] sm:$0xff] %vm46_vm1, %v2006_v42 }
  0x53   :  { %1817 = vmatpush3.bf16.msra.mxu1 %v1881_v47  ;;  %1719 = vmatprep.subr.bf16.mxu0 %v1888_v52  ;;  %59 = vst.msk [vmem:[#allocation2 + $0x60] sm:$0xff] %vm46_vm1, %v2006_v42  ;;  %60 = vst.msk [vmem:[#allocation2 + $0x68] sm:$0xff] %vm46_vm1, %v2006_v42 }
  0x54   :  { %1810 = vmatprep.subr.bf16.mxu1 %v1888_v52  ;;  %61 = vst.msk [vmem:[#allocation2 + $0x70] sm:$0xff] %vm46_vm1, %v2006_v42  ;;  %62 = vst.msk [vmem:[#allocation2 + $0x78] sm:$0xff] %vm46_vm1, %v2006_v42 }
  0x56   :  { %1720 = vmatpush3.bf16.msra.mxu0 %v1889_v53 }
  0x57   :  { %1818 = vmatpush3.bf16.msra.mxu1 %v1889_v53  ;;  %1721 = vmatprep.subr.bf16.mxu0 %v1896_v54 }
  0x58   :  { %897 = vmatmul.mubr.bf16.gmra.mrb[8].mxu0 %v1878_v48  ;;  %1811 = vmatprep.subr.bf16.mxu1 %v1896_v54 }
  0x59   :  { %994 = vmatmul.mubr.bf16.gmra.mrb[8].mxu1 %v1879_v49  ;;  %904 = vmatprep.mubr.bf16.mxu0 %v1882_v50 }
  0x5a   :  { %1001 = vmatprep.mubr.bf16.mxu1 %v1884_v51  ;;  %1722 = vmatpush3.bf16.msra.mxu0 %v1897_v55 }
  0x5b   :  { %1819 = vmatpush3.bf16.msra.mxu1 %v1897_v55  ;;  %1723 = vmatprep.subr.bf16.mxu0 %v1904_v60 }
  0x5c   :  { %1812 = vmatprep.subr.bf16.mxu1 %v1904_v60 }
  0x5e   :  { %1724 = vmatpush3.bf16.msra.mxu0 %v1905_v61 }
  0x5f   :  { %1820 = vmatpush3.bf16.msra.mxu1 %v1905_v61  ;;  %1725 = vmatprep.subr.bf16.mxu0 %v1912_v0 }
  0x60   :  { %905 = vmatmul.mubr.bf16.gmra.mrb[12].mxu0 %v1886_v56  ;;  %1813 = vmatprep.subr.bf16.mxu1 %v1912_v0 }
  0x61   :  { %1002 = vmatmul.mubr.bf16.gmra.mrb[12].mxu1 %v1887_v57  ;;  %912 = vmatprep.mubr.bf16.mxu0 %v1890_v58 }
  0x62   :  { %1009 = vmatprep.mubr.bf16.mxu1 %v1892_v59  ;;  %1726 = vmatpush3.bf16.msra.mxu0 %v1913_v1 }
  0x63   :  { %1821 = vmatpush3.bf16.msra.mxu1 %v1913_v1  ;;  %1727 = vmatprep.subr.bf16.mxu0 %v1920_v4 }
  0x64   :  { %1814 = vmatprep.subr.bf16.mxu1 %v1920_v4 }
  0x66   :  { %1728 = vmatpush3.bf16.msra.mxu0 %v1921_v5 }
  0x67   :  { %1822 = vmatpush3.bf16.msra.mxu1 %v1921_v5 }
  0x68   :  { %913 = vmatmul.mubr.bf16.gmra.mrb[16].mxu0 %v1894_v62  ;;  %1787 = vmatprep.subr.bf16.mxu1 %v1928_v8 }
  0x69   :  { %1010 = vmatmul.mubr.bf16.gmra.mrb[16].mxu1 %v1895_v63  ;;  %920 = vmatprep.mubr.bf16.mxu0 %v1898_v2 }
  0x6a   :  { %1017 = vmatprep.mubr.bf16.mxu1 %v1900_v3 }
  0x70   :  { %921 = vmatmul.mubr.bf16.gmra.mrb[20].mxu0 %v1902_v6 }
  0x71   :  { %1018 = vmatmul.mubr.bf16.gmra.mrb[20].mxu1 %v1903_v7  ;;  %928 = vmatprep.mubr.bf16.mxu0 %v1906_v9 }
  0x72   :  { %1025 = vmatprep.mubr.bf16.mxu1 %v1908_v10 }
  0x78   :  { %929 = vmatmul.mubr.bf16.gmra.mrb[24].mxu0 %v1910_v11 }
  0x79   :  { %1026 = vmatmul.mubr.bf16.gmra.mrb[24].mxu1 %v1911_v12  ;;  %936 = vmatprep.mubr.bf16.mxu0 %v1914_v13 }
  0x7a   :  { %1033 = vmatprep.mubr.bf16.mxu1 %v1916_v14 }
  0x80   :  { %937 = vmatmul.mubr.bf16.gmra.mrb[28].mxu0 %v1918_v15 }
  0x81   :  { %1034 = vmatmul.mubr.bf16.gmra.mrb[28].mxu1 %v1919_v16  ;;  %1074 = vmatprep.mubr.bf16.mxu0 %v1924_v17 }
  0x82   :  { %1122 = vmatprep.mubr.bf16.mxu1 %v1927_v18 }
  0x88   :  { %1075 = vmatmul.mubr.bf16.vlgmr.msra.gmra.mrb[32].mxu0 %v1922_v19 }
  0x89   :  { %1123 = vmatmul.mubr.bf16.vlgmr.msra.gmra.mrb[32].mxu1 %v1925_v20  ;;  %1082 = vmatprep.mubr.bf16.mxu0 %v1929_v21 }
  0x8a   :  { %1788 = vmatpush3.bf16.msra.mxu1 %v1928_v8  ;;  %1130 = vmatprep.mubr.bf16.mxu1 %v1931_v22 }
  0x8b   :  { %1789 = vmatprep.subr.bf16.mxu1 %v1935_v23 }
  0x8e   :  { %1790 = vmatpush3.bf16.msra.mxu1 %v1935_v23 }
  0x90   :  { %1083 = vmatmul.mubr.bf16.gmra.mrb[36].mxu0 %v1933_v24 }
  0x91   :  { %1131 = vmatmul.mubr.bf16.gmra.mrb[36].mxu1 %v1934_v25  ;;  %1090 = vmatprep.mubr.bf16.mxu0 %v1936_v26 }
  0x92   :  { %1791 = vmatprep.mubr.msk.bf16.mxu1 %vm823_vm0, %v1938_v27 }
  0x98   :  { %1091 = vmatmul.mubr.bf16.gmra.mrb[40].mxu0 %v1939_v28 }
  0x99   :  { %1792 = vmatmul.mubr.msk.bf16.vlgmr.msra.gmra.mrb[40].mxu1 %vm823_vm0, %v1940_v29  ;;  %1098 = vmatprep.mubr.bf16.mxu0 %v1941_v30 }
  0x9a   :  { %1795 = vmatprep.mubr.msk.bf16.mxu1 %vm823_vm0, %v1943_v31 }
  0xa0   :  { %1099 = vmatmul.mubr.bf16.gmra.mrb[44].mxu0 %v1944_v32 }
  0xa1   :  { %1796 = vmatmul.mubr.msk.bf16.gmra.mrb[44].mxu1 %vm823_vm0, %v1945_v33  ;;  %1106 = vmatprep.mubr.bf16.mxu0 %v1946_v34 }
  0xa2   :  { %1799 = vmatprep.mubr.msk.bf16.mxu1 %vm823_vm0, %v1948_v35 }
  0xa8   :  { %1107 = vmatmul.mubr.bf16.gmra.mrb[48].mxu0 %v1949_v36 }
  0xa9   :  { %1800 = vmatmul.mubr.msk.bf16.gmra.mrb[48].mxu1 %vm823_vm0, %v1950_v37  ;;  %1114 = vmatprep.mubr.bf16.mxu0 %v1951_v38 }
  0xaa   :  { %1803 = vmatprep.mubr.msk.bf16.mxu1 %vm823_vm0, %v1953_v39 }
  0xb0   :  { %1115 = vmatmul.mubr.bf16.gmra.mrb[52].mxu0 %v1954_v40 }
  0xb1   :  { %1804 = vmatmul.mubr.msk.bf16.gmra.mrb[52].mxu1 %vm823_vm0, %v1955_v41 }
 0x11b   :  { %v1601_v43 = vpop.f32.mrb[0].mxu0 }
 0x11c   :  { %v1665_v44 = vpop.f32.mrb[0].mxu1  ;;  %v1602_v45 = vpop.f32.mrb[1].mxu0 }
 0x11d   :  { %v1603_v46 = vadd.f32 %v1602_v45, %v1601_v43  ;;  %v1666_v47 = vpop.f32.mrb[1].mxu1  ;;  %v1604_v48 = vpop.f32.mrb[2].mxu0 }
 0x11e   :  { %v1667_v49 = vadd.f32 %v1666_v47, %v1665_v44  ;;  %v1668_v50 = vpop.f32.mrb[2].mxu1  ;;  %v1605_v51 = vpop.f32.mrb[3].mxu0 }
 0x11f   :  { %v1606_v52 = vadd.f32 %v1605_v51, %v1604_v48  ;;  %v1669_v53 = vpop.f32.mrb[3].mxu1 }
 0x120   :  { %v2398_v54 = vadd.f32 %v1667_v49, %v1603_v46  ;;  %v1670_v55 = vadd.f32 %v1669_v53, %v1668_v50 }
 0x122   :  { %v2400_v56 = vadd.f32 %v1670_v55, %v1606_v52 }
 0x123   :  { %v1607_v57 = vpop.f32.mrb[4].mxu0 }
 0x124   :  { %v1671_v58 = vpop.f32.mrb[4].mxu1  ;;  %v1608_v59 = vpop.f32.mrb[5].mxu0 }
 0x125   :  { %v1609_v60 = vadd.f32 %v1608_v59, %v1607_v57  ;;  %v1672_v61 = vpop.f32.mrb[5].mxu1  ;;  %v1610_v62 = vpop.f32.mrb[6].mxu0 }
 0x126   :  { %v1673_v63 = vadd.f32 %v1672_v61, %v1671_v58  ;;  %v1674_v0 = vpop.f32.mrb[6].mxu1  ;;  %v1611_v1 = vpop.f32.mrb[7].mxu0 }
 0x127   :  { %v1612_v2 = vadd.f32 %v1611_v1, %v1610_v62  ;;  %v1675_v3 = vpop.f32.mrb[7].mxu1 }
 0x128   :  { %v2402_v4 = vadd.f32 %v1673_v63, %v1609_v60  ;;  %v1676_v5 = vadd.f32 %v1675_v3, %v1674_v0 }
 0x12a   :  { %v2404_v6 = vadd.f32 %v1676_v5, %v1612_v2 }
 0x12b   :  { %v1613_v7 = vpop.f32.mrb[8].mxu0 }
 0x12c   :  { %v1677_v8 = vpop.f32.mrb[8].mxu1  ;;  %v1614_v9 = vpop.f32.mrb[9].mxu0 }
 0x12d   :  { %v1615_v10 = vadd.f32 %v1614_v9, %v1613_v7  ;;  %v1678_v11 = vpop.f32.mrb[9].mxu1  ;;  %v1616_v12 = vpop.f32.mrb[10].mxu0 }
 0x12e   :  { %v1679_v13 = vadd.f32 %v1678_v11, %v1677_v8  ;;  %v1680_v14 = vpop.f32.mrb[10].mxu1  ;;  %v1617_v15 = vpop.f32.mrb[11].mxu0 }
 0x12f   :  { %v1618_v16 = vadd.f32 %v1617_v15, %v1616_v12  ;;  %v1681_v17 = vpop.f32.mrb[11].mxu1 }
 0x130   :  { %v2406_v18 = vadd.f32 %v1679_v13, %v1615_v10  ;;  %v1682_v19 = vadd.f32 %v1681_v17, %v1680_v14 }
 0x132   :  { %v2408_v20 = vadd.f32 %v1682_v19, %v1618_v16 }
 0x133   :  { %v1619_v21 = vpop.f32.mrb[12].mxu0 }
 0x134   :  { %v1683_v22 = vpop.f32.mrb[12].mxu1  ;;  %v1620_v23 = vpop.f32.mrb[13].mxu0 }
 0x135   :  { %v1621_v24 = vadd.f32 %v1620_v23, %v1619_v21  ;;  %v1684_v25 = vpop.f32.mrb[13].mxu1  ;;  %v1622_v26 = vpop.f32.mrb[14].mxu0 }
 0x136   :  { %v1685_v27 = vadd.f32 %v1684_v25, %v1683_v22  ;;  %v1686_v28 = vpop.f32.mrb[14].mxu1  ;;  %v1623_v29 = vpop.f32.mrb[15].mxu0 }
 0x137   :  { %v1624_v30 = vadd.f32 %v1623_v29, %v1622_v26  ;;  %v1687_v31 = vpop.f32.mrb[15].mxu1 }
 0x138   :  { %v2410_v32 = vadd.f32 %v1685_v27, %v1621_v24  ;;  %v1688_v33 = vadd.f32 %v1687_v31, %v1686_v28 }
 0x13a   :  { %v2412_v34 = vadd.f32 %v1688_v33, %v1624_v30 }
 0x13b   :  { %v1625_v35 = vpop.f32.mrb[16].mxu0 }
 0x13c   :  { %v1689_v36 = vpop.f32.mrb[16].mxu1  ;;  %v1626_v37 = vpop.f32.mrb[17].mxu0 }
 0x13d   :  { %v1627_v38 = vadd.f32 %v1626_v37, %v1625_v35  ;;  %v1690_v39 = vpop.f32.mrb[17].mxu1  ;;  %v1628_v40 = vpop.f32.mrb[18].mxu0 }
 0x13e   :  { %v1691_v41 = vadd.f32 %v1690_v39, %v1689_v36  ;;  %v1692_v42 = vpop.f32.mrb[18].mxu1  ;;  %v1629_v43 = vpop.f32.mrb[19].mxu0 }
 0x13f   :  { %v1630_v44 = vadd.f32 %v1629_v43, %v1628_v40  ;;  %v1693_v45 = vpop.f32.mrb[19].mxu1 }
 0x140   :  { %v2414_v46 = vadd.f32 %v1691_v41, %v1627_v38  ;;  %v1694_v47 = vadd.f32 %v1693_v45, %v1692_v42 }
 0x142   :  { %v2416_v48 = vadd.f32 %v1694_v47, %v1630_v44 }
 0x143   :  { %v1631_v49 = vpop.f32.mrb[20].mxu0 }
 0x144   :  { %v1695_v50 = vpop.f32.mrb[20].mxu1  ;;  %v1632_v51 = vpop.f32.mrb[21].mxu0 }
 0x145   :  { %v1633_v52 = vadd.f32 %v1632_v51, %v1631_v49  ;;  %v1696_v53 = vpop.f32.mrb[21].mxu1  ;;  %v1634_v55 = vpop.f32.mrb[22].mxu0 }
 0x146   :  { %v1697_v57 = vadd.f32 %v1696_v53, %v1695_v50  ;;  %v1698_v58 = vpop.f32.mrb[22].mxu1  ;;  %v1635_v59 = vpop.f32.mrb[23].mxu0 }
 0x147   :  { %v1636_v60 = vadd.f32 %v1635_v59, %v1634_v55  ;;  %v1699_v61 = vpop.f32.mrb[23].mxu1 }
 0x148   :  { %v2418_v62 = vadd.f32 %v1697_v57, %v1633_v52  ;;  %v1700_v63 = vadd.f32 %v1699_v61, %v1698_v58 }
 0x14a   :  { %v2420_v0 = vadd.f32 %v1700_v63, %v1636_v60 }
 0x14b   :  { %v1637_v1 = vpop.f32.mrb[24].mxu0 }
 0x14c   :  { %v1701_v2 = vpop.f32.mrb[24].mxu1  ;;  %v1638_v3 = vpop.f32.mrb[25].mxu0 }
 0x14d   :  { %v1639_v5 = vadd.f32 %v1638_v3, %v1637_v1  ;;  %v1702_v7 = vpop.f32.mrb[25].mxu1  ;;  %v1640_v8 = vpop.f32.mrb[26].mxu0 }
 0x14e   :  { %v1703_v9 = vadd.f32 %v1702_v7, %v1701_v2  ;;  %v1704_v10 = vpop.f32.mrb[26].mxu1  ;;  %v1641_v11 = vpop.f32.mrb[27].mxu0 }
 0x14f   :  { %v1642_v12 = vadd.f32 %v1641_v11, %v1640_v8  ;;  %v1705_v13 = vpop.f32.mrb[27].mxu1 }
 0x150   :  { %v1028_v14 = vadd.f32 %v1703_v9, %v1639_v5  ;;  %v1706_v15 = vadd.f32 %v1705_v13, %v1704_v10  ;;  %v65_v10 = vld [vmem:[#allocation2 + $0x10] sm:$0xff] }
 0x152   :  { %v1031_v16 = vadd.f32 %v1706_v15, %v1642_v12  ;;  %v63_v15 = vld [vmem:[#allocation2] sm:$0xff] }
 0x153   :  { %v1643_v17 = vpop.f32.mrb[28].mxu0 }
 0x154   :  { %v1707_v19 = vpop.f32.mrb[28].mxu1  ;;  %v1644_v21 = vpop.f32.mrb[29].mxu0 }
 0x155   :  { %v1645_v22 = vadd.f32 %v1644_v21, %v1643_v17  ;;  %v1708_v23 = vpop.f32.mrb[29].mxu1  ;;  %v1646_v24 = vpop.f32.mrb[30].mxu0  ;;  %v66_v21 = vld [vmem:[#allocation2 + $0x18] sm:$0xff] }
 0x156   :  { %v1709_v25 = vadd.f32 %v1708_v23, %v1707_v19  ;;  %v1710_v26 = vpop.f32.mrb[30].mxu1  ;;  %v1647_v27 = vpop.f32.mrb[31].mxu0 }
 0x157   :  { %v1648_v28 = vadd.f32 %v1647_v27, %v1646_v24  ;;  %v1711_v29 = vpop.f32.mrb[31].mxu1 }
 0x158   :  { %v1036_v30 = vadd.f32 %v1709_v25, %v1645_v22  ;;  %v1712_v31 = vadd.f32 %v1711_v29, %v1710_v26  ;;  %v64_v26 = vld [vmem:[#allocation2 + $0x8] sm:$0xff] }
 0x15a   :  { %v1039_v33 = vadd.f32 %v1712_v31, %v1648_v28 }
 0x15b   :  { %v1729_v35 = vpop.f32.mrb[32].mxu0 }
 0x15c   :  { %v1765_v36 = vpop.f32.mrb[32].mxu1  ;;  %v1730_v37 = vpop.f32.mrb[33].mxu0 }
 0x15d   :  { %v1731_v38 = vadd.f32 %v1730_v37, %v1729_v35  ;;  %v1766_v39 = vpop.f32.mrb[33].mxu1  ;;  %v1732_v40 = vpop.f32.mrb[34].mxu0 }
 0x15e   :  { %v1767_v41 = vadd.f32 %v1766_v39, %v1765_v36  ;;  %v1768_v42 = vpop.f32.mrb[34].mxu1  ;;  %v1733_v43 = vpop.f32.mrb[35].mxu0  ;;  %v67_v39 = vld [vmem:[#allocation2 + $0x20] sm:$0xff] }
 0x15f   :  { %v1734_v44 = vadd.f32 %v1733_v43, %v1732_v40  ;;  %v1769_v45 = vpop.f32.mrb[35].mxu1  ;;  %v1077_v47 = vadd.f32 %v1731_v38, %v2398_v54 }
 0x160   :  { %v1770_v49 = vadd.f32 %v1769_v45, %v1768_v42  ;;  %v2423_v50 = vadd.f32 %v1767_v41, %v1028_v14  ;;  %v2440_v41 = vld [vmem:[#allocation3] ss:$0 sm:$0xff] }
 0x161   :  { %v1080_v51 = vadd.f32 %v1734_v44, %v2400_v56 }
 0x162   :  { %v2426_v52 = vadd.f32 %v1770_v49, %v1031_v16 }
 0x163   :  { %v1735_v53 = vpop.f32.mrb[36].mxu0 }
 0x164   :  { %v1771_v55 = vpop.f32.mrb[36].mxu1  ;;  %v1736_v57 = vpop.f32.mrb[37].mxu0 }
 0x165   :  { %v1737_v58 = vadd.f32 %v1736_v57, %v1735_v53  ;;  %v1772_v59 = vpop.f32.mrb[37].mxu1  ;;  %v1738_v60 = vpop.f32.mrb[38].mxu0  ;;  %v2443_v53 = vld [vmem:[#allocation5] ss:$0 sm:$0xff] }
 0x166   :  { %v1773_v61 = vadd.f32 %v1772_v59, %v1771_v55  ;;  %v1774_v63 = vpop.f32.mrb[38].mxu1  ;;  %v1739_v1 = vpop.f32.mrb[39].mxu0  ;;  %v69_v55 = vld [vmem:[#allocation2 + $0x30] sm:$0xff] }
 0x167   :  { %v1740_v2 = vadd.f32 %v1739_v1, %v1738_v60  ;;  %v1775_v3 = vpop.f32.mrb[39].mxu1  ;;  %v1085_v54 = vadd.f32 %v1737_v58, %v2402_v4 }
 0x168   :  { %v1776_v5 = vadd.f32 %v1775_v3, %v1774_v63  ;;  %v2429_v7 = vadd.f32 %v1773_v61, %v1036_v30 }
 0x169   :  { %v1088_v56 = vadd.f32 %v1740_v2, %v2404_v6 }
 0x16a   :  { %v2432_v8 = vadd.f32 %v1776_v5, %v1039_v33 }
 0x16b   :  { %v1741_v9 = vpop.f32.mrb[40].mxu0 }
 0x16c   :  { %v1793_v11 = vpop.f32.mrb[40].mxu1  ;;  %v1742_v12 = vpop.f32.mrb[41].mxu0 }
 0x16d   :  { %v1182_v13 = vadd.f32 %v1793_v11, %v1085_v54  ;;  %v1743_v14 = vadd.f32 %v1742_v12, %v1741_v9  ;;  %v1173_v16 = vpop.f32.mrb[41].mxu1  ;;  %v1744_v17 = vpop.f32.mrb[42].mxu0 }
 0x16e   :  { %v1174_v19 = vadd.f32 %v1173_v16, %v1077_v47  ;;  %v1794_v22 = vpop.f32.mrb[42].mxu1  ;;  %v1745_v4 = vpop.f32.mrb[43].mxu0  ;;  %v68_v47 = vld [vmem:[#allocation2 + $0x28] sm:$0xff] }
 0x16f   :  { %v1238_v23 = vadd.f32 %v1182_v13, %v65_v10  ;;  %v1185_v24 = vadd.f32 %v1794_v22, %v1088_v56  ;;  %v1746_v25 = vadd.f32 %v1745_v4, %v1744_v17  ;;  %v1176_v6 = vpop.f32.mrb[43].mxu1  ;;  %v1093_v27 = vadd.f32 %v1743_v14, %v2406_v18 }
 0x170   :  { %v1236_v28 = vadd.f32 %v1174_v19, %v63_v15  ;;  %v1177_v29 = vadd.f32 %v1176_v6, %v1080_v51 }
 0x171   :  { %1255 = vst.msk [vmem:[#allocation2 + $0x10] sm:$0xff] %vm46_vm1, %v1238_v23  ;;  %v1239_v30 = vadd.f32 %v1185_v24, %v66_v21  ;;  %v1096_v31 = vadd.f32 %v1746_v25, %v2408_v20 }
 0x172   :  { %1253 = vst.msk [vmem:[#allocation2] sm:$0xff] %vm46_vm1, %v1236_v28  ;;  %v1237_v33 = vadd.f32 %v1177_v29, %v64_v26 }
 0x173   :  { %1256 = vst.msk [vmem:[#allocation2 + $0x18] sm:$0xff] %vm46_vm1, %v1239_v30  ;;  %v1747_v35 = vpop.f32.mrb[44].mxu0 }
 0x174   :  { %1254 = vst.msk [vmem:[#allocation2 + $0x8] sm:$0xff] %vm46_vm1, %v1237_v33  ;;  %v1797_v36 = vpop.f32.mrb[44].mxu1  ;;  %v1748_v37 = vpop.f32.mrb[45].mxu0  ;;  %v71_v33 = vld [vmem:[#allocation2 + $0x40] sm:$0xff] }
 0x175   :  { %v1749_v38 = vadd.f32 %v1748_v37, %v1747_v35  ;;  %v1189_v18 = vpop.f32.mrb[45].mxu1  ;;  %v1750_v40 = vpop.f32.mrb[46].mxu0 }
 0x176   :  { %v1190_v42 = vadd.f32 %v1189_v18, %v1093_v27  ;;  %v1798_v43 = vpop.f32.mrb[46].mxu1  ;;  %v1751_v44 = vpop.f32.mrb[47].mxu0  ;;  %v72_v18 = vld [vmem:[#allocation2 + $0x48] sm:$0xff] }
 0x177   :  { %v1101_v20 = vadd.f32 %v1749_v38, %v2410_v32  ;;  %v1752_v45 = vadd.f32 %v1751_v44, %v1750_v40  ;;  %v1192_v49 = vpop.f32.mrb[47].mxu1  ;;  %v70_v32 = vld [vmem:[#allocation2 + $0x38] sm:$0xff] }
 0x178   :  { %v1274_v51 = vld [vmem:[#allocation2 + $0x10] sm:$0xff]  ;;  %v1240_v57 = vadd.f32 %v1190_v42, %v67_v39  ;;  %v1193_v58 = vadd.f32 %v1192_v49, %v1096_v31 }
 0x179   :  { %v1297_v59 = vmul.f32 %v2440_v41, %v1274_v51  ;;  %v1272_v60 = vld [vmem:[#allocation2] sm:$0xff]  ;;  %v1198_v61 = vadd.f32 %v1797_v36, %v1101_v20  ;;  %v1104_v63 = vadd.f32 %v1752_v45, %v2412_v34 }
 0x17a   :  { %v1295_v1 = vmul.f32 %v2440_v41, %v1272_v60  ;;  %v1275_v2 = vld [vmem:[#allocation2 + $0x18] sm:$0xff]  ;;  %1257 = vst.msk [vmem:[#allocation2 + $0x20] sm:$0xff] %vm46_vm1, %v1240_v57  ;;  %v1241_v3 = vadd.f32 %v1193_v58, %v68_v47  ;;  %v77_v47 = vld [vmem:[#allocation2 + $0x70] sm:$0xff]  ;;  %v75_v60 = vld [vmem:[#allocation2 + $0x60] sm:$0xff] }
 0x17b   :  { %v1320_v54 = vadd.f32 %v2443_v53, %v1297_v59  ;;  %v1298_v5 = vmul.f32 %v2440_v41, %v1275_v2  ;;  %v1273_v56 = vld [vmem:[#allocation2 + $0x8] sm:$0xff]  ;;  %v1242_v9 = vadd.f32 %v1198_v61, %v69_v55  ;;  %v1201_v10 = vadd.f32 %v1798_v43, %v1104_v63  ;;  %v1753_v11 = vpop.f32.mrb[48].mxu0 }
 0x17c   :  { %v1318_v12 = vadd.f32 %v2443_v53, %v1295_v1  ;;  %v1296_v13 = vmul.f32 %v2440_v41, %v1273_v56  ;;  %1258 = vst.msk [vmem:[#allocation2 + $0x28] sm:$0xff] %vm46_vm1, %v1241_v3  ;;  %v1754_v34 = vpop.f32.mrb[49].mxu0  ;;  %v2454_v14 = vpop.f32.mrb[48].mxu1 }
 0x17d   :  { %v1336_v15 = vmax.f32 %v1320_v54, 0.0  ;;  %v1321_v16 = vadd.f32 %v2443_v53, %v1298_v5  ;;  %1259 = vst.msk [vmem:[#allocation2 + $0x30] sm:$0xff] %vm46_vm1, %v1242_v9  ;;  %v1243_v17 = vadd.f32 %v1201_v10, %v70_v32  ;;  %v1755_v19 = vadd.f32 %v1754_v34, %v1753_v11  ;;  %v1756_v21 = vpop.f32.mrb[50].mxu0  ;;  %v1205_v22 = vpop.f32.mrb[49].mxu1  ;;  %v78_v11 = vld [vmem:[#allocation2 + $0x78] sm:$0xff] }
 0x17e   :  { %v1334_v4 = vmax.f32 %v1318_v12, 0.0  ;;  %v1319_v23 = vadd.f32 %v2443_v53, %v1296_v13  ;;  %v1757_v24 = vpop.f32.mrb[51].mxu0  ;;  %v2459_v25 = vpop.f32.mrb[50].mxu1 }
 0x17f   :  { %v1571_v26 = vpack.c.bf16 %v1336_v15, %v1336_v15  ;;  %v1337_v6 = vmax.f32 %v1321_v16, 0.0  ;;  %1260 = vst.msk [vmem:[#allocation2 + $0x38] sm:$0xff] %vm46_vm1, %v1243_v17  ;;  %v1758_v27 = vadd.f32 %v1757_v24, %v1756_v21  ;;  %v1109_v28 = vadd.f32 %v1755_v19, %v2414_v46  ;;  %v1208_v29 = vpop.f32.mrb[51].mxu1  ;;  %v73_v15 = vld [vmem:[#allocation2 + $0x50] sm:$0xff] }
 0x180   :  { %v1569_v30 = vpack.c.bf16 %v1334_v4, %v1334_v4  ;;  %v1335_v31 = vmax.f32 %v1319_v23, 0.0  ;;  %v76_v4 = vld [vmem:[#allocation2 + $0x68] sm:$0xff] }
 0x181   :  { %1417 = vst.msk [vmem:[%s2572_s4 + $0x8] sm:$0xf] %vm1414_vm2, %v1571_v26  ;;  %v1572_v35 = vpack.c.bf16 %v1337_v6, %v1337_v6  ;;  %v1276_v36 = vld [vmem:[#allocation2 + $0x20] sm:$0xff]  ;;  %v1206_v37 = vadd.f32 %v1205_v22, %v1109_v28  ;;  %v1112_v38 = vadd.f32 %v1758_v27, %v2416_v48  ;;  %v74_v28 = vld [vmem:[#allocation2 + $0x58] sm:$0xff] }
 0x182   :  { %1415 = vst.msk [vmem:[%s2572_s4] sm:$0xf] %vm1414_vm2, %v1569_v30  ;;  %v1570_v46 = vpack.c.bf16 %v1335_v31, %v1335_v31  ;;  %v1299_v39 = vmul.f32 %v2440_v41, %v1276_v36 }
 0x183   :  { %1418 = vst.msk [vmem:[%s2572_s4 + $0xc] sm:$0xf] %vm1414_vm2, %v1572_v35  ;;  %v1277_v40 = vld [vmem:[#allocation2 + $0x28] sm:$0xff]  ;;  %v1244_v42 = vadd.f32 %v1206_v37, %v71_v33  ;;  %v1209_v43 = vadd.f32 %v1208_v29, %v1112_v38  ;;  %v1759_v44 = vpop.f32.mrb[52].mxu0 }
 0x184   :  { %1416 = vst.msk [vmem:[%s2572_s4 + $0x4] sm:$0xf] %vm1414_vm2, %v1570_v46  ;;  %v1278_v48 = vld [vmem:[#allocation2 + $0x30] sm:$0xff]  ;;  %v1322_v20 = vadd.f32 %v2443_v53, %v1299_v39  ;;  %v1300_v45 = vmul.f32 %v2440_v41, %v1277_v40  ;;  %v1805_v49 = vpop.f32.mrb[52].mxu1  ;;  %v1760_v51 = vpop.f32.mrb[53].mxu0 }
 0x185   :  { %v1301_v55 = vmul.f32 %v2440_v41, %v1278_v48  ;;  %1261 = vst.msk [vmem:[#allocation2 + $0x40] sm:$0xff] %vm46_vm1, %v1244_v42  ;;  %v1245_v57 = vadd.f32 %v1209_v43, %v72_v18  ;;  %v1230_v58 = vadd.f32 %v1805_v49, %v2429_v7  ;;  %v1761_v59 = vadd.f32 %v1760_v51, %v1759_v44  ;;  %v1221_v61 = vpop.f32.mrb[53].mxu1  ;;  %v1762_v63 = vpop.f32.mrb[54].mxu0 }
 0x186   :  { %v1338_v1 = vmax.f32 %v1322_v20, 0.0  ;;  %v1279_v2 = vld [vmem:[#allocation2 + $0x38] sm:$0xff]  ;;  %v1323_v32 = vadd.f32 %v2443_v53, %v1300_v45  ;;  %v1222_v3 = vadd.f32 %v1221_v61, %v2423_v50  ;;  %v1806_v54 = vpop.f32.mrb[54].mxu1  ;;  %v1763_v5 = vpop.f32.mrb[55].mxu0 }
 0x187   :  { %v1324_v56 = vadd.f32 %v2443_v53, %v1301_v55  ;;  %v1302_v9 = vmul.f32 %v2440_v41, %v1279_v2  ;;  %1262 = vst.msk [vmem:[#allocation2 + $0x48] sm:$0xff] %vm46_vm1, %v1245_v57  ;;  %v1250_v10 = vadd.f32 %v1230_v58, %v77_v47  ;;  %v1117_v7 = vadd.f32 %v1761_v59, %v2418_v62  ;;  %v1224_v12 = vpop.f32.mrb[55].mxu1 }
 0x188   :  { %v1573_v13 = vpack.c.bf16 %v1338_v1, %v1338_v1  ;;  %v1339_v34 = vmax.f32 %v1323_v32, 0.0  ;;  %v1248_v16 = vadd.f32 %v1222_v3, %v75_v60  ;;  %v1233_v17 = vadd.f32 %v1806_v54, %v2432_v8 }
 0x189   :  { %v1340_v50 = vmax.f32 %v1324_v56, 0.0  ;;  %v1325_v19 = vadd.f32 %v2443_v53, %v1302_v9  ;;  %1267 = vst.msk [vmem:[#allocation2 + $0x70] sm:$0xff] %vm46_vm1, %v1250_v10  ;;  %v1214_v21 = vadd.f32 %v2454_v14, %v1117_v7  ;;  %v1764_v22 = vadd.f32 %v1763_v5, %v1762_v63 }
 0x18a   :  { %1419 = vst.msk [vmem:[%s2572_s4 + $0x10] sm:$0xf] %vm1414_vm2, %v1573_v13  ;;  %v1574_v62 = vpack.c.bf16 %v1339_v34, %v1339_v34  ;;  %v1251_v23 = vadd.f32 %v1233_v17, %v78_v11  ;;  %v1225_v8 = vadd.f32 %v1224_v12, %v2426_v52 }
 0x18b   :  { %1265 = vst.msk [vmem:[#allocation2 + $0x60] sm:$0xff] %vm46_vm1, %v1248_v16  ;;  %v1575_v24 = vpack.c.bf16 %v1340_v50, %v1340_v50  ;;  %v1341_v26 = vmax.f32 %v1325_v19, 0.0  ;;  %v1246_v6 = vadd.f32 %v1214_v21, %v73_v15  ;;  %v1120_v27 = vadd.f32 %v1764_v22, %v2420_v0 }
 0x18c   :  { %1420 = vst.msk [vmem:[%s2572_s4 + $0x14] sm:$0xf] %vm1414_vm2, %v1574_v62  ;;  %v1280_v14 = vld [vmem:[#allocation2 + $0x40] sm:$0xff]  ;;  %v1249_v29 = vadd.f32 %v1225_v8, %v76_v4 }
 0x18d   :  { %1268 = vst.msk [vmem:[#allocation2 + $0x78] sm:$0xff] %vm46_vm1, %v1251_v23  ;;  %v1576_v52 = vpack.c.bf16 %v1341_v26, %v1341_v26  ;;  %v1303_v30 = vmul.f32 %v2440_v41, %v1280_v14  ;;  %1263 = vst.msk [vmem:[#allocation2 + $0x50] sm:$0xff] %vm46_vm1, %v1246_v6  ;;  %v1217_v0 = vadd.f32 %v2459_v25, %v1120_v27 }
 0x18e   :  { %1421 = vst.msk [vmem:[%s2572_s4 + $0x18] sm:$0xf] %vm1414_vm2, %v1575_v24  ;;  %v1281_v31 = vld [vmem:[#allocation2 + $0x48] sm:$0xff] }
 0x18f   :  { %1266 = vst.msk [vmem:[#allocation2 + $0x68] sm:$0xff] %vm46_vm1, %v1249_v29  ;;  %v1326_v33 = vadd.f32 %v2443_v53, %v1303_v30  ;;  %v1304_v35 = vmul.f32 %v2440_v41, %v1281_v31  ;;  %v1247_v36 = vadd.f32 %v1217_v0, %v74_v28 }
 0x190   :  { %1422 = vst.msk [vmem:[%s2572_s4 + $0x1c] sm:$0xf] %vm1414_vm2, %v1576_v52  ;;  %v1286_v37 = vld [vmem:[#allocation2 + $0x70] sm:$0xff] }
 0x191   :  { %v1342_v38 = vmax.f32 %v1326_v33, 0.0  ;;  %v1327_v46 = vadd.f32 %v2443_v53, %v1304_v35  ;;  %v1309_v39 = vmul.f32 %v2440_v41, %v1286_v37  ;;  %1264 = vst.msk [vmem:[#allocation2 + $0x58] sm:$0xff] %vm46_vm1, %v1247_v36 }
 0x192   :  { %v1284_v25 = vld [vmem:[#allocation2 + $0x60] sm:$0xff] }
 0x193   :  { %v1307_v18 = vmul.f32 %v2440_v41, %v1284_v25  ;;  %v1577_v40 = vpack.c.bf16 %v1342_v38, %v1342_v38  ;;  %v1343_v42 = vmax.f32 %v1327_v46, 0.0  ;;  %v1332_v43 = vadd.f32 %v2443_v53, %v1309_v39 }
 0x194   :  { %v1287_v44 = vld [vmem:[#allocation2 + $0x78] sm:$0xff]  ;;  %v1282_v48 = vld [vmem:[#allocation2 + $0x50] sm:$0xff] }
 0x195   :  { %v1330_v20 = vadd.f32 %v2443_v53, %v1307_v18  ;;  %v1310_v45 = vmul.f32 %v2440_v41, %v1287_v44  ;;  %1423 = vst.msk [vmem:[%s2572_s4 + $0x20] sm:$0xf] %vm1414_vm2, %v1577_v40  ;;  %v1578_v47 = vpack.c.bf16 %v1343_v42, %v1343_v42  ;;  %v1348_v49 = vmax.f32 %v1332_v43, 0.0 }
 0x196   :  { %v1305_v51 = vmul.f32 %v2440_v41, %v1282_v48  ;;  %v1285_v55 = vld [vmem:[#allocation2 + $0x68] sm:$0xff] }
 0x197   :  { %v1346_v57 = vmax.f32 %v1330_v20, 0.0  ;;  %v1333_v58 = vadd.f32 %v2443_v53, %v1310_v45  ;;  %v1308_v59 = vmul.f32 %v2440_v41, %v1285_v55  ;;  %1424 = vst.msk [vmem:[%s2572_s4 + $0x24] sm:$0xf] %vm1414_vm2, %v1578_v47  ;;  %v1583_v60 = vpack.c.bf16 %v1348_v49, %v1348_v49 }
 0x198   :  { %v1328_v61 = vadd.f32 %v2443_v53, %v1305_v51  ;;  %v1283_v2 = vld [vmem:[#allocation2 + $0x58] sm:$0xff] }
 0x199   :  { %v1581_v63 = vpack.c.bf16 %v1346_v57, %v1346_v57  ;;  %v1349_v1 = vmax.f32 %v1333_v58, 0.0  ;;  %v1331_v32 = vadd.f32 %v2443_v53, %v1308_v59  ;;  %1429 = vst.msk [vmem:[%s2572_s4 + $0x38] sm:$0xf] %vm1414_vm2, %v1583_v60  ;;  %v1306_v54 = vmul.f32 %v2440_v41, %v1283_v2 }
 0x19a   :  { %v1344_v3 = vmax.f32 %v1328_v61, 0.0 }
 0x19b   :  { %1427 = vst.msk [vmem:[%s2572_s4 + $0x30] sm:$0xf] %vm1414_vm2, %v1581_v63  ;;  %v1584_v5 = vpack.c.bf16 %v1349_v1, %v1349_v1  ;;  %v1347_v56 = vmax.f32 %v1331_v32, 0.0  ;;  %v1329_v10 = vadd.f32 %v2443_v53, %v1306_v54 }
 0x19c   :  { %v1579_v9 = vpack.c.bf16 %v1344_v3, %v1344_v3 }
 0x19d   :  { %1430 = vst.msk [vmem:[%s2572_s4 + $0x3c] sm:$0xf] %vm1414_vm2, %v1584_v5  ;;  %v1582_v7 = vpack.c.bf16 %v1347_v56, %v1347_v56  ;;  %v1345_v41 = vmax.f32 %v1329_v10, 0.0 }
 0x19e   :  { %1425 = vst.msk [vmem:[%s2572_s4 + $0x28] sm:$0xf] %vm1414_vm2, %v1579_v9 }
 0x19f   :  { %1428 = vst.msk [vmem:[%s2572_s4 + $0x34] sm:$0xf] %vm1414_vm2, %v1582_v7  ;;  %v1580_v11 = vpack.c.bf16 %v1345_v41, %v1345_v41 }
 0x1a1   :  { %1426 = vst.msk [vmem:[%s2572_s4 + $0x2c] sm:$0xf] %vm1414_vm2, %v1580_v11 }
 0x1a2   :  { %1435 = vsyncpa [#allocation4], 1 }
 0x1a3   :  { %1436 = vsyncpa [#allocation6], 1 }

// kernel: segmentnet_forward.20
= control target key start
LH: loop header
LB: loop body
LE: loop exit
PB: predicated region body
PF: predicated region fallthrough
CT: control target
= control target key end

     0   :  { %vm36_vm0 = vcmask 519168   ;;  %s119_s0 = inlined_call_operand.vmem [shape: bf16[4,32,64], index: 0, kind: input, shape index: {}]   ;;  %s120_s1 = inlined_call_operand.vmem [shape: bf16[32,64], index: 1, kind: output, shape index: {}]  }
   0x1   :  { %v8_v0 = vld [vmem:[%s119_s0] sm:$0xf]  ;;  %v12_v1 = vld [vmem:[%s119_s0 + $0x10] sm:$0xf]  ;;  %v9_v5 = vld [vmem:[%s119_s0 + $0x4] sm:$0xf] }
   0x2   :  { %v16_v2 = vld [vmem:[%s119_s0 + $0x20] sm:$0xf]  ;;  %v20_v3 = vld [vmem:[%s119_s0 + $0x30] sm:$0xf]  ;;  %v24_v4 = vmax.bf16 %v12_v1, %v8_v0  ;;  %v13_v6 = vld [vmem:[%s119_s0 + $0x14] sm:$0xf] }
   0x3   :  { %v28_v7 = vmax.bf16 %v20_v3, %v16_v2  ;;  %v17_v8 = vld [vmem:[%s119_s0 + $0x24] sm:$0xf]  ;;  %v21_v9 = vld [vmem:[%s119_s0 + $0x34] sm:$0xf]  ;;  %v25_v10 = vmax.bf16 %v13_v6, %v9_v5  ;;  %v10_v11 = vld [vmem:[%s119_s0 + $0x8] sm:$0xf] }
   0x4   :  { %v29_v12 = vmax.bf16 %v21_v9, %v17_v8  ;;  %v14_v13 = vld [vmem:[%s119_s0 + $0x18] sm:$0xf]  ;;  %v18_v14 = vld [vmem:[%s119_s0 + $0x28] sm:$0xf]  ;;  %v11_v19 = vld [vmem:[%s119_s0 + $0xc] sm:$0xf] }
   0x5   :  { %v22_v15 = vld [vmem:[%s119_s0 + $0x38] sm:$0xf]  ;;  %v32_v16 = vmax.bf16 %v28_v7, %v24_v4  ;;  %v26_v17 = vmax.bf16 %v14_v13, %v10_v11  ;;  %v15_v20 = vld [vmem:[%s119_s0 + $0x1c] sm:$0xf]  ;;  %v19_v21 = vld [vmem:[%s119_s0 + $0x2c] sm:$0xf] }
   0x6   :  { %v30_v18 = vmax.bf16 %v22_v15, %v18_v14  ;;  %v33_v22 = vmax.bf16 %v29_v12, %v25_v10  ;;  %v23_v23 = vld [vmem:[%s119_s0 + $0x3c] sm:$0xf]  ;;  %v27_v24 = vmax.bf16 %v15_v20, %v11_v19 }
   0x7   :  { %37 = vst.msk [vmem:[%s120_s1] sm:$0xf] %vm36_vm0, %v32_v16  ;;  %v31_v26 = vmax.bf16 %v23_v23, %v19_v21 }
   0x8   :  { %v34_v25 = vmax.bf16 %v30_v18, %v26_v17  ;;  %38 = vst.msk [vmem:[%s120_s1 + $0x4] sm:$0xf] %vm36_vm0, %v33_v22 }
   0x9   :  { %v35_v27 = vmax.bf16 %v31_v26, %v27_v24 }
   0xa   :  { %39 = vst.msk [vmem:[%s120_s1 + $0x8] sm:$0xf] %vm36_vm0, %v34_v25 }
   0xb   :  { %40 = vst.msk [vmem:[%s120_s1 + $0xc] sm:$0xf] %vm36_vm0, %v35_v27 }

// kernel: segmentnet_forward.18
= control target key start
LH: loop header
LB: loop body
LE: loop exit
PB: predicated region body
PF: predicated region fallthrough
CT: control target
= control target key end

     0   :  { %9 = vsyncpa [#allocation4], 0  ;;  %s4331_s0 = inlined_call_operand.vmem [shape: bf16[128,1600], index: 0, kind: input, shape index: {}]   ;;  %s4332_s1 = inlined_call_operand.vmem [shape: bf16[1600,64], index: 1, kind: input, shape index: {}]   ;;  %s4333_s2 = inlined_call_operand.hbm [shape: f32[1,64], index: 2, kind: input, shape index: {}]   ;;  %s4334_s3 = inlined_call_operand.hbm [shape: f32[1,64], index: 3, kind: input, shape index: {}]   ;;  %s4335_s4 = inlined_call_operand.vmem [shape: bf16[128,64], index: 4, kind: output, shape index: {}]  }
   0x1   :  { %10 = vsyncpa [#allocation6], 0  ;;  %s3392_s15 = smov [#allocation3]   ;;  %s3393_s17 = smov [#allocation5]  }
   0x2   :  { %s21_s16 = sshll.u32 %s3392_s15, 4  ;;  %s31_s18 = sshll.u32 %s3393_s17, 4  ;;  %s22_s16 = int_to_ptr.vmem [resolvable:$true] %s21_s16  ;;  %s32_s18 = int_to_ptr.vmem [resolvable:$true] %s31_s18 }
   0x3   :  { %s3344_s21 = scalar_lea.hbm %s4333_s2, 16 }
   0x4   :  { %p3345_p0 = scmp.ne.s32.totalorder %s4333_s2, %s3344_s21  ;;  %p3348_p1 = scmp.lt.u32.totalorder %s3344_s21, %s4333_s2 }
   0x6   :  { %p3350_p2 = pnand %p3348_p1, %p3345_p0 }
   0x8   :  { %3353 = shalt.err (!%p3350_p2)
}
   0x9   :  { %s3354_s26 = scalar_lea.vmem %s22_s16, 16  ;;  %s3358_s27 = scalar_lea.vmem %s22_s16, 32 }
   0xa   :  { %p3355_p3 = scmp.ne.s32.totalorder %s22_s16, %s3354_s26  ;;  %p3359_p4 = scmp.lt.s32.totalorder %s22_s16, %s22_s16 }
   0xb   :  { %p3360_p5 = scmp.lt.s32.totalorder %s3358_s27, %s3354_s26 }
   0xd   :  { %p3361_p6 = por %p3360_p5, %p3359_p4 }
   0xf   :  { %p3362_p7 = pnand %p3361_p6, %p3355_p3 }
  0x11   :  { %3365 = shalt.err (!%p3362_p7)
}
  0x12   :  { %24 = dma.hbm_to_vmem [thread:$0]  %s4333_s2, 16, %s22_s16, [#allocation4]  }
  0x13   :  { %s3366_s6 = scalar_lea.hbm %s4334_s3, 16 }
  0x14   :  { %p3367_p8 = scmp.ne.s32.totalorder %s4334_s3, %s3366_s6  ;;  %p3370_p9 = scmp.lt.u32.totalorder %s3366_s6, %s4334_s3 }
  0x16   :  { %p3372_p10 = pnand %p3370_p9, %p3367_p8 }
  0x18   :  { %3375 = shalt.err (!%p3372_p10)
}
  0x19   :  { %s3376_s11 = scalar_lea.vmem %s32_s18, 16  ;;  %s3380_s12 = scalar_lea.vmem %s32_s18, 32 }
  0x1a   :  { %p3377_p11 = scmp.ne.s32.totalorder %s32_s18, %s3376_s11  ;;  %p3381_p12 = scmp.lt.s32.totalorder %s32_s18, %s32_s18 }
  0x1b   :  { %p3382_p13 = scmp.lt.s32.totalorder %s3380_s12, %s3376_s11 }
  0x1d   :  { %p3383_p0 = por %p3382_p13, %p3381_p12 }
  0x1f   :  { %p3384_p1 = pnand %p3383_p0, %p3377_p11 }
  0x21   :  { %3387 = shalt.err (!%p3384_p1)
}
  0x22   :  { %34 = dma.hbm_to_vmem [thread:$0]  %s4334_s3, 16, %s32_s18, [#allocation6]  }
  0x23   :  { %3388 = dma.done.wait [#allocation4], 16  }
  0x24   :  { %3389 = vsyncadd [#allocation4], 4294967280 }
  0x25   :  { %3390 = dma.done.wait [#allocation6], 16  }
  0x26   :  { %3391 = vsyncadd [#allocation6], 4294967280  ;;  %v3092_v0 = vld [vmem:[%s4332_s1 + $0x40] sm:$0xff]   ;;  %v3096_v4 = vld [vmem:[%s4332_s1 + $0x48] sm:$0xff]   ;;  %vm46_vm0 = vcmask 523264   ;;  %vm2392_vm1 = vcmask 519168  }
  0x27   :  { %v3093_v1 = vld [vmem:[%s4332_s1 + $0xc0] sm:$0xff]   ;;  %2661 = vmatprep.subr.bf16.mxu0 %v3092_v0  ;;  %v3097_v5 = vld [vmem:[%s4332_s1 + $0xc8] sm:$0xff]   ;;  %v3100_v8 = vld [vmem:[%s4332_s1 + $0x50] sm:$0xff]  }
  0x28   :  { %v3094_v2 = vld [vmem:[%s4332_s1] sm:$0xff]   ;;  %2725 = vmatprep.subr.bf16.mxu1 %v3093_v1  ;;  %v3098_v6 = vld [vmem:[%s4332_s1 + $0x8] sm:$0xff]   ;;  %v3101_v9 = vld [vmem:[%s4332_s1 + $0xd0] sm:$0xff]  }
  0x29   :  { %v3095_v3 = vld [vmem:[%s4332_s1 + $0x80] sm:$0xff]   ;;  %2662 = vmatpush3.bf16.msra.mxu0 %v3094_v2  ;;  %v3099_v7 = vld [vmem:[%s4332_s1 + $0x88] sm:$0xff]   ;;  %v3102_v10 = vld [vmem:[%s4332_s1 + $0x10] sm:$0xff]  }
  0x2a   :  { %2726 = vmatpush3.bf16.msra.mxu1 %v3095_v3  ;;  %2663 = vmatprep.subr.bf16.mxu0 %v3096_v4  ;;  %v3103_v11 = vld [vmem:[%s4332_s1 + $0x90] sm:$0xff]   ;;  %v3104_v12 = vld [vmem:[%s4332_s1 + $0x58] sm:$0xff]   ;;  %v3108_v16 = vld [vmem:[%s4332_s1 + $0x60] sm:$0xff]  }
  0x2b   :  { %2727 = vmatprep.subr.bf16.mxu1 %v3097_v5  ;;  %v3105_v13 = vld [vmem:[%s4332_s1 + $0xd8] sm:$0xff]   ;;  %v3109_v17 = vld [vmem:[%s4332_s1 + $0xe0] sm:$0xff]   ;;  %v3112_v20 = vld [vmem:[%s4332_s1 + $0x68] sm:$0xff]  }
  0x2c   :  { %v3106_v14 = vld [vmem:[%s4332_s1 + $0x18] sm:$0xff]   ;;  %v3110_v18 = vld [vmem:[%s4332_s1 + $0x20] sm:$0xff]   ;;  %v3113_v21 = vld [vmem:[%s4332_s1 + $0xe8] sm:$0xff]  }
  0x2d   :  { %2664 = vmatpush3.bf16.msra.mxu0 %v3098_v6  ;;  %v3107_v15 = vld [vmem:[%s4332_s1 + $0x98] sm:$0xff]   ;;  %v3111_v19 = vld [vmem:[%s4332_s1 + $0xa0] sm:$0xff]   ;;  %v3114_v22 = vld [vmem:[%s4332_s1 + $0x28] sm:$0xff]  }
  0x2e   :  { %2728 = vmatpush3.bf16.msra.mxu1 %v3099_v7  ;;  %2665 = vmatprep.subr.bf16.mxu0 %v3100_v8  ;;  %v3115_v23 = vld [vmem:[%s4332_s1 + $0xa8] sm:$0xff]   ;;  %v3116_v24 = vld [vmem:[%s4332_s1 + $0x70] sm:$0xff]   ;;  %v3120_v28 = vld [vmem:[%s4332_s1 + $0x78] sm:$0xff]  }
  0x2f   :  { %2729 = vmatprep.subr.bf16.mxu1 %v3101_v9  ;;  %v3117_v25 = vld [vmem:[%s4332_s1 + $0xf0] sm:$0xff]   ;;  %v3121_v29 = vld [vmem:[%s4332_s1 + $0xf8] sm:$0xff]   ;;  %v3129_v35 = vld [vmem:[%s4331_s0 + $0xc] ss:$52 sps:$4 sm:$0xff]  }
  0x30   :  { %v3118_v26 = vld [vmem:[%s4332_s1 + $0x30] sm:$0xff]   ;;  %v3122_v30 = vld [vmem:[%s4332_s1 + $0x38] sm:$0xff]   ;;  %v3130_v36 = vld [vmem:[%s4332_s1 + $0x140] sm:$0xff]   ;;  %1665 = vmatprep.mubr.bf16.mxu1 %v3129_v35 }
  0x31   :  { %2666 = vmatpush3.bf16.msra.mxu0 %v3102_v10  ;;  %v3119_v27 = vld [vmem:[%s4332_s1 + $0xb0] sm:$0xff]   ;;  %v3123_v31 = vld [vmem:[%s4332_s1 + $0xb8] sm:$0xff]   ;;  %v3131_v37 = vld [vmem:[%s4332_s1 + $0x1c0] sm:$0xff]  }
  0x32   :  { %2730 = vmatpush3.bf16.msra.mxu1 %v3103_v11  ;;  %2667 = vmatprep.subr.bf16.mxu0 %v3104_v12  ;;  %v3124_v32 = vld [vmem:[%s4331_s0] ss:$52 sps:$4 sm:$0xff]   ;;  %v3126_v33 = vld [vmem:[%s4331_s0 + $0x4] ss:$52 sps:$4 sm:$0xff]   ;;  %v3127_v34 = vld [vmem:[%s4331_s0 + $0x8] ss:$52 sps:$4 sm:$0xff]  }
  0x33   :  { %2731 = vmatprep.subr.bf16.mxu1 %v3105_v13  ;;  %1568 = vmatprep.mubr.bf16.mxu0 %v3126_v33  ;;  %v3132_v38 = vld [vmem:[%s4332_s1 + $0x100] sm:$0xff]   ;;  %v3136_v41 = vld [vmem:[%s4331_s0 + $0x74] ss:$52 sps:$4 sm:$0xff]   ;;  %v3146_v49 = vld [vmem:[%s4331_s0 + $0xdc] ss:$52 sps:$4 sm:$0xff]  }
  0x34   :  { %v3133_v39 = vld [vmem:[%s4332_s1 + $0x180] sm:$0xff]   ;;  %v3138_v42 = vld [vmem:[%s4331_s0 + $0x68] ss:$52 sps:$4 sm:$0xff]   ;;  %v3149_v51 = vld [vmem:[%s4331_s0 + $0xd8] ss:$52 sps:$4 sm:$0xff]  }
  0x35   :  { %2668 = vmatpush3.bf16.msra.mxu0 %v3106_v14  ;;  %v3134_v40 = vld [vmem:[%s4331_s0 + $0x6c] ss:$52 sps:$4 sm:$0xff]   ;;  %v3139_v43 = vld [vmem:[%s4331_s0 + $0x70] ss:$52 sps:$4 sm:$0xff]   ;;  %v3144_v48 = vld [vmem:[%s4331_s0 + $0xd4] ss:$52 sps:$4 sm:$0xff]  }
  0x36   :  { %2732 = vmatpush3.bf16.msra.mxu1 %v3107_v15  ;;  %2669 = vmatprep.subr.bf16.mxu0 %v3108_v16  ;;  %v3140_v44 = vld [vmem:[%s4332_s1 + $0x148] sm:$0xff]   ;;  %v3148_v50 = vld [vmem:[%s4331_s0 + $0xd0] ss:$52 sps:$4 sm:$0xff]   ;;  %v3159_v59 = vld [vmem:[%s4331_s0 + $0x140] ss:$52 sps:$4 sm:$0xff]  }
  0x37   :  { %2733 = vmatprep.subr.bf16.mxu1 %v3109_v17  ;;  %v3141_v45 = vld [vmem:[%s4332_s1 + $0x1c8] sm:$0xff]   ;;  %v3150_v52 = vld [vmem:[%s4332_s1 + $0x150] sm:$0xff]   ;;  %v3156_v57 = vld [vmem:[%s4331_s0 + $0x144] ss:$52 sps:$4 sm:$0xff]  }
  0x38   :  { %v3142_v46 = vld [vmem:[%s4332_s1 + $0x108] sm:$0xff]   ;;  %v3151_v53 = vld [vmem:[%s4332_s1 + $0x1d0] sm:$0xff]   ;;  %v3160_v60 = vld [vmem:[%s4332_s1 + $0x158] sm:$0xff]  }
  0x39   :  { %2670 = vmatpush3.bf16.msra.mxu0 %v3110_v18  ;;  %v3143_v47 = vld [vmem:[%s4332_s1 + $0x188] sm:$0xff]   ;;  %v3152_v54 = vld [vmem:[%s4332_s1 + $0x110] sm:$0xff]   ;;  %v3161_v61 = vld [vmem:[%s4332_s1 + $0x1d8] sm:$0xff]  }
  0x3a   :  { %2734 = vmatpush3.bf16.msra.mxu1 %v3111_v19  ;;  %2671 = vmatprep.subr.bf16.mxu0 %v3112_v20  ;;  %v3153_v55 = vld [vmem:[%s4332_s1 + $0x190] sm:$0xff]   ;;  %v3158_v58 = vld [vmem:[%s4331_s0 + $0x138] ss:$52 sps:$4 sm:$0xff]   ;;  %v3170_v3 = vld [vmem:[%s4332_s1 + $0x160] sm:$0xff]  }
  0x3b   :  { %2735 = vmatprep.subr.bf16.mxu1 %v3113_v21  ;;  %v3154_v56 = vld [vmem:[%s4331_s0 + $0x13c] ss:$52 sps:$4 sm:$0xff]   ;;  %v3164_v0 = vld [vmem:[%s4331_s0 + $0x1a4] ss:$52 sps:$4 sm:$0xff]   ;;  %v3166_v1 = vld [vmem:[%s4331_s0 + $0x1ac] ss:$52 sps:$4 sm:$0xff]  }
  0x3c   :  { %v3162_v62 = vld [vmem:[%s4332_s1 + $0x118] sm:$0xff]   ;;  %v3168_v2 = vld [vmem:[%s4331_s0 + $0x1a0] ss:$52 sps:$4 sm:$0xff]   ;;  %v3180_v10 = vld [vmem:[%s4332_s1 + $0x168] sm:$0xff]  }
  0x3d   :  { %2672 = vmatpush3.bf16.msra.mxu0 %v3114_v22  ;;  %v3163_v63 = vld [vmem:[%s4332_s1 + $0x198] sm:$0xff]   ;;  %v3171_v5 = vld [vmem:[%s4332_s1 + $0x1e0] sm:$0xff]   ;;  %v3176_v9 = vld [vmem:[%s4331_s0 + $0x214] ss:$52 sps:$4 sm:$0xff]  }
  0x3e   :  { %2736 = vmatpush3.bf16.msra.mxu1 %v3115_v23  ;;  %2673 = vmatprep.subr.bf16.mxu0 %v3116_v24  ;;  %v3169_v4 = vld [vmem:[%s4331_s0 + $0x1a8] ss:$52 sps:$4 sm:$0xff]   ;;  %v3172_v6 = vld [vmem:[%s4332_s1 + $0x120] sm:$0xff]   ;;  %v3190_v18 = vld [vmem:[%s4332_s1 + $0x170] sm:$0xff]  }
  0x3f   :  { %2737 = vmatprep.subr.bf16.mxu1 %v3117_v25  ;;  %v3173_v7 = vld [vmem:[%s4332_s1 + $0x1a0] sm:$0xff]   ;;  %v3181_v11 = vld [vmem:[%s4332_s1 + $0x1e8] sm:$0xff]   ;;  %v3186_v17 = vld [vmem:[%s4331_s0 + $0x27c] ss:$52 sps:$4 sm:$0xff]  }
  0x40   :  { %v3174_v8 = vld [vmem:[%s4331_s0 + $0x20c] ss:$52 sps:$4 sm:$0xff]   ;;  %v3178_v12 = vld [vmem:[%s4331_s0 + $0x208] ss:$52 sps:$4 sm:$0xff]   ;;  %v3179_v15 = vld [vmem:[%s4331_s0 + $0x210] ss:$52 sps:$4 sm:$0xff]  }
  0x41   :  { %2674 = vmatpush3.bf16.msra.mxu0 %v3118_v26  ;;  %v3182_v13 = vld [vmem:[%s4332_s1 + $0x128] sm:$0xff]   ;;  %v3191_v19 = vld [vmem:[%s4332_s1 + $0x1f0] sm:$0xff]   ;;  %v3196_v25 = vld [vmem:[%s4331_s0 + $0x2e4] ss:$52 sps:$4 sm:$0xff]  }
  0x42   :  { %2738 = vmatpush3.bf16.msra.mxu1 %v3119_v27  ;;  %2675 = vmatprep.subr.bf16.mxu0 %v3120_v28  ;;  %v3183_v14 = vld [vmem:[%s4332_s1 + $0x1a8] sm:$0xff]   ;;  %v3192_v20 = vld [vmem:[%s4332_s1 + $0x130] sm:$0xff]   ;;  %v3200_v26 = vld [vmem:[%s4332_s1 + $0x178] sm:$0xff]  }
  0x43   :  { %2739 = vmatprep.subr.bf16.mxu1 %v3121_v29  ;;  %v3184_v16 = vld [vmem:[%s4331_s0 + $0x274] ss:$52 sps:$4 sm:$0xff]   ;;  %v3188_v22 = vld [vmem:[%s4331_s0 + $0x270] ss:$52 sps:$4 sm:$0xff]   ;;  %v3189_v23 = vld [vmem:[%s4331_s0 + $0x278] ss:$52 sps:$4 sm:$0xff]  }
  0x44   :  { %v3193_v21 = vld [vmem:[%s4332_s1 + $0x1b0] sm:$0xff]   ;;  %v3201_v27 = vld [vmem:[%s4332_s1 + $0x1f8] sm:$0xff]   ;;  %v3210_v33 = vld [vmem:[%s4332_s1 + $0x240] sm:$0xff]  }
  0x45   :  { %2676 = vmatpush3.bf16.msra.mxu0 %v3122_v30  ;;  %v3194_v24 = vld [vmem:[%s4331_s0 + $0x2dc] ss:$52 sps:$4 sm:$0xff]   ;;  %v3198_v30 = vld [vmem:[%s4331_s0 + $0x2d8] ss:$52 sps:$4 sm:$0xff]  }
  0x46   :  { %2740 = vmatpush3.bf16.msra.mxu1 %v3123_v31  ;;  %2789 = vmatprep.subr.bf16.mxu0 %v3130_v36  ;;  %v3202_v28 = vld [vmem:[%s4332_s1 + $0x138] sm:$0xff]   ;;  %v3199_v31 = vld [vmem:[%s4331_s0 + $0x2e0] ss:$52 sps:$4 sm:$0xff]   ;;  %v3204_v36 = vld [vmem:[%s4331_s0 + $0x10] ss:$52 sps:$4 sm:$0xff]  }
  0x47   :  { %2853 = vmatprep.subr.bf16.mxu1 %v3131_v37  ;;  %v3203_v29 = vld [vmem:[%s4332_s1 + $0x1b8] sm:$0xff]  }
  0x48   :  { %1569 = vmatmul.mubr.bf16.vlgmr.msra.gmra.mrb[0].mxu0 %v3124_v32  ;;  %v3206_v32 = vld [vmem:[%s4331_s0 + $0x14] ss:$52 sps:$4 sm:$0xff]   ;;  %v3209_v35 = vld [vmem:[%s4331_s0 + $0x1c] ss:$52 sps:$4 sm:$0xff]   ;;  %v3207_v37 = vld [vmem:[%s4331_s0 + $0x18] ss:$52 sps:$4 sm:$0xff]  }
  0x49   :  { %1666 = vmatmul.mubr.bf16.vlgmr.msra.gmra.mrb[0].mxu1 %v3127_v34  ;;  %2790 = vmatpush3.bf16.msra.mxu0 %v3132_v38  ;;  %v3211_v34 = vld [vmem:[%s4332_s1 + $0x2c0] sm:$0xff]  }
  0x4a   :  { %2854 = vmatpush3.bf16.msra.mxu1 %v3133_v39  ;;  %1576 = vmatprep.mubr.bf16.mxu0 %v3134_v40  ;;  %v3212_v38 = vld [vmem:[%s4332_s1 + $0x200] sm:$0xff]   ;;  %v3214_v40 = vld [vmem:[%s4331_s0 + $0x7c] ss:$52 sps:$4 sm:$0xff]  }
  0x4b   :  { %1673 = vmatprep.mubr.bf16.mxu1 %v3136_v41  ;;  %2791 = vmatprep.subr.bf16.mxu0 %v3140_v44  ;;  %v3213_v39 = vld [vmem:[%s4332_s1 + $0x280] sm:$0xff]   ;;  %v3222_v44 = vld [vmem:[%s4332_s1 + $0x208] sm:$0xff]  }
  0x4c   :  { %2855 = vmatprep.subr.bf16.mxu1 %v3141_v45  ;;  %v3216_v41 = vld [vmem:[%s4331_s0 + $0x84] ss:$52 sps:$4 sm:$0xff]   ;;  %v3223_v45 = vld [vmem:[%s4332_s1 + $0x288] sm:$0xff]  }
  0x4d   :  { %2792 = vmatpush3.bf16.msra.mxu0 %v3142_v46  ;;  %v3218_v46 = vld [vmem:[%s4331_s0 + $0x78] ss:$52 sps:$4 sm:$0xff]  }
  0x4e   :  { %2856 = vmatpush3.bf16.msra.mxu1 %v3143_v47  ;;  %2793 = vmatprep.subr.bf16.mxu0 %v3150_v52  ;;  %v3230_v47 = vld [vmem:[%s4332_s1 + $0x250] sm:$0xff]  }
  0x4f   :  { %2857 = vmatprep.subr.bf16.mxu1 %v3151_v53  ;;  %v3232_v52 = vld [vmem:[%s4332_s1 + $0x210] sm:$0xff]  }
  0x50   :  { %1577 = vmatmul.mubr.bf16.gmra.mrb[4].mxu0 %v3138_v42  ;;  %v3220_v42 = vld [vmem:[%s4332_s1 + $0x248] sm:$0xff]   ;;  %v3233_v53 = vld [vmem:[%s4332_s1 + $0x290] sm:$0xff]  }
  0x51   :  { %1674 = vmatmul.mubr.bf16.gmra.mrb[4].mxu1 %v3139_v43  ;;  %1584 = vmatprep.mubr.bf16.mxu0 %v3144_v48  ;;  %v3221_v43 = vld [vmem:[%s4332_s1 + $0x2c8] sm:$0xff]   ;;  %v3219_v48 = vld [vmem:[%s4331_s0 + $0x80] ss:$52 sps:$4 sm:$0xff]  }
  0x52   :  { %1681 = vmatprep.mubr.bf16.mxu1 %v3146_v49  ;;  %2794 = vmatpush3.bf16.msra.mxu0 %v3152_v54  ;;  %v3231_v49 = vld [vmem:[%s4332_s1 + $0x2d0] sm:$0xff]   ;;  %v3240_v54 = vld [vmem:[%s4332_s1 + $0x258] sm:$0xff]  }
  0x53   :  { %2858 = vmatpush3.bf16.msra.mxu1 %v3153_v55  ;;  %2795 = vmatprep.subr.bf16.mxu0 %v3160_v60  ;;  %v3241_v55 = vld [vmem:[%s4332_s1 + $0x2d8] sm:$0xff]   ;;  %v3234_v60 = vld [vmem:[%s4331_s0 + $0x14c] ss:$52 sps:$4 sm:$0xff]  }
  0x54   :  { %2859 = vmatprep.subr.bf16.mxu1 %v3161_v61  ;;  %v3236_v61 = vld [vmem:[%s4331_s0 + $0x154] ss:$52 sps:$4 sm:$0xff]  }
  0x56   :  { %2796 = vmatpush3.bf16.msra.mxu0 %v3162_v62  ;;  %v3250_v62 = vld [vmem:[%s4332_s1 + $0x260] sm:$0xff]  }
  0x57   :  { %2860 = vmatpush3.bf16.msra.mxu1 %v3163_v63  ;;  %2797 = vmatprep.subr.bf16.mxu0 %v3170_v3  ;;  %v3251_v63 = vld [vmem:[%s4332_s1 + $0x2e0] sm:$0xff]  }
  0x58   :  { %1585 = vmatmul.mubr.bf16.gmra.mrb[8].mxu0 %v3148_v50  ;;  %2861 = vmatprep.subr.bf16.mxu1 %v3171_v5  ;;  %v3224_v50 = vld [vmem:[%s4331_s0 + $0xe4] ss:$52 sps:$4 sm:$0xff]   ;;  %v3246_v5 = vld [vmem:[%s4331_s0 + $0x1bc] ss:$52 sps:$4 sm:$0xff]  }
  0x59   :  { %1682 = vmatmul.mubr.bf16.gmra.mrb[8].mxu1 %v3149_v51  ;;  %1592 = vmatprep.mubr.bf16.mxu0 %v3154_v56  ;;  %v3226_v51 = vld [vmem:[%s4331_s0 + $0xec] ss:$52 sps:$4 sm:$0xff]   ;;  %v3239_v3 = vld [vmem:[%s4331_s0 + $0x150] ss:$52 sps:$4 sm:$0xff]  }
  0x5a   :  { %1689 = vmatprep.mubr.bf16.mxu1 %v3156_v57  ;;  %2798 = vmatpush3.bf16.msra.mxu0 %v3172_v6  ;;  %v3228_v56 = vld [vmem:[%s4331_s0 + $0xe0] ss:$52 sps:$4 sm:$0xff]   ;;  %v3242_v57 = vld [vmem:[%s4332_s1 + $0x218] sm:$0xff]   ;;  %v3260_v6 = vld [vmem:[%s4332_s1 + $0x268] sm:$0xff]  }
  0x5b   :  { %2862 = vmatpush3.bf16.msra.mxu1 %v3173_v7  ;;  %2799 = vmatprep.subr.bf16.mxu0 %v3180_v10  ;;  %v3261_v7 = vld [vmem:[%s4332_s1 + $0x2e8] sm:$0xff]   ;;  %v3248_v10 = vld [vmem:[%s4331_s0 + $0x1b0] ss:$52 sps:$4 sm:$0xff]  }
  0x5c   :  { %2863 = vmatprep.subr.bf16.mxu1 %v3181_v11  ;;  %v3249_v11 = vld [vmem:[%s4331_s0 + $0x1b8] ss:$52 sps:$4 sm:$0xff]  }
  0x5e   :  { %2800 = vmatpush3.bf16.msra.mxu0 %v3182_v13  ;;  %v3256_v13 = vld [vmem:[%s4331_s0 + $0x224] ss:$52 sps:$4 sm:$0xff]  }
  0x5f   :  { %2864 = vmatpush3.bf16.msra.mxu1 %v3183_v14  ;;  %2801 = vmatprep.subr.bf16.mxu0 %v3190_v18  ;;  %v3270_v14 = vld [vmem:[%s4332_s1 + $0x270] sm:$0xff]   ;;  %v3258_v18 = vld [vmem:[%s4331_s0 + $0x218] ss:$52 sps:$4 sm:$0xff]  }
  0x60   :  { %1593 = vmatmul.mubr.bf16.gmra.mrb[12].mxu0 %v3158_v58  ;;  %2865 = vmatprep.subr.bf16.mxu1 %v3191_v19  ;;  %v3243_v58 = vld [vmem:[%s4332_s1 + $0x298] sm:$0xff]   ;;  %v3259_v19 = vld [vmem:[%s4331_s0 + $0x220] ss:$52 sps:$4 sm:$0xff]  }
  0x61   :  { %1690 = vmatmul.mubr.bf16.gmra.mrb[12].mxu1 %v3159_v59  ;;  %1600 = vmatprep.mubr.bf16.mxu0 %v3164_v0  ;;  %v3229_v59 = vld [vmem:[%s4331_s0 + $0xe8] ss:$52 sps:$4 sm:$0xff]   ;;  %v3252_v0 = vld [vmem:[%s4332_s1 + $0x220] sm:$0xff]  }
  0x62   :  { %1697 = vmatprep.mubr.bf16.mxu1 %v3166_v1  ;;  %2802 = vmatpush3.bf16.msra.mxu0 %v3192_v20  ;;  %v3253_v1 = vld [vmem:[%s4332_s1 + $0x2a0] sm:$0xff]  }
  0x63   :  { %2866 = vmatpush3.bf16.msra.mxu1 %v3193_v21  ;;  %2803 = vmatprep.subr.bf16.mxu0 %v3200_v26  ;;  %v3264_v20 = vld [vmem:[%s4331_s0 + $0x284] ss:$52 sps:$4 sm:$0xff]  }
  0x64   :  { %2867 = vmatprep.subr.bf16.mxu1 %v3201_v27  ;;  %v3280_v21 = vld [vmem:[%s4332_s1 + $0x278] sm:$0xff]   ;;  %v3290_v26 = vld [vmem:[%s4332_s1 + $0x300] sm:$0xff]  }
  0x65   :  { %v3268_v27 = vld [vmem:[%s4331_s0 + $0x280] ss:$52 sps:$4 sm:$0xff]  }
  0x66   :  { %2804 = vmatpush3.bf16.msra.mxu0 %v3202_v28  ;;  %v3269_v28 = vld [vmem:[%s4331_s0 + $0x288] ss:$52 sps:$4 sm:$0xff]  }
  0x67   :  { %2868 = vmatpush3.bf16.msra.mxu1 %v3203_v29  ;;  %2917 = vmatprep.subr.bf16.mxu0 %v3210_v33  ;;  %v3274_v29 = vld [vmem:[%s4331_s0 + $0x2ec] ss:$52 sps:$4 sm:$0xff]   ;;  %v3286_v33 = vld [vmem:[%s4331_s0 + $0x24] ss:$52 sps:$4 sm:$0xff]  }
  0x68   :  { %1601 = vmatmul.mubr.bf16.gmra.mrb[16].mxu0 %v3168_v2  ;;  %2981 = vmatprep.subr.bf16.mxu1 %v3211_v34  ;;  %v3238_v2 = vld [vmem:[%s4331_s0 + $0x148] ss:$52 sps:$4 sm:$0xff]   ;;  %v3289_v34 = vld [vmem:[%s4331_s0 + $0x2c] ss:$52 sps:$4 sm:$0xff]  }
  0x69   :  { %1698 = vmatmul.mubr.bf16.gmra.mrb[16].mxu1 %v3169_v4  ;;  %1608 = vmatprep.mubr.bf16.mxu0 %v3174_v8  ;;  %v3244_v4 = vld [vmem:[%s4331_s0 + $0x1b4] ss:$52 sps:$4 sm:$0xff]  }
  0x6a   :  { %1705 = vmatprep.mubr.bf16.mxu1 %v3176_v9  ;;  %v3262_v8 = vld [vmem:[%s4332_s1 + $0x228] sm:$0xff]  }
  0x6b   :  { %v3263_v9 = vld [vmem:[%s4332_s1 + $0x2a8] sm:$0xff]  }
  0x70   :  { %1609 = vmatmul.mubr.bf16.gmra.mrb[20].mxu0 %v3178_v12  ;;  %v3254_v12 = vld [vmem:[%s4331_s0 + $0x21c] ss:$52 sps:$4 sm:$0xff]  }
  0x71   :  { %1706 = vmatmul.mubr.bf16.gmra.mrb[20].mxu1 %v3179_v15  ;;  %1616 = vmatprep.mubr.bf16.mxu0 %v3184_v16  ;;  %v3271_v15 = vld [vmem:[%s4332_s1 + $0x2f0] sm:$0xff]  }
  0x72   :  { %1713 = vmatprep.mubr.bf16.mxu1 %v3186_v17  ;;  %v3272_v16 = vld [vmem:[%s4332_s1 + $0x230] sm:$0xff]  }
  0x73   :  { %v3273_v17 = vld [vmem:[%s4332_s1 + $0x2b0] sm:$0xff]  }
  0x78   :  { %1617 = vmatmul.mubr.bf16.gmra.mrb[24].mxu0 %v3188_v22  ;;  %v3266_v22 = vld [vmem:[%s4331_s0 + $0x28c] ss:$52 sps:$4 sm:$0xff]  }
  0x79   :  { %1714 = vmatmul.mubr.bf16.gmra.mrb[24].mxu1 %v3189_v23  ;;  %1624 = vmatprep.mubr.bf16.mxu0 %v3194_v24  ;;  %v3281_v23 = vld [vmem:[%s4332_s1 + $0x2f8] sm:$0xff]  }
  0x7a   :  { %1721 = vmatprep.mubr.bf16.mxu1 %v3196_v25  ;;  %v3282_v24 = vld [vmem:[%s4332_s1 + $0x238] sm:$0xff]  }
  0x7b   :  { %v3283_v25 = vld [vmem:[%s4332_s1 + $0x2b8] sm:$0xff]  }
  0x80   :  { %1625 = vmatmul.mubr.bf16.gmra.mrb[28].mxu0 %v3198_v30  ;;  %v3276_v30 = vld [vmem:[%s4331_s0 + $0x2f4] ss:$52 sps:$4 sm:$0xff]  }
  0x81   :  { %1722 = vmatmul.mubr.bf16.gmra.mrb[28].mxu1 %v3199_v31  ;;  %1762 = vmatprep.mubr.bf16.mxu0 %v3206_v32  ;;  %v3278_v31 = vld [vmem:[%s4331_s0 + $0x2e8] ss:$52 sps:$4 sm:$0xff]   ;;  %v3279_v32 = vld [vmem:[%s4331_s0 + $0x2f0] ss:$52 sps:$4 sm:$0xff]  }
  0x82   :  { %1859 = vmatprep.mubr.bf16.mxu1 %v3209_v35  ;;  %v3284_v35 = vld [vmem:[%s4331_s0 + $0x20] ss:$52 sps:$4 sm:$0xff]  }
  0x88   :  { %1763 = vmatmul.mubr.bf16.vlgmr.msra.gmra.mrb[32].mxu0 %v3204_v36  ;;  %v3287_v36 = vld [vmem:[%s4331_s0 + $0x28] ss:$52 sps:$4 sm:$0xff]  }
  0x89   :  { %1860 = vmatmul.mubr.bf16.vlgmr.msra.gmra.mrb[32].mxu1 %v3207_v37  ;;  %2918 = vmatpush3.bf16.msra.mxu0 %v3212_v38  ;;  %v3291_v37 = vld [vmem:[%s4331_s0 + $0x8c] ss:$52 sps:$4 sm:$0xff]   ;;  %v3293_v38 = vld [vmem:[%s4331_s0 + $0x94] ss:$52 sps:$4 sm:$0xff]  }
  0x8a   :  { %2982 = vmatpush3.bf16.msra.mxu1 %v3213_v39  ;;  %1770 = vmatprep.mubr.bf16.mxu0 %v3214_v40  ;;  %v3303_v39 = vld [vmem:[%s4332_s1 + $0x308] sm:$0xff]   ;;  %v3316_v40 = vld [vmem:[%s4332_s1 + $0x310] sm:$0xff]  }
  0x8b   :  { %1867 = vmatprep.mubr.bf16.mxu1 %v3216_v41  ;;  %2919 = vmatprep.subr.bf16.mxu0 %v3220_v42  ;;  %v3295_v41 = vld [vmem:[%s4331_s0 + $0x88] ss:$52 sps:$4 sm:$0xff]   ;;  %v3296_v42 = vld [vmem:[%s4331_s0 + $0x90] ss:$52 sps:$4 sm:$0xff]  }
  0x8c   :  { %2983 = vmatprep.subr.bf16.mxu1 %v3221_v43  ;;  %v3297_v43 = vld [vmem:[%s4331_s0 + $0xf4] ss:$52 sps:$4 sm:$0xff]  }
  0x8d   :  { %2920 = vmatpush3.bf16.msra.mxu0 %v3222_v44  ;;  %v3299_v44 = vld [vmem:[%s4331_s0 + $0xfc] ss:$52 sps:$4 sm:$0xff]  }
  0x8e   :  { %2984 = vmatpush3.bf16.msra.mxu1 %v3223_v45  ;;  %2921 = vmatprep.subr.bf16.mxu0 %v3230_v47  ;;  %v3329_v45 = vld [vmem:[%s4332_s1 + $0x318] sm:$0xff]  }
  0x8f   :  { %2985 = vmatprep.subr.bf16.mxu1 %v3231_v49  ;;  %v3302_v47 = vld [vmem:[%s4331_s0 + $0xf8] ss:$52 sps:$4 sm:$0xff]  }
  0x90   :  { %1771 = vmatmul.mubr.bf16.gmra.mrb[36].mxu0 %v3218_v46  ;;  %v3301_v46 = vld [vmem:[%s4331_s0 + $0xf0] ss:$52 sps:$4 sm:$0xff]  }
  0x91   :  { %1868 = vmatmul.mubr.bf16.gmra.mrb[36].mxu1 %v3219_v48  ;;  %1778 = vmatprep.mubr.bf16.mxu0 %v3224_v50  ;;  %v3304_v48 = vld [vmem:[%s4331_s0 + $0x15c] ss:$52 sps:$4 sm:$0xff]   ;;  %v3306_v49 = vld [vmem:[%s4331_s0 + $0x164] ss:$52 sps:$4 sm:$0xff]  }
  0x92   :  { %1875 = vmatprep.mubr.bf16.mxu1 %v3226_v51  ;;  %2922 = vmatpush3.bf16.msra.mxu0 %v3232_v52  ;;  %v3308_v50 = vld [vmem:[%s4331_s0 + $0x158] ss:$52 sps:$4 sm:$0xff]   ;;  %v3309_v51 = vld [vmem:[%s4331_s0 + $0x160] ss:$52 sps:$4 sm:$0xff]  }
  0x93   :  { %2986 = vmatpush3.bf16.msra.mxu1 %v3233_v53  ;;  %2923 = vmatprep.subr.bf16.mxu0 %v3240_v54  ;;  %v3310_v52 = vld [vmem:[%s4331_s0 + $0x1c4] ss:$52 sps:$4 sm:$0xff]   ;;  %v3312_v53 = vld [vmem:[%s4331_s0 + $0x1cc] ss:$52 sps:$4 sm:$0xff]  }
  0x94   :  { %2987 = vmatprep.subr.bf16.mxu1 %v3241_v55  ;;  %v3314_v54 = vld [vmem:[%s4331_s0 + $0x1c0] ss:$52 sps:$4 sm:$0xff]   ;;  %v3315_v55 = vld [vmem:[%s4331_s0 + $0x1c8] ss:$52 sps:$4 sm:$0xff]  }
  0x96   :  { %2924 = vmatpush3.bf16.msra.mxu0 %v3242_v57  ;;  %v3319_v57 = vld [vmem:[%s4331_s0 + $0x234] ss:$52 sps:$4 sm:$0xff]  }
  0x97   :  { %2988 = vmatpush3.bf16.msra.mxu1 %v3243_v58  ;;  %2925 = vmatprep.subr.bf16.mxu0 %v3250_v62  ;;  %v3321_v58 = vld [vmem:[%s4331_s0 + $0x228] ss:$52 sps:$4 sm:$0xff]   ;;  %v3327_v62 = vld [vmem:[%s4331_s0 + $0x290] ss:$52 sps:$4 sm:$0xff]  }
  0x98   :  { %1779 = vmatmul.mubr.bf16.gmra.mrb[40].mxu0 %v3228_v56  ;;  %2989 = vmatprep.subr.bf16.mxu1 %v3251_v63  ;;  %v3317_v56 = vld [vmem:[%s4331_s0 + $0x22c] ss:$52 sps:$4 sm:$0xff]  }
  0x99   :  { %1876 = vmatmul.mubr.bf16.gmra.mrb[40].mxu1 %v3229_v59  ;;  %1786 = vmatprep.mubr.bf16.mxu0 %v3234_v60  ;;  %v3322_v59 = vld [vmem:[%s4331_s0 + $0x230] ss:$52 sps:$4 sm:$0xff]   ;;  %v3323_v60 = vld [vmem:[%s4331_s0 + $0x294] ss:$52 sps:$4 sm:$0xff]   ;;  %v3328_v63 = vld [vmem:[%s4331_s0 + $0x298] ss:$52 sps:$4 sm:$0xff]  }
  0x9a   :  { %1883 = vmatprep.mubr.bf16.mxu1 %v3236_v61  ;;  %2926 = vmatpush3.bf16.msra.mxu0 %v3252_v0  ;;  %v3325_v61 = vld [vmem:[%s4331_s0 + $0x29c] ss:$52 sps:$4 sm:$0xff]  }
  0x9b   :  { %2990 = vmatpush3.bf16.msra.mxu1 %v3253_v1  ;;  %2927 = vmatprep.subr.bf16.mxu0 %v3260_v6  ;;  %v3330_v0 = vld [vmem:[%s4331_s0 + $0x2fc] ss:$52 sps:$4 sm:$0xff]   ;;  %v3332_v1 = vld [vmem:[%s4331_s0 + $0x304] ss:$52 sps:$4 sm:$0xff]  }
  0x9c   :  { %2991 = vmatprep.subr.bf16.mxu1 %v3261_v7  ;;  %v3338_v6 = vld [vmem:[%s4331_s0 + $0x98] ss:$52 sps:$4 sm:$0xff]  }
  0x9d   :  { %v3339_v7 = vld [vmem:[%s4331_s0 + $0x238] ss:$52 sps:$4 sm:$0xff]  }
  0x9e   :  { %2928 = vmatpush3.bf16.msra.mxu0 %v3262_v8  ;;  %v3340_v8 = vld [vmem:[%s4331_s0 + $0x100] ss:$52 sps:$4 sm:$0xff]  }
  0x9f   :  { %2992 = vmatpush3.bf16.msra.mxu1 %v3263_v9  ;;  %2929 = vmatprep.subr.bf16.mxu0 %v3270_v14  ;;  %v3341_v9 = vld [vmem:[%s4331_s0 + $0x2a0] ss:$52 sps:$4 sm:$0xff]  }
  0xa0   :  { %1787 = vmatmul.mubr.bf16.gmra.mrb[44].mxu0 %v3238_v2  ;;  %2993 = vmatprep.subr.bf16.mxu1 %v3271_v15  ;;  %v3334_v2 = vld [vmem:[%s4331_s0 + $0x2f8] ss:$52 sps:$4 sm:$0xff]  }
  0xa1   :  { %1884 = vmatmul.mubr.bf16.gmra.mrb[44].mxu1 %v3239_v3  ;;  %1794 = vmatprep.mubr.bf16.mxu0 %v3244_v4  ;;  %v3335_v3 = vld [vmem:[%s4331_s0 + $0x300] ss:$52 sps:$4 sm:$0xff]   ;;  %v3336_v4 = vld [vmem:[%s4331_s0 + $0x30] ss:$52 sps:$4 sm:$0xff]  }
  0xa2   :  { %1891 = vmatprep.mubr.bf16.mxu1 %v3246_v5  ;;  %2930 = vmatpush3.bf16.msra.mxu0 %v3272_v16  ;;  %v3337_v5 = vld [vmem:[%s4331_s0 + $0x1d0] ss:$52 sps:$4 sm:$0xff]  }
  0xa3   :  { %2994 = vmatpush3.bf16.msra.mxu1 %v3273_v17  ;;  %2931 = vmatprep.subr.bf16.mxu0 %v3280_v21 }
  0xa4   :  { %2995 = vmatprep.subr.bf16.mxu1 %v3281_v23 }
  0xa6   :  { %2932 = vmatpush3.bf16.msra.mxu0 %v3282_v24 }
  0xa7   :  { %2996 = vmatpush3.bf16.msra.mxu1 %v3283_v25  ;;  %3057 = vmatprep.subr.bf16.mxu0 %v3290_v26 }
  0xa8   :  { %1795 = vmatmul.mubr.bf16.gmra.mrb[48].mxu0 %v3248_v10  ;;  %3081 = vmatprep.subr.bf16.mxu1 %v3290_v26  ;;  %v3342_v10 = vld [vmem:[%s4331_s0 + $0x168] ss:$52 sps:$4 sm:$0xff]  }
  0xa9   :  { %1892 = vmatmul.mubr.bf16.gmra.mrb[48].mxu1 %v3249_v11  ;;  %1802 = vmatprep.mubr.bf16.mxu0 %v3254_v12  ;;  %v3343_v11 = vld [vmem:[%s4331_s0 + $0x308] ss:$52 sps:$4 sm:$0xff]  }
  0xaa   :  { %1899 = vmatprep.mubr.bf16.mxu1 %v3256_v13 }
  0xb0   :  { %1803 = vmatmul.mubr.bf16.gmra.mrb[52].mxu0 %v3258_v18 }
  0xb1   :  { %1900 = vmatmul.mubr.bf16.gmra.mrb[52].mxu1 %v3259_v19  ;;  %1810 = vmatprep.mubr.bf16.mxu0 %v3264_v20 }
  0xb2   :  { %1907 = vmatprep.mubr.bf16.mxu1 %v3266_v22 }
  0xb8   :  { %1811 = vmatmul.mubr.bf16.gmra.mrb[56].mxu0 %v3268_v27 }
  0xb9   :  { %1908 = vmatmul.mubr.bf16.gmra.mrb[56].mxu1 %v3269_v28  ;;  %1818 = vmatprep.mubr.bf16.mxu0 %v3274_v29 }
  0xba   :  { %1915 = vmatprep.mubr.bf16.mxu1 %v3276_v30 }
  0xc0   :  { %1819 = vmatmul.mubr.bf16.gmra.mrb[60].mxu0 %v3278_v31 }
  0xc1   :  { %1916 = vmatmul.mubr.bf16.gmra.mrb[60].mxu1 %v3279_v32  ;;  %1956 = vmatprep.mubr.bf16.mxu0 %v3286_v33 }
  0xc2   :  { %2053 = vmatprep.mubr.bf16.mxu1 %v3289_v34 }
  0xc8   :  { %1957 = vmatmul.mubr.bf16.vlgmr.msra.gmra.mrb[64].mxu0 %v3284_v35 }
  0xc9   :  { %2054 = vmatmul.mubr.bf16.vlgmr.msra.gmra.mrb[64].mxu1 %v3287_v36  ;;  %3058 = vmatpush3.bf16.msra.mxu0 %v3290_v26 }
  0xca   :  { %3085 = vmatpush3.bf16.msra.mxu1 %v3290_v26  ;;  %1964 = vmatprep.mubr.bf16.mxu0 %v3291_v37 }
  0xcb   :  { %2061 = vmatprep.mubr.bf16.mxu1 %v3293_v38  ;;  %3059 = vmatprep.subr.bf16.mxu0 %v3303_v39 }
  0xcc   :  { %3082 = vmatprep.subr.bf16.mxu1 %v3303_v39 }
  0xcd   :  { %3060 = vmatpush3.bf16.msra.mxu0 %v3303_v39 }
  0xce   :  { %3086 = vmatpush3.bf16.msra.mxu1 %v3303_v39  ;;  %3061 = vmatprep.subr.bf16.mxu0 %v3316_v40 }
  0xcf   :  { %3083 = vmatprep.subr.bf16.mxu1 %v3316_v40 }
  0xd0   :  { %1965 = vmatmul.mubr.bf16.gmra.mrb[68].mxu0 %v3295_v41 }
  0xd1   :  { %2062 = vmatmul.mubr.bf16.gmra.mrb[68].mxu1 %v3296_v42  ;;  %1972 = vmatprep.mubr.bf16.mxu0 %v3297_v43 }
  0xd2   :  { %2069 = vmatprep.mubr.bf16.mxu1 %v3299_v44  ;;  %3062 = vmatpush3.bf16.msra.mxu0 %v3316_v40 }
  0xd3   :  { %3087 = vmatpush3.bf16.msra.mxu1 %v3316_v40  ;;  %3063 = vmatprep.subr.bf16.mxu0 %v3329_v45 }
  0xd4   :  { %3084 = vmatprep.subr.bf16.mxu1 %v3329_v45 }
  0xd6   :  { %3064 = vmatpush3.bf16.msra.mxu0 %v3329_v45 }
  0xd7   :  { %3088 = vmatpush3.bf16.msra.mxu1 %v3329_v45 }
  0xd8   :  { %1973 = vmatmul.mubr.bf16.gmra.mrb[72].mxu0 %v3301_v46 }
  0xd9   :  { %2070 = vmatmul.mubr.bf16.gmra.mrb[72].mxu1 %v3302_v47  ;;  %1980 = vmatprep.mubr.bf16.mxu0 %v3304_v48 }
  0xda   :  { %2077 = vmatprep.mubr.bf16.mxu1 %v3306_v49 }
  0xe0   :  { %1981 = vmatmul.mubr.bf16.gmra.mrb[76].mxu0 %v3308_v50 }
  0xe1   :  { %2078 = vmatmul.mubr.bf16.gmra.mrb[76].mxu1 %v3309_v51  ;;  %1988 = vmatprep.mubr.bf16.mxu0 %v3310_v52 }
  0xe2   :  { %2085 = vmatprep.mubr.bf16.mxu1 %v3312_v53 }
  0xe8   :  { %1989 = vmatmul.mubr.bf16.gmra.mrb[80].mxu0 %v3314_v54 }
  0xe9   :  { %2086 = vmatmul.mubr.bf16.gmra.mrb[80].mxu1 %v3315_v55  ;;  %1996 = vmatprep.mubr.bf16.mxu0 %v3317_v56 }
  0xea   :  { %2093 = vmatprep.mubr.bf16.mxu1 %v3319_v57 }
  0xf0   :  { %1997 = vmatmul.mubr.bf16.gmra.mrb[84].mxu0 %v3321_v58 }
  0xf1   :  { %2094 = vmatmul.mubr.bf16.gmra.mrb[84].mxu1 %v3322_v59  ;;  %2004 = vmatprep.mubr.bf16.mxu0 %v3323_v60 }
  0xf2   :  { %2101 = vmatprep.mubr.bf16.mxu1 %v3325_v61 }
  0xf8   :  { %2005 = vmatmul.mubr.bf16.gmra.mrb[88].mxu0 %v3327_v62 }
  0xf9   :  { %2102 = vmatmul.mubr.bf16.gmra.mrb[88].mxu1 %v3328_v63  ;;  %2012 = vmatprep.mubr.bf16.mxu0 %v3330_v0 }
  0xfa   :  { %2109 = vmatprep.mubr.bf16.mxu1 %v3332_v1 }
 0x100   :  { %2013 = vmatmul.mubr.bf16.gmra.mrb[92].mxu0 %v3334_v2 }
 0x101   :  { %2110 = vmatmul.mubr.bf16.gmra.mrb[92].mxu1 %v3335_v3  ;;  %3065 = vmatprep.mubr.msk.bf16.mxu0 %vm46_vm0, %v3336_v4 }
 0x102   :  { %3073 = vmatprep.mubr.msk.bf16.mxu1 %vm46_vm0, %v3337_v5 }
 0x108   :  { %3066 = vmatmul.mubr.msk.bf16.vlgmr.msra.gmra.mrb[96].mxu0 %vm46_vm0, %v3338_v6 }
 0x109   :  { %3074 = vmatmul.mubr.msk.bf16.vlgmr.msra.gmra.mrb[96].mxu1 %vm46_vm0, %v3339_v7  ;;  %3069 = vmatprep.mubr.msk.bf16.mxu0 %vm46_vm0, %v3340_v8 }
 0x10a   :  { %3077 = vmatprep.mubr.msk.bf16.mxu1 %vm46_vm0, %v3341_v9 }
 0x110   :  { %3070 = vmatmul.mubr.msk.bf16.gmra.mrb[100].mxu0 %vm46_vm0, %v3342_v10 }
 0x111   :  { %3078 = vmatmul.mubr.msk.bf16.gmra.mrb[100].mxu1 %vm46_vm0, %v3343_v11 }
 0x11b   :  { %v2677_v12 = vpop.f32.mrb[0].mxu0 }
 0x11c   :  { %v2741_v13 = vpop.f32.mrb[0].mxu1  ;;  %v2678_v14 = vpop.f32.mrb[1].mxu0 }
 0x11d   :  { %v2679_v15 = vadd.f32 %v2678_v14, %v2677_v12  ;;  %v2742_v16 = vpop.f32.mrb[1].mxu1  ;;  %v2680_v17 = vpop.f32.mrb[2].mxu0 }
 0x11e   :  { %v2743_v18 = vadd.f32 %v2742_v16, %v2741_v13  ;;  %v2744_v19 = vpop.f32.mrb[2].mxu1  ;;  %v2681_v20 = vpop.f32.mrb[3].mxu0 }
 0x11f   :  { %v2682_v21 = vadd.f32 %v2681_v20, %v2680_v17  ;;  %v2745_v22 = vpop.f32.mrb[3].mxu1 }
 0x120   :  { %v4064_v23 = vadd.f32 %v2743_v18, %v2679_v15  ;;  %v2746_v24 = vadd.f32 %v2745_v22, %v2744_v19 }
 0x122   :  { %v4066_v25 = vadd.f32 %v2746_v24, %v2682_v21 }
 0x123   :  { %v2683_v26 = vpop.f32.mrb[4].mxu0 }
 0x124   :  { %v2747_v27 = vpop.f32.mrb[4].mxu1  ;;  %v2684_v28 = vpop.f32.mrb[5].mxu0 }
 0x125   :  { %v2685_v29 = vadd.f32 %v2684_v28, %v2683_v26  ;;  %v2748_v30 = vpop.f32.mrb[5].mxu1  ;;  %v2686_v31 = vpop.f32.mrb[6].mxu0 }
 0x126   :  { %v2749_v32 = vadd.f32 %v2748_v30, %v2747_v27  ;;  %v2750_v33 = vpop.f32.mrb[6].mxu1  ;;  %v2687_v34 = vpop.f32.mrb[7].mxu0 }
 0x127   :  { %v2688_v35 = vadd.f32 %v2687_v34, %v2686_v31  ;;  %v2751_v36 = vpop.f32.mrb[7].mxu1 }
 0x128   :  { %v4068_v37 = vadd.f32 %v2749_v32, %v2685_v29  ;;  %v2752_v38 = vadd.f32 %v2751_v36, %v2750_v33 }
 0x12a   :  { %v4070_v39 = vadd.f32 %v2752_v38, %v2688_v35 }
 0x12b   :  { %v2689_v40 = vpop.f32.mrb[8].mxu0 }
 0x12c   :  { %v2753_v41 = vpop.f32.mrb[8].mxu1  ;;  %v2690_v42 = vpop.f32.mrb[9].mxu0 }
 0x12d   :  { %v2691_v43 = vadd.f32 %v2690_v42, %v2689_v40  ;;  %v2754_v44 = vpop.f32.mrb[9].mxu1  ;;  %v2692_v45 = vpop.f32.mrb[10].mxu0 }
 0x12e   :  { %v2755_v46 = vadd.f32 %v2754_v44, %v2753_v41  ;;  %v2756_v47 = vpop.f32.mrb[10].mxu1  ;;  %v2693_v48 = vpop.f32.mrb[11].mxu0 }
 0x12f   :  { %v2694_v49 = vadd.f32 %v2693_v48, %v2692_v45  ;;  %v2757_v50 = vpop.f32.mrb[11].mxu1 }
 0x130   :  { %v4072_v51 = vadd.f32 %v2755_v46, %v2691_v43  ;;  %v2758_v52 = vadd.f32 %v2757_v50, %v2756_v47 }
 0x132   :  { %v4074_v53 = vadd.f32 %v2758_v52, %v2694_v49 }
 0x133   :  { %v2695_v54 = vpop.f32.mrb[12].mxu0 }
 0x134   :  { %v2759_v55 = vpop.f32.mrb[12].mxu1  ;;  %v2696_v56 = vpop.f32.mrb[13].mxu0 }
 0x135   :  { %v2697_v57 = vadd.f32 %v2696_v56, %v2695_v54  ;;  %v2760_v58 = vpop.f32.mrb[13].mxu1  ;;  %v2698_v59 = vpop.f32.mrb[14].mxu0 }
 0x136   :  { %v2761_v60 = vadd.f32 %v2760_v58, %v2759_v55  ;;  %v2762_v61 = vpop.f32.mrb[14].mxu1  ;;  %v2699_v62 = vpop.f32.mrb[15].mxu0 }
 0x137   :  { %v2700_v63 = vadd.f32 %v2699_v62, %v2698_v59  ;;  %v2763_v0 = vpop.f32.mrb[15].mxu1 }
 0x138   :  { %v4076_v1 = vadd.f32 %v2761_v60, %v2697_v57  ;;  %v2764_v2 = vadd.f32 %v2763_v0, %v2762_v61 }
 0x13a   :  { %v4078_v3 = vadd.f32 %v2764_v2, %v2700_v63  ;;  %v3394_v63 = vmov 0.0  }
 0x13b   :  { %v2701_v4 = vpop.f32.mrb[16].mxu0  ;;  %49 = vst.msk [vmem:[#allocation2 + $0x10] sm:$0xff] %vm46_vm0, %v3394_v63  ;;  %47 = vst.msk [vmem:[#allocation2] sm:$0xff] %vm46_vm0, %v3394_v63 }
 0x13c   :  { %v2765_v5 = vpop.f32.mrb[16].mxu1  ;;  %v2702_v6 = vpop.f32.mrb[17].mxu0  ;;  %48 = vst.msk [vmem:[#allocation2 + $0x8] sm:$0xff] %vm46_vm0, %v3394_v63  ;;  %50 = vst.msk [vmem:[#allocation2 + $0x18] sm:$0xff] %vm46_vm0, %v3394_v63 }
 0x13d   :  { %v2703_v7 = vadd.f32 %v2702_v6, %v2701_v4  ;;  %v2766_v8 = vpop.f32.mrb[17].mxu1  ;;  %v2704_v9 = vpop.f32.mrb[18].mxu0  ;;  %51 = vst.msk [vmem:[#allocation2 + $0x20] sm:$0xff] %vm46_vm0, %v3394_v63  ;;  %52 = vst.msk [vmem:[#allocation2 + $0x28] sm:$0xff] %vm46_vm0, %v3394_v63 }
 0x13e   :  { %v2767_v10 = vadd.f32 %v2766_v8, %v2765_v5  ;;  %v2768_v11 = vpop.f32.mrb[18].mxu1  ;;  %v2705_v12 = vpop.f32.mrb[19].mxu0  ;;  %53 = vst.msk [vmem:[#allocation2 + $0x30] sm:$0xff] %vm46_vm0, %v3394_v63  ;;  %54 = vst.msk [vmem:[#allocation2 + $0x38] sm:$0xff] %vm46_vm0, %v3394_v63 }
 0x13f   :  { %v2706_v13 = vadd.f32 %v2705_v12, %v2704_v9  ;;  %v2769_v14 = vpop.f32.mrb[19].mxu1  ;;  %55 = vst.msk [vmem:[#allocation2 + $0x40] sm:$0xff] %vm46_vm0, %v3394_v63  ;;  %56 = vst.msk [vmem:[#allocation2 + $0x48] sm:$0xff] %vm46_vm0, %v3394_v63 }
 0x140   :  { %v4080_v15 = vadd.f32 %v2767_v10, %v2703_v7  ;;  %v2770_v16 = vadd.f32 %v2769_v14, %v2768_v11  ;;  %57 = vst.msk [vmem:[#allocation2 + $0x50] sm:$0xff] %vm46_vm0, %v3394_v63  ;;  %58 = vst.msk [vmem:[#allocation2 + $0x58] sm:$0xff] %vm46_vm0, %v3394_v63 }
 0x141   :  { %59 = vst.msk [vmem:[#allocation2 + $0x60] sm:$0xff] %vm46_vm0, %v3394_v63  ;;  %60 = vst.msk [vmem:[#allocation2 + $0x68] sm:$0xff] %vm46_vm0, %v3394_v63 }
 0x142   :  { %v4082_v17 = vadd.f32 %v2770_v16, %v2706_v13  ;;  %61 = vst.msk [vmem:[#allocation2 + $0x70] sm:$0xff] %vm46_vm0, %v3394_v63  ;;  %62 = vst.msk [vmem:[#allocation2 + $0x78] sm:$0xff] %vm46_vm0, %v3394_v63 }
 0x143   :  { %v2707_v18 = vpop.f32.mrb[20].mxu0 }
 0x144   :  { %v2771_v19 = vpop.f32.mrb[20].mxu1  ;;  %v2708_v20 = vpop.f32.mrb[21].mxu0 }
 0x145   :  { %v2709_v21 = vadd.f32 %v2708_v20, %v2707_v18  ;;  %v2772_v22 = vpop.f32.mrb[21].mxu1  ;;  %v2710_v24 = vpop.f32.mrb[22].mxu0 }
 0x146   :  { %v2773_v26 = vadd.f32 %v2772_v22, %v2771_v19  ;;  %v2774_v27 = vpop.f32.mrb[22].mxu1  ;;  %v2711_v28 = vpop.f32.mrb[23].mxu0 }
 0x147   :  { %v2712_v29 = vadd.f32 %v2711_v28, %v2710_v24  ;;  %v2775_v30 = vpop.f32.mrb[23].mxu1 }
 0x148   :  { %v4084_v31 = vadd.f32 %v2773_v26, %v2709_v21  ;;  %v2776_v32 = vadd.f32 %v2775_v30, %v2774_v27 }
 0x14a   :  { %v4086_v33 = vadd.f32 %v2776_v32, %v2712_v29 }
 0x14b   :  { %v2713_v34 = vpop.f32.mrb[24].mxu0 }
 0x14c   :  { %v2777_v35 = vpop.f32.mrb[24].mxu1  ;;  %v2714_v36 = vpop.f32.mrb[25].mxu0 }
 0x14d   :  { %v2715_v38 = vadd.f32 %v2714_v36, %v2713_v34  ;;  %v2778_v40 = vpop.f32.mrb[25].mxu1  ;;  %v2716_v41 = vpop.f32.mrb[26].mxu0 }
 0x14e   :  { %v2779_v42 = vadd.f32 %v2778_v40, %v2777_v35  ;;  %v2780_v43 = vpop.f32.mrb[26].mxu1  ;;  %v2717_v44 = vpop.f32.mrb[27].mxu0 }
 0x14f   :  { %v2718_v45 = vadd.f32 %v2717_v44, %v2716_v41  ;;  %v2781_v46 = vpop.f32.mrb[27].mxu1 }
 0x150   :  { %v4088_v47 = vadd.f32 %v2779_v42, %v2715_v38  ;;  %v2782_v48 = vadd.f32 %v2781_v46, %v2780_v43 }
 0x152   :  { %v4090_v49 = vadd.f32 %v2782_v48, %v2718_v45 }
 0x153   :  { %v2719_v50 = vpop.f32.mrb[28].mxu0 }
 0x154   :  { %v2783_v52 = vpop.f32.mrb[28].mxu1  ;;  %v2720_v54 = vpop.f32.mrb[29].mxu0 }
 0x155   :  { %v2721_v55 = vadd.f32 %v2720_v54, %v2719_v50  ;;  %v2784_v56 = vpop.f32.mrb[29].mxu1  ;;  %v2722_v57 = vpop.f32.mrb[30].mxu0 }
 0x156   :  { %v2785_v58 = vadd.f32 %v2784_v56, %v2783_v52  ;;  %v2786_v59 = vpop.f32.mrb[30].mxu1  ;;  %v2723_v60 = vpop.f32.mrb[31].mxu0 }
 0x157   :  { %v2724_v61 = vadd.f32 %v2723_v60, %v2722_v57  ;;  %v2787_v62 = vpop.f32.mrb[31].mxu1 }
 0x158   :  { %v4108_v0 = vadd.f32 %v2785_v58, %v2721_v55  ;;  %v2788_v2 = vadd.f32 %v2787_v62, %v2786_v59 }
 0x15a   :  { %v4110_v4 = vadd.f32 %v2788_v2, %v2724_v61 }
 0x15b   :  { %v2805_v5 = vpop.f32.mrb[32].mxu0 }
 0x15c   :  { %v2869_v6 = vpop.f32.mrb[32].mxu1  ;;  %v2806_v7 = vpop.f32.mrb[33].mxu0 }
 0x15d   :  { %v2807_v8 = vadd.f32 %v2806_v7, %v2805_v5  ;;  %v2870_v9 = vpop.f32.mrb[33].mxu1  ;;  %v2808_v10 = vpop.f32.mrb[34].mxu0 }
 0x15e   :  { %v2871_v11 = vadd.f32 %v2870_v9, %v2869_v6  ;;  %v2872_v12 = vpop.f32.mrb[34].mxu1  ;;  %v2809_v13 = vpop.f32.mrb[35].mxu0 }
 0x15f   :  { %v1765_v14 = vadd.f32 %v2807_v8, %v4064_v23  ;;  %v2810_v16 = vadd.f32 %v2809_v13, %v2808_v10  ;;  %v2873_v18 = vpop.f32.mrb[35].mxu1 }
 0x160   :  { %v2874_v19 = vadd.f32 %v2873_v18, %v2872_v12 }
 0x161   :  { %v4113_v20 = vadd.f32 %v2871_v11, %v1765_v14  ;;  %v1768_v21 = vadd.f32 %v2810_v16, %v4066_v25 }
 0x163   :  { %v4116_v22 = vadd.f32 %v2874_v19, %v1768_v21  ;;  %v2811_v24 = vpop.f32.mrb[36].mxu0 }
 0x164   :  { %v2875_v26 = vpop.f32.mrb[36].mxu1  ;;  %v2812_v27 = vpop.f32.mrb[37].mxu0 }
 0x165   :  { %v2813_v28 = vadd.f32 %v2812_v27, %v2811_v24  ;;  %v2876_v29 = vpop.f32.mrb[37].mxu1  ;;  %v2814_v30 = vpop.f32.mrb[38].mxu0 }
 0x166   :  { %v2877_v32 = vadd.f32 %v2876_v29, %v2875_v26  ;;  %v2878_v34 = vpop.f32.mrb[38].mxu1  ;;  %v2815_v35 = vpop.f32.mrb[39].mxu0 }
 0x167   :  { %v1773_v23 = vadd.f32 %v2813_v28, %v4068_v37  ;;  %v2816_v36 = vadd.f32 %v2815_v35, %v2814_v30  ;;  %v2879_v38 = vpop.f32.mrb[39].mxu1 }
 0x168   :  { %v2880_v40 = vadd.f32 %v2879_v38, %v2878_v34 }
 0x169   :  { %v4119_v41 = vadd.f32 %v2877_v32, %v1773_v23  ;;  %v1776_v25 = vadd.f32 %v2816_v36, %v4070_v39 }
 0x16b   :  { %v4122_v42 = vadd.f32 %v2880_v40, %v1776_v25  ;;  %v2817_v43 = vpop.f32.mrb[40].mxu0 }
 0x16c   :  { %v2881_v44 = vpop.f32.mrb[40].mxu1  ;;  %v2818_v45 = vpop.f32.mrb[41].mxu0 }
 0x16d   :  { %v2819_v46 = vadd.f32 %v2818_v45, %v2817_v43  ;;  %v2882_v48 = vpop.f32.mrb[41].mxu1  ;;  %v2820_v50 = vpop.f32.mrb[42].mxu0 }
 0x16e   :  { %v2883_v52 = vadd.f32 %v2882_v48, %v2881_v44  ;;  %v2884_v54 = vpop.f32.mrb[42].mxu1  ;;  %v2821_v55 = vpop.f32.mrb[43].mxu0 }
 0x16f   :  { %v1781_v37 = vadd.f32 %v2819_v46, %v4072_v51  ;;  %v2822_v56 = vadd.f32 %v2821_v55, %v2820_v50  ;;  %v2885_v57 = vpop.f32.mrb[43].mxu1 }
 0x170   :  { %v2886_v58 = vadd.f32 %v2885_v57, %v2884_v54 }
 0x171   :  { %v4125_v59 = vadd.f32 %v2883_v52, %v1781_v37  ;;  %v1784_v39 = vadd.f32 %v2822_v56, %v4074_v53 }
 0x173   :  { %v4128_v60 = vadd.f32 %v2886_v58, %v1784_v39  ;;  %v2823_v61 = vpop.f32.mrb[44].mxu0 }
 0x174   :  { %v2887_v62 = vpop.f32.mrb[44].mxu1  ;;  %v2824_v63 = vpop.f32.mrb[45].mxu0 }
 0x175   :  { %v2825_v2 = vadd.f32 %v2824_v63, %v2823_v61  ;;  %v2888_v5 = vpop.f32.mrb[45].mxu1  ;;  %v2826_v6 = vpop.f32.mrb[46].mxu0 }
 0x176   :  { %v2889_v7 = vadd.f32 %v2888_v5, %v2887_v62  ;;  %v2890_v8 = vpop.f32.mrb[46].mxu1  ;;  %v2827_v9 = vpop.f32.mrb[47].mxu0 }
 0x177   :  { %v1789_v51 = vadd.f32 %v2825_v2, %v4076_v1  ;;  %v2828_v10 = vadd.f32 %v2827_v9, %v2826_v6  ;;  %v2891_v11 = vpop.f32.mrb[47].mxu1 }
 0x178   :  { %v2892_v12 = vadd.f32 %v2891_v11, %v2890_v8 }
 0x179   :  { %v4131_v13 = vadd.f32 %v2889_v7, %v1789_v51  ;;  %v1792_v53 = vadd.f32 %v2828_v10, %v4078_v3 }
 0x17b   :  { %v4134_v14 = vadd.f32 %v2892_v12, %v1792_v53  ;;  %v2829_v16 = vpop.f32.mrb[48].mxu0 }
 0x17c   :  { %v2893_v18 = vpop.f32.mrb[48].mxu1  ;;  %v2830_v19 = vpop.f32.mrb[49].mxu0 }
 0x17d   :  { %v2831_v21 = vadd.f32 %v2830_v19, %v2829_v16  ;;  %v2894_v24 = vpop.f32.mrb[49].mxu1  ;;  %v2832_v26 = vpop.f32.mrb[50].mxu0 }
 0x17e   :  { %v2895_v27 = vadd.f32 %v2894_v24, %v2893_v18  ;;  %v2896_v28 = vpop.f32.mrb[50].mxu1  ;;  %v2833_v29 = vpop.f32.mrb[51].mxu0 }
 0x17f   :  { %v1797_v1 = vadd.f32 %v2831_v21, %v4080_v15  ;;  %v2834_v30 = vadd.f32 %v2833_v29, %v2832_v26  ;;  %v2897_v32 = vpop.f32.mrb[51].mxu1 }
 0x180   :  { %v2898_v34 = vadd.f32 %v2897_v32, %v2896_v28 }
 0x181   :  { %v4137_v35 = vadd.f32 %v2895_v27, %v1797_v1  ;;  %v1800_v3 = vadd.f32 %v2834_v30, %v4082_v17 }
 0x183   :  { %v4140_v23 = vadd.f32 %v2898_v34, %v1800_v3  ;;  %v2835_v36 = vpop.f32.mrb[52].mxu0 }
 0x184   :  { %v2899_v38 = vpop.f32.mrb[52].mxu1  ;;  %v2836_v40 = vpop.f32.mrb[53].mxu0 }
 0x185   :  { %v2837_v25 = vadd.f32 %v2836_v40, %v2835_v36  ;;  %v2900_v43 = vpop.f32.mrb[53].mxu1  ;;  %v2838_v44 = vpop.f32.mrb[54].mxu0 }
 0x186   :  { %v2901_v45 = vadd.f32 %v2900_v43, %v2899_v38  ;;  %v2902_v46 = vpop.f32.mrb[54].mxu1  ;;  %v2839_v48 = vpop.f32.mrb[55].mxu0 }
 0x187   :  { %v1805_v15 = vadd.f32 %v2837_v25, %v4084_v31  ;;  %v2840_v50 = vadd.f32 %v2839_v48, %v2838_v44  ;;  %v2903_v52 = vpop.f32.mrb[55].mxu1 }
 0x188   :  { %v2904_v54 = vadd.f32 %v2903_v52, %v2902_v46 }
 0x189   :  { %v4143_v55 = vadd.f32 %v2901_v45, %v1805_v15  ;;  %v1808_v17 = vadd.f32 %v2840_v50, %v4086_v33 }
 0x18b   :  { %v4146_v37 = vadd.f32 %v2904_v54, %v1808_v17  ;;  %v2841_v56 = vpop.f32.mrb[56].mxu0 }
 0x18c   :  { %v2905_v57 = vpop.f32.mrb[56].mxu1  ;;  %v2842_v58 = vpop.f32.mrb[57].mxu0 }
 0x18d   :  { %v2843_v39 = vadd.f32 %v2842_v58, %v2841_v56  ;;  %v2906_v61 = vpop.f32.mrb[57].mxu1  ;;  %v2844_v62 = vpop.f32.mrb[58].mxu0 }
 0x18e   :  { %v2907_v63 = vadd.f32 %v2906_v61, %v2905_v57  ;;  %v2908_v2 = vpop.f32.mrb[58].mxu1  ;;  %v2845_v5 = vpop.f32.mrb[59].mxu0 }
 0x18f   :  { %v1813_v31 = vadd.f32 %v2843_v39, %v4088_v47  ;;  %v2846_v6 = vadd.f32 %v2845_v5, %v2844_v62  ;;  %v2909_v7 = vpop.f32.mrb[59].mxu1 }
 0x190   :  { %v2910_v8 = vadd.f32 %v2909_v7, %v2908_v2 }
 0x191   :  { %v4149_v9 = vadd.f32 %v2907_v63, %v1813_v31  ;;  %v1816_v33 = vadd.f32 %v2846_v6, %v4090_v49 }
 0x193   :  { %v4152_v51 = vadd.f32 %v2910_v8, %v1816_v33  ;;  %v2847_v10 = vpop.f32.mrb[60].mxu0 }
 0x194   :  { %v2911_v11 = vpop.f32.mrb[60].mxu1  ;;  %v2848_v12 = vpop.f32.mrb[61].mxu0 }
 0x195   :  { %v2849_v53 = vadd.f32 %v2848_v12, %v2847_v10  ;;  %v2912_v16 = vpop.f32.mrb[61].mxu1  ;;  %v2850_v18 = vpop.f32.mrb[62].mxu0 }
 0x196   :  { %v2913_v19 = vadd.f32 %v2912_v16, %v2911_v11  ;;  %v2914_v21 = vpop.f32.mrb[62].mxu1  ;;  %v2851_v24 = vpop.f32.mrb[63].mxu0 }
 0x197   :  { %v1821_v47 = vadd.f32 %v2849_v53, %v4108_v0  ;;  %v2852_v26 = vadd.f32 %v2851_v24, %v2850_v18  ;;  %v2915_v27 = vpop.f32.mrb[63].mxu1 }
 0x198   :  { %v2916_v28 = vadd.f32 %v2915_v27, %v2914_v21 }
 0x199   :  { %v4155_v29 = vadd.f32 %v2913_v19, %v1821_v47  ;;  %v1824_v49 = vadd.f32 %v2852_v26, %v4110_v4 }
 0x19b   :  { %v4158_v1 = vadd.f32 %v2916_v28, %v1824_v49  ;;  %v2933_v30 = vpop.f32.mrb[64].mxu0 }
 0x19c   :  { %v2997_v32 = vpop.f32.mrb[64].mxu1  ;;  %v2934_v34 = vpop.f32.mrb[65].mxu0 }
 0x19d   :  { %v2935_v3 = vadd.f32 %v2934_v34, %v2933_v30  ;;  %v2998_v36 = vpop.f32.mrb[65].mxu1  ;;  %v2936_v38 = vpop.f32.mrb[66].mxu0 }
 0x19e   :  { %v2999_v40 = vadd.f32 %v2998_v36, %v2997_v32  ;;  %v3000_v25 = vpop.f32.mrb[66].mxu1  ;;  %v2937_v43 = vpop.f32.mrb[67].mxu0 }
 0x19f   :  { %v1959_v0 = vadd.f32 %v2935_v3, %v4113_v20  ;;  %v2938_v44 = vadd.f32 %v2937_v43, %v2936_v38  ;;  %v3001_v45 = vpop.f32.mrb[67].mxu1 }
 0x1a0   :  { %v3002_v46 = vadd.f32 %v3001_v45, %v3000_v25 }
 0x1a1   :  { %v1962_v48 = vadd.f32 %v2938_v44, %v4116_v22  ;;  %v4162_v15 = vadd.f32 %v2999_v40, %v1959_v0 }
 0x1a3   :  { %v2939_v4 = vpop.f32.mrb[68].mxu0  ;;  %v4164_v50 = vadd.f32 %v3002_v46, %v1962_v48 }
 0x1a4   :  { %v3003_v52 = vpop.f32.mrb[68].mxu1  ;;  %v2940_v54 = vpop.f32.mrb[69].mxu0 }
 0x1a5   :  { %v2941_v17 = vadd.f32 %v2940_v54, %v2939_v4  ;;  %v3004_v56 = vpop.f32.mrb[69].mxu1  ;;  %v2942_v57 = vpop.f32.mrb[70].mxu0 }
 0x1a6   :  { %v3005_v58 = vadd.f32 %v3004_v56, %v3003_v52  ;;  %v3006_v39 = vpop.f32.mrb[70].mxu1  ;;  %v2943_v61 = vpop.f32.mrb[71].mxu0 }
 0x1a7   :  { %v1967_v20 = vadd.f32 %v2941_v17, %v4119_v41  ;;  %v2944_v62 = vadd.f32 %v2943_v61, %v2942_v57  ;;  %v3007_v63 = vpop.f32.mrb[71].mxu1 }
 0x1a8   :  { %v3008_v2 = vadd.f32 %v3007_v63, %v3006_v39 }
 0x1a9   :  { %v1970_v22 = vadd.f32 %v2944_v62, %v4122_v42  ;;  %v4168_v5 = vadd.f32 %v3005_v58, %v1967_v20 }
 0x1ab   :  { %v2945_v31 = vpop.f32.mrb[72].mxu0  ;;  %v4170_v6 = vadd.f32 %v3008_v2, %v1970_v22 }
 0x1ac   :  { %v3009_v7 = vpop.f32.mrb[72].mxu1  ;;  %v2946_v8 = vpop.f32.mrb[73].mxu0 }
 0x1ad   :  { %v2947_v33 = vadd.f32 %v2946_v8, %v2945_v31  ;;  %v3010_v10 = vpop.f32.mrb[73].mxu1  ;;  %v2948_v11 = vpop.f32.mrb[74].mxu0 }
 0x1ae   :  { %v3011_v12 = vadd.f32 %v3010_v10, %v3009_v7  ;;  %v3012_v53 = vpop.f32.mrb[74].mxu1  ;;  %v2949_v16 = vpop.f32.mrb[75].mxu0 }
 0x1af   :  { %v1975_v41 = vadd.f32 %v2947_v33, %v4125_v59  ;;  %v2950_v18 = vadd.f32 %v2949_v16, %v2948_v11  ;;  %v3013_v19 = vpop.f32.mrb[75].mxu1 }
 0x1b0   :  { %v3014_v21 = vadd.f32 %v3013_v19, %v3012_v53 }
 0x1b1   :  { %v1978_v42 = vadd.f32 %v2950_v18, %v4128_v60  ;;  %v4174_v24 = vadd.f32 %v3011_v12, %v1975_v41 }
 0x1b3   :  { %v2951_v47 = vpop.f32.mrb[76].mxu0  ;;  %v4176_v26 = vadd.f32 %v3014_v21, %v1978_v42 }
 0x1b4   :  { %v3015_v27 = vpop.f32.mrb[76].mxu1  ;;  %v2952_v28 = vpop.f32.mrb[77].mxu0 }
 0x1b5   :  { %v2953_v49 = vadd.f32 %v2952_v28, %v2951_v47  ;;  %v3016_v30 = vpop.f32.mrb[77].mxu1  ;;  %v2954_v32 = vpop.f32.mrb[78].mxu0 }
 0x1b6   :  { %v3017_v34 = vadd.f32 %v3016_v30, %v3015_v27  ;;  %v3018_v3 = vpop.f32.mrb[78].mxu1  ;;  %v2955_v36 = vpop.f32.mrb[79].mxu0 }
 0x1b7   :  { %v1983_v59 = vadd.f32 %v2953_v49, %v4131_v13  ;;  %v2956_v38 = vadd.f32 %v2955_v36, %v2954_v32  ;;  %v3019_v40 = vpop.f32.mrb[79].mxu1 }
 0x1b8   :  { %v3020_v25 = vadd.f32 %v3019_v40, %v3018_v3 }
 0x1b9   :  { %v1986_v60 = vadd.f32 %v2956_v38, %v4134_v14  ;;  %v4180_v43 = vadd.f32 %v3017_v34, %v1983_v59 }
 0x1bb   :  { %v2957_v0 = vpop.f32.mrb[80].mxu0  ;;  %v4182_v44 = vadd.f32 %v3020_v25, %v1986_v60 }
 0x1bc   :  { %v3021_v45 = vpop.f32.mrb[80].mxu1  ;;  %v2958_v46 = vpop.f32.mrb[81].mxu0 }
 0x1bd   :  { %v2959_v48 = vadd.f32 %v2958_v46, %v2957_v0  ;;  %v3022_v4 = vpop.f32.mrb[81].mxu1  ;;  %v2960_v52 = vpop.f32.mrb[82].mxu0 }
 0x1be   :  { %v3023_v54 = vadd.f32 %v3022_v4, %v3021_v45  ;;  %v3024_v17 = vpop.f32.mrb[82].mxu1  ;;  %v2961_v56 = vpop.f32.mrb[83].mxu0 }
 0x1bf   :  { %v1991_v13 = vadd.f32 %v2959_v48, %v4137_v35  ;;  %v2962_v57 = vadd.f32 %v2961_v56, %v2960_v52  ;;  %v3025_v58 = vpop.f32.mrb[83].mxu1 }
 0x1c0   :  { %v3026_v39 = vadd.f32 %v3025_v58, %v3024_v17 }
 0x1c1   :  { %v1994_v14 = vadd.f32 %v2962_v57, %v4140_v23  ;;  %v4186_v61 = vadd.f32 %v3023_v54, %v1991_v13  ;;  %v65_v13 = vld [vmem:[#allocation2 + $0x10] sm:$0xff] }
 0x1c3   :  { %v2963_v20 = vpop.f32.mrb[84].mxu0  ;;  %v4188_v62 = vadd.f32 %v3026_v39, %v1994_v14  ;;  %v73_v14 = vld [vmem:[#allocation2 + $0x50] sm:$0xff] }
 0x1c4   :  { %v3027_v63 = vpop.f32.mrb[84].mxu1  ;;  %v2964_v2 = vpop.f32.mrb[85].mxu0 }
 0x1c5   :  { %v2965_v22 = vadd.f32 %v2964_v2, %v2963_v20  ;;  %v3028_v31 = vpop.f32.mrb[85].mxu1  ;;  %v2966_v7 = vpop.f32.mrb[86].mxu0 }
 0x1c6   :  { %v3029_v8 = vadd.f32 %v3028_v31, %v3027_v63  ;;  %v3030_v33 = vpop.f32.mrb[86].mxu1  ;;  %v2967_v10 = vpop.f32.mrb[87].mxu0  ;;  %v63_v63 = vld [vmem:[#allocation2] sm:$0xff] }
 0x1c7   :  { %v1999_v35 = vadd.f32 %v2965_v22, %v4143_v55  ;;  %v2968_v11 = vadd.f32 %v2967_v10, %v2966_v7  ;;  %v3031_v12 = vpop.f32.mrb[87].mxu1 }
 0x1c8   :  { %v3032_v53 = vadd.f32 %v3031_v12, %v3030_v33 }
 0x1c9   :  { %v2002_v23 = vadd.f32 %v2968_v11, %v4146_v37  ;;  %v2096_v16 = vadd.f32 %v3029_v8, %v1999_v35  ;;  %v66_v8 = vld [vmem:[#allocation2 + $0x18] sm:$0xff] }
 0x1ca   :  { %v74_v11 = vld [vmem:[#allocation2 + $0x58] sm:$0xff] }
 0x1cb   :  { %v2969_v41 = vpop.f32.mrb[88].mxu0  ;;  %v2099_v18 = vadd.f32 %v3032_v53, %v2002_v23  ;;  %v64_v53 = vld [vmem:[#allocation2 + $0x8] sm:$0xff] }
 0x1cc   :  { %v3033_v19 = vpop.f32.mrb[88].mxu1  ;;  %v2970_v21 = vpop.f32.mrb[89].mxu0 }
 0x1cd   :  { %v2971_v42 = vadd.f32 %v2970_v21, %v2969_v41  ;;  %v3034_v47 = vpop.f32.mrb[89].mxu1  ;;  %v2972_v27 = vpop.f32.mrb[90].mxu0  ;;  %v72_v21 = vld [vmem:[#allocation2 + $0x48] sm:$0xff] }
 0x1ce   :  { %v3035_v28 = vadd.f32 %v3034_v47, %v3033_v19  ;;  %v3036_v49 = vpop.f32.mrb[90].mxu1  ;;  %v2973_v30 = vpop.f32.mrb[91].mxu0 }
 0x1cf   :  { %v2007_v32 = vadd.f32 %v2971_v42, %v4149_v9  ;;  %v2974_v34 = vadd.f32 %v2973_v30, %v2972_v27  ;;  %v3037_v55 = vpop.f32.mrb[91].mxu1 }
 0x1d0   :  { %v3038_v3 = vadd.f32 %v3037_v55, %v3036_v49  ;;  %v77_v49 = vld [vmem:[#allocation2 + $0x70] sm:$0xff]  ;;  %v4217_v55 = vld [vmem:[#allocation3] ss:$0 sm:$0xff] }
 0x1d1   :  { %v2010_v36 = vadd.f32 %v2974_v34, %v4152_v51  ;;  %v4194_v59 = vadd.f32 %v3035_v28, %v2007_v32  ;;  %v67_v32 = vld [vmem:[#allocation2 + $0x20] sm:$0xff] }
 0x1d3   :  { %v2975_v37 = vpop.f32.mrb[92].mxu0  ;;  %v4196_v38 = vadd.f32 %v3038_v3, %v2010_v36 }
 0x1d4   :  { %v3039_v40 = vpop.f32.mrb[92].mxu1  ;;  %v2976_v25 = vpop.f32.mrb[93].mxu0 }
 0x1d5   :  { %v2977_v60 = vadd.f32 %v2976_v25, %v2975_v37  ;;  %v3040_v0 = vpop.f32.mrb[93].mxu1  ;;  %v2978_v45 = vpop.f32.mrb[94].mxu0  ;;  %v75_v37 = vld [vmem:[#allocation2 + $0x60] sm:$0xff]  ;;  %v70_v25 = vld [vmem:[#allocation2 + $0x38] sm:$0xff] }
 0x1d6   :  { %v3041_v46 = vadd.f32 %v3040_v0, %v3039_v40  ;;  %v3042_v48 = vpop.f32.mrb[94].mxu1  ;;  %v2979_v4 = vpop.f32.mrb[95].mxu0 }
 0x1d7   :  { %v2015_v9 = vadd.f32 %v2977_v60, %v4155_v29  ;;  %v2980_v52 = vadd.f32 %v2979_v4, %v2978_v45  ;;  %v3043_v54 = vpop.f32.mrb[95].mxu1  ;;  %v71_v29 = vld [vmem:[#allocation2 + $0x40] sm:$0xff]  ;;  %v68_v4 = vld [vmem:[#allocation2 + $0x28] sm:$0xff] }
 0x1d8   :  { %v3044_v17 = vadd.f32 %v3043_v54, %v3042_v48  ;;  %v4222_v54 = vld [vmem:[#allocation5] ss:$0 sm:$0xff] }
 0x1d9   :  { %v2018_v51 = vadd.f32 %v2980_v52, %v4158_v1  ;;  %v2112_v56 = vadd.f32 %v3041_v46, %v2015_v9 }
 0x1db   :  { %v3067_v57 = vpop.f32.mrb[96].mxu0  ;;  %v4200_v58 = vadd.f32 %v3044_v17, %v2018_v51 }
 0x1dc   :  { %v2161_v39 = vadd.f32 %v3067_v57, %v4168_v5  ;;  %v3075_v20 = vpop.f32.mrb[96].mxu1  ;;  %v2152_v2 = vpop.f32.mrb[97].mxu0 }
 0x1dd   :  { %v2193_v22 = vadd.f32 %v3075_v20, %v2096_v16  ;;  %v2153_v31 = vadd.f32 %v2152_v2, %v4162_v15  ;;  %v2184_v7 = vpop.f32.mrb[97].mxu1  ;;  %v3068_v33 = vpop.f32.mrb[98].mxu0 }
 0x1de   :  { %v2217_v10 = vadd.f32 %v2161_v39, %v65_v13  ;;  %v2185_v1 = vadd.f32 %v2184_v7, %v4186_v61  ;;  %v2164_v35 = vadd.f32 %v3068_v33, %v4170_v6  ;;  %v3076_v12 = vpop.f32.mrb[98].mxu1  ;;  %v2155_v5 = vpop.f32.mrb[99].mxu0  ;;  %v76_v13 = vld [vmem:[#allocation2 + $0x68] sm:$0xff] }
 0x1df   :  { %v2225_v23 = vadd.f32 %v2193_v22, %v73_v14  ;;  %v2215_v41 = vadd.f32 %v2153_v31, %v63_v63  ;;  %v2196_v19 = vadd.f32 %v3076_v12, %v2099_v18  ;;  %v2156_v16 = vadd.f32 %v2155_v5, %v4164_v50  ;;  %v2187_v15 = vpop.f32.mrb[99].mxu1  ;;  %v69_v50 = vld [vmem:[#allocation2 + $0x30] sm:$0xff] }
 0x1e0   :  { %2233 = vst.msk [vmem:[#allocation2 + $0x10] sm:$0xff] %vm46_vm0, %v2217_v10  ;;  %v2223_v42 = vadd.f32 %v2185_v1, %v71_v29  ;;  %v2218_v47 = vadd.f32 %v2164_v35, %v66_v8  ;;  %v2188_v27 = vadd.f32 %v2187_v15, %v4188_v62 }
 0x1e1   :  { %2241 = vst.msk [vmem:[#allocation2 + $0x50] sm:$0xff] %vm46_vm0, %v2225_v23  ;;  %2231 = vst.msk [vmem:[#allocation2] sm:$0xff] %vm46_vm0, %v2215_v41  ;;  %v2226_v6 = vadd.f32 %v2196_v19, %v74_v11  ;;  %v2216_v61 = vadd.f32 %v2156_v16, %v64_v53 }
 0x1e2   :  { %2239 = vst.msk [vmem:[#allocation2 + $0x40] sm:$0xff] %vm46_vm0, %v2223_v42  ;;  %2234 = vst.msk [vmem:[#allocation2 + $0x18] sm:$0xff] %vm46_vm0, %v2218_v47  ;;  %v2224_v18 = vadd.f32 %v2188_v27, %v72_v21 }
 0x1e3   :  { %2242 = vst.msk [vmem:[#allocation2 + $0x58] sm:$0xff] %vm46_vm0, %v2226_v6  ;;  %2232 = vst.msk [vmem:[#allocation2 + $0x8] sm:$0xff] %vm46_vm0, %v2216_v61  ;;  %v3071_v28 = vpop.f32.mrb[100].mxu0 }
 0x1e4   :  { %2240 = vst.msk [vmem:[#allocation2 + $0x48] sm:$0xff] %vm46_vm0, %v2224_v18  ;;  %v2177_v62 = vadd.f32 %v3071_v28, %v4180_v43  ;;  %v3079_v30 = vpop.f32.mrb[100].mxu1  ;;  %v2168_v34 = vpop.f32.mrb[101].mxu0  ;;  %v78_v43 = vld [vmem:[#allocation2 + $0x78] sm:$0xff] }
 0x1e5   :  { %v2209_v3 = vadd.f32 %v3079_v30, %v2112_v56  ;;  %v2169_v36 = vadd.f32 %v2168_v34, %v4174_v24  ;;  %v2200_v40 = vpop.f32.mrb[101].mxu1  ;;  %v3072_v60 = vpop.f32.mrb[102].mxu0 }
 0x1e6   :  { %v2221_v0 = vadd.f32 %v2177_v62, %v69_v50  ;;  %v2201_v45 = vadd.f32 %v2200_v40, %v4194_v59  ;;  %v2180_v46 = vadd.f32 %v3072_v60, %v4182_v44  ;;  %v3080_v48 = vpop.f32.mrb[102].mxu1  ;;  %v2171_v9 = vpop.f32.mrb[103].mxu0 }
 0x1e7   :  { %v2252_v52 = vld [vmem:[#allocation2 + $0x10] sm:$0xff]  ;;  %v2229_v17 = vadd.f32 %v2209_v3, %v77_v49  ;;  %v2219_v51 = vadd.f32 %v2169_v36, %v67_v32  ;;  %v2212_v24 = vadd.f32 %v3080_v48, %v4200_v58  ;;  %v2172_v56 = vadd.f32 %v2171_v9, %v4176_v26  ;;  %v2203_v57 = vpop.f32.mrb[103].mxu1 }
 0x1e8   :  { %v2275_v39 = vmul.f32 %v4217_v55, %v2252_v52  ;;  %v2260_v59 = vld [vmem:[#allocation2 + $0x50] sm:$0xff]  ;;  %v2250_v14 = vld [vmem:[#allocation2] sm:$0xff]  ;;  %2237 = vst.msk [vmem:[#allocation2 + $0x30] sm:$0xff] %vm46_vm0, %v2221_v0  ;;  %v2227_v44 = vadd.f32 %v2201_v45, %v75_v37  ;;  %v2222_v20 = vadd.f32 %v2180_v46, %v70_v25  ;;  %v2204_v63 = vadd.f32 %v2203_v57, %v4196_v38 }
 0x1e9   :  { %v2283_v2 = vmul.f32 %v4217_v55, %v2260_v59  ;;  %v2273_v22 = vmul.f32 %v4217_v55, %v2250_v14  ;;  %v2258_v31 = vld [vmem:[#allocation2 + $0x40] sm:$0xff]  ;;  %v2253_v58 = vld [vmem:[#allocation2 + $0x18] sm:$0xff]  ;;  %2245 = vst.msk [vmem:[#allocation2 + $0x70] sm:$0xff] %vm46_vm0, %v2229_v17  ;;  %2235 = vst.msk [vmem:[#allocation2 + $0x20] sm:$0xff] %vm46_vm0, %v2219_v51  ;;  %v2230_v26 = vadd.f32 %v2212_v24, %v78_v43 }
 0x1ea   :  { %v2220_v29 = vadd.f32 %v2172_v56, %v68_v4  ;;  %v2298_v7 = vadd.f32 %v4222_v54, %v2275_v39  ;;  %v2281_v8 = vmul.f32 %v4217_v55, %v2258_v31  ;;  %v2276_v33 = vmul.f32 %v4217_v55, %v2253_v58  ;;  %v2261_v10 = vld [vmem:[#allocation2 + $0x58] sm:$0xff]  ;;  %v2251_v38 = vld [vmem:[#allocation2 + $0x8] sm:$0xff]  ;;  %2243 = vst.msk [vmem:[#allocation2 + $0x60] sm:$0xff] %vm46_vm0, %v2227_v44 }
 0x1eb   :  { %2238 = vst.msk [vmem:[#allocation2 + $0x38] sm:$0xff] %vm46_vm0, %v2222_v20  ;;  %v2228_v1 = vadd.f32 %v2204_v63, %v76_v13  ;;  %v2306_v35 = vadd.f32 %v4222_v54, %v2283_v2  ;;  %v2296_v11 = vadd.f32 %v4222_v54, %v2273_v22  ;;  %v2284_v12 = vmul.f32 %v4217_v55, %v2261_v10  ;;  %v2259_v5 = vld [vmem:[#allocation2 + $0x48] sm:$0xff] }
 0x1ec   :  { %v2274_v53 = vmul.f32 %v4217_v55, %v2251_v38  ;;  %2246 = vst.msk [vmem:[#allocation2 + $0x78] sm:$0xff] %vm46_vm0, %v2230_v26  ;;  %2236 = vst.msk [vmem:[#allocation2 + $0x28] sm:$0xff] %vm46_vm0, %v2220_v29  ;;  %v2314_v23 = vmax.f32 %v2298_v7, 0.0  ;;  %v2304_v41 = vadd.f32 %v4222_v54, %v2281_v8  ;;  %v2299_v19 = vadd.f32 %v4222_v54, %v2276_v33 }
 0x1ed   :  { %v2282_v16 = vmul.f32 %v4217_v55, %v2259_v5  ;;  %2244 = vst.msk [vmem:[#allocation2 + $0x68] sm:$0xff] %vm46_vm0, %v2228_v1  ;;  %v2322_v21 = vmax.f32 %v2306_v35, 0.0  ;;  %v2312_v15 = vmax.f32 %v2296_v11, 0.0  ;;  %v2307_v42 = vadd.f32 %v4222_v54, %v2284_v12 }
 0x1ee   :  { %v2297_v47 = vadd.f32 %v4222_v54, %v2274_v53  ;;  %v2647_v27 = vpack.c.bf16 %v2314_v23, %v2314_v23  ;;  %v2320_v6 = vmax.f32 %v2304_v41, 0.0  ;;  %v2315_v61 = vmax.f32 %v2299_v19, 0.0 }
 0x1ef   :  { %v2305_v18 = vadd.f32 %v4222_v54, %v2282_v16  ;;  %v2655_v50 = vpack.c.bf16 %v2322_v21, %v2322_v21  ;;  %v2645_v28 = vpack.c.bf16 %v2312_v15, %v2312_v15  ;;  %v2323_v62 = vmax.f32 %v2307_v42, 0.0  ;;  %v2256_v30 = vld [vmem:[#allocation2 + $0x30] sm:$0xff] }
 0x1f0   :  { %v2313_v49 = vmax.f32 %v2297_v47, 0.0  ;;  %2395 = vst.msk [vmem:[%s4335_s4 + $0x8] sm:$0xf] %vm2392_vm1, %v2647_v27  ;;  %v2653_v32 = vpack.c.bf16 %v2320_v6, %v2320_v6  ;;  %v2648_v34 = vpack.c.bf16 %v2315_v61, %v2315_v61  ;;  %v2279_v36 = vmul.f32 %v4217_v55, %v2256_v30  ;;  %v2264_v37 = vld [vmem:[#allocation2 + $0x70] sm:$0xff]  ;;  %v2254_v40 = vld [vmem:[#allocation2 + $0x20] sm:$0xff] }
 0x1f1   :  { %v2321_v3 = vmax.f32 %v2305_v18, 0.0  ;;  %2403 = vst.msk [vmem:[%s4335_s4 + $0x28] sm:$0xf] %vm2392_vm1, %v2655_v50  ;;  %2393 = vst.msk [vmem:[%s4335_s4] sm:$0xf] %vm2392_vm1, %v2645_v28  ;;  %v2656_v25 = vpack.c.bf16 %v2323_v62, %v2323_v62  ;;  %v2287_v0 = vmul.f32 %v4217_v55, %v2264_v37  ;;  %v2277_v45 = vmul.f32 %v4217_v55, %v2254_v40  ;;  %v2262_v46 = vld [vmem:[#allocation2 + $0x60] sm:$0xff] }
 0x1f2   :  { %v2646_v60 = vpack.c.bf16 %v2313_v49, %v2313_v49  ;;  %v2257_v43 = vld [vmem:[#allocation2 + $0x38] sm:$0xff]  ;;  %2401 = vst.msk [vmem:[%s4335_s4 + $0x20] sm:$0xf] %vm2392_vm1, %v2653_v32  ;;  %2396 = vst.msk [vmem:[%s4335_s4 + $0xc] sm:$0xf] %vm2392_vm1, %v2648_v34  ;;  %v2302_v4 = vadd.f32 %v4222_v54, %v2279_v36  ;;  %v2285_v9 = vmul.f32 %v4217_v55, %v2262_v46 }
 0x1f3   :  { %v2654_v48 = vpack.c.bf16 %v2321_v3, %v2321_v3  ;;  %v2280_v52 = vmul.f32 %v4217_v55, %v2257_v43  ;;  %v2265_v17 = vld [vmem:[#allocation2 + $0x78] sm:$0xff]  ;;  %v2255_v51 = vld [vmem:[#allocation2 + $0x28] sm:$0xff]  ;;  %2404 = vst.msk [vmem:[%s4335_s4 + $0x2c] sm:$0xf] %vm2392_vm1, %v2656_v25  ;;  %v2310_v24 = vadd.f32 %v4222_v54, %v2287_v0  ;;  %v2300_v56 = vadd.f32 %v4222_v54, %v2277_v45 }
 0x1f4   :  { %2394 = vst.msk [vmem:[%s4335_s4 + $0x4] sm:$0xf] %vm2392_vm1, %v2646_v60  ;;  %v2288_v13 = vmul.f32 %v4217_v55, %v2265_v17  ;;  %v2278_v57 = vmul.f32 %v4217_v55, %v2255_v51  ;;  %v2263_v39 = vld [vmem:[#allocation2 + $0x68] sm:$0xff]  ;;  %v2318_v59 = vmax.f32 %v2302_v4, 0.0  ;;  %v2308_v14 = vadd.f32 %v4222_v54, %v2285_v9 }
 0x1f5   :  { %2402 = vst.msk [vmem:[%s4335_s4 + $0x24] sm:$0xf] %vm2392_vm1, %v2654_v48  ;;  %v2303_v44 = vadd.f32 %v4222_v54, %v2280_v52  ;;  %v2286_v20 = vmul.f32 %v4217_v55, %v2263_v39  ;;  %v2326_v63 = vmax.f32 %v2310_v24, 0.0  ;;  %v2316_v2 = vmax.f32 %v2300_v56, 0.0 }
 0x1f6   :  { %v2311_v22 = vadd.f32 %v4222_v54, %v2288_v13  ;;  %v2301_v31 = vadd.f32 %v4222_v54, %v2278_v57  ;;  %v2651_v58 = vpack.c.bf16 %v2318_v59, %v2318_v59  ;;  %v2324_v26 = vmax.f32 %v2308_v14, 0.0 }
 0x1f7   :  { %v2319_v29 = vmax.f32 %v2303_v44, 0.0  ;;  %v2309_v7 = vadd.f32 %v4222_v54, %v2286_v20  ;;  %v2659_v8 = vpack.c.bf16 %v2326_v63, %v2326_v63  ;;  %v2649_v33 = vpack.c.bf16 %v2316_v2, %v2316_v2 }
 0x1f8   :  { %v2327_v10 = vmax.f32 %v2311_v22, 0.0  ;;  %v2317_v38 = vmax.f32 %v2301_v31, 0.0  ;;  %2399 = vst.msk [vmem:[%s4335_s4 + $0x18] sm:$0xf] %vm2392_vm1, %v2651_v58  ;;  %v2657_v55 = vpack.c.bf16 %v2324_v26, %v2324_v26 }
 0x1f9   :  { %v2652_v1 = vpack.c.bf16 %v2319_v29, %v2319_v29  ;;  %v2325_v35 = vmax.f32 %v2309_v7, 0.0  ;;  %2407 = vst.msk [vmem:[%s4335_s4 + $0x38] sm:$0xf] %vm2392_vm1, %v2659_v8  ;;  %2397 = vst.msk [vmem:[%s4335_s4 + $0x10] sm:$0xf] %vm2392_vm1, %v2649_v33 }
 0x1fa   :  { %v2660_v54 = vpack.c.bf16 %v2327_v10, %v2327_v10  ;;  %v2650_v11 = vpack.c.bf16 %v2317_v38, %v2317_v38  ;;  %2405 = vst.msk [vmem:[%s4335_s4 + $0x30] sm:$0xf] %vm2392_vm1, %v2657_v55 }
 0x1fb   :  { %2400 = vst.msk [vmem:[%s4335_s4 + $0x1c] sm:$0xf] %vm2392_vm1, %v2652_v1  ;;  %v2658_v12 = vpack.c.bf16 %v2325_v35, %v2325_v35 }
 0x1fc   :  { %2408 = vst.msk [vmem:[%s4335_s4 + $0x3c] sm:$0xf] %vm2392_vm1, %v2660_v54  ;;  %2398 = vst.msk [vmem:[%s4335_s4 + $0x14] sm:$0xf] %vm2392_vm1, %v2650_v11 }
 0x1fd   :  { %2406 = vst.msk [vmem:[%s4335_s4 + $0x34] sm:$0xf] %vm2392_vm1, %v2658_v12 }
 0x1fe   :  { %2413 = vsyncpa [#allocation4], 1 }
 0x1ff   :  { %2414 = vsyncpa [#allocation6], 1 }

// kernel: segmentnet_forward.25
= control target key start
LH: loop header
LB: loop body
LE: loop exit
PB: predicated region body
PF: predicated region fallthrough
CT: control target
= control target key end

     0   :  { %vm15_vm0 = vcmask 519168   ;;  %s46_s0 = inlined_call_operand.vmem [shape: bf16[4,8,64], index: 0, kind: input, shape index: {}]   ;;  %s47_s1 = inlined_call_operand.vmem [shape: bf16[8,64], index: 1, kind: output, shape index: {}]  }
   0x1   :  { %v8_v0 = vld [vmem:[%s46_s0] sm:$0xf]  ;;  %v9_v1 = vld [vmem:[%s46_s0 + $0x4] sm:$0xf]  ;;  %v10_v2 = vld [vmem:[%s46_s0 + $0x8] sm:$0xf] }
   0x2   :  { %v11_v3 = vld [vmem:[%s46_s0 + $0xc] sm:$0xf]  ;;  %v12_v4 = vmax.bf16 %v9_v1, %v8_v0 }
   0x3   :  { %v13_v5 = vmax.bf16 %v11_v3, %v10_v2 }
   0x5   :  { %v14_v6 = vmax.bf16 %v13_v5, %v12_v4 }
   0x7   :  { %16 = vst.msk [vmem:[%s47_s1] sm:$0xf] %vm15_vm0, %v14_v6 }

// kernel: segmentnet_forward.26
= control target key start
LH: loop header
LB: loop body
LE: loop exit
PB: predicated region body
PF: predicated region fallthrough
CT: control target
= control target key end

     0   :  { %10 = vsyncpa [#allocation3], 0  ;;  %s508_s0 = inlined_call_operand.vmem [shape: bf16[2,4,64], index: 0, kind: input, shape index: {}]   ;;  %s509_s1 = inlined_call_operand.vmem [shape: f32[64,4], index: 1, kind: input, shape index: {}]   ;;  %s510_s2 = inlined_call_operand.hbm [shape: f32[1,4], index: 2, kind: input, shape index: {}]   ;;  %s511_s3 = inlined_call_operand.hbm [shape: f32[4,64], index: 3, kind: input, shape index: {}]   ;;  %s512_s4 = inlined_call_operand.hbm [shape: f32[1,64], index: 4, kind: input, shape index: {}]   ;;  %s513_s5 = inlined_call_operand.vmem [shape: f32[2,64], index: 5, kind: output, shape index: {}]  }
   0x1   :  { %11 = vsyncpa [#allocation5], 0  ;;  %s403_s18 = smov [#allocation4]   ;;  %s404_s20 = smov [#allocation2]  }
   0x2   :  { %s32_s19 = sshll.u32 %s403_s18, 4  ;;  %s22_s21 = sshll.u32 %s404_s20, 4  ;;  %s33_s19 = int_to_ptr.vmem [resolvable:$true] %s32_s19  ;;  %s23_s21 = int_to_ptr.vmem [resolvable:$true] %s22_s21 }
   0x3   :  { %s333_s24 = scalar_lea.hbm %s511_s3, 64 }
   0x4   :  { %p334_p0 = scmp.ne.s32.totalorder %s511_s3, %s333_s24  ;;  %p337_p1 = scmp.lt.u32.totalorder %s333_s24, %s511_s3 }
   0x6   :  { %p339_p2 = pnand %p337_p1, %p334_p0 }
   0x8   :  { %342 = shalt.err (!%p339_p2)
}
   0x9   :  { %s343_s29 = scalar_lea.vmem %s33_s19, 64  ;;  %p348_p4 = scmp.lt.s32.totalorder %s33_s19, %s33_s19 }
   0xa   :  { %p344_p3 = scmp.ne.s32.totalorder %s33_s19, %s343_s29  ;;  %p349_p5 = scmp.lt.s32.totalorder %s343_s29, %s343_s29 }
   0xc   :  { %p350_p6 = por %p349_p5, %p348_p4 }
   0xe   :  { %p351_p7 = pnand %p350_p6, %p344_p3 }
  0x10   :  { %354 = shalt.err (!%p351_p7)
}
  0x11   :  { %35 = dma.hbm_to_vmem [thread:$0]  %s511_s3, 64, %s33_s19, [#allocation5]  }
  0x12   :  { %s355_s9 = scalar_lea.hbm %s510_s2, 16 }
  0x13   :  { %p356_p8 = scmp.ne.s32.totalorder %s510_s2, %s355_s9  ;;  %p359_p9 = scmp.lt.u32.totalorder %s355_s9, %s510_s2 }
  0x15   :  { %p361_p10 = pnand %p359_p9, %p356_p8 }
  0x17   :  { %364 = shalt.err (!%p361_p10)
}
  0x18   :  { %s365_s14 = scalar_lea.vmem %s23_s21, 16  ;;  %s369_s15 = scalar_lea.vmem %s23_s21, 32 }
  0x19   :  { %p366_p11 = scmp.ne.s32.totalorder %s23_s21, %s365_s14  ;;  %p370_p12 = scmp.lt.s32.totalorder %s23_s21, %s23_s21 }
  0x1a   :  { %p371_p13 = scmp.lt.s32.totalorder %s369_s15, %s365_s14 }
  0x1c   :  { %p372_p0 = por %p371_p13, %p370_p12 }
  0x1e   :  { %p373_p1 = pnand %p372_p0, %p366_p11 }
  0x20   :  { %376 = shalt.err (!%p373_p1)
}
  0x21   :  { %25 = dma.hbm_to_vmem [thread:$0]  %s510_s2, 16, %s23_s21, [#allocation3]  }
  0x22   :  { %s405_s17 = smov [#allocation6]   ;;  %s377_s22 = scalar_lea.hbm %s512_s4, 16 }
  0x23   :  { %s42_s18 = sshll.u32 %s405_s17, 4  ;;  %p378_p2 = scmp.ne.s32.totalorder %s512_s4, %s377_s22  ;;  %s43_s18 = int_to_ptr.vmem [resolvable:$true] %s42_s18 }
  0x24   :  { %p381_p3 = scmp.lt.u32.totalorder %s377_s22, %s512_s4 }
  0x26   :  { %p383_p4 = pnand %p381_p3, %p378_p2 }
  0x28   :  { %386 = shalt.err (!%p383_p4)
}
  0x29   :  { %s387_s27 = scalar_lea.vmem %s43_s18, 16  ;;  %s391_s2 = scalar_lea.vmem %s43_s18, 32 }
  0x2a   :  { %p388_p5 = scmp.ne.s32.totalorder %s43_s18, %s387_s27  ;;  %p392_p6 = scmp.lt.s32.totalorder %s43_s18, %s43_s18 }
  0x2b   :  { %p393_p7 = scmp.lt.s32.totalorder %s391_s2, %s387_s27 }
  0x2d   :  { %p394_p8 = por %p393_p7, %p392_p6 }
  0x2f   :  { %p395_p9 = pnand %p394_p8, %p388_p5 }
  0x31   :  { %398 = shalt.err (!%p395_p9)
}
  0x32   :  { %45 = dma.hbm_to_vmem [thread:$0]  %s512_s4, 16, %s43_s18, [#allocation5]  }
  0x33   :  { %399 = dma.done.wait [#allocation3], 16  }
  0x34   :  { %400 = vsyncadd [#allocation3], 4294967280 }
  0x35   :  { %401 = dma.done.wait [#allocation5], 80  }
  0x36   :  { %402 = vsyncadd [#allocation5], 4294967216  ;;  %v406_v0 = vmov 0.0|0.0   ;;  %vm407_vm0 = vmmov 0   ;;  %v408_v1 = vmov 0.0   ;;  %v77_v2 = vld [vmem:[%s509_s1] sm:$0xff] }
  0x37   :  { %311 = vmatprep.subr.bf16.mxu0 %v406_v0  ;;  %303 = vmatprep.mubr.msk.f32.mxu0 %vm407_vm0, %v408_v1  ;;  %v78_v3 = vld [vmem:[%s509_s1 + $0x8] sm:$0xff]  ;;  %v79_v4 = vld [vmem:[%s509_s1 + $0x10] sm:$0xff]  ;;  %v80_v6 = vld [vmem:[%s509_s1 + $0x18] sm:$0xff]  ;;  %vm59_vm1 = vcmask 519168   ;;  %vm94_vm2 = vcmask 1041409   ;;  %vm96_vm3 = vcmask 523264  }
  0x38   :  { %306 = vmatprep.subr.mxu1 %v408_v1  ;;  %308 = vmatprep.mubr.msk.f32.mxu1 %vm407_vm0, %v408_v1  ;;  %v312_v5 = vpack.c.bf16 %v78_v3, %v77_v2  ;;  %v55_v7 = vld [vmem:[%s508_s0] sm:$0x3]  ;;  %v315_v8 = vpack.c.bf16 %v80_v6, %v79_v4  ;;  %v56_v9 = vld [vmem:[%s508_s0 + $0x2] sm:$0x3]  ;;  %v82_v12 = vld [vmem:[%s509_s1 + $0x28] sm:$0xff]  ;;  %vm182_vm4 = vcmask 1043456  }
  0x39   :  { %v57_v10 = vunpack.c.l.bf16 %v55_v7  ;;  %v81_v11 = vld [vmem:[%s509_s1 + $0x20] sm:$0xff]  ;;  %v58_v13 = vunpack.c.l.bf16 %v56_v9  ;;  %v83_v19 = vld [vmem:[%s509_s1 + $0x30] sm:$0xff]  ;;  %v84_v20 = vld [vmem:[%s509_s1 + $0x38] sm:$0xff]  ;;  %vm178_vm5 = vcmask 31744   ;;  %vm262_vm6 = vcmask 517120  }
  0x3a   :  { %313 = vmatpush3.bf16.msra.mxu0 %v312_v5  ;;  %v318_v17 = vpack.c.bf16 %v82_v12, %v81_v11  ;;  %v321_v24 = vpack.c.bf16 %v84_v20, %v83_v19  ;;  %v170_v35 = vld [vmem:[#allocation4] sm:$0xf]  ;;  %v270_v36 = vld [vmem:[#allocation2] ss:$0 sm:$0xff]  ;;  %v272_v41 = vld [vmem:[#allocation6] ss:$0 sm:$0xff] }
  0x3b   :  { %314 = vmatprep.subr.bf16.mxu0 %v406_v0  ;;  %v60_v14 = vsel %vm59_vm1, %v57_v10, 0.0  ;;  %v67_v16 = vsel %vm59_vm1, %v58_v13, 0.0  ;;  %307 = vmatpush3.msk.msra.mxu1 %vm182_vm4, %v170_v35 }
  0x3c   :  { %v61_v15 = vrot.slane %v60_v14, 4  ;;  %v68_v18 = vrot.slane %v67_v16, 4 }
  0x3e   :  { %316 = vmatpush3.bf16.msra.mxu0 %v315_v8  ;;  %v62_v21 = vadd.f32 %v61_v15, %v60_v14  ;;  %v69_v22 = vadd.f32 %v68_v18, %v67_v16 }
  0x3f   :  { %317 = vmatprep.subr.bf16.mxu0 %v406_v0 }
  0x40   :  { %v63_v23 = vrot.slane %v62_v21, 2  ;;  %v70_v25 = vrot.slane %v69_v22, 2 }
  0x42   :  { %319 = vmatpush3.bf16.msra.mxu0 %v318_v17  ;;  %v64_v26 = vadd.f32 %v63_v23, %v62_v21  ;;  %v71_v27 = vadd.f32 %v70_v25, %v69_v22 }
  0x43   :  { %320 = vmatprep.subr.bf16.mxu0 %v406_v0 }
  0x44   :  { %v65_v28 = vrot.slane %v64_v26, 1  ;;  %v72_v29 = vrot.slane %v71_v27, 1 }
  0x46   :  { %322 = vmatpush3.bf16.msra.mxu0 %v321_v24  ;;  %v66_v30 = vadd.f32 %v65_v28, %v64_v26  ;;  %v73_v31 = vadd.f32 %v72_v29, %v71_v27 }
  0x48   :  { %v75_v32 = vmul.f32 0.25, %v66_v30  ;;  %v76_v33 = vmul.f32 0.25, %v73_v31 }
  0x4a   :  { %v95_v34 = vsel %vm94_vm2, %v76_v33, %v75_v32 }
  0x4b   :  { %304 = vmatmul.mubr.msk.f32.vlgmr.msra.gmra.mrb[0].mxu0 %vm96_vm3, %v95_v34 }
 0x11e   :  { %v165_v37 = vpop.f32.mrb[0].mxu0 }
 0x11f   :  { %v166_v38 = vadd.f32 %v270_v36, %v165_v37  ;;  %v305_v39 = vpop.f32.mrb[1].mxu0 }
 0x121   :  { %v169_v40 = vmax.f32 %v166_v38, 0.0 }
 0x123   :  { %309 = vmatmul.mubr.msk.f32.vlgmr.msra.gmra.mrb[0].mxu1 %vm178_vm5, %v169_v40 }
 0x1f6   :  { %v252_v42 = vpop.f32.mrb[0].mxu1 }
 0x1f7   :  { %v253_v43 = vadd.f32 %v272_v41, %v252_v42  ;;  %v310_v44 = vpop.f32.mrb[1].mxu1 }
 0x1f9   :  { %v275_v45 = vmul.f32 -1.442695, %v253_v43 }
 0x1fb   :  { %329 = vpow2.f32 %v275_v45 }
 0x205   :  { %v330_v46 = vpop.eup %329 }
 0x206   :  { %v259_v47 = vadd.f32 1.0, %v330_v46 }
 0x208   :  { %331 = vrcp.f32 %v259_v47 }
 0x212   :  { %v332_v48 = vpop.eup %331 }
 0x213   :  { %263 = vst.msk [vmem:[%s513_s5] sm:$0x3] %vm262_vm6, %v332_v48 }
 0x214   :  { %268 = vsyncpa [#allocation3], 1 }
 0x215   :  { %269 = vsyncpa [#allocation5], 1 }

// kernel: segmentnet_forward.21
= control target key start
LH: loop header
LB: loop body
LE: loop exit
PB: predicated region body
PF: predicated region fallthrough
CT: control target
= control target key end

     0   :  { %9 = vsyncpa [#allocation4], 0  ;;  %s2396_s0 = inlined_call_operand.vmem [shape: bf16[32,1600], index: 0, kind: input, shape index: {}]   ;;  %s2397_s1 = inlined_call_operand.vmem [shape: bf16[1600,64], index: 1, kind: input, shape index: {}]   ;;  %s2398_s2 = inlined_call_operand.hbm [shape: f32[1,64], index: 2, kind: input, shape index: {}]   ;;  %s2399_s3 = inlined_call_operand.hbm [shape: f32[1,64], index: 3, kind: input, shape index: {}]   ;;  %s2400_s4 = inlined_call_operand.vmem [shape: bf16[32,64], index: 4, kind: output, shape index: {}]  }
   0x1   :  { %10 = vsyncpa [#allocation6], 0  ;;  %s1944_s15 = smov [#allocation3]   ;;  %s1945_s17 = smov [#allocation5]  }
   0x2   :  { %s21_s16 = sshll.u32 %s1944_s15, 4  ;;  %s31_s18 = sshll.u32 %s1945_s17, 4  ;;  %s22_s16 = int_to_ptr.vmem [resolvable:$true] %s21_s16  ;;  %s32_s18 = int_to_ptr.vmem [resolvable:$true] %s31_s18 }
   0x3   :  { %s1896_s21 = scalar_lea.hbm %s2398_s2, 16 }
   0x4   :  { %p1897_p0 = scmp.ne.s32.totalorder %s2398_s2, %s1896_s21  ;;  %p1900_p1 = scmp.lt.u32.totalorder %s1896_s21, %s2398_s2 }
   0x6   :  { %p1902_p2 = pnand %p1900_p1, %p1897_p0 }
   0x8   :  { %1905 = shalt.err (!%p1902_p2)
}
   0x9   :  { %s1906_s26 = scalar_lea.vmem %s22_s16, 16  ;;  %s1910_s27 = scalar_lea.vmem %s22_s16, 32 }
   0xa   :  { %p1907_p3 = scmp.ne.s32.totalorder %s22_s16, %s1906_s26  ;;  %p1911_p4 = scmp.lt.s32.totalorder %s22_s16, %s22_s16 }
   0xb   :  { %p1912_p5 = scmp.lt.s32.totalorder %s1910_s27, %s1906_s26 }
   0xd   :  { %p1913_p6 = por %p1912_p5, %p1911_p4 }
   0xf   :  { %p1914_p7 = pnand %p1913_p6, %p1907_p3 }
  0x11   :  { %1917 = shalt.err (!%p1914_p7)
}
  0x12   :  { %24 = dma.hbm_to_vmem [thread:$0]  %s2398_s2, 16, %s22_s16, [#allocation4]  }
  0x13   :  { %s1918_s6 = scalar_lea.hbm %s2399_s3, 16 }
  0x14   :  { %p1919_p8 = scmp.ne.s32.totalorder %s2399_s3, %s1918_s6  ;;  %p1922_p9 = scmp.lt.u32.totalorder %s1918_s6, %s2399_s3 }
  0x16   :  { %p1924_p10 = pnand %p1922_p9, %p1919_p8 }
  0x18   :  { %1927 = shalt.err (!%p1924_p10)
}
  0x19   :  { %s1928_s11 = scalar_lea.vmem %s32_s18, 16  ;;  %s1932_s12 = scalar_lea.vmem %s32_s18, 32 }
  0x1a   :  { %p1929_p11 = scmp.ne.s32.totalorder %s32_s18, %s1928_s11  ;;  %p1933_p12 = scmp.lt.s32.totalorder %s32_s18, %s32_s18 }
  0x1b   :  { %p1934_p13 = scmp.lt.s32.totalorder %s1932_s12, %s1928_s11 }
  0x1d   :  { %p1935_p0 = por %p1934_p13, %p1933_p12 }
  0x1f   :  { %p1936_p1 = pnand %p1935_p0, %p1929_p11 }
  0x21   :  { %1939 = shalt.err (!%p1936_p1)
}
  0x22   :  { %34 = dma.hbm_to_vmem [thread:$0]  %s2399_s3, 16, %s32_s18, [#allocation6]  }
  0x23   :  { %1940 = dma.done.wait [#allocation4], 16  }
  0x24   :  { %1941 = vsyncadd [#allocation4], 4294967280 }
  0x25   :  { %1942 = dma.done.wait [#allocation6], 16  }
  0x26   :  { %1943 = vsyncadd [#allocation6], 4294967280  ;;  %v1758_v0 = vld [vmem:[%s2397_s1 + $0x40] sm:$0xff]   ;;  %v1762_v4 = vld [vmem:[%s2397_s1 + $0x48] sm:$0xff]   ;;  %vm46_vm0 = vcmask 523264   ;;  %vm1420_vm1 = vcmask 519168  }
  0x27   :  { %v1759_v1 = vld [vmem:[%s2397_s1 + $0xc0] sm:$0xff]   ;;  %1569 = vmatprep.subr.bf16.mxu0 %v1758_v0  ;;  %v1763_v5 = vld [vmem:[%s2397_s1 + $0xc8] sm:$0xff]   ;;  %v1766_v8 = vld [vmem:[%s2397_s1 + $0x50] sm:$0xff]  }
  0x28   :  { %v1760_v2 = vld [vmem:[%s2397_s1] sm:$0xff]   ;;  %1597 = vmatprep.subr.bf16.mxu1 %v1759_v1  ;;  %v1764_v6 = vld [vmem:[%s2397_s1 + $0x8] sm:$0xff]   ;;  %v1767_v9 = vld [vmem:[%s2397_s1 + $0xd0] sm:$0xff]  }
  0x29   :  { %v1761_v3 = vld [vmem:[%s2397_s1 + $0x80] sm:$0xff]   ;;  %1570 = vmatpush3.bf16.msra.mxu0 %v1760_v2  ;;  %v1765_v7 = vld [vmem:[%s2397_s1 + $0x88] sm:$0xff]   ;;  %v1768_v10 = vld [vmem:[%s2397_s1 + $0x10] sm:$0xff]  }
  0x2a   :  { %1598 = vmatpush3.bf16.msra.mxu1 %v1761_v3  ;;  %1571 = vmatprep.subr.bf16.mxu0 %v1762_v4  ;;  %v1769_v11 = vld [vmem:[%s2397_s1 + $0x90] sm:$0xff]   ;;  %v1770_v12 = vld [vmem:[%s2397_s1 + $0x58] sm:$0xff]   ;;  %v1774_v16 = vld [vmem:[%s2397_s1 + $0x60] sm:$0xff]  }
  0x2b   :  { %1599 = vmatprep.subr.bf16.mxu1 %v1763_v5  ;;  %v1771_v13 = vld [vmem:[%s2397_s1 + $0xd8] sm:$0xff]   ;;  %v1775_v17 = vld [vmem:[%s2397_s1 + $0xe0] sm:$0xff]   ;;  %v1778_v20 = vld [vmem:[%s2397_s1 + $0x68] sm:$0xff]  }
  0x2c   :  { %v1772_v14 = vld [vmem:[%s2397_s1 + $0x18] sm:$0xff]   ;;  %v1776_v18 = vld [vmem:[%s2397_s1 + $0x20] sm:$0xff]   ;;  %v1779_v21 = vld [vmem:[%s2397_s1 + $0xe8] sm:$0xff]  }
  0x2d   :  { %1572 = vmatpush3.bf16.msra.mxu0 %v1764_v6  ;;  %v1773_v15 = vld [vmem:[%s2397_s1 + $0x98] sm:$0xff]   ;;  %v1777_v19 = vld [vmem:[%s2397_s1 + $0xa0] sm:$0xff]   ;;  %v1780_v22 = vld [vmem:[%s2397_s1 + $0x28] sm:$0xff]  }
  0x2e   :  { %1600 = vmatpush3.bf16.msra.mxu1 %v1765_v7  ;;  %1573 = vmatprep.subr.bf16.mxu0 %v1766_v8  ;;  %v1781_v23 = vld [vmem:[%s2397_s1 + $0xa8] sm:$0xff]   ;;  %v1782_v24 = vld [vmem:[%s2397_s1 + $0x70] sm:$0xff]   ;;  %v1786_v28 = vld [vmem:[%s2397_s1 + $0x78] sm:$0xff]  }
  0x2f   :  { %1601 = vmatprep.subr.bf16.mxu1 %v1767_v9  ;;  %v1783_v25 = vld [vmem:[%s2397_s1 + $0xf0] sm:$0xff]   ;;  %v1787_v29 = vld [vmem:[%s2397_s1 + $0xf8] sm:$0xff]   ;;  %v1795_v35 = vld [vmem:[%s2396_s0 + $0xc] ss:$52 sps:$4 sm:$0xff]  }
  0x30   :  { %v1784_v26 = vld [vmem:[%s2397_s1 + $0x30] sm:$0xff]   ;;  %v1788_v30 = vld [vmem:[%s2397_s1 + $0x38] sm:$0xff]   ;;  %v1796_v36 = vld [vmem:[%s2397_s1 + $0x140] sm:$0xff]   ;;  %1101 = vmatprep.mubr.bf16.mxu1 %v1795_v35 }
  0x31   :  { %1574 = vmatpush3.bf16.msra.mxu0 %v1768_v10  ;;  %v1785_v27 = vld [vmem:[%s2397_s1 + $0xb0] sm:$0xff]   ;;  %v1789_v31 = vld [vmem:[%s2397_s1 + $0xb8] sm:$0xff]   ;;  %v1797_v37 = vld [vmem:[%s2397_s1 + $0x100] sm:$0xff]  }
  0x32   :  { %1602 = vmatpush3.bf16.msra.mxu1 %v1769_v11  ;;  %1575 = vmatprep.subr.bf16.mxu0 %v1770_v12  ;;  %v1790_v32 = vld [vmem:[%s2396_s0] ss:$52 sps:$4 sm:$0xff]   ;;  %v1792_v33 = vld [vmem:[%s2396_s0 + $0x4] ss:$52 sps:$4 sm:$0xff]   ;;  %v1793_v34 = vld [vmem:[%s2396_s0 + $0x8] ss:$52 sps:$4 sm:$0xff]  }
  0x33   :  { %1603 = vmatprep.subr.bf16.mxu1 %v1771_v13  ;;  %1052 = vmatprep.mubr.bf16.mxu0 %v1792_v33  ;;  %v1798_v38 = vld [vmem:[%s2397_s1 + $0x1c0] sm:$0xff]   ;;  %v1800_v40 = vld [vmem:[%s2397_s1 + $0x148] sm:$0xff]   ;;  %v1804_v44 = vld [vmem:[%s2397_s1 + $0x150] sm:$0xff]  }
  0x34   :  { %v1799_v39 = vld [vmem:[%s2397_s1 + $0x180] sm:$0xff]   ;;  %v1801_v41 = vld [vmem:[%s2397_s1 + $0x108] sm:$0xff]   ;;  %v1805_v45 = vld [vmem:[%s2397_s1 + $0x110] sm:$0xff]  }
  0x35   :  { %1576 = vmatpush3.bf16.msra.mxu0 %v1772_v14  ;;  %v1802_v42 = vld [vmem:[%s2397_s1 + $0x1c8] sm:$0xff]   ;;  %v1806_v46 = vld [vmem:[%s2397_s1 + $0x1d0] sm:$0xff]   ;;  %v1808_v48 = vld [vmem:[%s2397_s1 + $0x158] sm:$0xff]  }
  0x36   :  { %1604 = vmatpush3.bf16.msra.mxu1 %v1773_v15  ;;  %1577 = vmatprep.subr.bf16.mxu0 %v1774_v16  ;;  %v1803_v43 = vld [vmem:[%s2397_s1 + $0x188] sm:$0xff]   ;;  %v1807_v47 = vld [vmem:[%s2397_s1 + $0x190] sm:$0xff]   ;;  %v1809_v49 = vld [vmem:[%s2397_s1 + $0x118] sm:$0xff]  }
  0x37   :  { %1605 = vmatprep.subr.bf16.mxu1 %v1775_v17  ;;  %v1810_v50 = vld [vmem:[%s2397_s1 + $0x1d8] sm:$0xff]   ;;  %v1812_v52 = vld [vmem:[%s2397_s1 + $0x160] sm:$0xff]   ;;  %v1816_v56 = vld [vmem:[%s2397_s1 + $0x168] sm:$0xff]  }
  0x38   :  { %v1811_v51 = vld [vmem:[%s2397_s1 + $0x198] sm:$0xff]   ;;  %v1813_v53 = vld [vmem:[%s2397_s1 + $0x120] sm:$0xff]   ;;  %v1819_v58 = vld [vmem:[%s2396_s0 + $0x74] ss:$52 sps:$4 sm:$0xff]  }
  0x39   :  { %1578 = vmatpush3.bf16.msra.mxu0 %v1776_v18  ;;  %v1814_v54 = vld [vmem:[%s2397_s1 + $0x1e0] sm:$0xff]   ;;  %v1821_v59 = vld [vmem:[%s2397_s1 + $0x128] sm:$0xff]   ;;  %v1826_v0 = vld [vmem:[%s2397_s1 + $0x170] sm:$0xff]  }
  0x3a   :  { %1606 = vmatpush3.bf16.msra.mxu1 %v1777_v19  ;;  %1579 = vmatprep.subr.bf16.mxu0 %v1778_v20  ;;  %v1815_v55 = vld [vmem:[%s2397_s1 + $0x1a0] sm:$0xff]   ;;  %v1822_v60 = vld [vmem:[%s2396_s0 + $0x68] ss:$52 sps:$4 sm:$0xff]   ;;  %v1827_v1 = vld [vmem:[%s2397_s1 + $0x130] sm:$0xff]  }
  0x3b   :  { %1607 = vmatprep.subr.bf16.mxu1 %v1779_v21  ;;  %v1817_v57 = vld [vmem:[%s2396_s0 + $0x6c] ss:$52 sps:$4 sm:$0xff]   ;;  %v1823_v61 = vld [vmem:[%s2396_s0 + $0x70] ss:$52 sps:$4 sm:$0xff]   ;;  %v1830_v4 = vld [vmem:[%s2397_s1 + $0x178] sm:$0xff]  }
  0x3c   :  { %v1824_v62 = vld [vmem:[%s2397_s1 + $0x1e8] sm:$0xff]   ;;  %v1828_v2 = vld [vmem:[%s2397_s1 + $0x1f0] sm:$0xff]   ;;  %v1831_v5 = vld [vmem:[%s2397_s1 + $0x138] sm:$0xff]  }
  0x3d   :  { %1580 = vmatpush3.bf16.msra.mxu0 %v1780_v22  ;;  %v1825_v63 = vld [vmem:[%s2397_s1 + $0x1a8] sm:$0xff]   ;;  %v1829_v3 = vld [vmem:[%s2397_s1 + $0x1b0] sm:$0xff]   ;;  %v1832_v6 = vld [vmem:[%s2397_s1 + $0x1f8] sm:$0xff]  }
  0x3e   :  { %1608 = vmatpush3.bf16.msra.mxu1 %v1781_v23  ;;  %1581 = vmatprep.subr.bf16.mxu0 %v1782_v24  ;;  %v1833_v7 = vld [vmem:[%s2396_s0 + $0x10] ss:$52 sps:$4 sm:$0xff]   ;;  %v1835_v8 = vld [vmem:[%s2396_s0 + $0x14] ss:$52 sps:$4 sm:$0xff]   ;;  %v1836_v9 = vld [vmem:[%s2397_s1 + $0x1b8] sm:$0xff]  }
  0x3f   :  { %1609 = vmatprep.subr.bf16.mxu1 %v1783_v25  ;;  %v1837_v10 = vld [vmem:[%s2397_s1 + $0x240] sm:$0xff]   ;;  %v1838_v11 = vld [vmem:[%s2396_s0 + $0x18] ss:$52 sps:$4 sm:$0xff]   ;;  %v1840_v12 = vld [vmem:[%s2396_s0 + $0x1c] ss:$52 sps:$4 sm:$0xff]  }
  0x40   :  { %v1841_v13 = vld [vmem:[%s2397_s1 + $0x200] sm:$0xff]   ;;  %v1844_v16 = vld [vmem:[%s2397_s1 + $0x248] sm:$0xff]   ;;  %v1847_v19 = vld [vmem:[%s2396_s0 + $0x7c] ss:$52 sps:$4 sm:$0xff]  }
  0x41   :  { %1582 = vmatpush3.bf16.msra.mxu0 %v1784_v26  ;;  %v1842_v14 = vld [vmem:[%s2397_s1 + $0x2c0] sm:$0xff]   ;;  %v1845_v17 = vld [vmem:[%s2397_s1 + $0x208] sm:$0xff]   ;;  %v1851_v22 = vld [vmem:[%s2397_s1 + $0x250] sm:$0xff]  }
  0x42   :  { %1610 = vmatpush3.bf16.msra.mxu1 %v1785_v27  ;;  %1583 = vmatprep.subr.bf16.mxu0 %v1786_v28  ;;  %v1843_v15 = vld [vmem:[%s2397_s1 + $0x280] sm:$0xff]   ;;  %v1846_v18 = vld [vmem:[%s2397_s1 + $0x2c8] sm:$0xff]   ;;  %v1854_v24 = vld [vmem:[%s2397_s1 + $0x210] sm:$0xff]  }
  0x43   :  { %1611 = vmatprep.subr.bf16.mxu1 %v1787_v29  ;;  %v1849_v20 = vld [vmem:[%s2397_s1 + $0x288] sm:$0xff]   ;;  %v1852_v23 = vld [vmem:[%s2396_s0 + $0x84] ss:$52 sps:$4 sm:$0xff]   ;;  %v1855_v25 = vld [vmem:[%s2396_s0 + $0x80] ss:$52 sps:$4 sm:$0xff]  }
  0x44   :  { %v1850_v21 = vld [vmem:[%s2396_s0 + $0x78] ss:$52 sps:$4 sm:$0xff]   ;;  %v1856_v26 = vld [vmem:[%s2397_s1 + $0x2d0] sm:$0xff]   ;;  %v1863_v33 = vld [vmem:[%s2397_s1 + $0x220] sm:$0xff]  }
  0x45   :  { %1584 = vmatpush3.bf16.msra.mxu0 %v1788_v30  ;;  %v1857_v27 = vld [vmem:[%s2397_s1 + $0x290] sm:$0xff]   ;;  %v1858_v28 = vld [vmem:[%s2397_s1 + $0x258] sm:$0xff]   ;;  %v1865_v35 = vld [vmem:[%s2397_s1 + $0x2a0] sm:$0xff]  }
  0x46   :  { %1612 = vmatpush3.bf16.msra.mxu1 %v1789_v31  ;;  %1625 = vmatprep.subr.bf16.mxu0 %v1796_v36  ;;  %v1859_v29 = vld [vmem:[%s2397_s1 + $0x218] sm:$0xff]   ;;  %v1866_v36 = vld [vmem:[%s2397_s1 + $0x268] sm:$0xff]  }
  0x47   :  { %1653 = vmatprep.subr.bf16.mxu1 %v1798_v38  ;;  %v1860_v30 = vld [vmem:[%s2397_s1 + $0x2d8] sm:$0xff]   ;;  %v1868_v38 = vld [vmem:[%s2397_s1 + $0x2e8] sm:$0xff]  }
  0x48   :  { %1053 = vmatmul.mubr.bf16.vlgmr.msra.gmra.mrb[0].mxu0 %v1790_v32  ;;  %v1861_v31 = vld [vmem:[%s2397_s1 + $0x298] sm:$0xff]   ;;  %v1862_v32 = vld [vmem:[%s2397_s1 + $0x260] sm:$0xff]  }
  0x49   :  { %1102 = vmatmul.mubr.bf16.vlgmr.msra.gmra.mrb[0].mxu1 %v1793_v34  ;;  %1626 = vmatpush3.bf16.msra.mxu0 %v1797_v37  ;;  %v1864_v34 = vld [vmem:[%s2397_s1 + $0x2e0] sm:$0xff]   ;;  %v1867_v37 = vld [vmem:[%s2397_s1 + $0x228] sm:$0xff]  }
  0x4a   :  { %1654 = vmatpush3.bf16.msra.mxu1 %v1799_v39  ;;  %1627 = vmatprep.subr.bf16.mxu0 %v1800_v40  ;;  %v1869_v39 = vld [vmem:[%s2397_s1 + $0x2a8] sm:$0xff]   ;;  %v1870_v40 = vld [vmem:[%s2397_s1 + $0x270] sm:$0xff]  }
  0x4b   :  { %1655 = vmatprep.subr.bf16.mxu1 %v1802_v42  ;;  %1060 = vmatprep.mubr.bf16.mxu0 %v1817_v57  ;;  %v1872_v42 = vld [vmem:[%s2397_s1 + $0x2f0] sm:$0xff]  }
  0x4c   :  { %1109 = vmatprep.mubr.bf16.mxu1 %v1819_v58  ;;  %v1890_v57 = vld [vmem:[%s2396_s0 + $0x94] ss:$52 sps:$4 sm:$0xff]   ;;  %v1893_v58 = vld [vmem:[%s2397_s1 + $0x318] sm:$0xff]  }
  0x4d   :  { %1628 = vmatpush3.bf16.msra.mxu0 %v1801_v41  ;;  %v1871_v41 = vld [vmem:[%s2397_s1 + $0x230] sm:$0xff]  }
  0x4e   :  { %1656 = vmatpush3.bf16.msra.mxu1 %v1803_v43  ;;  %1629 = vmatprep.subr.bf16.mxu0 %v1804_v44  ;;  %v1873_v43 = vld [vmem:[%s2397_s1 + $0x2b0] sm:$0xff]   ;;  %v1874_v44 = vld [vmem:[%s2397_s1 + $0x278] sm:$0xff]  }
  0x4f   :  { %1657 = vmatprep.subr.bf16.mxu1 %v1806_v46  ;;  %v1876_v46 = vld [vmem:[%s2397_s1 + $0x2f8] sm:$0xff]  }
  0x50   :  { %1061 = vmatmul.mubr.bf16.gmra.mrb[4].mxu0 %v1822_v60  ;;  %v1892_v60 = vld [vmem:[%s2396_s0 + $0x90] ss:$52 sps:$4 sm:$0xff]  }
  0x51   :  { %1630 = vmatpush3.bf16.msra.mxu0 %v1805_v45  ;;  %1110 = vmatmul.mubr.bf16.gmra.mrb[4].mxu1 %v1823_v61  ;;  %v1875_v45 = vld [vmem:[%s2397_s1 + $0x238] sm:$0xff]  }
  0x52   :  { %1658 = vmatpush3.bf16.msra.mxu1 %v1807_v47  ;;  %1631 = vmatprep.subr.bf16.mxu0 %v1808_v48  ;;  %v1877_v47 = vld [vmem:[%s2396_s0 + $0x20] ss:$52 sps:$4 sm:$0xff]   ;;  %v1879_v48 = vld [vmem:[%s2396_s0 + $0x24] ss:$52 sps:$4 sm:$0xff]  }
  0x53   :  { %1659 = vmatprep.subr.bf16.mxu1 %v1810_v50  ;;  %1150 = vmatprep.mubr.bf16.mxu0 %v1835_v8  ;;  %v1881_v50 = vld [vmem:[%s2397_s1 + $0x300] sm:$0xff]   ;;  %v1895_v61 = vld [vmem:[%s2396_s0 + $0x98] ss:$52 sps:$4 sm:$0xff]  }
  0x54   :  { %1199 = vmatprep.mubr.bf16.mxu1 %v1840_v12 }
  0x55   :  { %1632 = vmatpush3.bf16.msra.mxu0 %v1809_v49  ;;  %v1880_v49 = vld [vmem:[%s2397_s1 + $0x2b8] sm:$0xff]  }
  0x56   :  { %1660 = vmatpush3.bf16.msra.mxu1 %v1811_v51  ;;  %1633 = vmatprep.subr.bf16.mxu0 %v1812_v52  ;;  %v1882_v51 = vld [vmem:[%s2396_s0 + $0x28] ss:$52 sps:$4 sm:$0xff]   ;;  %v1884_v52 = vld [vmem:[%s2396_s0 + $0x2c] ss:$52 sps:$4 sm:$0xff]  }
  0x57   :  { %1661 = vmatprep.subr.bf16.mxu1 %v1814_v54  ;;  %v1886_v54 = vld [vmem:[%s2396_s0 + $0x8c] ss:$52 sps:$4 sm:$0xff]  }
  0x59   :  { %1634 = vmatpush3.bf16.msra.mxu0 %v1813_v53  ;;  %v1885_v53 = vld [vmem:[%s2397_s1 + $0x308] sm:$0xff]  }
  0x5a   :  { %1662 = vmatpush3.bf16.msra.mxu1 %v1815_v55  ;;  %1635 = vmatprep.subr.bf16.mxu0 %v1816_v56  ;;  %v1888_v55 = vld [vmem:[%s2396_s0 + $0x88] ss:$52 sps:$4 sm:$0xff]   ;;  %v1889_v56 = vld [vmem:[%s2397_s1 + $0x310] sm:$0xff]  }
  0x5b   :  { %1663 = vmatprep.subr.bf16.mxu1 %v1824_v62  ;;  %v1946_v62 = vmov 0.0  }
  0x5c   :  { %49 = vst.msk [vmem:[#allocation2 + $0x10] sm:$0xff] %vm46_vm0, %v1946_v62  ;;  %47 = vst.msk [vmem:[#allocation2] sm:$0xff] %vm46_vm0, %v1946_v62 }
  0x5d   :  { %1636 = vmatpush3.bf16.msra.mxu0 %v1821_v59  ;;  %v1894_v59 = vld [vmem:[%s2396_s0 + $0x30] ss:$52 sps:$4 sm:$0xff]   ;;  %48 = vst.msk [vmem:[#allocation2 + $0x8] sm:$0xff] %vm46_vm0, %v1946_v62  ;;  %50 = vst.msk [vmem:[#allocation2 + $0x18] sm:$0xff] %vm46_vm0, %v1946_v62 }
  0x5e   :  { %1664 = vmatpush3.bf16.msra.mxu1 %v1825_v63  ;;  %1637 = vmatprep.subr.bf16.mxu0 %v1826_v0 }
  0x5f   :  { %1665 = vmatprep.subr.bf16.mxu1 %v1828_v2 }
  0x61   :  { %1638 = vmatpush3.bf16.msra.mxu0 %v1827_v1 }
  0x62   :  { %1666 = vmatpush3.bf16.msra.mxu1 %v1829_v3  ;;  %1639 = vmatprep.subr.bf16.mxu0 %v1830_v4 }
  0x63   :  { %1667 = vmatprep.subr.bf16.mxu1 %v1832_v6 }
  0x65   :  { %1640 = vmatpush3.bf16.msra.mxu0 %v1831_v5 }
  0x66   :  { %1668 = vmatpush3.bf16.msra.mxu1 %v1836_v9  ;;  %1681 = vmatprep.subr.bf16.mxu0 %v1837_v10 }
  0x67   :  { %1709 = vmatprep.subr.bf16.mxu1 %v1842_v14 }
  0x68   :  { %1151 = vmatmul.mubr.bf16.vlgmr.msra.gmra.mrb[8].mxu0 %v1833_v7 }
  0x69   :  { %1682 = vmatpush3.bf16.msra.mxu0 %v1841_v13  ;;  %1200 = vmatmul.mubr.bf16.vlgmr.msra.gmra.mrb[8].mxu1 %v1838_v11 }
  0x6a   :  { %1710 = vmatpush3.bf16.msra.mxu1 %v1843_v15  ;;  %1683 = vmatprep.subr.bf16.mxu0 %v1844_v16 }
  0x6b   :  { %1711 = vmatprep.subr.bf16.mxu1 %v1846_v18  ;;  %1158 = vmatprep.mubr.bf16.mxu0 %v1847_v19 }
  0x6c   :  { %1207 = vmatprep.mubr.bf16.mxu1 %v1852_v23 }
  0x6d   :  { %1684 = vmatpush3.bf16.msra.mxu0 %v1845_v17 }
  0x6e   :  { %1712 = vmatpush3.bf16.msra.mxu1 %v1849_v20  ;;  %1685 = vmatprep.subr.bf16.mxu0 %v1851_v22 }
  0x6f   :  { %1713 = vmatprep.subr.bf16.mxu1 %v1856_v26 }
  0x70   :  { %1159 = vmatmul.mubr.bf16.gmra.mrb[12].mxu0 %v1850_v21 }
  0x71   :  { %1686 = vmatpush3.bf16.msra.mxu0 %v1854_v24  ;;  %1208 = vmatmul.mubr.bf16.gmra.mrb[12].mxu1 %v1855_v25 }
  0x72   :  { %1714 = vmatpush3.bf16.msra.mxu1 %v1857_v27  ;;  %1687 = vmatprep.subr.bf16.mxu0 %v1858_v28 }
  0x73   :  { %1715 = vmatprep.subr.bf16.mxu1 %v1860_v30  ;;  %1248 = vmatprep.mubr.bf16.mxu0 %v1879_v48 }
  0x74   :  { %1297 = vmatprep.mubr.bf16.mxu1 %v1884_v52 }
  0x75   :  { %1688 = vmatpush3.bf16.msra.mxu0 %v1859_v29 }
  0x76   :  { %1716 = vmatpush3.bf16.msra.mxu1 %v1861_v31  ;;  %1689 = vmatprep.subr.bf16.mxu0 %v1862_v32 }
  0x77   :  { %1717 = vmatprep.subr.bf16.mxu1 %v1864_v34 }
  0x79   :  { %1690 = vmatpush3.bf16.msra.mxu0 %v1863_v33 }
  0x7a   :  { %1718 = vmatpush3.bf16.msra.mxu1 %v1865_v35  ;;  %1691 = vmatprep.subr.bf16.mxu0 %v1866_v36 }
  0x7b   :  { %1719 = vmatprep.subr.bf16.mxu1 %v1868_v38 }
  0x7d   :  { %1692 = vmatpush3.bf16.msra.mxu0 %v1867_v37 }
  0x7e   :  { %1720 = vmatpush3.bf16.msra.mxu1 %v1869_v39  ;;  %1693 = vmatprep.subr.bf16.mxu0 %v1870_v40 }
  0x7f   :  { %1721 = vmatprep.subr.bf16.mxu1 %v1872_v42 }
  0x81   :  { %1694 = vmatpush3.bf16.msra.mxu0 %v1871_v41 }
  0x82   :  { %1722 = vmatpush3.bf16.msra.mxu1 %v1873_v43  ;;  %1695 = vmatprep.subr.bf16.mxu0 %v1874_v44 }
  0x83   :  { %1723 = vmatprep.subr.bf16.mxu1 %v1876_v46 }
  0x85   :  { %1696 = vmatpush3.bf16.msra.mxu0 %v1875_v45 }
  0x86   :  { %1724 = vmatpush3.bf16.msra.mxu1 %v1880_v49  ;;  %1743 = vmatprep.subr.bf16.mxu0 %v1881_v50 }
  0x88   :  { %1249 = vmatmul.mubr.bf16.vlgmr.msra.gmra.mrb[16].mxu0 %v1877_v47 }
  0x89   :  { %1744 = vmatpush3.bf16.msra.mxu0 %v1881_v50  ;;  %1298 = vmatmul.mubr.bf16.vlgmr.msra.gmra.mrb[16].mxu1 %v1882_v51 }
  0x8a   :  { %1745 = vmatprep.subr.bf16.mxu0 %v1885_v53  ;;  %1256 = vmatprep.mubr.bf16.mxu0 %v1886_v54 }
  0x8b   :  { %1305 = vmatprep.mubr.bf16.mxu1 %v1890_v57 }
  0x8d   :  { %1746 = vmatpush3.bf16.msra.mxu0 %v1885_v53 }
  0x8e   :  { %1747 = vmatprep.subr.bf16.mxu0 %v1889_v56 }
  0x90   :  { %1257 = vmatmul.mubr.bf16.gmra.mrb[20].mxu0 %v1888_v55 }
  0x91   :  { %1751 = vmatprep.mubr.msk.bf16.mxu0 %vm46_vm0, %v1894_v59  ;;  %1748 = vmatpush3.bf16.msra.mxu0 %v1889_v56 }
  0x92   :  { %1749 = vmatprep.subr.bf16.mxu0 %v1893_v58  ;;  %1306 = vmatmul.mubr.bf16.gmra.mrb[20].mxu1 %v1892_v60 }
  0x95   :  { %1750 = vmatpush3.bf16.msra.mxu0 %v1893_v58 }
  0x98   :  { %1752 = vmatmul.mubr.msk.bf16.vlgmr.msra.gmra.mrb[24].mxu0 %vm46_vm0, %v1895_v61 }
 0x11b   :  { %v1585_v63 = vpop.f32.mrb[0].mxu0 }
 0x11c   :  { %v1613_v0 = vpop.f32.mrb[0].mxu1  ;;  %v1586_v1 = vpop.f32.mrb[1].mxu0 }
 0x11d   :  { %v1587_v2 = vadd.f32 %v1586_v1, %v1585_v63  ;;  %v1614_v3 = vpop.f32.mrb[1].mxu1  ;;  %v1588_v4 = vpop.f32.mrb[2].mxu0 }
 0x11e   :  { %v1615_v5 = vadd.f32 %v1614_v3, %v1613_v0  ;;  %v1616_v6 = vpop.f32.mrb[2].mxu1  ;;  %v1589_v7 = vpop.f32.mrb[3].mxu0 }
 0x11f   :  { %v1590_v8 = vadd.f32 %v1589_v7, %v1588_v4  ;;  %v1617_v9 = vpop.f32.mrb[3].mxu1 }
 0x120   :  { %v1104_v10 = vadd.f32 %v1615_v5, %v1587_v2  ;;  %v1618_v11 = vadd.f32 %v1617_v9, %v1616_v6 }
 0x122   :  { %v1107_v12 = vadd.f32 %v1618_v11, %v1590_v8 }
 0x123   :  { %v1591_v13 = vpop.f32.mrb[4].mxu0 }
 0x124   :  { %v1619_v14 = vpop.f32.mrb[4].mxu1  ;;  %v1592_v15 = vpop.f32.mrb[5].mxu0 }
 0x125   :  { %v1620_v16 = vpop.f32.mrb[5].mxu1  ;;  %v1593_v17 = vadd.f32 %v1592_v15, %v1591_v13  ;;  %v1594_v19 = vpop.f32.mrb[6].mxu0 }
 0x126   :  { %v1621_v18 = vadd.f32 %v1620_v16, %v1619_v14  ;;  %v1622_v20 = vpop.f32.mrb[6].mxu1  ;;  %v1595_v21 = vpop.f32.mrb[7].mxu0 }
 0x127   :  { %v1623_v22 = vpop.f32.mrb[7].mxu1  ;;  %v1596_v24 = vadd.f32 %v1595_v21, %v1594_v19 }
 0x128   :  { %v1112_v23 = vadd.f32 %v1621_v18, %v1593_v17  ;;  %v1624_v25 = vadd.f32 %v1623_v22, %v1622_v20 }
 0x12a   :  { %v1115_v26 = vadd.f32 %v1624_v25, %v1596_v24 }
 0x13b   :  { %v1641_v27 = vpop.f32.mrb[8].mxu0 }
 0x13c   :  { %v1642_v28 = vpop.f32.mrb[9].mxu0  ;;  %v1669_v31 = vpop.f32.mrb[8].mxu1 }
 0x13d   :  { %v1643_v29 = vadd.f32 %v1642_v28, %v1641_v27  ;;  %v1644_v30 = vpop.f32.mrb[10].mxu0  ;;  %v1670_v35 = vpop.f32.mrb[9].mxu1 }
 0x13e   :  { %v1645_v32 = vpop.f32.mrb[11].mxu0  ;;  %v1671_v36 = vadd.f32 %v1670_v35, %v1669_v31  ;;  %v1672_v37 = vpop.f32.mrb[10].mxu1 }
 0x13f   :  { %v1153_v33 = vadd.f32 %v1643_v29, %v1104_v10  ;;  %v1646_v34 = vadd.f32 %v1645_v32, %v1644_v30  ;;  %v1673_v39 = vpop.f32.mrb[11].mxu1  ;;  %v51_v29 = vld [vmem:[#allocation2] sm:$0xff] }
 0x140   :  { %v1674_v41 = vadd.f32 %v1673_v39, %v1672_v37  ;;  %v52_v37 = vld [vmem:[#allocation2 + $0x8] sm:$0xff] }
 0x141   :  { %v1156_v38 = vadd.f32 %v1646_v34, %v1107_v12  ;;  %v1202_v40 = vadd.f32 %v1671_v36, %v1153_v33  ;;  %v54_v33 = vld [vmem:[#allocation2 + $0x18] sm:$0xff] }
 0x143   :  { %v1205_v42 = vadd.f32 %v1674_v41, %v1156_v38  ;;  %v1647_v43 = vpop.f32.mrb[12].mxu0 }
 0x144   :  { %v1648_v44 = vpop.f32.mrb[13].mxu0  ;;  %v1675_v47 = vpop.f32.mrb[12].mxu1 }
 0x145   :  { %v1649_v45 = vadd.f32 %v1648_v44, %v1647_v43  ;;  %v1650_v46 = vpop.f32.mrb[14].mxu0  ;;  %v1676_v51 = vpop.f32.mrb[13].mxu1  ;;  %v1559_v43 = vld [vmem:[#allocation3] ss:$0 sm:$0xff] }
 0x146   :  { %v1651_v48 = vpop.f32.mrb[15].mxu0  ;;  %v1677_v52 = vadd.f32 %v1676_v51, %v1675_v47  ;;  %v1678_v53 = vpop.f32.mrb[14].mxu1 }
 0x147   :  { %v1161_v49 = vadd.f32 %v1649_v45, %v1112_v23  ;;  %v1652_v50 = vadd.f32 %v1651_v48, %v1650_v46  ;;  %v1679_v55 = vpop.f32.mrb[15].mxu1  ;;  %v1560_v45 = vld [vmem:[#allocation5] ss:$0 sm:$0xff] }
 0x148   :  { %v1680_v57 = vadd.f32 %v1679_v55, %v1678_v53 }
 0x149   :  { %v1164_v54 = vadd.f32 %v1652_v50, %v1115_v26  ;;  %v1210_v56 = vadd.f32 %v1677_v52, %v1161_v49  ;;  %v53_v26 = vld [vmem:[#allocation2 + $0x10] sm:$0xff] }
 0x14b   :  { %v1213_v58 = vadd.f32 %v1680_v57, %v1164_v54 }
 0x15b   :  { %v1697_v59 = vpop.f32.mrb[16].mxu0 }
 0x15c   :  { %v1698_v60 = vpop.f32.mrb[17].mxu0  ;;  %v1725_v1 = vpop.f32.mrb[16].mxu1 }
 0x15d   :  { %v1699_v61 = vadd.f32 %v1698_v60, %v1697_v59  ;;  %v1700_v62 = vpop.f32.mrb[18].mxu0  ;;  %v1726_v3 = vpop.f32.mrb[17].mxu1 }
 0x15e   :  { %v1701_v63 = vpop.f32.mrb[19].mxu0  ;;  %v1727_v5 = vadd.f32 %v1726_v3, %v1725_v1  ;;  %v1728_v6 = vpop.f32.mrb[18].mxu1 }
 0x15f   :  { %v1251_v0 = vadd.f32 %v1699_v61, %v1202_v40  ;;  %v1702_v2 = vadd.f32 %v1701_v63, %v1700_v62  ;;  %v1729_v7 = vpop.f32.mrb[19].mxu1 }
 0x160   :  { %v1730_v8 = vadd.f32 %v1729_v7, %v1728_v6 }
 0x161   :  { %v1254_v4 = vadd.f32 %v1702_v2, %v1205_v42  ;;  %v1300_v10 = vadd.f32 %v1727_v5, %v1251_v0 }
 0x163   :  { %v1703_v9 = vpop.f32.mrb[20].mxu0  ;;  %v1303_v14 = vadd.f32 %v1730_v8, %v1254_v4 }
 0x164   :  { %v1704_v11 = vpop.f32.mrb[21].mxu0 }
 0x165   :  { %v1705_v12 = vadd.f32 %v1704_v11, %v1703_v9  ;;  %v1706_v13 = vpop.f32.mrb[22].mxu0  ;;  %v1731_v17 = vpop.f32.mrb[20].mxu1 }
 0x166   :  { %v1707_v15 = vpop.f32.mrb[23].mxu0  ;;  %v1732_v19 = vpop.f32.mrb[21].mxu1 }
 0x167   :  { %v1259_v16 = vadd.f32 %v1705_v12, %v1210_v56  ;;  %v1708_v18 = vadd.f32 %v1707_v15, %v1706_v13  ;;  %v1733_v21 = vadd.f32 %v1732_v19, %v1731_v17  ;;  %v1734_v22 = vpop.f32.mrb[22].mxu1 }
 0x168   :  { %v1735_v23 = vpop.f32.mrb[23].mxu1 }
 0x169   :  { %v1262_v20 = vadd.f32 %v1708_v18, %v1213_v58  ;;  %v1736_v24 = vadd.f32 %v1735_v23, %v1734_v22  ;;  %v1308_v25 = vadd.f32 %v1733_v21, %v1259_v16 }
 0x16b   :  { %v1753_v27 = vpop.f32.mrb[24].mxu0  ;;  %v1311_v31 = vadd.f32 %v1736_v24, %v1262_v20 }
 0x16c   :  { %v1357_v28 = vadd.f32 %v1753_v27, %v1308_v25  ;;  %v1348_v30 = vpop.f32.mrb[25].mxu0 }
 0x16d   :  { %v1349_v32 = vadd.f32 %v1348_v30, %v1300_v10  ;;  %v1754_v34 = vpop.f32.mrb[26].mxu0 }
 0x16e   :  { %v1365_v35 = vadd.f32 %v1357_v28, %v53_v26  ;;  %v1360_v36 = vadd.f32 %v1754_v34, %v1311_v31  ;;  %v1351_v38 = vpop.f32.mrb[27].mxu0 }
 0x16f   :  { %v1363_v39 = vadd.f32 %v1349_v32, %v51_v29  ;;  %v1352_v40 = vadd.f32 %v1351_v38, %v1303_v14 }
 0x170   :  { %1369 = vst.msk [vmem:[#allocation2 + $0x10] sm:$0xff] %vm46_vm0, %v1365_v35  ;;  %v1366_v41 = vadd.f32 %v1360_v36, %v54_v33 }
 0x171   :  { %1367 = vst.msk [vmem:[#allocation2] sm:$0xff] %vm46_vm0, %v1363_v39  ;;  %v1364_v42 = vadd.f32 %v1352_v40, %v52_v37 }
 0x172   :  { %1370 = vst.msk [vmem:[#allocation2 + $0x18] sm:$0xff] %vm46_vm0, %v1366_v41 }
 0x173   :  { %1368 = vst.msk [vmem:[#allocation2 + $0x8] sm:$0xff] %vm46_vm0, %v1364_v42 }
 0x177   :  { %v1376_v44 = vld [vmem:[#allocation2 + $0x10] sm:$0xff] }
 0x178   :  { %v1387_v46 = vmul.f32 %v1559_v43, %v1376_v44  ;;  %v1374_v47 = vld [vmem:[#allocation2] sm:$0xff] }
 0x179   :  { %v1385_v48 = vmul.f32 %v1559_v43, %v1374_v47  ;;  %v1377_v49 = vld [vmem:[#allocation2 + $0x18] sm:$0xff] }
 0x17a   :  { %v1398_v50 = vadd.f32 %v1560_v45, %v1387_v46  ;;  %v1388_v51 = vmul.f32 %v1559_v43, %v1377_v49  ;;  %v1375_v52 = vld [vmem:[#allocation2 + $0x8] sm:$0xff] }
 0x17b   :  { %v1396_v53 = vadd.f32 %v1560_v45, %v1385_v48  ;;  %v1386_v54 = vmul.f32 %v1559_v43, %v1375_v52 }
 0x17c   :  { %v1402_v55 = vmax.f32 %v1398_v50, 0.0  ;;  %v1399_v56 = vadd.f32 %v1560_v45, %v1388_v51 }
 0x17d   :  { %v1400_v57 = vmax.f32 %v1396_v53, 0.0  ;;  %v1397_v58 = vadd.f32 %v1560_v45, %v1386_v54 }
 0x17e   :  { %v1567_v59 = vpack.c.bf16 %v1402_v55, %v1402_v55  ;;  %v1403_v60 = vmax.f32 %v1399_v56, 0.0 }
 0x17f   :  { %v1565_v61 = vpack.c.bf16 %v1400_v57, %v1400_v57  ;;  %v1401_v62 = vmax.f32 %v1397_v58, 0.0 }
 0x180   :  { %1423 = vst.msk [vmem:[%s2400_s4 + $0x8] sm:$0xf] %vm1420_vm1, %v1567_v59  ;;  %v1568_v63 = vpack.c.bf16 %v1403_v60, %v1403_v60 }
 0x181   :  { %1421 = vst.msk [vmem:[%s2400_s4] sm:$0xf] %vm1420_vm1, %v1565_v61  ;;  %v1566_v0 = vpack.c.bf16 %v1401_v62, %v1401_v62 }
 0x182   :  { %1424 = vst.msk [vmem:[%s2400_s4 + $0xc] sm:$0xf] %vm1420_vm1, %v1568_v63 }
 0x183   :  { %1422 = vst.msk [vmem:[%s2400_s4 + $0x4] sm:$0xf] %vm1420_vm1, %v1566_v0 }
 0x184   :  { %1429 = vsyncpa [#allocation4], 1 }
 0x185   :  { %1430 = vsyncpa [#allocation6], 1 }

// kernel: segmentnet_forward.27
= control target key start
LH: loop header
LB: loop body
LE: loop exit
PB: predicated region body
PF: predicated region fallthrough
CT: control target
= control target key end

     0   :  { %s5617_s0 = inlined_call_operand.vmem [shape: bf16[8,15360], index: 0, kind: input, shape index: {}]   ;;  %s5618_s1 = inlined_call_operand.vmem [shape: bf16[15360,1024], index: 1, kind: input, shape index: {}]   ;;  %s5619_s2 = inlined_call_operand.hbm [shape: f32[1,1024], index: 2, kind: input, shape index: {}]   ;;  %s5620_s3 = inlined_call_operand.hbm [shape: f32[1,1024], index: 3, kind: input, shape index: {}]   ;;  %s5621_s4 = inlined_call_operand.hbm [shape: f32[1,1024], index: 4, kind: input, shape index: {}]   ;;  %s5622_s5 = inlined_call_operand.<no memory space> [shape: f32[1,1], index: 5, kind: input, shape index: {}]   ;;  %s5623_s6 = inlined_call_operand.vmem [shape: f32[8,1024], index: 6, kind: output, shape index: {0}]   ;;  %s5624_s7 = inlined_call_operand.vmem [shape: f32[8,1], index: 7, kind: output, shape index: {1}]  }
   0x1   :  { %5632 = sst [smem:[#allocation18_spill]] %s5618_s1  ;;  %v13_v0 = vstv %s5622_s5 }
   0x2   :  { %5633 = sst [smem:[#allocation19_spill]] %s5620_s3  ;;  %14 = vst [vmem:[#allocation4] sm:$0x1] %v13_v0 }
   0x3   :  { %15 = vsyncpa [#allocation7], 0 }
   0x4   :  { %17 = vsyncpa [#allocation7 + $0x1], 0 }
   0x5   :  { %18 = vsyncpa [#allocation9], 0 }
   0x6   :  { %20 = vsyncpa [#allocation9 + $0x1], 0  ;;  %s4578_s26 = smov 0   ;;  %s4580_s27 = smov 0  }
   0x7   :  { %s4582_s28 = smov 0   ;;  %s4584_s29 = smov 0  }
   0x8   :  { %s4586_s30 = smov 0   ;;  %s4588_s8 = smov 0  }
   0x9   :  { %s4590_s9 = smov 0   ;;  %s4592_s5 = smov 0  }
   0xa   :  { %s4594_s10 = smov 0   ;;  %s4596_s11 = smov 0  }
   0xb LB: > { %5634 = sst [smem:[#allocation13_spill]] %s4519_s5  ;;  %s5625_s12 = sadd.s32 4294967295, %s4527_s11   ;;  %s4527_s11 = sphi %s4596_s11, %s26_s11   ;;  %s4523_s10 = sphi %s4594_s10, %s5651_s10   ;;  %s4519_s5 = sphi %s4592_s5, %s5650_s5   ;;  %s4515_s9 = sphi %s4590_s9, %s5658_s9   ;;  %s4511_s8 = sphi %s4588_s8, %s5657_s8   ;;  %s4507_s30 = sphi %s4586_s30, %s5656_s30   ;;  %s4503_s29 = sphi %s4584_s29, %s5655_s29   ;;  %s4499_s28 = sphi %s4582_s28, %s5654_s28   ;;  %s4495_s27 = sphi %s4580_s27, %s5653_s27   ;;  %s4491_s26 = sphi %s4578_s26, %s5652_s26  }
   0xc   : > { %5635 = sst [smem:[#allocation14_spill]] %s4523_s10  ;;  %s38_s13 = sadd.s32 1, %s4519_s5 }
   0xd   : > { %p39_p0 = scmp.ge.s32.totalorder %s38_s13, 8  ;;  %s41_s14 = sadd.s32 1, %s4523_s10 }
   0xe   : > { %s82_s15 = sadd.s32 1, %s4507_s30  ;;  %p89_p1 = scmp.ne.s32.totalorder %s4507_s30, %s4503_s29 }
   0xf   : > { %s5660_s13 = smov (%p39_p0, %s38_s13), 0  ;;  %s5662_s14 = smov (!%p39_p0, %s41_s14), %s4523_s10 }
  0x10   : > { %5636 = sst [smem:[#allocation15_spill]] %s5660_s13  ;;  %s77_s16 = ssub.s32 %s4519_s5, %s5660_s13 }
  0x11   : > { %p90_p2 = scmp.eq.s32.totalorder %s4527_s11, 0  ;;  %p43_p3 = scmp.ge.s32.totalorder %s5662_s14, 4 }
  0x12   : > { %s108_s17 = sadd.s32 1, %s4499_s28  ;;  %p115_p5 = scmp.ne.s32.totalorder %s4499_s28, %s4495_s27 }
  0x13   : > { %p4641_p4 = por %p90_p2, %p89_p1  ;;  %s5664_s14 = smov (%p43_p3, %s5662_s14), 0 }
  0x14   : > { %5638 = sst [smem:[#allocation16_spill]] %s5664_s14  ;;  %p4649_p6 = por %p115_p5, %p90_p2 }
  0x15   : > { %p121_p7 = scmp.ne.s32.totalorder %s4495_s27, %s4491_s26  ;;  %s78_s20 = ssub.s32 %s4523_s10, %s5664_s14 }
  0x16   : > { %p122_p8 = scmp.eq.s32.totalorder %s5625_s12, 0  ;;  %s79_s21 = sor.u32 %s78_s20, %s77_s16 }
  0x17   : > { %p106_p9 = scmp.eq.s32.totalorder %s78_s20, 0  ;;  %p80_p10 = scmp.eq.s32.totalorder %s79_s21, 0 }
  0x18   : > { %p4659_p11 = por %p122_p8, %p121_p7  ;;  %p3606_p12 = scmp.ge.s32.totalorder %s4527_s11, 32 }
  0x19   : > { %s4664_s23 = scalar_select %p106_p9, %s4499_s28, %s108_s17  }
  0x1a   : > { %s5640_s22 = scalar_select %p4659_p11, 1, 0 }
  0x1b   : > { %s4667_s24 = scalar_select %p80_p10, %s4507_s30, %s82_s15  }
  0x1c   : > { %271 = sbr.rel (%p3606_p12) target bundleno = 363 (0x16b), region = 20 }
  0x1d   : > { %5641 = sst [smem:[#allocation17_spill]] %s4667_s24 }
  0x23   : > { %287 = sbr.rel (!%p4641_p4) target bundleno = 285 (0x11d), region = 28  ;;  %s289_s25 = sand.u32 (%p4641_p4), 1, %s4507_s30  }
  0x24   : > { %s3891_s26 = smul.u32 (%p4641_p4), 1920, %s289_s25  ;;  %s3607_s16 = sshll.u32 (%p4641_p4), %s4523_s10, 1 }
  0x25   : > { %s3887_s20 = smul.u32 (%p4641_p4), 1920, %s4519_s5  ;;  %s5642_s1 = sld [smem:[#allocation18_spill]] (%p4641_p4) }
  0x26   : > { %s4683_s18 = scalar_lea.vmem (%p4641_p4), [#allocation5], %s3891_s26 }
  0x27   : > { %s295_s21 = sadd.s32 (%p4641_p4), %s3887_s20, %s3607_s16 }
  0x28   : > { %s3609_s12 = sshll.u32 (%p4641_p4), %s295_s21, 2 }
  0x2b   : > { %s4678_s15 = scalar_lea.vmem %s5642_s1, %s3609_s12 }
  0x2c   : > { %v803_v1 = vld [vmem:[%s4678_s15] sm:$0xff] }
  0x2d   : > { %v805_v2 = vld [vmem:[%s4678_s15 + $0x20] sm:$0xff]  ;;  %804 = vst [vmem:[%s4683_s18] sm:$0xff] %v803_v1 }
  0x2e   : > { %v807_v3 = vld [vmem:[%s4678_s15 + $0x40] sm:$0xff]  ;;  %806 = vst [vmem:[%s4683_s18 + $0x8] sm:$0xff] %v805_v2 }
  0x2f   : > { %808 = vst [vmem:[%s4683_s18 + $0x10] sm:$0xff] %v807_v3  ;;  %v809_v4 = vld [vmem:[%s4678_s15 + $0x60] sm:$0xff] }
  0x30   : > { %v811_v5 = vld [vmem:[%s4678_s15 + $0x80] sm:$0xff]  ;;  %810 = vst [vmem:[%s4683_s18 + $0x18] sm:$0xff] %v809_v4 }
  0x31   : > { %v813_v6 = vld [vmem:[%s4678_s15 + $0xa0] sm:$0xff]  ;;  %812 = vst [vmem:[%s4683_s18 + $0x20] sm:$0xff] %v811_v5 }
  0x32   : > { %814 = vst [vmem:[%s4683_s18 + $0x28] sm:$0xff] %v813_v6  ;;  %v815_v7 = vld [vmem:[%s4678_s15 + $0xc0] sm:$0xff] }
  0x33   : > { %v817_v8 = vld [vmem:[%s4678_s15 + $0xe0] sm:$0xff]  ;;  %816 = vst [vmem:[%s4683_s18 + $0x30] sm:$0xff] %v815_v7 }
  0x34   : > { %v819_v9 = vld [vmem:[%s4678_s15 + $0x100] sm:$0xff]  ;;  %818 = vst [vmem:[%s4683_s18 + $0x38] sm:$0xff] %v817_v8 }
  0x35   : > { %820 = vst [vmem:[%s4683_s18 + $0x40] sm:$0xff] %v819_v9  ;;  %v821_v10 = vld [vmem:[%s4678_s15 + $0x120] sm:$0xff] }
  0x36   : > { %v823_v11 = vld [vmem:[%s4678_s15 + $0x140] sm:$0xff]  ;;  %822 = vst [vmem:[%s4683_s18 + $0x48] sm:$0xff] %v821_v10 }
  0x37   : > { %v825_v12 = vld [vmem:[%s4678_s15 + $0x160] sm:$0xff]  ;;  %824 = vst [vmem:[%s4683_s18 + $0x50] sm:$0xff] %v823_v11 }
  0x38   : > { %826 = vst [vmem:[%s4683_s18 + $0x58] sm:$0xff] %v825_v12  ;;  %v827_v13 = vld [vmem:[%s4678_s15 + $0x180] sm:$0xff] }
  0x39   : > { %v829_v14 = vld [vmem:[%s4678_s15 + $0x1a0] sm:$0xff]  ;;  %828 = vst [vmem:[%s4683_s18 + $0x60] sm:$0xff] %v827_v13 }
  0x3a   : > { %v831_v15 = vld [vmem:[%s4678_s15 + $0x1c0] sm:$0xff]  ;;  %830 = vst [vmem:[%s4683_s18 + $0x68] sm:$0xff] %v829_v14 }
  0x3b   : > { %832 = vst [vmem:[%s4683_s18 + $0x70] sm:$0xff] %v831_v15  ;;  %v833_v16 = vld [vmem:[%s4678_s15 + $0x1e0] sm:$0xff] }
  0x3c   : > { %v835_v17 = vld [vmem:[%s4678_s15 + $0x200] sm:$0xff]  ;;  %834 = vst [vmem:[%s4683_s18 + $0x78] sm:$0xff] %v833_v16 }
  0x3d   : > { %v837_v18 = vld [vmem:[%s4678_s15 + $0x220] sm:$0xff]  ;;  %836 = vst [vmem:[%s4683_s18 + $0x80] sm:$0xff] %v835_v17 }
  0x3e   : > { %838 = vst [vmem:[%s4683_s18 + $0x88] sm:$0xff] %v837_v18  ;;  %v839_v19 = vld [vmem:[%s4678_s15 + $0x240] sm:$0xff] }
  0x3f   : > { %v841_v20 = vld [vmem:[%s4678_s15 + $0x260] sm:$0xff]  ;;  %840 = vst [vmem:[%s4683_s18 + $0x90] sm:$0xff] %v839_v19 }
  0x40   : > { %v843_v21 = vld [vmem:[%s4678_s15 + $0x280] sm:$0xff]  ;;  %842 = vst [vmem:[%s4683_s18 + $0x98] sm:$0xff] %v841_v20 }
  0x41   : > { %844 = vst [vmem:[%s4683_s18 + $0xa0] sm:$0xff] %v843_v21  ;;  %v845_v22 = vld [vmem:[%s4678_s15 + $0x2a0] sm:$0xff] }
  0x42   : > { %v847_v23 = vld [vmem:[%s4678_s15 + $0x2c0] sm:$0xff]  ;;  %846 = vst [vmem:[%s4683_s18 + $0xa8] sm:$0xff] %v845_v22 }
  0x43   : > { %v849_v24 = vld [vmem:[%s4678_s15 + $0x2e0] sm:$0xff]  ;;  %848 = vst [vmem:[%s4683_s18 + $0xb0] sm:$0xff] %v847_v23 }
  0x44   : > { %850 = vst [vmem:[%s4683_s18 + $0xb8] sm:$0xff] %v849_v24  ;;  %v851_v25 = vld [vmem:[%s4678_s15 + $0x300] sm:$0xff] }
  0x45   : > { %v853_v26 = vld [vmem:[%s4678_s15 + $0x320] sm:$0xff]  ;;  %852 = vst [vmem:[%s4683_s18 + $0xc0] sm:$0xff] %v851_v25 }
  0x46   : > { %v855_v27 = vld [vmem:[%s4678_s15 + $0x340] sm:$0xff]  ;;  %854 = vst [vmem:[%s4683_s18 + $0xc8] sm:$0xff] %v853_v26 }
  0x47   : > { %856 = vst [vmem:[%s4683_s18 + $0xd0] sm:$0xff] %v855_v27  ;;  %v857_v28 = vld [vmem:[%s4678_s15 + $0x360] sm:$0xff] }
  0x48   : > { %v859_v29 = vld [vmem:[%s4678_s15 + $0x380] sm:$0xff]  ;;  %858 = vst [vmem:[%s4683_s18 + $0xd8] sm:$0xff] %v857_v28 }
  0x49   : > { %v861_v30 = vld [vmem:[%s4678_s15 + $0x3a0] sm:$0xff]  ;;  %860 = vst [vmem:[%s4683_s18 + $0xe0] sm:$0xff] %v859_v29 }
  0x4a   : > { %862 = vst [vmem:[%s4683_s18 + $0xe8] sm:$0xff] %v861_v30  ;;  %v863_v31 = vld [vmem:[%s4678_s15 + $0x3c0] sm:$0xff] }
  0x4b   : > { %v865_v32 = vld [vmem:[%s4678_s15 + $0x3e0] sm:$0xff]  ;;  %864 = vst [vmem:[%s4683_s18 + $0xf0] sm:$0xff] %v863_v31 }
  0x4c   : > { %v867_v33 = vld [vmem:[%s4678_s15 + $0x400] sm:$0xff]  ;;  %866 = vst [vmem:[%s4683_s18 + $0xf8] sm:$0xff] %v865_v32 }
  0x4d   : > { %868 = vst [vmem:[%s4683_s18 + $0x100] sm:$0xff] %v867_v33  ;;  %v869_v34 = vld [vmem:[%s4678_s15 + $0x420] sm:$0xff] }
  0x4e   : > { %v871_v35 = vld [vmem:[%s4678_s15 + $0x440] sm:$0xff]  ;;  %870 = vst [vmem:[%s4683_s18 + $0x108] sm:$0xff] %v869_v34 }
  0x4f   : > { %v873_v36 = vld [vmem:[%s4678_s15 + $0x460] sm:$0xff]  ;;  %872 = vst [vmem:[%s4683_s18 + $0x110] sm:$0xff] %v871_v35 }
  0x50   : > { %874 = vst [vmem:[%s4683_s18 + $0x118] sm:$0xff] %v873_v36  ;;  %v875_v37 = vld [vmem:[%s4678_s15 + $0x480] sm:$0xff] }
  0x51   : > { %v877_v38 = vld [vmem:[%s4678_s15 + $0x4a0] sm:$0xff]  ;;  %876 = vst [vmem:[%s4683_s18 + $0x120] sm:$0xff] %v875_v37 }
  0x52   : > { %v879_v39 = vld [vmem:[%s4678_s15 + $0x4c0] sm:$0xff]  ;;  %878 = vst [vmem:[%s4683_s18 + $0x128] sm:$0xff] %v877_v38 }
  0x53   : > { %880 = vst [vmem:[%s4683_s18 + $0x130] sm:$0xff] %v879_v39  ;;  %v881_v40 = vld [vmem:[%s4678_s15 + $0x4e0] sm:$0xff] }
  0x54   : > { %v883_v41 = vld [vmem:[%s4678_s15 + $0x500] sm:$0xff]  ;;  %882 = vst [vmem:[%s4683_s18 + $0x138] sm:$0xff] %v881_v40 }
  0x55   : > { %v885_v42 = vld [vmem:[%s4678_s15 + $0x520] sm:$0xff]  ;;  %884 = vst [vmem:[%s4683_s18 + $0x140] sm:$0xff] %v883_v41 }
  0x56   : > { %886 = vst [vmem:[%s4683_s18 + $0x148] sm:$0xff] %v885_v42  ;;  %v887_v43 = vld [vmem:[%s4678_s15 + $0x540] sm:$0xff] }
  0x57   : > { %v889_v44 = vld [vmem:[%s4678_s15 + $0x560] sm:$0xff]  ;;  %888 = vst [vmem:[%s4683_s18 + $0x150] sm:$0xff] %v887_v43 }
  0x58   : > { %v891_v45 = vld [vmem:[%s4678_s15 + $0x580] sm:$0xff]  ;;  %890 = vst [vmem:[%s4683_s18 + $0x158] sm:$0xff] %v889_v44 }
  0x59   : > { %892 = vst [vmem:[%s4683_s18 + $0x160] sm:$0xff] %v891_v45  ;;  %v893_v46 = vld [vmem:[%s4678_s15 + $0x5a0] sm:$0xff] }
  0x5a   : > { %v895_v47 = vld [vmem:[%s4678_s15 + $0x5c0] sm:$0xff]  ;;  %894 = vst [vmem:[%s4683_s18 + $0x168] sm:$0xff] %v893_v46 }
  0x5b   : > { %v897_v48 = vld [vmem:[%s4678_s15 + $0x5e0] sm:$0xff]  ;;  %896 = vst [vmem:[%s4683_s18 + $0x170] sm:$0xff] %v895_v47 }
  0x5c   : > { %898 = vst [vmem:[%s4683_s18 + $0x178] sm:$0xff] %v897_v48  ;;  %v899_v49 = vld [vmem:[%s4678_s15 + $0x600] sm:$0xff] }
  0x5d   : > { %v901_v50 = vld [vmem:[%s4678_s15 + $0x620] sm:$0xff]  ;;  %900 = vst [vmem:[%s4683_s18 + $0x180] sm:$0xff] %v899_v49 }
  0x5e   : > { %v903_v51 = vld [vmem:[%s4678_s15 + $0x640] sm:$0xff]  ;;  %902 = vst [vmem:[%s4683_s18 + $0x188] sm:$0xff] %v901_v50 }
  0x5f   : > { %904 = vst [vmem:[%s4683_s18 + $0x190] sm:$0xff] %v903_v51  ;;  %v905_v52 = vld [vmem:[%s4678_s15 + $0x660] sm:$0xff] }
  0x60   : > { %v907_v53 = vld [vmem:[%s4678_s15 + $0x680] sm:$0xff]  ;;  %906 = vst [vmem:[%s4683_s18 + $0x198] sm:$0xff] %v905_v52 }
  0x61   : > { %v909_v54 = vld [vmem:[%s4678_s15 + $0x6a0] sm:$0xff]  ;;  %908 = vst [vmem:[%s4683_s18 + $0x1a0] sm:$0xff] %v907_v53 }
  0x62   : > { %910 = vst [vmem:[%s4683_s18 + $0x1a8] sm:$0xff] %v909_v54  ;;  %v911_v55 = vld [vmem:[%s4678_s15 + $0x6c0] sm:$0xff] }
  0x63   : > { %v913_v56 = vld [vmem:[%s4678_s15 + $0x6e0] sm:$0xff]  ;;  %912 = vst [vmem:[%s4683_s18 + $0x1b0] sm:$0xff] %v911_v55 }
  0x64   : > { %v915_v57 = vld [vmem:[%s4678_s15 + $0x700] sm:$0xff]  ;;  %914 = vst [vmem:[%s4683_s18 + $0x1b8] sm:$0xff] %v913_v56 }
  0x65   : > { %916 = vst [vmem:[%s4683_s18 + $0x1c0] sm:$0xff] %v915_v57  ;;  %v917_v58 = vld [vmem:[%s4678_s15 + $0x720] sm:$0xff] }
  0x66   : > { %v919_v59 = vld [vmem:[%s4678_s15 + $0x740] sm:$0xff]  ;;  %918 = vst [vmem:[%s4683_s18 + $0x1c8] sm:$0xff] %v917_v58 }
  0x67   : > { %v921_v60 = vld [vmem:[%s4678_s15 + $0x760] sm:$0xff]  ;;  %920 = vst [vmem:[%s4683_s18 + $0x1d0] sm:$0xff] %v919_v59 }
  0x68   : > { %922 = vst [vmem:[%s4683_s18 + $0x1d8] sm:$0xff] %v921_v60  ;;  %v923_v61 = vld [vmem:[%s4678_s15 + $0x780] sm:$0xff] }
  0x69   : > { %v925_v62 = vld [vmem:[%s4678_s15 + $0x7a0] sm:$0xff]  ;;  %924 = vst [vmem:[%s4683_s18 + $0x1e0] sm:$0xff] %v923_v61 }
  0x6a   : > { %v927_v63 = vld [vmem:[%s4678_s15 + $0x7c0] sm:$0xff]  ;;  %926 = vst [vmem:[%s4683_s18 + $0x1e8] sm:$0xff] %v925_v62 }
  0x6b   : > { %928 = vst [vmem:[%s4683_s18 + $0x1f0] sm:$0xff] %v927_v63  ;;  %v929_v0 = vld [vmem:[%s4678_s15 + $0x7e0] sm:$0xff] }
  0x6c   : > { %v931_v1 = vld [vmem:[%s4678_s15 + $0x800] sm:$0xff]  ;;  %930 = vst [vmem:[%s4683_s18 + $0x1f8] sm:$0xff] %v929_v0 }
  0x6d   : > { %v933_v2 = vld [vmem:[%s4678_s15 + $0x820] sm:$0xff]  ;;  %932 = vst [vmem:[%s4683_s18 + $0x200] sm:$0xff] %v931_v1 }
  0x6e   : > { %934 = vst [vmem:[%s4683_s18 + $0x208] sm:$0xff] %v933_v2  ;;  %v935_v3 = vld [vmem:[%s4678_s15 + $0x840] sm:$0xff] }
  0x6f   : > { %v937_v4 = vld [vmem:[%s4678_s15 + $0x860] sm:$0xff]  ;;  %936 = vst [vmem:[%s4683_s18 + $0x210] sm:$0xff] %v935_v3 }
  0x70   : > { %v939_v5 = vld [vmem:[%s4678_s15 + $0x880] sm:$0xff]  ;;  %938 = vst [vmem:[%s4683_s18 + $0x218] sm:$0xff] %v937_v4 }
  0x71   : > { %940 = vst [vmem:[%s4683_s18 + $0x220] sm:$0xff] %v939_v5  ;;  %v941_v6 = vld [vmem:[%s4678_s15 + $0x8a0] sm:$0xff] }
  0x72   : > { %v943_v7 = vld [vmem:[%s4678_s15 + $0x8c0] sm:$0xff]  ;;  %942 = vst [vmem:[%s4683_s18 + $0x228] sm:$0xff] %v941_v6 }
  0x73   : > { %v945_v8 = vld [vmem:[%s4678_s15 + $0x8e0] sm:$0xff]  ;;  %944 = vst [vmem:[%s4683_s18 + $0x230] sm:$0xff] %v943_v7 }
  0x74   : > { %946 = vst [vmem:[%s4683_s18 + $0x238] sm:$0xff] %v945_v8  ;;  %v947_v9 = vld [vmem:[%s4678_s15 + $0x900] sm:$0xff] }
  0x75   : > { %v949_v10 = vld [vmem:[%s4678_s15 + $0x920] sm:$0xff]  ;;  %948 = vst [vmem:[%s4683_s18 + $0x240] sm:$0xff] %v947_v9 }
  0x76   : > { %v951_v11 = vld [vmem:[%s4678_s15 + $0x940] sm:$0xff]  ;;  %950 = vst [vmem:[%s4683_s18 + $0x248] sm:$0xff] %v949_v10 }
  0x77   : > { %952 = vst [vmem:[%s4683_s18 + $0x250] sm:$0xff] %v951_v11  ;;  %v953_v12 = vld [vmem:[%s4678_s15 + $0x960] sm:$0xff] }
  0x78   : > { %v955_v13 = vld [vmem:[%s4678_s15 + $0x980] sm:$0xff]  ;;  %954 = vst [vmem:[%s4683_s18 + $0x258] sm:$0xff] %v953_v12 }
  0x79   : > { %v957_v14 = vld [vmem:[%s4678_s15 + $0x9a0] sm:$0xff]  ;;  %956 = vst [vmem:[%s4683_s18 + $0x260] sm:$0xff] %v955_v13 }
  0x7a   : > { %958 = vst [vmem:[%s4683_s18 + $0x268] sm:$0xff] %v957_v14  ;;  %v959_v15 = vld [vmem:[%s4678_s15 + $0x9c0] sm:$0xff] }
  0x7b   : > { %v961_v16 = vld [vmem:[%s4678_s15 + $0x9e0] sm:$0xff]  ;;  %960 = vst [vmem:[%s4683_s18 + $0x270] sm:$0xff] %v959_v15 }
  0x7c   : > { %v963_v17 = vld [vmem:[%s4678_s15 + $0xa00] sm:$0xff]  ;;  %962 = vst [vmem:[%s4683_s18 + $0x278] sm:$0xff] %v961_v16 }
  0x7d   : > { %964 = vst [vmem:[%s4683_s18 + $0x280] sm:$0xff] %v963_v17  ;;  %v965_v18 = vld [vmem:[%s4678_s15 + $0xa20] sm:$0xff] }
  0x7e   : > { %v967_v19 = vld [vmem:[%s4678_s15 + $0xa40] sm:$0xff]  ;;  %966 = vst [vmem:[%s4683_s18 + $0x288] sm:$0xff] %v965_v18 }
  0x7f   : > { %v969_v20 = vld [vmem:[%s4678_s15 + $0xa60] sm:$0xff]  ;;  %968 = vst [vmem:[%s4683_s18 + $0x290] sm:$0xff] %v967_v19 }
  0x80   : > { %970 = vst [vmem:[%s4683_s18 + $0x298] sm:$0xff] %v969_v20  ;;  %v971_v21 = vld [vmem:[%s4678_s15 + $0xa80] sm:$0xff] }
  0x81   : > { %v973_v22 = vld [vmem:[%s4678_s15 + $0xaa0] sm:$0xff]  ;;  %972 = vst [vmem:[%s4683_s18 + $0x2a0] sm:$0xff] %v971_v21 }
  0x82   : > { %v975_v23 = vld [vmem:[%s4678_s15 + $0xac0] sm:$0xff]  ;;  %974 = vst [vmem:[%s4683_s18 + $0x2a8] sm:$0xff] %v973_v22 }
  0x83   : > { %976 = vst [vmem:[%s4683_s18 + $0x2b0] sm:$0xff] %v975_v23  ;;  %v977_v24 = vld [vmem:[%s4678_s15 + $0xae0] sm:$0xff] }
  0x84   : > { %v979_v25 = vld [vmem:[%s4678_s15 + $0xb00] sm:$0xff]  ;;  %978 = vst [vmem:[%s4683_s18 + $0x2b8] sm:$0xff] %v977_v24 }
  0x85   : > { %v981_v26 = vld [vmem:[%s4678_s15 + $0xb20] sm:$0xff]  ;;  %980 = vst [vmem:[%s4683_s18 + $0x2c0] sm:$0xff] %v979_v25 }
  0x86   : > { %982 = vst [vmem:[%s4683_s18 + $0x2c8] sm:$0xff] %v981_v26  ;;  %v983_v27 = vld [vmem:[%s4678_s15 + $0xb40] sm:$0xff] }
  0x87   : > { %v985_v28 = vld [vmem:[%s4678_s15 + $0xb60] sm:$0xff]  ;;  %984 = vst [vmem:[%s4683_s18 + $0x2d0] sm:$0xff] %v983_v27 }
  0x88   : > { %v987_v29 = vld [vmem:[%s4678_s15 + $0xb80] sm:$0xff]  ;;  %986 = vst [vmem:[%s4683_s18 + $0x2d8] sm:$0xff] %v985_v28 }
  0x89   : > { %988 = vst [vmem:[%s4683_s18 + $0x2e0] sm:$0xff] %v987_v29  ;;  %v989_v30 = vld [vmem:[%s4678_s15 + $0xba0] sm:$0xff] }
  0x8a   : > { %v991_v31 = vld [vmem:[%s4678_s15 + $0xbc0] sm:$0xff]  ;;  %990 = vst [vmem:[%s4683_s18 + $0x2e8] sm:$0xff] %v989_v30 }
  0x8b   : > { %v993_v32 = vld [vmem:[%s4678_s15 + $0xbe0] sm:$0xff]  ;;  %992 = vst [vmem:[%s4683_s18 + $0x2f0] sm:$0xff] %v991_v31 }
  0x8c   : > { %994 = vst [vmem:[%s4683_s18 + $0x2f8] sm:$0xff] %v993_v32  ;;  %v995_v33 = vld [vmem:[%s4678_s15 + $0xc00] sm:$0xff] }
  0x8d   : > { %v997_v34 = vld [vmem:[%s4678_s15 + $0xc20] sm:$0xff]  ;;  %996 = vst [vmem:[%s4683_s18 + $0x300] sm:$0xff] %v995_v33 }
  0x8e   : > { %v999_v35 = vld [vmem:[%s4678_s15 + $0xc40] sm:$0xff]  ;;  %998 = vst [vmem:[%s4683_s18 + $0x308] sm:$0xff] %v997_v34 }
  0x8f   : > { %1000 = vst [vmem:[%s4683_s18 + $0x310] sm:$0xff] %v999_v35  ;;  %v1001_v36 = vld [vmem:[%s4678_s15 + $0xc60] sm:$0xff] }
  0x90   : > { %v1003_v37 = vld [vmem:[%s4678_s15 + $0xc80] sm:$0xff]  ;;  %1002 = vst [vmem:[%s4683_s18 + $0x318] sm:$0xff] %v1001_v36 }
  0x91   : > { %v1005_v38 = vld [vmem:[%s4678_s15 + $0xca0] sm:$0xff]  ;;  %1004 = vst [vmem:[%s4683_s18 + $0x320] sm:$0xff] %v1003_v37 }
  0x92   : > { %1006 = vst [vmem:[%s4683_s18 + $0x328] sm:$0xff] %v1005_v38  ;;  %v1007_v39 = vld [vmem:[%s4678_s15 + $0xcc0] sm:$0xff] }
  0x93   : > { %v1009_v40 = vld [vmem:[%s4678_s15 + $0xce0] sm:$0xff]  ;;  %1008 = vst [vmem:[%s4683_s18 + $0x330] sm:$0xff] %v1007_v39 }
  0x94   : > { %v1011_v41 = vld [vmem:[%s4678_s15 + $0xd00] sm:$0xff]  ;;  %1010 = vst [vmem:[%s4683_s18 + $0x338] sm:$0xff] %v1009_v40 }
  0x95   : > { %1012 = vst [vmem:[%s4683_s18 + $0x340] sm:$0xff] %v1011_v41  ;;  %v1013_v42 = vld [vmem:[%s4678_s15 + $0xd20] sm:$0xff] }
  0x96   : > { %v1015_v43 = vld [vmem:[%s4678_s15 + $0xd40] sm:$0xff]  ;;  %1014 = vst [vmem:[%s4683_s18 + $0x348] sm:$0xff] %v1013_v42 }
  0x97   : > { %v1017_v44 = vld [vmem:[%s4678_s15 + $0xd60] sm:$0xff]  ;;  %1016 = vst [vmem:[%s4683_s18 + $0x350] sm:$0xff] %v1015_v43 }
  0x98   : > { %1018 = vst [vmem:[%s4683_s18 + $0x358] sm:$0xff] %v1017_v44  ;;  %v1019_v45 = vld [vmem:[%s4678_s15 + $0xd80] sm:$0xff] }
  0x99   : > { %v1021_v46 = vld [vmem:[%s4678_s15 + $0xda0] sm:$0xff]  ;;  %1020 = vst [vmem:[%s4683_s18 + $0x360] sm:$0xff] %v1019_v45 }
  0x9a   : > { %v1023_v47 = vld [vmem:[%s4678_s15 + $0xdc0] sm:$0xff]  ;;  %1022 = vst [vmem:[%s4683_s18 + $0x368] sm:$0xff] %v1021_v46 }
  0x9b   : > { %1024 = vst [vmem:[%s4683_s18 + $0x370] sm:$0xff] %v1023_v47  ;;  %v1025_v48 = vld [vmem:[%s4678_s15 + $0xde0] sm:$0xff] }
  0x9c   : > { %v1027_v49 = vld [vmem:[%s4678_s15 + $0xe00] sm:$0xff]  ;;  %1026 = vst [vmem:[%s4683_s18 + $0x378] sm:$0xff] %v1025_v48 }
  0x9d   : > { %v1029_v50 = vld [vmem:[%s4678_s15 + $0xe20] sm:$0xff]  ;;  %1028 = vst [vmem:[%s4683_s18 + $0x380] sm:$0xff] %v1027_v49 }
  0x9e   : > { %1030 = vst [vmem:[%s4683_s18 + $0x388] sm:$0xff] %v1029_v50  ;;  %v1031_v51 = vld [vmem:[%s4678_s15 + $0xe40] sm:$0xff] }
  0x9f   : > { %v1033_v52 = vld [vmem:[%s4678_s15 + $0xe60] sm:$0xff]  ;;  %1032 = vst [vmem:[%s4683_s18 + $0x390] sm:$0xff] %v1031_v51 }
  0xa0   : > { %v1035_v53 = vld [vmem:[%s4678_s15 + $0xe80] sm:$0xff]  ;;  %1034 = vst [vmem:[%s4683_s18 + $0x398] sm:$0xff] %v1033_v52 }
  0xa1   : > { %1036 = vst [vmem:[%s4683_s18 + $0x3a0] sm:$0xff] %v1035_v53  ;;  %v1037_v54 = vld [vmem:[%s4678_s15 + $0xea0] sm:$0xff] }
  0xa2   : > { %v1039_v55 = vld [vmem:[%s4678_s15 + $0xec0] sm:$0xff]  ;;  %1038 = vst [vmem:[%s4683_s18 + $0x3a8] sm:$0xff] %v1037_v54 }
  0xa3   : > { %v1041_v56 = vld [vmem:[%s4678_s15 + $0xee0] sm:$0xff]  ;;  %1040 = vst [vmem:[%s4683_s18 + $0x3b0] sm:$0xff] %v1039_v55 }
  0xa4   : > { %1042 = vst [vmem:[%s4683_s18 + $0x3b8] sm:$0xff] %v1041_v56  ;;  %v1043_v57 = vld [vmem:[%s4678_s15 + $0xf00] sm:$0xff] }
  0xa5   : > { %v1045_v58 = vld [vmem:[%s4678_s15 + $0xf20] sm:$0xff]  ;;  %1044 = vst [vmem:[%s4683_s18 + $0x3c0] sm:$0xff] %v1043_v57 }
  0xa6   : > { %v1047_v59 = vld [vmem:[%s4678_s15 + $0xf40] sm:$0xff]  ;;  %1046 = vst [vmem:[%s4683_s18 + $0x3c8] sm:$0xff] %v1045_v58 }
  0xa7   : > { %1048 = vst [vmem:[%s4683_s18 + $0x3d0] sm:$0xff] %v1047_v59  ;;  %v1049_v60 = vld [vmem:[%s4678_s15 + $0xf60] sm:$0xff] }
  0xa8   : > { %v1051_v61 = vld [vmem:[%s4678_s15 + $0xf80] sm:$0xff]  ;;  %1050 = vst [vmem:[%s4683_s18 + $0x3d8] sm:$0xff] %v1049_v60 }
  0xa9   : > { %v1053_v62 = vld [vmem:[%s4678_s15 + $0xfa0] sm:$0xff]  ;;  %1052 = vst [vmem:[%s4683_s18 + $0x3e0] sm:$0xff] %v1051_v61 }
  0xaa   : > { %1054 = vst [vmem:[%s4683_s18 + $0x3e8] sm:$0xff] %v1053_v62  ;;  %v1055_v63 = vld [vmem:[%s4678_s15 + $0xfc0] sm:$0xff] }
  0xab   : > { %v1057_v0 = vld [vmem:[%s4678_s15 + $0xfe0] sm:$0xff]  ;;  %1056 = vst [vmem:[%s4683_s18 + $0x3f0] sm:$0xff] %v1055_v63 }
  0xac   : > { %v1059_v1 = vld [vmem:[%s4678_s15 + $0x1000] sm:$0xff]  ;;  %1058 = vst [vmem:[%s4683_s18 + $0x3f8] sm:$0xff] %v1057_v0 }
  0xad   : > { %1060 = vst [vmem:[%s4683_s18 + $0x400] sm:$0xff] %v1059_v1  ;;  %v1061_v2 = vld [vmem:[%s4678_s15 + $0x1020] sm:$0xff] }
  0xae   : > { %v1063_v3 = vld [vmem:[%s4678_s15 + $0x1040] sm:$0xff]  ;;  %1062 = vst [vmem:[%s4683_s18 + $0x408] sm:$0xff] %v1061_v2 }
  0xaf   : > { %v1065_v4 = vld [vmem:[%s4678_s15 + $0x1060] sm:$0xff]  ;;  %1064 = vst [vmem:[%s4683_s18 + $0x410] sm:$0xff] %v1063_v3 }
  0xb0   : > { %1066 = vst [vmem:[%s4683_s18 + $0x418] sm:$0xff] %v1065_v4  ;;  %v1067_v5 = vld [vmem:[%s4678_s15 + $0x1080] sm:$0xff] }
  0xb1   : > { %v1069_v6 = vld [vmem:[%s4678_s15 + $0x10a0] sm:$0xff]  ;;  %1068 = vst [vmem:[%s4683_s18 + $0x420] sm:$0xff] %v1067_v5 }
  0xb2   : > { %v1071_v7 = vld [vmem:[%s4678_s15 + $0x10c0] sm:$0xff]  ;;  %1070 = vst [vmem:[%s4683_s18 + $0x428] sm:$0xff] %v1069_v6 }
  0xb3   : > { %1072 = vst [vmem:[%s4683_s18 + $0x430] sm:$0xff] %v1071_v7  ;;  %v1073_v8 = vld [vmem:[%s4678_s15 + $0x10e0] sm:$0xff] }
  0xb4   : > { %v1075_v9 = vld [vmem:[%s4678_s15 + $0x1100] sm:$0xff]  ;;  %1074 = vst [vmem:[%s4683_s18 + $0x438] sm:$0xff] %v1073_v8 }
  0xb5   : > { %v1077_v10 = vld [vmem:[%s4678_s15 + $0x1120] sm:$0xff]  ;;  %1076 = vst [vmem:[%s4683_s18 + $0x440] sm:$0xff] %v1075_v9 }
  0xb6   : > { %1078 = vst [vmem:[%s4683_s18 + $0x448] sm:$0xff] %v1077_v10  ;;  %v1079_v11 = vld [vmem:[%s4678_s15 + $0x1140] sm:$0xff] }
  0xb7   : > { %v1081_v12 = vld [vmem:[%s4678_s15 + $0x1160] sm:$0xff]  ;;  %1080 = vst [vmem:[%s4683_s18 + $0x450] sm:$0xff] %v1079_v11 }
  0xb8   : > { %v1083_v13 = vld [vmem:[%s4678_s15 + $0x1180] sm:$0xff]  ;;  %1082 = vst [vmem:[%s4683_s18 + $0x458] sm:$0xff] %v1081_v12 }
  0xb9   : > { %1084 = vst [vmem:[%s4683_s18 + $0x460] sm:$0xff] %v1083_v13  ;;  %v1085_v14 = vld [vmem:[%s4678_s15 + $0x11a0] sm:$0xff] }
  0xba   : > { %v1087_v15 = vld [vmem:[%s4678_s15 + $0x11c0] sm:$0xff]  ;;  %1086 = vst [vmem:[%s4683_s18 + $0x468] sm:$0xff] %v1085_v14 }
  0xbb   : > { %v1089_v16 = vld [vmem:[%s4678_s15 + $0x11e0] sm:$0xff]  ;;  %1088 = vst [vmem:[%s4683_s18 + $0x470] sm:$0xff] %v1087_v15 }
  0xbc   : > { %1090 = vst [vmem:[%s4683_s18 + $0x478] sm:$0xff] %v1089_v16  ;;  %v1091_v17 = vld [vmem:[%s4678_s15 + $0x1200] sm:$0xff] }
  0xbd   : > { %v1093_v18 = vld [vmem:[%s4678_s15 + $0x1220] sm:$0xff]  ;;  %1092 = vst [vmem:[%s4683_s18 + $0x480] sm:$0xff] %v1091_v17 }
  0xbe   : > { %v1095_v19 = vld [vmem:[%s4678_s15 + $0x1240] sm:$0xff]  ;;  %1094 = vst [vmem:[%s4683_s18 + $0x488] sm:$0xff] %v1093_v18 }
  0xbf   : > { %1096 = vst [vmem:[%s4683_s18 + $0x490] sm:$0xff] %v1095_v19  ;;  %v1097_v20 = vld [vmem:[%s4678_s15 + $0x1260] sm:$0xff] }
  0xc0   : > { %v1099_v21 = vld [vmem:[%s4678_s15 + $0x1280] sm:$0xff]  ;;  %1098 = vst [vmem:[%s4683_s18 + $0x498] sm:$0xff] %v1097_v20 }
  0xc1   : > { %v1101_v22 = vld [vmem:[%s4678_s15 + $0x12a0] sm:$0xff]  ;;  %1100 = vst [vmem:[%s4683_s18 + $0x4a0] sm:$0xff] %v1099_v21 }
  0xc2   : > { %1102 = vst [vmem:[%s4683_s18 + $0x4a8] sm:$0xff] %v1101_v22  ;;  %v1103_v23 = vld [vmem:[%s4678_s15 + $0x12c0] sm:$0xff] }
  0xc3   : > { %v1105_v24 = vld [vmem:[%s4678_s15 + $0x12e0] sm:$0xff]  ;;  %1104 = vst [vmem:[%s4683_s18 + $0x4b0] sm:$0xff] %v1103_v23 }
  0xc4   : > { %v1107_v25 = vld [vmem:[%s4678_s15 + $0x1300] sm:$0xff]  ;;  %1106 = vst [vmem:[%s4683_s18 + $0x4b8] sm:$0xff] %v1105_v24 }
  0xc5   : > { %1108 = vst [vmem:[%s4683_s18 + $0x4c0] sm:$0xff] %v1107_v25  ;;  %v1109_v26 = vld [vmem:[%s4678_s15 + $0x1320] sm:$0xff] }
  0xc6   : > { %v1111_v27 = vld [vmem:[%s4678_s15 + $0x1340] sm:$0xff]  ;;  %1110 = vst [vmem:[%s4683_s18 + $0x4c8] sm:$0xff] %v1109_v26 }
  0xc7   : > { %v1113_v28 = vld [vmem:[%s4678_s15 + $0x1360] sm:$0xff]  ;;  %1112 = vst [vmem:[%s4683_s18 + $0x4d0] sm:$0xff] %v1111_v27 }
  0xc8   : > { %1114 = vst [vmem:[%s4683_s18 + $0x4d8] sm:$0xff] %v1113_v28  ;;  %v1115_v29 = vld [vmem:[%s4678_s15 + $0x1380] sm:$0xff] }
  0xc9   : > { %v1117_v30 = vld [vmem:[%s4678_s15 + $0x13a0] sm:$0xff]  ;;  %1116 = vst [vmem:[%s4683_s18 + $0x4e0] sm:$0xff] %v1115_v29 }
  0xca   : > { %v1119_v31 = vld [vmem:[%s4678_s15 + $0x13c0] sm:$0xff]  ;;  %1118 = vst [vmem:[%s4683_s18 + $0x4e8] sm:$0xff] %v1117_v30 }
  0xcb   : > { %1120 = vst [vmem:[%s4683_s18 + $0x4f0] sm:$0xff] %v1119_v31  ;;  %v1121_v32 = vld [vmem:[%s4678_s15 + $0x13e0] sm:$0xff] }
  0xcc   : > { %v1123_v33 = vld [vmem:[%s4678_s15 + $0x1400] sm:$0xff]  ;;  %1122 = vst [vmem:[%s4683_s18 + $0x4f8] sm:$0xff] %v1121_v32 }
  0xcd   : > { %v1125_v34 = vld [vmem:[%s4678_s15 + $0x1420] sm:$0xff]  ;;  %1124 = vst [vmem:[%s4683_s18 + $0x500] sm:$0xff] %v1123_v33 }
  0xce   : > { %1126 = vst [vmem:[%s4683_s18 + $0x508] sm:$0xff] %v1125_v34  ;;  %v1127_v35 = vld [vmem:[%s4678_s15 + $0x1440] sm:$0xff] }
  0xcf   : > { %v1129_v36 = vld [vmem:[%s4678_s15 + $0x1460] sm:$0xff]  ;;  %1128 = vst [vmem:[%s4683_s18 + $0x510] sm:$0xff] %v1127_v35 }
  0xd0   : > { %v1131_v37 = vld [vmem:[%s4678_s15 + $0x1480] sm:$0xff]  ;;  %1130 = vst [vmem:[%s4683_s18 + $0x518] sm:$0xff] %v1129_v36 }
  0xd1   : > { %1132 = vst [vmem:[%s4683_s18 + $0x520] sm:$0xff] %v1131_v37  ;;  %v1133_v38 = vld [vmem:[%s4678_s15 + $0x14a0] sm:$0xff] }
  0xd2   : > { %v1135_v39 = vld [vmem:[%s4678_s15 + $0x14c0] sm:$0xff]  ;;  %1134 = vst [vmem:[%s4683_s18 + $0x528] sm:$0xff] %v1133_v38 }
  0xd3   : > { %v1137_v40 = vld [vmem:[%s4678_s15 + $0x14e0] sm:$0xff]  ;;  %1136 = vst [vmem:[%s4683_s18 + $0x530] sm:$0xff] %v1135_v39 }
  0xd4   : > { %1138 = vst [vmem:[%s4683_s18 + $0x538] sm:$0xff] %v1137_v40  ;;  %v1139_v41 = vld [vmem:[%s4678_s15 + $0x1500] sm:$0xff] }
  0xd5   : > { %v1141_v42 = vld [vmem:[%s4678_s15 + $0x1520] sm:$0xff]  ;;  %1140 = vst [vmem:[%s4683_s18 + $0x540] sm:$0xff] %v1139_v41 }
  0xd6   : > { %v1143_v43 = vld [vmem:[%s4678_s15 + $0x1540] sm:$0xff]  ;;  %1142 = vst [vmem:[%s4683_s18 + $0x548] sm:$0xff] %v1141_v42 }
  0xd7   : > { %1144 = vst [vmem:[%s4683_s18 + $0x550] sm:$0xff] %v1143_v43  ;;  %v1145_v44 = vld [vmem:[%s4678_s15 + $0x1560] sm:$0xff] }
  0xd8   : > { %v1147_v45 = vld [vmem:[%s4678_s15 + $0x1580] sm:$0xff]  ;;  %1146 = vst [vmem:[%s4683_s18 + $0x558] sm:$0xff] %v1145_v44 }
  0xd9   : > { %v1149_v46 = vld [vmem:[%s4678_s15 + $0x15a0] sm:$0xff]  ;;  %1148 = vst [vmem:[%s4683_s18 + $0x560] sm:$0xff] %v1147_v45 }
  0xda   : > { %1150 = vst [vmem:[%s4683_s18 + $0x568] sm:$0xff] %v1149_v46  ;;  %v1151_v47 = vld [vmem:[%s4678_s15 + $0x15c0] sm:$0xff] }
  0xdb   : > { %v1153_v48 = vld [vmem:[%s4678_s15 + $0x15e0] sm:$0xff]  ;;  %1152 = vst [vmem:[%s4683_s18 + $0x570] sm:$0xff] %v1151_v47 }
  0xdc   : > { %v1155_v49 = vld [vmem:[%s4678_s15 + $0x1600] sm:$0xff]  ;;  %1154 = vst [vmem:[%s4683_s18 + $0x578] sm:$0xff] %v1153_v48 }
  0xdd   : > { %1156 = vst [vmem:[%s4683_s18 + $0x580] sm:$0xff] %v1155_v49  ;;  %v1157_v50 = vld [vmem:[%s4678_s15 + $0x1620] sm:$0xff] }
  0xde   : > { %v1159_v51 = vld [vmem:[%s4678_s15 + $0x1640] sm:$0xff]  ;;  %1158 = vst [vmem:[%s4683_s18 + $0x588] sm:$0xff] %v1157_v50 }
  0xdf   : > { %v1161_v52 = vld [vmem:[%s4678_s15 + $0x1660] sm:$0xff]  ;;  %1160 = vst [vmem:[%s4683_s18 + $0x590] sm:$0xff] %v1159_v51 }
  0xe0   : > { %1162 = vst [vmem:[%s4683_s18 + $0x598] sm:$0xff] %v1161_v52  ;;  %v1163_v53 = vld [vmem:[%s4678_s15 + $0x1680] sm:$0xff] }
  0xe1   : > { %v1165_v54 = vld [vmem:[%s4678_s15 + $0x16a0] sm:$0xff]  ;;  %1164 = vst [vmem:[%s4683_s18 + $0x5a0] sm:$0xff] %v1163_v53 }
  0xe2   : > { %v1167_v55 = vld [vmem:[%s4678_s15 + $0x16c0] sm:$0xff]  ;;  %1166 = vst [vmem:[%s4683_s18 + $0x5a8] sm:$0xff] %v1165_v54 }
  0xe3   : > { %1168 = vst [vmem:[%s4683_s18 + $0x5b0] sm:$0xff] %v1167_v55  ;;  %v1169_v56 = vld [vmem:[%s4678_s15 + $0x16e0] sm:$0xff] }
  0xe4   : > { %v1171_v57 = vld [vmem:[%s4678_s15 + $0x1700] sm:$0xff]  ;;  %1170 = vst [vmem:[%s4683_s18 + $0x5b8] sm:$0xff] %v1169_v56 }
  0xe5   : > { %v1173_v58 = vld [vmem:[%s4678_s15 + $0x1720] sm:$0xff]  ;;  %1172 = vst [vmem:[%s4683_s18 + $0x5c0] sm:$0xff] %v1171_v57 }
  0xe6   : > { %1174 = vst [vmem:[%s4683_s18 + $0x5c8] sm:$0xff] %v1173_v58  ;;  %v1175_v59 = vld [vmem:[%s4678_s15 + $0x1740] sm:$0xff] }
  0xe7   : > { %v1177_v60 = vld [vmem:[%s4678_s15 + $0x1760] sm:$0xff]  ;;  %1176 = vst [vmem:[%s4683_s18 + $0x5d0] sm:$0xff] %v1175_v59 }
  0xe8   : > { %v1179_v61 = vld [vmem:[%s4678_s15 + $0x1780] sm:$0xff]  ;;  %1178 = vst [vmem:[%s4683_s18 + $0x5d8] sm:$0xff] %v1177_v60 }
  0xe9   : > { %1180 = vst [vmem:[%s4683_s18 + $0x5e0] sm:$0xff] %v1179_v61  ;;  %v1181_v62 = vld [vmem:[%s4678_s15 + $0x17a0] sm:$0xff] }
  0xea   : > { %v1183_v63 = vld [vmem:[%s4678_s15 + $0x17c0] sm:$0xff]  ;;  %1182 = vst [vmem:[%s4683_s18 + $0x5e8] sm:$0xff] %v1181_v62 }
  0xeb   : > { %v1185_v0 = vld [vmem:[%s4678_s15 + $0x17e0] sm:$0xff]  ;;  %1184 = vst [vmem:[%s4683_s18 + $0x5f0] sm:$0xff] %v1183_v63 }
  0xec   : > { %1186 = vst [vmem:[%s4683_s18 + $0x5f8] sm:$0xff] %v1185_v0  ;;  %v1187_v1 = vld [vmem:[%s4678_s15 + $0x1800] sm:$0xff] }
  0xed   : > { %v1189_v2 = vld [vmem:[%s4678_s15 + $0x1820] sm:$0xff]  ;;  %1188 = vst [vmem:[%s4683_s18 + $0x600] sm:$0xff] %v1187_v1 }
  0xee   : > { %v1191_v3 = vld [vmem:[%s4678_s15 + $0x1840] sm:$0xff]  ;;  %1190 = vst [vmem:[%s4683_s18 + $0x608] sm:$0xff] %v1189_v2 }
  0xef   : > { %1192 = vst [vmem:[%s4683_s18 + $0x610] sm:$0xff] %v1191_v3  ;;  %v1193_v4 = vld [vmem:[%s4678_s15 + $0x1860] sm:$0xff] }
  0xf0   : > { %v1195_v5 = vld [vmem:[%s4678_s15 + $0x1880] sm:$0xff]  ;;  %1194 = vst [vmem:[%s4683_s18 + $0x618] sm:$0xff] %v1193_v4 }
  0xf1   : > { %v1197_v6 = vld [vmem:[%s4678_s15 + $0x18a0] sm:$0xff]  ;;  %1196 = vst [vmem:[%s4683_s18 + $0x620] sm:$0xff] %v1195_v5 }
  0xf2   : > { %1198 = vst [vmem:[%s4683_s18 + $0x628] sm:$0xff] %v1197_v6  ;;  %v1199_v7 = vld [vmem:[%s4678_s15 + $0x18c0] sm:$0xff] }
  0xf3   : > { %v1201_v8 = vld [vmem:[%s4678_s15 + $0x18e0] sm:$0xff]  ;;  %1200 = vst [vmem:[%s4683_s18 + $0x630] sm:$0xff] %v1199_v7 }
  0xf4   : > { %v1203_v9 = vld [vmem:[%s4678_s15 + $0x1900] sm:$0xff]  ;;  %1202 = vst [vmem:[%s4683_s18 + $0x638] sm:$0xff] %v1201_v8 }
  0xf5   : > { %1204 = vst [vmem:[%s4683_s18 + $0x640] sm:$0xff] %v1203_v9  ;;  %v1205_v10 = vld [vmem:[%s4678_s15 + $0x1920] sm:$0xff] }
  0xf6   : > { %v1207_v11 = vld [vmem:[%s4678_s15 + $0x1940] sm:$0xff]  ;;  %1206 = vst [vmem:[%s4683_s18 + $0x648] sm:$0xff] %v1205_v10 }
  0xf7   : > { %v1209_v12 = vld [vmem:[%s4678_s15 + $0x1960] sm:$0xff]  ;;  %1208 = vst [vmem:[%s4683_s18 + $0x650] sm:$0xff] %v1207_v11 }
  0xf8   : > { %1210 = vst [vmem:[%s4683_s18 + $0x658] sm:$0xff] %v1209_v12  ;;  %v1211_v13 = vld [vmem:[%s4678_s15 + $0x1980] sm:$0xff] }
  0xf9   : > { %v1213_v14 = vld [vmem:[%s4678_s15 + $0x19a0] sm:$0xff]  ;;  %1212 = vst [vmem:[%s4683_s18 + $0x660] sm:$0xff] %v1211_v13 }
  0xfa   : > { %v1215_v15 = vld [vmem:[%s4678_s15 + $0x19c0] sm:$0xff]  ;;  %1214 = vst [vmem:[%s4683_s18 + $0x668] sm:$0xff] %v1213_v14 }
  0xfb   : > { %1216 = vst [vmem:[%s4683_s18 + $0x670] sm:$0xff] %v1215_v15  ;;  %v1217_v16 = vld [vmem:[%s4678_s15 + $0x19e0] sm:$0xff] }
  0xfc   : > { %v1219_v17 = vld [vmem:[%s4678_s15 + $0x1a00] sm:$0xff]  ;;  %1218 = vst [vmem:[%s4683_s18 + $0x678] sm:$0xff] %v1217_v16 }
  0xfd   : > { %v1221_v18 = vld [vmem:[%s4678_s15 + $0x1a20] sm:$0xff]  ;;  %1220 = vst [vmem:[%s4683_s18 + $0x680] sm:$0xff] %v1219_v17 }
  0xfe   : > { %1222 = vst [vmem:[%s4683_s18 + $0x688] sm:$0xff] %v1221_v18  ;;  %v1223_v19 = vld [vmem:[%s4678_s15 + $0x1a40] sm:$0xff] }
  0xff   : > { %v1225_v20 = vld [vmem:[%s4678_s15 + $0x1a60] sm:$0xff]  ;;  %1224 = vst [vmem:[%s4683_s18 + $0x690] sm:$0xff] %v1223_v19 }
 0x100   : > { %v1227_v21 = vld [vmem:[%s4678_s15 + $0x1a80] sm:$0xff]  ;;  %1226 = vst [vmem:[%s4683_s18 + $0x698] sm:$0xff] %v1225_v20 }
 0x101   : > { %1228 = vst [vmem:[%s4683_s18 + $0x6a0] sm:$0xff] %v1227_v21  ;;  %v1229_v22 = vld [vmem:[%s4678_s15 + $0x1aa0] sm:$0xff] }
 0x102   : > { %v1231_v23 = vld [vmem:[%s4678_s15 + $0x1ac0] sm:$0xff]  ;;  %1230 = vst [vmem:[%s4683_s18 + $0x6a8] sm:$0xff] %v1229_v22 }
 0x103   : > { %v1233_v24 = vld [vmem:[%s4678_s15 + $0x1ae0] sm:$0xff]  ;;  %1232 = vst [vmem:[%s4683_s18 + $0x6b0] sm:$0xff] %v1231_v23 }
 0x104   : > { %1234 = vst [vmem:[%s4683_s18 + $0x6b8] sm:$0xff] %v1233_v24  ;;  %v1235_v25 = vld [vmem:[%s4678_s15 + $0x1b00] sm:$0xff] }
 0x105   : > { %v1237_v26 = vld [vmem:[%s4678_s15 + $0x1b20] sm:$0xff]  ;;  %1236 = vst [vmem:[%s4683_s18 + $0x6c0] sm:$0xff] %v1235_v25 }
 0x106   : > { %v1239_v27 = vld [vmem:[%s4678_s15 + $0x1b40] sm:$0xff]  ;;  %1238 = vst [vmem:[%s4683_s18 + $0x6c8] sm:$0xff] %v1237_v26 }
 0x107   : > { %1240 = vst [vmem:[%s4683_s18 + $0x6d0] sm:$0xff] %v1239_v27  ;;  %v1241_v28 = vld [vmem:[%s4678_s15 + $0x1b60] sm:$0xff] }
 0x108   : > { %v1243_v29 = vld [vmem:[%s4678_s15 + $0x1b80] sm:$0xff]  ;;  %1242 = vst [vmem:[%s4683_s18 + $0x6d8] sm:$0xff] %v1241_v28 }
 0x109   : > { %v1245_v30 = vld [vmem:[%s4678_s15 + $0x1ba0] sm:$0xff]  ;;  %1244 = vst [vmem:[%s4683_s18 + $0x6e0] sm:$0xff] %v1243_v29 }
 0x10a   : > { %1246 = vst [vmem:[%s4683_s18 + $0x6e8] sm:$0xff] %v1245_v30  ;;  %v1247_v31 = vld [vmem:[%s4678_s15 + $0x1bc0] sm:$0xff] }
 0x10b   : > { %v1249_v32 = vld [vmem:[%s4678_s15 + $0x1be0] sm:$0xff]  ;;  %1248 = vst [vmem:[%s4683_s18 + $0x6f0] sm:$0xff] %v1247_v31 }
 0x10c   : > { %v1251_v33 = vld [vmem:[%s4678_s15 + $0x1c00] sm:$0xff]  ;;  %1250 = vst [vmem:[%s4683_s18 + $0x6f8] sm:$0xff] %v1249_v32 }
 0x10d   : > { %1252 = vst [vmem:[%s4683_s18 + $0x700] sm:$0xff] %v1251_v33  ;;  %v1253_v34 = vld [vmem:[%s4678_s15 + $0x1c20] sm:$0xff] }
 0x10e   : > { %v1255_v35 = vld [vmem:[%s4678_s15 + $0x1c40] sm:$0xff]  ;;  %1254 = vst [vmem:[%s4683_s18 + $0x708] sm:$0xff] %v1253_v34 }
 0x10f   : > { %v1257_v36 = vld [vmem:[%s4678_s15 + $0x1c60] sm:$0xff]  ;;  %1256 = vst [vmem:[%s4683_s18 + $0x710] sm:$0xff] %v1255_v35 }
 0x110   : > { %1258 = vst [vmem:[%s4683_s18 + $0x718] sm:$0xff] %v1257_v36  ;;  %v1259_v37 = vld [vmem:[%s4678_s15 + $0x1c80] sm:$0xff] }
 0x111   : > { %v1261_v38 = vld [vmem:[%s4678_s15 + $0x1ca0] sm:$0xff]  ;;  %1260 = vst [vmem:[%s4683_s18 + $0x720] sm:$0xff] %v1259_v37 }
 0x112   : > { %v1263_v39 = vld [vmem:[%s4678_s15 + $0x1cc0] sm:$0xff]  ;;  %1262 = vst [vmem:[%s4683_s18 + $0x728] sm:$0xff] %v1261_v38 }
 0x113   : > { %1264 = vst [vmem:[%s4683_s18 + $0x730] sm:$0xff] %v1263_v39  ;;  %v1265_v40 = vld [vmem:[%s4678_s15 + $0x1ce0] sm:$0xff] }
 0x114   : > { %v1267_v41 = vld [vmem:[%s4678_s15 + $0x1d00] sm:$0xff]  ;;  %1266 = vst [vmem:[%s4683_s18 + $0x738] sm:$0xff] %v1265_v40 }
 0x115   : > { %v1269_v42 = vld [vmem:[%s4678_s15 + $0x1d20] sm:$0xff]  ;;  %1268 = vst [vmem:[%s4683_s18 + $0x740] sm:$0xff] %v1267_v41 }
 0x116   : > { %1270 = vst [vmem:[%s4683_s18 + $0x748] sm:$0xff] %v1269_v42  ;;  %v1271_v43 = vld [vmem:[%s4678_s15 + $0x1d40] sm:$0xff] }
 0x117   : > { %v1273_v44 = vld [vmem:[%s4678_s15 + $0x1d60] sm:$0xff]  ;;  %1272 = vst [vmem:[%s4683_s18 + $0x750] sm:$0xff] %v1271_v43 }
 0x118   : > { %v1275_v45 = vld [vmem:[%s4678_s15 + $0x1d80] sm:$0xff]  ;;  %1274 = vst [vmem:[%s4683_s18 + $0x758] sm:$0xff] %v1273_v44 }
 0x119   : > { %1276 = vst [vmem:[%s4683_s18 + $0x760] sm:$0xff] %v1275_v45  ;;  %v1277_v46 = vld [vmem:[%s4678_s15 + $0x1da0] sm:$0xff] }
 0x11a   : > { %v1279_v47 = vld [vmem:[%s4678_s15 + $0x1dc0] sm:$0xff]  ;;  %1278 = vst [vmem:[%s4683_s18 + $0x768] sm:$0xff] %v1277_v46 }
 0x11b   : > { %v1281_v48 = vld [vmem:[%s4678_s15 + $0x1de0] sm:$0xff]  ;;  %1280 = vst [vmem:[%s4683_s18 + $0x770] sm:$0xff] %v1279_v47 }
 0x11c   : > { %1282 = vst [vmem:[%s4683_s18 + $0x778] sm:$0xff] %v1281_v48 }
 0x11d PF: > { %s5627_s12 = sand.u32 1, %s4499_s28   ;;  %s5164_s14 = sshll.u32 %s4523_s10, 5 }
 0x11e   : > { %s5168_s25 = sshll.u32 %s5627_s12, 1  ;;  %s1308_s26 = sand.u32 1, %s4527_s11  }
 0x11f   : > { %s5643_s3 = sld [smem:[#allocation19_spill]]  ;;  %s1312_s17 = scalar_lea.vmem [#allocation8], %s5168_s25 }
 0x120   : > { %s1320_s15 = sshll.u32 %s1312_s17, 4  ;;  %s5178_s18 = scalar_lea.sflag [#allocation9], %s1308_s26  ;;  %s1321_s15 = int_to_ptr.vmem [resolvable:$true] %s1320_s15 }
 0x125   : > { %s5175_s21 = scalar_lea.hbm %s5643_s3, %s5164_s14  ;;  %s4361_s16 = scalar_lea.hbm %s5643_s3, 128 }
 0x126   : > { %s4357_s1 = scalar_lea.hbm %s5175_s21, 32  ;;  %p4362_p2 = scmp.lt.u32.totalorder %s5175_s21, %s5643_s3 }
 0x127   : > { %p4358_p13 = scmp.ne.s32.totalorder %s5175_s21, %s4357_s1  ;;  %p4363_p3 = scmp.lt.u32.totalorder %s4361_s16, %s4357_s1 }
 0x128   : > { %p4365_p5 = scmp.lt.u32.totalorder %s4357_s1, %s5175_s21 }
 0x129   : > { %p4359_p0 = pnand %p4358_p13, %p4649_p6  ;;  %p4364_p4 = por %p4363_p3, %p4362_p2 }
 0x12b   : > { %p4360_p1 = pneg %p4359_p0  ;;  %p4366_p7 = por %p4365_p5, %p4364_p4 }
 0x12d   : > { %p4367_p8 = pnand %p4366_p7, %p4360_p1 }
 0x12f   : > { %4370 = shalt.err (!%p4367_p8)
}
 0x130   : > { %s4371_s26 = scalar_lea.vmem %s1321_s15, 32  ;;  %s4529_s17 = smov [#allocation8]  }
 0x131   : > { %p4372_p9 = scmp.ne.s32.totalorder %s1321_s15, %s4371_s26  ;;  %s4375_s5 = sshll.u32 %s4529_s17, 4  ;;  %s4376_s5 = int_to_ptr.vmem [resolvable:$false] %s4375_s5 }
 0x132   : > { %s4377_s13 = scalar_lea.vmem %s4376_s5, 64  ;;  %p4378_p13 = scmp.lt.s32.totalorder %s1321_s15, %s4376_s5 }
 0x133   : > { %p4373_p10 = pnand %p4372_p9, %p4649_p6  ;;  %p4379_p0 = scmp.lt.s32.totalorder %s4377_s13, %s4371_s26 }
 0x135   : > { %p4374_p12 = pneg %p4373_p10  ;;  %p4380_p11 = por %p4379_p0, %p4378_p13 }
 0x137   : > { %p4381_p2 = pnand %p4380_p11, %p4374_p12 }
 0x139   : > { %4384 = shalt.err (!%p4381_p2)
}
 0x13a   : > { %3894 = dma.hbm_to_vmem [thread:$0]  (%p4649_p6), %s5175_s21, 32, %s1321_s15, %s5178_s18  }
 0x13b   : > { %s5202_s12 = scalar_lea.hbm %s5619_s2, %s5164_s14  ;;  %s1293_s5 = scalar_lea.vmem [#allocation6], %s5168_s25 }
 0x13c   : > { %s1301_s16 = sshll.u32 %s1293_s5, 4  ;;  %s5211_s17 = scalar_lea.hbm %s5621_s4, %s5164_s14  ;;  %s5205_s16 = int_to_ptr.vmem [resolvable:$true] %s1301_s16 }
 0x13d   : > { %s5644_s13 = sand.u32 1, %s4499_s28   ;;  %s4385_s15 = scalar_lea.hbm %s5202_s12, 32 }
 0x13e   : > { %s1290_s21 = scalar_lea.sflag [#allocation7], %s5644_s13  ;;  %p4386_p11 = scmp.ne.s32.totalorder %s5202_s12, %s4385_s15 }
 0x13f   : > { %s4389_s3 = scalar_lea.hbm %s5619_s2, 128  ;;  %p4390_p4 = scmp.lt.u32.totalorder %s5202_s12, %s5619_s2 }
 0x140   : > { %p4387_p1 = pnand %p4386_p11, %p4649_p6  ;;  %p4391_p5 = scmp.lt.u32.totalorder %s4389_s3, %s4385_s15 }
 0x141   : > { %p4393_p8 = scmp.lt.u32.totalorder %s4385_s15, %s5202_s12 }
 0x142   : > { %p4388_p3 = pneg %p4387_p1  ;;  %p4392_p7 = por %p4391_p5, %p4390_p4 }
 0x144   : > { %p4394_p9 = por %p4393_p8, %p4392_p7 }
 0x146   : > { %p4395_p10 = pnand %p4394_p9, %p4388_p3 }
 0x148   : > { %4398 = shalt.err (!%p4395_p10)
}
 0x149   : > { %s4399_s14 = scalar_lea.vmem %s5205_s16, 32  ;;  %s4530_s20 = smov [#allocation6]  }
 0x14a   : > { %p4400_p12 = scmp.ne.s32.totalorder %s5205_s16, %s4399_s14  ;;  %s4403_s26 = sshll.u32 %s4530_s20, 4  ;;  %s4404_s26 = int_to_ptr.vmem [resolvable:$false] %s4403_s26 }
 0x14b   : > { %s4405_s24 = scalar_lea.vmem %s4404_s26, 64  ;;  %p4406_p2 = scmp.lt.s32.totalorder %s5205_s16, %s4404_s26 }
 0x14c   : > { %p4401_p13 = pnand %p4400_p12, %p4649_p6  ;;  %p4407_p11 = scmp.lt.s32.totalorder %s4405_s24, %s4399_s14 }
 0x14e   : > { %p4402_p0 = pneg %p4401_p13  ;;  %p4408_p1 = por %p4407_p11, %p4406_p2 }
 0x150   : > { %p4409_p4 = pnand %p4408_p1, %p4402_p0 }
 0x152   : > { %4412 = shalt.err (!%p4409_p4)
}
 0x153   : > { %3893 = dma.hbm_to_vmem [thread:$0]  (%p4649_p6), %s5202_s12, 32, %s5205_s16, %s1290_s21  }
 0x154   : > { %s1331_s3 = scalar_lea.vmem [#allocation10], %s5168_s25  ;;  %s4413_s15 = scalar_lea.hbm %s5211_s17, 32 }
 0x155   : > { %s1339_s13 = sshll.u32 %s1331_s3, 4  ;;  %p4414_p3 = scmp.ne.s32.totalorder %s5211_s17, %s4413_s15  ;;  %s1340_s13 = int_to_ptr.vmem [resolvable:$true] %s1339_s13 }
 0x156   : > { %s4417_s5 = scalar_lea.hbm %s5621_s4, 128  ;;  %p4418_p8 = scmp.lt.u32.totalorder %s5211_s17, %s5621_s4 }
 0x157   : > { %p4415_p5 = pnand %p4414_p3, %p4649_p6  ;;  %p4419_p9 = scmp.lt.u32.totalorder %s4417_s5, %s4413_s15 }
 0x158   : > { %p4421_p12 = scmp.lt.u32.totalorder %s4413_s15, %s5211_s17 }
 0x159   : > { %p4416_p7 = pneg %p4415_p5  ;;  %p4420_p10 = por %p4419_p9, %p4418_p8 }
 0x15b   : > { %p4422_p13 = por %p4421_p12, %p4420_p10 }
 0x15d   : > { %p4423_p0 = pnand %p4422_p13, %p4416_p7 }
 0x15f   : > { %4426 = shalt.err (!%p4423_p0)
}
 0x160   : > { %s4427_s25 = scalar_lea.vmem %s1340_s13, 32  ;;  %s4531_s12 = smov [#allocation10]  }
 0x161   : > { %p4428_p2 = scmp.ne.s32.totalorder %s1340_s13, %s4427_s25  ;;  %s4431_s16 = sshll.u32 %s4531_s12, 4  ;;  %s4432_s16 = int_to_ptr.vmem [resolvable:$false] %s4431_s16 }
 0x162   : > { %s4433_s21 = scalar_lea.vmem %s4432_s16, 64  ;;  %p4434_p4 = scmp.lt.s32.totalorder %s1340_s13, %s4432_s16 }
 0x163   : > { %p4429_p11 = pnand %p4428_p2, %p4649_p6  ;;  %p4435_p3 = scmp.lt.s32.totalorder %s4433_s21, %s4427_s25 }
 0x165   : > { %p4430_p1 = pneg %p4429_p11  ;;  %p4436_p5 = por %p4435_p3, %p4434_p4 }
 0x167   : > { %p4437_p8 = pnand %p4436_p5, %p4430_p1 }
 0x169   : > { %4440 = shalt.err (!%p4437_p8)
}
 0x16a   : > { %3895 = dma.hbm_to_vmem [thread:$0]  (%p4649_p6), %s5211_s17, 32, %s1340_s13, %s5178_s18  }
 0x16b PF: > { %p3619_p7 = scmp.ge.s32.totalorder %s4527_s11, 1  ;;  %p1344_p9 = scmp.lt.s32.totalorder %s4527_s11, 33 }
 0x16d   : > { %p1345_p10 = pnand %p3619_p7, %p1344_p9 }
 0x16e   : > { %s1351_s26 = sand.u32 (!%p1345_p10), 1, %s4503_s29   ;;  %s1357_s24 = sand.u32 (!%p1345_p10), 1, %s4495_s27  }
 0x16f   : > { %1348 = sbr.rel (%p1345_p10) target bundleno = 1054 (0x41e), region = 78  ;;  %s5259_s15 = sshll.u32 (!%p1345_p10), %s1357_s24, 1 }
 0x170   : > { %s3892_s3 = smul.u32 (!%p1345_p10), 1920, %s1351_s26  ;;  %s1358_s1 = scalar_lea.sflag (!%p1345_p10), [#allocation7], %s1357_s24 }
 0x171   : > { %s1361_s18 = scalar_lea.vmem (!%p1345_p10), [#allocation6], %s5259_s15  ;;  %p5645_p6 = scmp.ne.s32.totalorder (!%p1345_p10), %s5640_s22, 0 }
 0x172   : > { %s5261_s19 = scalar_lea.vmem (!%p1345_p10), [#allocation5], %s3892_s3 }
 0x176   : > { %4482 = dma.done.wait (%p5645_p6), %s1358_s1, 32  }
 0x177   : > { %4484 = vsyncadd (%p5645_p6), %s1358_s1, 4294967264  ;;  %s5646_s17 = sadd.s32 4294967295, %s4527_s11   ;;  %s1370_s10 = scalar_lea.vmem [#allocation8], %s5259_s15 }
 0x178   : > { %s1366_s13 = sand.u32 1, %s5646_s17  }
 0x179   : > { %s1367_s29 = scalar_lea.sflag [#allocation9], %s1366_s13 }
 0x17a   : > { %4486 = dma.done.wait (%p5645_p6), %s1367_s29, 64  }
 0x17b   : > { %4488 = vsyncadd (%p5645_p6), %s1367_s29, 4294967232  ;;  %s1441_s5 = smul.u32 15, %s4511_s8  ;;  %s3624_s14 = sshll.u32 %s4515_s9, 1 }
 0x17c   : > { %p1471_p12 = scmp.eq.s32.totalorder %s4511_s8, 0  ;;  %p1459_p0 = scmp.lt.s32.totalorder %s3624_s14, 7 }
 0x17d   : > { %p1444_p13 = scmp.lt.s32.totalorder %s1441_s5, 119  ;;  %s1379_s3 = scalar_lea.vmem [#allocation10], %s5259_s15 }
 0x17e   : > { %s5668_s14 = smov (!%p1459_p0, %s3624_s14), 7  ;;  %p3626_p2 = scmp.ne.s32.totalorder %s4511_s8, 0 }
 0x17f   : > { %s5666_s5 = smov (!%p1444_p13, %s1441_s5), 119  ;;  %s3625_s21 = sshll.u32 %s5668_s14, 3  ;;  %v4532_v49 = vmov (!%p3626_p2), 0.0  }
 0x180   : > { %s3623_s20 = sshll.u32 %s5666_s5, 2  ;;  %s5286_s24 = scalar_lea.vmem %s5623_s6, %s3625_s21  ;;  %1475 = vst [vmem:[#allocation2] sm:$0xff] (!%p3626_p2), %v4532_v49  ;;  %1476 = vst [vmem:[#allocation2 + $0x8] sm:$0xff] (!%p3626_p2), %v4532_v49 }
 0x181   : > { %s5281_s16 = scalar_lea.vmem %s5617_s0, %s3623_s20  ;;  %1474 = sbr.rel (%p3626_p2) target bundleno = 392 (0x188), region = 98 }
 0x188 PF: > { %p1477_p11 = scmp.eq.s32.totalorder %s4515_s9, 0 }
 0x18a   : > { %p1478_p1 = pnand %p1477_p11, %p1471_p12 }
 0x18b   : > { %vm1482_vm0 = vcmask (!%p1478_p1), 7168   ;;  %v4533_v50 = vmov (!%p1478_p1), 0.0  }
 0x18c   : > { %1481 = sbr.rel (%p1478_p1) target bundleno = 403 (0x193), region = 102  ;;  %1483 = vst.msk [vmem:[#allocation3] sm:$0xff] (!%p1478_p1), %vm1482_vm0, %v4533_v50 }
 0x193 PF: > { %v3982_v51 = vld [vmem:[%s5261_s19 + $0x4] ss:$8 sps:$4 sm:$0xff]   ;;  %v3986_v53 = vld [vmem:[%s5261_s19] ss:$8 sps:$4 sm:$0xff]   ;;  %v3988_v55 = vld [vmem:[%s5261_s19 + $0x14] ss:$8 sps:$4 sm:$0xff]  }
 0x194   : > { %v3984_v52 = vld [vmem:[%s5261_s19 + $0x104] ss:$8 sps:$4 sm:$0xff]   ;;  %2987 = vmatprep.subr.bf16.mxu0 %v3982_v51  ;;  %v3987_v54 = vld [vmem:[%s5261_s19 + $0x100] ss:$8 sps:$4 sm:$0xff]   ;;  %v3990_v56 = vld [vmem:[%s5261_s19 + $0x114] ss:$8 sps:$4 sm:$0xff]  }
 0x195   : > { %3028 = vmatprep.subr.bf16.mxu1 %v3984_v52  ;;  %2988 = vmatpush1.bf16.msra.mxu0 %v3986_v53  ;;  %v3992_v57 = vld [vmem:[%s5261_s19 + $0x10] ss:$8 sps:$4 sm:$0xff]   ;;  %v3994_v59 = vld [vmem:[%s5261_s19 + $0x24] ss:$8 sps:$4 sm:$0xff]   ;;  %v3998_v61 = vld [vmem:[%s5261_s19 + $0x20] ss:$8 sps:$4 sm:$0xff]  }
 0x196   : > { %3029 = vmatpush1.bf16.msra.mxu1 %v3987_v54  ;;  %2989 = vmatprep.subr.bf16.mxu0 %v3988_v55  ;;  %v3993_v58 = vld [vmem:[%s5261_s19 + $0x110] ss:$8 sps:$4 sm:$0xff]   ;;  %v3996_v60 = vld [vmem:[%s5261_s19 + $0x124] ss:$8 sps:$4 sm:$0xff]   ;;  %v3999_v62 = vld [vmem:[%s5261_s19 + $0x120] ss:$8 sps:$4 sm:$0xff]  }
 0x197   : > { %3030 = vmatprep.subr.bf16.mxu1 %v3990_v56  ;;  %v4000_v63 = vld [vmem:[%s5261_s19 + $0x34] ss:$8 sps:$4 sm:$0xff]   ;;  %v4004_v1 = vld [vmem:[%s5261_s19 + $0x30] ss:$8 sps:$4 sm:$0xff]   ;;  %v4006_v3 = vld [vmem:[%s5261_s19 + $0x44] ss:$8 sps:$4 sm:$0xff]  }
 0x198   : > { %v4002_v0 = vld [vmem:[%s5261_s19 + $0x134] ss:$8 sps:$4 sm:$0xff]   ;;  %v4005_v2 = vld [vmem:[%s5261_s19 + $0x130] ss:$8 sps:$4 sm:$0xff]   ;;  %v4008_v4 = vld [vmem:[%s5261_s19 + $0x144] ss:$8 sps:$4 sm:$0xff]  }
 0x199   : > { %2990 = vmatpush1.bf16.msra.mxu0 %v3992_v57  ;;  %v4010_v5 = vld [vmem:[%s5261_s19 + $0x40] ss:$8 sps:$4 sm:$0xff]   ;;  %v4012_v7 = vld [vmem:[%s5261_s19 + $0x54] ss:$8 sps:$4 sm:$0xff]   ;;  %v4016_v9 = vld [vmem:[%s5261_s19 + $0x50] ss:$8 sps:$4 sm:$0xff]  }
 0x19a   : > { %3031 = vmatpush1.bf16.msra.mxu1 %v3993_v58  ;;  %2991 = vmatprep.subr.bf16.mxu0 %v3994_v59  ;;  %v4011_v6 = vld [vmem:[%s5261_s19 + $0x140] ss:$8 sps:$4 sm:$0xff]   ;;  %v4014_v8 = vld [vmem:[%s5261_s19 + $0x154] ss:$8 sps:$4 sm:$0xff]   ;;  %v4017_v10 = vld [vmem:[%s5261_s19 + $0x150] ss:$8 sps:$4 sm:$0xff]  }
 0x19b   : > { %3032 = vmatprep.subr.bf16.mxu1 %v3996_v60  ;;  %v4018_v11 = vld [vmem:[%s5261_s19 + $0x64] ss:$8 sps:$4 sm:$0xff]   ;;  %v4022_v13 = vld [vmem:[%s5261_s19 + $0x60] ss:$8 sps:$4 sm:$0xff]   ;;  %v4024_v15 = vld [vmem:[%s5261_s19 + $0x74] ss:$8 sps:$4 sm:$0xff]  }
 0x19c   : > { %v4020_v12 = vld [vmem:[%s5261_s19 + $0x164] ss:$8 sps:$4 sm:$0xff]   ;;  %v4023_v14 = vld [vmem:[%s5261_s19 + $0x160] ss:$8 sps:$4 sm:$0xff]   ;;  %v4026_v16 = vld [vmem:[%s5261_s19 + $0x174] ss:$8 sps:$4 sm:$0xff]  }
 0x19d   : > { %2992 = vmatpush1.bf16.msra.mxu0 %v3998_v61  ;;  %v4028_v17 = vld [vmem:[%s5261_s19 + $0x70] ss:$8 sps:$4 sm:$0xff]   ;;  %v4030_v19 = vld [vmem:[%s5261_s19 + $0x84] ss:$8 sps:$4 sm:$0xff]   ;;  %v4034_v21 = vld [vmem:[%s5261_s19 + $0x80] ss:$8 sps:$4 sm:$0xff]  }
 0x19e   : > { %3033 = vmatpush1.bf16.msra.mxu1 %v3999_v62  ;;  %2993 = vmatprep.subr.bf16.mxu0 %v4000_v63  ;;  %v4029_v18 = vld [vmem:[%s5261_s19 + $0x170] ss:$8 sps:$4 sm:$0xff]   ;;  %v4032_v20 = vld [vmem:[%s5261_s19 + $0x184] ss:$8 sps:$4 sm:$0xff]   ;;  %v4035_v22 = vld [vmem:[%s5261_s19 + $0x180] ss:$8 sps:$4 sm:$0xff]  }
 0x19f   : > { %3034 = vmatprep.subr.bf16.mxu1 %v4002_v0  ;;  %v4036_v23 = vld [vmem:[%s5261_s19 + $0x94] ss:$8 sps:$4 sm:$0xff]   ;;  %v4040_v25 = vld [vmem:[%s5261_s19 + $0x90] ss:$8 sps:$4 sm:$0xff]   ;;  %v4042_v27 = vld [vmem:[%s5261_s19 + $0xa4] ss:$8 sps:$4 sm:$0xff]  }
 0x1a0   : > { %v4038_v24 = vld [vmem:[%s5261_s19 + $0x194] ss:$8 sps:$4 sm:$0xff]   ;;  %v4041_v26 = vld [vmem:[%s5261_s19 + $0x190] ss:$8 sps:$4 sm:$0xff]   ;;  %v4044_v28 = vld [vmem:[%s5261_s19 + $0x1a4] ss:$8 sps:$4 sm:$0xff]  }
 0x1a1   : > { %2994 = vmatpush1.bf16.msra.mxu0 %v4004_v1  ;;  %v4046_v29 = vld [vmem:[%s5261_s19 + $0xa0] ss:$8 sps:$4 sm:$0xff]   ;;  %v4048_v31 = vld [vmem:[%s5261_s19 + $0xb4] ss:$8 sps:$4 sm:$0xff]   ;;  %v4052_v36 = vld [vmem:[%s5261_s19 + $0xb0] ss:$8 sps:$4 sm:$0xff]  }
 0x1a2   : > { %3035 = vmatpush1.bf16.msra.mxu1 %v4005_v2  ;;  %2995 = vmatprep.subr.bf16.mxu0 %v4006_v3  ;;  %v4047_v30 = vld [vmem:[%s5261_s19 + $0x1a0] ss:$8 sps:$4 sm:$0xff]   ;;  %v4050_v32 = vld [vmem:[%s5261_s19 + $0x1b4] ss:$8 sps:$4 sm:$0xff]   ;;  %v4053_v37 = vld [vmem:[%s5261_s19 + $0x1b0] ss:$8 sps:$4 sm:$0xff]  }
 0x1a3   : > { %3036 = vmatprep.subr.bf16.mxu1 %v4008_v4  ;;  %v1486_v33 = vld [vmem:[%s5281_s16] sm:$0xff]  ;;  %v1487_v35 = vld [vmem:[%s5281_s16 + $0x8] sm:$0xff]  ;;  %p3319_p4 = scmp.eq.s32.totalorder %s4511_s8, 7  ;;  %p3882_p3 = scmp.ne.s32.totalorder %s4511_s8, 7 }
 0x1a4   : > { %v3628_v34 = vcombine.high %v1486_v33, %v1486_v33  ;;  %v3630_v38 = vcombine.high %v1487_v35, %v1487_v35  ;;  %v4054_v39 = vld [vmem:[%s5261_s19 + $0xc4] ss:$8 sps:$4 sm:$0xff]   ;;  %v4058_v41 = vld [vmem:[%s5261_s19 + $0xc0] ss:$8 sps:$4 sm:$0xff]   ;;  %v4060_v43 = vld [vmem:[%s5261_s19 + $0xd4] ss:$8 sps:$4 sm:$0xff]   ;;  %v3627_v57 = vcombine.low %v1486_v33, %v1486_v33  ;;  %v3629_v58 = vcombine.low %v1487_v35, %v1487_v35 }
 0x1a5   : > { %2996 = vmatpush1.bf16.msra.mxu0 %v4010_v5  ;;  %v4056_v40 = vld [vmem:[%s5261_s19 + $0x1c4] ss:$8 sps:$4 sm:$0xff]   ;;  %v4059_v42 = vld [vmem:[%s5261_s19 + $0x1c0] ss:$8 sps:$4 sm:$0xff]   ;;  %v4062_v44 = vld [vmem:[%s5261_s19 + $0x1d4] ss:$8 sps:$4 sm:$0xff]  }
 0x1a6   : > { %3037 = vmatpush1.bf16.msra.mxu1 %v4011_v6  ;;  %2997 = vmatprep.subr.bf16.mxu0 %v4012_v7  ;;  %v4064_v45 = vld [vmem:[%s5261_s19 + $0xd0] ss:$8 sps:$4 sm:$0xff]   ;;  %v4066_v47 = vld [vmem:[%s5261_s19 + $0xe4] ss:$8 sps:$4 sm:$0xff]   ;;  %v4070_v49 = vld [vmem:[%s5261_s19 + $0xe0] ss:$8 sps:$4 sm:$0xff]  }
 0x1a7   : > { %3038 = vmatprep.subr.bf16.mxu1 %v4014_v8  ;;  %3019 = vmatprep.mubr.bf16.mxu0 %v3628_v34  ;;  %v4065_v46 = vld [vmem:[%s5261_s19 + $0x1d0] ss:$8 sps:$4 sm:$0xff]   ;;  %v4068_v48 = vld [vmem:[%s5261_s19 + $0x1e4] ss:$8 sps:$4 sm:$0xff]   ;;  %v4071_v50 = vld [vmem:[%s5261_s19 + $0x1e0] ss:$8 sps:$4 sm:$0xff]  }
 0x1a8   : > { %3060 = vmatprep.mubr.bf16.mxu1 %v3630_v38  ;;  %v4072_v51 = vld [vmem:[%s5261_s19 + $0xf4] ss:$8 sps:$4 sm:$0xff]   ;;  %v4076_v53 = vld [vmem:[%s5261_s19 + $0xf0] ss:$8 sps:$4 sm:$0xff]   ;;  %v4084_v55 = vld [vmem:[%s5261_s19 + $0x204] ss:$8 sps:$4 sm:$0xff]  }
 0x1a9   : > { %2998 = vmatpush1.bf16.msra.mxu0 %v4016_v9  ;;  %v4074_v52 = vld [vmem:[%s5261_s19 + $0x1f4] ss:$8 sps:$4 sm:$0xff]   ;;  %v4077_v54 = vld [vmem:[%s5261_s19 + $0x1f0] ss:$8 sps:$4 sm:$0xff]   ;;  %v4087_v56 = vld [vmem:[%s5261_s19 + $0x304] ss:$8 sps:$4 sm:$0xff]  }
 0x1aa   : > { %3039 = vmatpush1.bf16.msra.mxu1 %v4017_v10  ;;  %2999 = vmatprep.subr.bf16.mxu0 %v4018_v11  ;;  %v4082_v59 = vld [vmem:[%s5261_s19 + $0x200] ss:$8 sps:$4 sm:$0xff]   ;;  %v4090_v61 = vld [vmem:[%s5261_s19 + $0x214] ss:$8 sps:$4 sm:$0xff]   ;;  %v4088_v63 = vld [vmem:[%s5261_s19 + $0x210] ss:$8 sps:$4 sm:$0xff]  }
 0x1ab   : > { %3040 = vmatprep.subr.bf16.mxu1 %v4020_v12  ;;  %v4085_v60 = vld [vmem:[%s5261_s19 + $0x300] ss:$8 sps:$4 sm:$0xff]   ;;  %v4093_v62 = vld [vmem:[%s5261_s19 + $0x314] ss:$8 sps:$4 sm:$0xff]   ;;  %v4091_v0 = vld [vmem:[%s5261_s19 + $0x310] ss:$8 sps:$4 sm:$0xff]  }
 0x1ac   : > { %v4096_v1 = vld [vmem:[%s5261_s19 + $0x224] ss:$8 sps:$4 sm:$0xff]   ;;  %v4094_v3 = vld [vmem:[%s5261_s19 + $0x220] ss:$8 sps:$4 sm:$0xff]   ;;  %v4102_v5 = vld [vmem:[%s5261_s19 + $0x234] ss:$8 sps:$4 sm:$0xff]  }
 0x1ad   : > { %3000 = vmatpush1.bf16.msra.mxu0 %v4022_v13  ;;  %v4099_v2 = vld [vmem:[%s5261_s19 + $0x324] ss:$8 sps:$4 sm:$0xff]   ;;  %v4097_v4 = vld [vmem:[%s5261_s19 + $0x320] ss:$8 sps:$4 sm:$0xff]   ;;  %v4105_v6 = vld [vmem:[%s5261_s19 + $0x334] ss:$8 sps:$4 sm:$0xff]  }
 0x1ae   : > { %3041 = vmatpush1.bf16.msra.mxu1 %v4023_v14  ;;  %3001 = vmatprep.subr.bf16.mxu0 %v4024_v15  ;;  %v4100_v7 = vld [vmem:[%s5261_s19 + $0x230] ss:$8 sps:$4 sm:$0xff]   ;;  %v4108_v9 = vld [vmem:[%s5261_s19 + $0x244] ss:$8 sps:$4 sm:$0xff]   ;;  %v4106_v11 = vld [vmem:[%s5261_s19 + $0x240] ss:$8 sps:$4 sm:$0xff]  }
 0x1af   : > { %3042 = vmatprep.subr.bf16.mxu1 %v4026_v16  ;;  %v4103_v8 = vld [vmem:[%s5261_s19 + $0x330] ss:$8 sps:$4 sm:$0xff]   ;;  %v4111_v10 = vld [vmem:[%s5261_s19 + $0x344] ss:$8 sps:$4 sm:$0xff]   ;;  %v4109_v12 = vld [vmem:[%s5261_s19 + $0x340] ss:$8 sps:$4 sm:$0xff]  }
 0x1b0   : > { %v4114_v13 = vld [vmem:[%s5261_s19 + $0x254] ss:$8 sps:$4 sm:$0xff]   ;;  %v4112_v15 = vld [vmem:[%s5261_s19 + $0x250] ss:$8 sps:$4 sm:$0xff]   ;;  %v4147_v38 = vld [vmem:[%s5261_s19 + $0x3a4] ss:$8 sps:$4 sm:$0xff]  }
 0x1b1   : > { %3002 = vmatpush1.bf16.msra.mxu0 %v4028_v17  ;;  %v4117_v14 = vld [vmem:[%s5261_s19 + $0x354] ss:$8 sps:$4 sm:$0xff]   ;;  %v4115_v16 = vld [vmem:[%s5261_s19 + $0x350] ss:$8 sps:$4 sm:$0xff]   ;;  %v4120_v17 = vld [vmem:[%s5261_s19 + $0x264] ss:$8 sps:$4 sm:$0xff]  }
 0x1b2   : > { %3043 = vmatpush1.bf16.msra.mxu1 %v4029_v18  ;;  %3003 = vmatprep.subr.bf16.mxu0 %v4030_v19  ;;  %v4123_v18 = vld [vmem:[%s5261_s19 + $0x364] ss:$8 sps:$4 sm:$0xff]   ;;  %v5386_v19 = vld [vmem:[%s5281_s16 + $0x10] sm:$0xff]  ;;  %vm3376_vm1 = vcmask (!%p3882_p3), 7168  }
 0x1b3   : > { %3044 = vmatprep.subr.bf16.mxu1 %v4032_v20  ;;  %v4118_v20 = vld [vmem:[%s5261_s19 + $0x260] ss:$8 sps:$4 sm:$0xff]   ;;  %v4138_v33 = vld [vmem:[%s5261_s19 + $0x294] ss:$8 sps:$4 sm:$0xff]   ;;  %v4136_v35 = vld [vmem:[%s5261_s19 + $0x290] ss:$8 sps:$4 sm:$0xff]  }
 0x1b4   : > { %v4141_v34 = vld [vmem:[%s5261_s19 + $0x394] ss:$8 sps:$4 sm:$0xff]  }
 0x1b5   : > { %3004 = vmatpush1.bf16.msra.mxu0 %v4034_v21  ;;  %v4121_v21 = vld [vmem:[%s5261_s19 + $0x360] ss:$8 sps:$4 sm:$0xff]  }
 0x1b6   : > { %3045 = vmatpush1.bf16.msra.mxu1 %v4035_v22  ;;  %3005 = vmatprep.subr.bf16.mxu0 %v4036_v23  ;;  %v3632_v22 = vcombine.high %v5386_v19, %v5386_v19  ;;  %v5393_v23 = vld [vmem:[%s5281_s16 + $0x18] sm:$0xff] }
 0x1b7   : > { %3046 = vmatprep.subr.bf16.mxu1 %v4038_v24  ;;  %v4126_v24 = vld [vmem:[%s5261_s19 + $0x274] ss:$8 sps:$4 sm:$0xff]  }
 0x1b9   : > { %3006 = vmatpush1.bf16.msra.mxu0 %v4040_v25  ;;  %v3634_v25 = vcombine.high %v5393_v23, %v5393_v23 }
 0x1ba   : > { %3047 = vmatpush1.bf16.msra.mxu1 %v4041_v26  ;;  %3007 = vmatprep.subr.bf16.mxu0 %v4042_v27  ;;  %v4129_v26 = vld [vmem:[%s5261_s19 + $0x374] ss:$8 sps:$4 sm:$0xff]   ;;  %v4124_v27 = vld [vmem:[%s5261_s19 + $0x270] ss:$8 sps:$4 sm:$0xff]  }
 0x1bb   : > { %3048 = vmatprep.subr.bf16.mxu1 %v4044_v28  ;;  %v4127_v28 = vld [vmem:[%s5261_s19 + $0x370] ss:$8 sps:$4 sm:$0xff]  }
 0x1bd   : > { %3008 = vmatpush1.bf16.msra.mxu0 %v4046_v29  ;;  %v4132_v29 = vld [vmem:[%s5261_s19 + $0x284] ss:$8 sps:$4 sm:$0xff]  }
 0x1be   : > { %3049 = vmatpush1.bf16.msra.mxu1 %v4047_v30  ;;  %3009 = vmatprep.subr.bf16.mxu0 %v4048_v31  ;;  %v4135_v30 = vld [vmem:[%s5261_s19 + $0x384] ss:$8 sps:$4 sm:$0xff]   ;;  %v4130_v31 = vld [vmem:[%s5261_s19 + $0x280] ss:$8 sps:$4 sm:$0xff]  }
 0x1bf   : > { %3050 = vmatprep.subr.bf16.mxu1 %v4050_v32  ;;  %v4133_v32 = vld [vmem:[%s5261_s19 + $0x380] ss:$8 sps:$4 sm:$0xff]  }
 0x1c1   : > { %3010 = vmatpush1.bf16.msra.mxu0 %v4052_v36  ;;  %v4139_v36 = vld [vmem:[%s5261_s19 + $0x390] ss:$8 sps:$4 sm:$0xff]  }
 0x1c2   : > { %3051 = vmatpush1.bf16.msra.mxu1 %v4053_v37  ;;  %3011 = vmatprep.subr.bf16.mxu0 %v4054_v39  ;;  %v4144_v37 = vld [vmem:[%s5261_s19 + $0x2a4] ss:$8 sps:$4 sm:$0xff]   ;;  %v4142_v39 = vld [vmem:[%s5261_s19 + $0x2a0] ss:$8 sps:$4 sm:$0xff]  }
 0x1c3   : > { %3052 = vmatprep.subr.bf16.mxu1 %v4056_v40  ;;  %v4145_v40 = vld [vmem:[%s5261_s19 + $0x3a0] ss:$8 sps:$4 sm:$0xff]  }
 0x1c5   : > { %3012 = vmatpush1.bf16.msra.mxu0 %v4058_v41  ;;  %v4150_v41 = vld [vmem:[%s5261_s19 + $0x2b4] ss:$8 sps:$4 sm:$0xff]  }
 0x1c6   : > { %3053 = vmatpush1.bf16.msra.mxu1 %v4059_v42  ;;  %3013 = vmatprep.subr.bf16.mxu0 %v4060_v43  ;;  %v4153_v42 = vld [vmem:[%s5261_s19 + $0x3b4] ss:$8 sps:$4 sm:$0xff]   ;;  %v4148_v43 = vld [vmem:[%s5261_s19 + $0x2b0] ss:$8 sps:$4 sm:$0xff]  }
 0x1c7   : > { %3054 = vmatprep.subr.bf16.mxu1 %v4062_v44  ;;  %v4151_v44 = vld [vmem:[%s5261_s19 + $0x3b0] ss:$8 sps:$4 sm:$0xff]  }
 0x1c9   : > { %3014 = vmatpush1.bf16.msra.mxu0 %v4064_v45  ;;  %v4156_v45 = vld [vmem:[%s5261_s19 + $0x2c4] ss:$8 sps:$4 sm:$0xff]  }
 0x1ca   : > { %3055 = vmatpush1.bf16.msra.mxu1 %v4065_v46  ;;  %3015 = vmatprep.subr.bf16.mxu0 %v4066_v47  ;;  %v4159_v46 = vld [vmem:[%s5261_s19 + $0x3c4] ss:$8 sps:$4 sm:$0xff]   ;;  %v4154_v47 = vld [vmem:[%s5261_s19 + $0x2c0] ss:$8 sps:$4 sm:$0xff]  }
 0x1cb   : > { %3056 = vmatprep.subr.bf16.mxu1 %v4068_v48  ;;  %v4157_v48 = vld [vmem:[%s5261_s19 + $0x3c0] ss:$8 sps:$4 sm:$0xff]  }
 0x1cd   : > { %3016 = vmatpush1.bf16.msra.mxu0 %v4070_v49  ;;  %v4162_v49 = vld [vmem:[%s5261_s19 + $0x2d4] ss:$8 sps:$4 sm:$0xff]  }
 0x1ce   : > { %3057 = vmatpush1.bf16.msra.mxu1 %v4071_v50  ;;  %3017 = vmatprep.subr.bf16.mxu0 %v4072_v51  ;;  %v4165_v50 = vld [vmem:[%s5261_s19 + $0x3d4] ss:$8 sps:$4 sm:$0xff]   ;;  %v4160_v51 = vld [vmem:[%s5261_s19 + $0x2d0] ss:$8 sps:$4 sm:$0xff]  }
 0x1cf   : > { %3058 = vmatprep.subr.bf16.mxu1 %v4074_v52  ;;  %v4163_v52 = vld [vmem:[%s5261_s19 + $0x3d0] ss:$8 sps:$4 sm:$0xff]  }
 0x1d1   : > { %3018 = vmatpush1.bf16.msra.mxu0 %v4076_v53  ;;  %v4168_v53 = vld [vmem:[%s5261_s19 + $0x2e4] ss:$8 sps:$4 sm:$0xff]  }
 0x1d2   : > { %3059 = vmatpush1.bf16.msra.mxu1 %v4077_v54  ;;  %3069 = vmatprep.subr.bf16.mxu0 %v4084_v55  ;;  %v4171_v54 = vld [vmem:[%s5261_s19 + $0x3e4] ss:$8 sps:$4 sm:$0xff]   ;;  %v4166_v55 = vld [vmem:[%s5261_s19 + $0x2e0] ss:$8 sps:$4 sm:$0xff]  }
 0x1d3   : > { %3110 = vmatprep.subr.bf16.mxu1 %v4087_v56  ;;  %v4169_v56 = vld [vmem:[%s5261_s19 + $0x3e0] ss:$8 sps:$4 sm:$0xff]  }
 0x1d4   : > { %3020 = vmatmul.mubr.bf16.vlgmr.msra.gmra.mrb[0].mxu0 %v3627_v57  ;;  %v4174_v57 = vld [vmem:[%s5261_s19 + $0x2f4] ss:$8 sps:$4 sm:$0xff]  }
 0x1d5   : > { %3061 = vmatmul.mubr.bf16.vlgmr.msra.gmra.mrb[0].mxu1 %v3629_v58  ;;  %3070 = vmatpush1.bf16.msra.mxu0 %v4082_v59  ;;  %v4177_v58 = vld [vmem:[%s5261_s19 + $0x3f4] ss:$8 sps:$4 sm:$0xff]   ;;  %v4172_v59 = vld [vmem:[%s5261_s19 + $0x2f0] ss:$8 sps:$4 sm:$0xff]  }
 0x1d6   : > { %3111 = vmatpush1.bf16.msra.mxu1 %v4085_v60  ;;  %3071 = vmatprep.subr.bf16.mxu0 %v4090_v61  ;;  %v4175_v60 = vld [vmem:[%s5261_s19 + $0x3f0] ss:$8 sps:$4 sm:$0xff]   ;;  %v4182_v61 = vld [vmem:[%s5261_s19 + $0x404] ss:$8 sps:$4 sm:$0xff]  }
 0x1d7   : > { %3112 = vmatprep.subr.bf16.mxu1 %v4093_v62  ;;  %3101 = vmatprep.mubr.bf16.mxu0 %v3632_v22  ;;  %v4187_v62 = vld [vmem:[%s5261_s19 + $0x504] ss:$8 sps:$4 sm:$0xff]   ;;  %v4209_v22 = vld [vmem:[%s5261_s19 + $0x540] ss:$8 sps:$4 sm:$0xff]  }
 0x1d8   : > { %3142 = vmatprep.mubr.bf16.mxu1 %v3634_v25  ;;  %v4212_v25 = vld [vmem:[%s5261_s19 + $0x450] ss:$8 sps:$4 sm:$0xff]  }
 0x1d9   : > { %3072 = vmatpush1.bf16.msra.mxu0 %v4088_v63  ;;  %v3631_v63 = vcombine.low %v5386_v19, %v5386_v19  ;;  %v4208_v19 = vld [vmem:[%s5261_s19 + $0x444] ss:$8 sps:$4 sm:$0xff]  }
 0x1da   : > { %3113 = vmatpush1.bf16.msra.mxu1 %v4091_v0  ;;  %3073 = vmatprep.subr.bf16.mxu0 %v4096_v1  ;;  %v4180_v0 = vld [vmem:[%s5261_s19 + $0x400] ss:$8 sps:$4 sm:$0xff]   ;;  %v3633_v1 = vcombine.low %v5393_v23, %v5393_v23  ;;  %v4214_v23 = vld [vmem:[%s5261_s19 + $0x454] ss:$8 sps:$4 sm:$0xff]  }
 0x1db   : > { %3114 = vmatprep.subr.bf16.mxu1 %v4099_v2  ;;  %v4185_v2 = vld [vmem:[%s5261_s19 + $0x500] ss:$8 sps:$4 sm:$0xff]  }
 0x1dd   : > { %3074 = vmatpush1.bf16.msra.mxu0 %v4094_v3  ;;  %v4190_v3 = vld [vmem:[%s5261_s19 + $0x414] ss:$8 sps:$4 sm:$0xff]  }
 0x1de   : > { %3115 = vmatpush1.bf16.msra.mxu1 %v4097_v4  ;;  %3075 = vmatprep.subr.bf16.mxu0 %v4102_v5  ;;  %v4193_v4 = vld [vmem:[%s5261_s19 + $0x514] ss:$8 sps:$4 sm:$0xff]   ;;  %v5444_v5 = vld [vmem:[%s5281_s16 + $0x20] sm:$0xff] }
 0x1df   : > { %3116 = vmatprep.subr.bf16.mxu1 %v4105_v6  ;;  %v3636_v6 = vcombine.high %v5444_v5, %v5444_v5 }
 0x1e1   : > { %3076 = vmatpush1.bf16.msra.mxu0 %v4100_v7  ;;  %v5449_v7 = vld [vmem:[%s5281_s16 + $0x28] sm:$0xff] }
 0x1e2   : > { %3117 = vmatpush1.bf16.msra.mxu1 %v4103_v8  ;;  %3077 = vmatprep.subr.bf16.mxu0 %v4108_v9  ;;  %v4188_v8 = vld [vmem:[%s5261_s19 + $0x410] ss:$8 sps:$4 sm:$0xff]  }
 0x1e3   : > { %3118 = vmatprep.subr.bf16.mxu1 %v4111_v10  ;;  %v4191_v9 = vld [vmem:[%s5261_s19 + $0x510] ss:$8 sps:$4 sm:$0xff]   ;;  %v3638_v10 = vcombine.high %v5449_v7, %v5449_v7 }
 0x1e5   : > { %3078 = vmatpush1.bf16.msra.mxu0 %v4106_v11  ;;  %v4196_v11 = vld [vmem:[%s5261_s19 + $0x424] ss:$8 sps:$4 sm:$0xff]  }
 0x1e6   : > { %3119 = vmatpush1.bf16.msra.mxu1 %v4109_v12  ;;  %3079 = vmatprep.subr.bf16.mxu0 %v4114_v13  ;;  %v4199_v12 = vld [vmem:[%s5261_s19 + $0x524] ss:$8 sps:$4 sm:$0xff]   ;;  %v4194_v13 = vld [vmem:[%s5261_s19 + $0x420] ss:$8 sps:$4 sm:$0xff]  }
 0x1e7   : > { %3120 = vmatprep.subr.bf16.mxu1 %v4117_v14  ;;  %v4197_v14 = vld [vmem:[%s5261_s19 + $0x520] ss:$8 sps:$4 sm:$0xff]  }
 0x1e9   : > { %3080 = vmatpush1.bf16.msra.mxu0 %v4112_v15  ;;  %v4202_v15 = vld [vmem:[%s5261_s19 + $0x434] ss:$8 sps:$4 sm:$0xff]  }
 0x1ea   : > { %3121 = vmatpush1.bf16.msra.mxu1 %v4115_v16  ;;  %3081 = vmatprep.subr.bf16.mxu0 %v4120_v17  ;;  %v4205_v16 = vld [vmem:[%s5261_s19 + $0x534] ss:$8 sps:$4 sm:$0xff]   ;;  %v4200_v17 = vld [vmem:[%s5261_s19 + $0x430] ss:$8 sps:$4 sm:$0xff]  }
 0x1eb   : > { %3122 = vmatprep.subr.bf16.mxu1 %v4123_v18  ;;  %v4203_v18 = vld [vmem:[%s5261_s19 + $0x530] ss:$8 sps:$4 sm:$0xff]  }
 0x1ed   : > { %3082 = vmatpush1.bf16.msra.mxu0 %v4118_v20  ;;  %v4211_v20 = vld [vmem:[%s5261_s19 + $0x544] ss:$8 sps:$4 sm:$0xff]  }
 0x1ee   : > { %3123 = vmatpush1.bf16.msra.mxu1 %v4121_v21  ;;  %3083 = vmatprep.subr.bf16.mxu0 %v4126_v24  ;;  %v4206_v21 = vld [vmem:[%s5261_s19 + $0x440] ss:$8 sps:$4 sm:$0xff]   ;;  %v4217_v24 = vld [vmem:[%s5261_s19 + $0x554] ss:$8 sps:$4 sm:$0xff]  }
 0x1ef   : > { %3124 = vmatprep.subr.bf16.mxu1 %v4129_v26  ;;  %v4215_v26 = vld [vmem:[%s5261_s19 + $0x550] ss:$8 sps:$4 sm:$0xff]  }
 0x1f1   : > { %3084 = vmatpush1.bf16.msra.mxu0 %v4124_v27  ;;  %v4220_v27 = vld [vmem:[%s5261_s19 + $0x464] ss:$8 sps:$4 sm:$0xff]  }
 0x1f2   : > { %3125 = vmatpush1.bf16.msra.mxu1 %v4127_v28  ;;  %3085 = vmatprep.subr.bf16.mxu0 %v4132_v29  ;;  %v4223_v28 = vld [vmem:[%s5261_s19 + $0x564] ss:$8 sps:$4 sm:$0xff]   ;;  %v4218_v29 = vld [vmem:[%s5261_s19 + $0x460] ss:$8 sps:$4 sm:$0xff]  }
 0x1f3   : > { %3126 = vmatprep.subr.bf16.mxu1 %v4135_v30  ;;  %v4221_v30 = vld [vmem:[%s5261_s19 + $0x560] ss:$8 sps:$4 sm:$0xff]  }
 0x1f5   : > { %3086 = vmatpush1.bf16.msra.mxu0 %v4130_v31  ;;  %v4226_v31 = vld [vmem:[%s5261_s19 + $0x474] ss:$8 sps:$4 sm:$0xff]  }
 0x1f6   : > { %3127 = vmatpush1.bf16.msra.mxu1 %v4133_v32  ;;  %3087 = vmatprep.subr.bf16.mxu0 %v4138_v33  ;;  %v4229_v32 = vld [vmem:[%s5261_s19 + $0x574] ss:$8 sps:$4 sm:$0xff]   ;;  %v4224_v33 = vld [vmem:[%s5261_s19 + $0x470] ss:$8 sps:$4 sm:$0xff]  }
 0x1f7   : > { %3128 = vmatprep.subr.bf16.mxu1 %v4141_v34  ;;  %v4227_v34 = vld [vmem:[%s5261_s19 + $0x570] ss:$8 sps:$4 sm:$0xff]  }
 0x1f9   : > { %3088 = vmatpush1.bf16.msra.mxu0 %v4136_v35  ;;  %v4232_v35 = vld [vmem:[%s5261_s19 + $0x484] ss:$8 sps:$4 sm:$0xff]  }
 0x1fa   : > { %3129 = vmatpush1.bf16.msra.mxu1 %v4139_v36  ;;  %3089 = vmatprep.subr.bf16.mxu0 %v4144_v37  ;;  %v4235_v36 = vld [vmem:[%s5261_s19 + $0x584] ss:$8 sps:$4 sm:$0xff]   ;;  %v4230_v37 = vld [vmem:[%s5261_s19 + $0x480] ss:$8 sps:$4 sm:$0xff]  }
 0x1fb   : > { %3130 = vmatprep.subr.bf16.mxu1 %v4147_v38  ;;  %v4233_v38 = vld [vmem:[%s5261_s19 + $0x580] ss:$8 sps:$4 sm:$0xff]  }
 0x1fd   : > { %3090 = vmatpush1.bf16.msra.mxu0 %v4142_v39  ;;  %v4238_v39 = vld [vmem:[%s5261_s19 + $0x494] ss:$8 sps:$4 sm:$0xff]  }
 0x1fe   : > { %3131 = vmatpush1.bf16.msra.mxu1 %v4145_v40  ;;  %3091 = vmatprep.subr.bf16.mxu0 %v4150_v41  ;;  %v4241_v40 = vld [vmem:[%s5261_s19 + $0x594] ss:$8 sps:$4 sm:$0xff]   ;;  %v4236_v41 = vld [vmem:[%s5261_s19 + $0x490] ss:$8 sps:$4 sm:$0xff]  }
 0x1ff   : > { %3132 = vmatprep.subr.bf16.mxu1 %v4153_v42  ;;  %v4239_v42 = vld [vmem:[%s5261_s19 + $0x590] ss:$8 sps:$4 sm:$0xff]  }
 0x201   : > { %3092 = vmatpush1.bf16.msra.mxu0 %v4148_v43  ;;  %v4244_v43 = vld [vmem:[%s5261_s19 + $0x4a4] ss:$8 sps:$4 sm:$0xff]  }
 0x202   : > { %3133 = vmatpush1.bf16.msra.mxu1 %v4151_v44  ;;  %3093 = vmatprep.subr.bf16.mxu0 %v4156_v45  ;;  %v4247_v44 = vld [vmem:[%s5261_s19 + $0x5a4] ss:$8 sps:$4 sm:$0xff]   ;;  %v4242_v45 = vld [vmem:[%s5261_s19 + $0x4a0] ss:$8 sps:$4 sm:$0xff]  }
 0x203   : > { %3134 = vmatprep.subr.bf16.mxu1 %v4159_v46  ;;  %v4245_v46 = vld [vmem:[%s5261_s19 + $0x5a0] ss:$8 sps:$4 sm:$0xff]  }
 0x205   : > { %3094 = vmatpush1.bf16.msra.mxu0 %v4154_v47  ;;  %v4250_v47 = vld [vmem:[%s5261_s19 + $0x4b4] ss:$8 sps:$4 sm:$0xff]  }
 0x206   : > { %3135 = vmatpush1.bf16.msra.mxu1 %v4157_v48  ;;  %3095 = vmatprep.subr.bf16.mxu0 %v4162_v49  ;;  %v4253_v48 = vld [vmem:[%s5261_s19 + $0x5b4] ss:$8 sps:$4 sm:$0xff]   ;;  %v4248_v49 = vld [vmem:[%s5261_s19 + $0x4b0] ss:$8 sps:$4 sm:$0xff]  }
 0x207   : > { %3136 = vmatprep.subr.bf16.mxu1 %v4165_v50  ;;  %v4251_v50 = vld [vmem:[%s5261_s19 + $0x5b0] ss:$8 sps:$4 sm:$0xff]  }
 0x209   : > { %3096 = vmatpush1.bf16.msra.mxu0 %v4160_v51  ;;  %v4256_v51 = vld [vmem:[%s5261_s19 + $0x4c4] ss:$8 sps:$4 sm:$0xff]  }
 0x20a   : > { %3137 = vmatpush1.bf16.msra.mxu1 %v4163_v52  ;;  %3097 = vmatprep.subr.bf16.mxu0 %v4168_v53  ;;  %v4259_v52 = vld [vmem:[%s5261_s19 + $0x5c4] ss:$8 sps:$4 sm:$0xff]   ;;  %v4254_v53 = vld [vmem:[%s5261_s19 + $0x4c0] ss:$8 sps:$4 sm:$0xff]  }
 0x20b   : > { %3138 = vmatprep.subr.bf16.mxu1 %v4171_v54  ;;  %v4257_v54 = vld [vmem:[%s5261_s19 + $0x5c0] ss:$8 sps:$4 sm:$0xff]  }
 0x20d   : > { %3098 = vmatpush1.bf16.msra.mxu0 %v4166_v55  ;;  %v4262_v55 = vld [vmem:[%s5261_s19 + $0x4d4] ss:$8 sps:$4 sm:$0xff]  }
 0x20e   : > { %3139 = vmatpush1.bf16.msra.mxu1 %v4169_v56  ;;  %3099 = vmatprep.subr.bf16.mxu0 %v4174_v57  ;;  %v4265_v56 = vld [vmem:[%s5261_s19 + $0x5d4] ss:$8 sps:$4 sm:$0xff]   ;;  %v4260_v57 = vld [vmem:[%s5261_s19 + $0x4d0] ss:$8 sps:$4 sm:$0xff]  }
 0x20f   : > { %3140 = vmatprep.subr.bf16.mxu1 %v4177_v58  ;;  %v4263_v58 = vld [vmem:[%s5261_s19 + $0x5d0] ss:$8 sps:$4 sm:$0xff]  }
 0x211   : > { %3100 = vmatpush1.bf16.msra.mxu0 %v4172_v59  ;;  %v4268_v59 = vld [vmem:[%s5261_s19 + $0x4e4] ss:$8 sps:$4 sm:$0xff]  }
 0x212   : > { %3141 = vmatpush1.bf16.msra.mxu1 %v4175_v60  ;;  %3151 = vmatprep.subr.bf16.mxu0 %v4182_v61  ;;  %v4271_v60 = vld [vmem:[%s5261_s19 + $0x5e4] ss:$8 sps:$4 sm:$0xff]   ;;  %v4266_v61 = vld [vmem:[%s5261_s19 + $0x4e0] ss:$8 sps:$4 sm:$0xff]  }
 0x213   : > { %3192 = vmatprep.subr.bf16.mxu1 %v4187_v62  ;;  %v4269_v62 = vld [vmem:[%s5261_s19 + $0x5e0] ss:$8 sps:$4 sm:$0xff]  }
 0x214   : > { %3102 = vmatmul.mubr.bf16.vlgmr.msra.gmra.mrb[4].mxu0 %v3631_v63  ;;  %v4274_v63 = vld [vmem:[%s5261_s19 + $0x4f4] ss:$8 sps:$4 sm:$0xff]  }
 0x215   : > { %3143 = vmatmul.mubr.bf16.vlgmr.msra.gmra.mrb[4].mxu1 %v3633_v1  ;;  %3152 = vmatpush1.bf16.msra.mxu0 %v4180_v0  ;;  %v4277_v0 = vld [vmem:[%s5261_s19 + $0x5f4] ss:$8 sps:$4 sm:$0xff]   ;;  %v4272_v1 = vld [vmem:[%s5261_s19 + $0x4f0] ss:$8 sps:$4 sm:$0xff]  }
 0x216   : > { %3193 = vmatpush1.bf16.msra.mxu1 %v4185_v2  ;;  %3153 = vmatprep.subr.bf16.mxu0 %v4190_v3  ;;  %v4275_v2 = vld [vmem:[%s5261_s19 + $0x5f0] ss:$8 sps:$4 sm:$0xff]   ;;  %v4282_v3 = vld [vmem:[%s5261_s19 + $0x604] ss:$8 sps:$4 sm:$0xff]  }
 0x217   : > { %3194 = vmatprep.subr.bf16.mxu1 %v4193_v4  ;;  %3183 = vmatprep.mubr.bf16.mxu0 %v3636_v6  ;;  %v4308_v4 = vld [vmem:[%s5261_s19 + $0x704] ss:$8 sps:$4 sm:$0xff]   ;;  %v3635_v6 = vcombine.low %v5444_v5, %v5444_v5 }
 0x218   : > { %3224 = vmatprep.mubr.bf16.mxu1 %v3638_v10  ;;  %v4280_v10 = vld [vmem:[%s5261_s19 + $0x600] ss:$8 sps:$4 sm:$0xff]  }
 0x219   : > { %3154 = vmatpush1.bf16.msra.mxu0 %v4188_v8  ;;  %v3637_v8 = vcombine.low %v5449_v7, %v5449_v7  ;;  %v4285_v7 = vld [vmem:[%s5261_s19 + $0x610] ss:$8 sps:$4 sm:$0xff]  }
 0x21a   : > { %3195 = vmatpush1.bf16.msra.mxu1 %v4191_v9  ;;  %3155 = vmatprep.subr.bf16.mxu0 %v4196_v11  ;;  %v5518_v9 = vld [vmem:[%s5281_s16 + $0x30] sm:$0xff]  ;;  %v4306_v11 = vld [vmem:[%s5261_s19 + $0x700] ss:$8 sps:$4 sm:$0xff]  }
 0x21b   : > { %3196 = vmatprep.subr.bf16.mxu1 %v4199_v12  ;;  %v4287_v12 = vld [vmem:[%s5261_s19 + $0x614] ss:$8 sps:$4 sm:$0xff]   ;;  %v3640_v5 = vcombine.high %v5518_v9, %v5518_v9 }
 0x21d   : > { %3156 = vmatpush1.bf16.msra.mxu0 %v4194_v13  ;;  %v4314_v13 = vld [vmem:[%s5261_s19 + $0x714] ss:$8 sps:$4 sm:$0xff]  }
 0x21e   : > { %3197 = vmatpush1.bf16.msra.mxu1 %v4197_v14  ;;  %3157 = vmatprep.subr.bf16.mxu0 %v4202_v15  ;;  %v4312_v14 = vld [vmem:[%s5261_s19 + $0x710] ss:$8 sps:$4 sm:$0xff]   ;;  %v4290_v15 = vld [vmem:[%s5261_s19 + $0x624] ss:$8 sps:$4 sm:$0xff]  }
 0x21f   : > { %3198 = vmatprep.subr.bf16.mxu1 %v4205_v16  ;;  %v4320_v16 = vld [vmem:[%s5261_s19 + $0x724] ss:$8 sps:$4 sm:$0xff]  }
 0x221   : > { %3158 = vmatpush1.bf16.msra.mxu0 %v4200_v17  ;;  %v4534_v17 = vmov 0  }
 0x222   : > { %3199 = vmatpush1.bf16.msra.mxu1 %v4203_v18  ;;  %3159 = vmatprep.subr.bf16.mxu0 %v4208_v19  ;;  %v4288_v18 = vld [vmem:[%s5261_s19 + $0x620] ss:$8 sps:$4 sm:$0xff]  }
 0x223   : > { %3200 = vmatprep.subr.bf16.mxu1 %v4211_v20  ;;  %v4318_v19 = vld [vmem:[%s5261_s19 + $0x720] ss:$8 sps:$4 sm:$0xff]   ;;  %v4293_v20 = vld [vmem:[%s5261_s19 + $0x634] ss:$8 sps:$4 sm:$0xff]  }
 0x225   : > { %3160 = vmatpush1.bf16.msra.mxu0 %v4206_v21  ;;  %v4326_v21 = vld [vmem:[%s5261_s19 + $0x734] ss:$8 sps:$4 sm:$0xff]  }
 0x226   : > { %3201 = vmatpush1.bf16.msra.mxu1 %v4209_v22  ;;  %3161 = vmatprep.subr.bf16.mxu0 %v4214_v23  ;;  %v4291_v22 = vld [vmem:[%s5261_s19 + $0x630] ss:$8 sps:$4 sm:$0xff]  }
 0x227   : > { %3202 = vmatprep.subr.bf16.mxu1 %v4217_v24  ;;  %v4324_v23 = vld [vmem:[%s5261_s19 + $0x730] ss:$8 sps:$4 sm:$0xff]   ;;  %v4296_v24 = vld [vmem:[%s5261_s19 + $0x644] ss:$8 sps:$4 sm:$0xff]  }
 0x229   : > { %3162 = vmatpush1.bf16.msra.mxu0 %v4212_v25  ;;  %v4332_v25 = vld [vmem:[%s5261_s19 + $0x744] ss:$8 sps:$4 sm:$0xff]  }
 0x22a   : > { %3203 = vmatpush1.bf16.msra.mxu1 %v4215_v26  ;;  %3163 = vmatprep.subr.bf16.mxu0 %v4220_v27  ;;  %v4294_v26 = vld [vmem:[%s5261_s19 + $0x640] ss:$8 sps:$4 sm:$0xff]  }
 0x22b   : > { %3204 = vmatprep.subr.bf16.mxu1 %v4223_v28  ;;  %v4330_v27 = vld [vmem:[%s5261_s19 + $0x740] ss:$8 sps:$4 sm:$0xff]   ;;  %v4299_v28 = vld [vmem:[%s5261_s19 + $0x654] ss:$8 sps:$4 sm:$0xff]  }
 0x22d   : > { %3164 = vmatpush1.bf16.msra.mxu0 %v4218_v29  ;;  %v4338_v29 = vld [vmem:[%s5261_s19 + $0x754] ss:$8 sps:$4 sm:$0xff]  }
 0x22e   : > { %3205 = vmatpush1.bf16.msra.mxu1 %v4221_v30  ;;  %3165 = vmatprep.subr.bf16.mxu0 %v4226_v31  ;;  %v4297_v30 = vld [vmem:[%s5261_s19 + $0x650] ss:$8 sps:$4 sm:$0xff]  }
 0x22f   : > { %3206 = vmatprep.subr.bf16.mxu1 %v4229_v32  ;;  %v4336_v31 = vld [vmem:[%s5261_s19 + $0x750] ss:$8 sps:$4 sm:$0xff]   ;;  %v4302_v32 = vld [vmem:[%s5261_s19 + $0x664] ss:$8 sps:$4 sm:$0xff]  }
 0x231   : > { %3166 = vmatpush1.bf16.msra.mxu0 %v4224_v33  ;;  %v4344_v33 = vld [vmem:[%s5261_s19 + $0x764] ss:$8 sps:$4 sm:$0xff]  }
 0x232   : > { %3207 = vmatpush1.bf16.msra.mxu1 %v4227_v34  ;;  %3167 = vmatprep.subr.bf16.mxu0 %v4232_v35  ;;  %v4300_v34 = vld [vmem:[%s5261_s19 + $0x660] ss:$8 sps:$4 sm:$0xff]  }
 0x233   : > { %3208 = vmatprep.subr.bf16.mxu1 %v4235_v36  ;;  %v4342_v35 = vld [vmem:[%s5261_s19 + $0x760] ss:$8 sps:$4 sm:$0xff]   ;;  %v4305_v36 = vld [vmem:[%s5261_s19 + $0x674] ss:$8 sps:$4 sm:$0xff]  }
 0x235   : > { %3168 = vmatpush1.bf16.msra.mxu0 %v4230_v37  ;;  %v4350_v37 = vld [vmem:[%s5261_s19 + $0x774] ss:$8 sps:$4 sm:$0xff]  }
 0x236   : > { %3209 = vmatpush1.bf16.msra.mxu1 %v4233_v38  ;;  %3169 = vmatprep.subr.bf16.mxu0 %v4238_v39  ;;  %v4303_v38 = vld [vmem:[%s5261_s19 + $0x670] ss:$8 sps:$4 sm:$0xff]  }
 0x237   : > { %3210 = vmatprep.subr.bf16.mxu1 %v4241_v40  ;;  %v4348_v39 = vld [vmem:[%s5261_s19 + $0x770] ss:$8 sps:$4 sm:$0xff]   ;;  %v4311_v40 = vld [vmem:[%s5261_s19 + $0x684] ss:$8 sps:$4 sm:$0xff]  }
 0x239   : > { %3170 = vmatpush1.bf16.msra.mxu0 %v4236_v41  ;;  %v4356_v41 = vld [vmem:[%s5281_s16 + $0x38] ss:$0 sps:$4 sm:$0xff]  }
 0x23a   : > { %3211 = vmatpush1.bf16.msra.mxu1 %v4239_v42  ;;  %3171 = vmatprep.subr.bf16.mxu0 %v4244_v43  ;;  %v4309_v42 = vld [vmem:[%s5261_s19 + $0x680] ss:$8 sps:$4 sm:$0xff]   ;;  %v4317_v43 = vld [vmem:[%s5261_s19 + $0x694] ss:$8 sps:$4 sm:$0xff]  }
 0x23b   : > { %3212 = vmatprep.subr.bf16.mxu1 %v4247_v44  ;;  %v4315_v44 = vld [vmem:[%s5261_s19 + $0x690] ss:$8 sps:$4 sm:$0xff]  }
 0x23d   : > { %3172 = vmatpush1.bf16.msra.mxu0 %v4242_v45  ;;  %v4323_v45 = vld [vmem:[%s5261_s19 + $0x6a4] ss:$8 sps:$4 sm:$0xff]  }
 0x23e   : > { %3213 = vmatpush1.bf16.msra.mxu1 %v4245_v46  ;;  %3173 = vmatprep.subr.bf16.mxu0 %v4250_v47  ;;  %v4321_v46 = vld [vmem:[%s5261_s19 + $0x6a0] ss:$8 sps:$4 sm:$0xff]   ;;  %v4329_v47 = vld [vmem:[%s5261_s19 + $0x6b4] ss:$8 sps:$4 sm:$0xff]  }
 0x23f   : > { %3214 = vmatprep.subr.bf16.mxu1 %v4253_v48  ;;  %v4327_v48 = vld [vmem:[%s5261_s19 + $0x6b0] ss:$8 sps:$4 sm:$0xff]  }
 0x241   : > { %3174 = vmatpush1.bf16.msra.mxu0 %v4248_v49  ;;  %v4335_v49 = vld [vmem:[%s5261_s19 + $0x6c4] ss:$8 sps:$4 sm:$0xff]  }
 0x242   : > { %3215 = vmatpush1.bf16.msra.mxu1 %v4251_v50  ;;  %3175 = vmatprep.subr.bf16.mxu0 %v4256_v51  ;;  %v4333_v50 = vld [vmem:[%s5261_s19 + $0x6c0] ss:$8 sps:$4 sm:$0xff]   ;;  %v4341_v51 = vld [vmem:[%s5261_s19 + $0x6d4] ss:$8 sps:$4 sm:$0xff]  }
 0x243   : > { %3216 = vmatprep.subr.bf16.mxu1 %v4259_v52  ;;  %v4339_v52 = vld [vmem:[%s5261_s19 + $0x6d0] ss:$8 sps:$4 sm:$0xff]  }
 0x245   : > { %3176 = vmatpush1.bf16.msra.mxu0 %v4254_v53  ;;  %v4347_v53 = vld [vmem:[%s5261_s19 + $0x6e4] ss:$8 sps:$4 sm:$0xff]  }
 0x246   : > { %3217 = vmatpush1.bf16.msra.mxu1 %v4257_v54  ;;  %3177 = vmatprep.subr.bf16.mxu0 %v4262_v55  ;;  %v4345_v54 = vld [vmem:[%s5261_s19 + $0x6e0] ss:$8 sps:$4 sm:$0xff]   ;;  %v4353_v55 = vld [vmem:[%s5261_s19 + $0x6f4] ss:$8 sps:$4 sm:$0xff]  }
 0x247   : > { %3218 = vmatprep.subr.bf16.mxu1 %v4265_v56  ;;  %v4351_v56 = vld [vmem:[%s5261_s19 + $0x6f0] ss:$8 sps:$4 sm:$0xff]  }
 0x249   : > { %3178 = vmatpush1.bf16.msra.mxu0 %v4260_v57  ;;  %v3639_v57 = vcombine.low %v5518_v9, %v5518_v9 }
 0x24a   : > { %3219 = vmatpush1.bf16.msra.mxu1 %v4263_v58  ;;  %3179 = vmatprep.subr.bf16.mxu0 %v4268_v59 }
 0x24b   : > { %3220 = vmatprep.subr.bf16.mxu1 %v4271_v60 }
 0x24d   : > { %3180 = vmatpush1.bf16.msra.mxu0 %v4266_v61 }
 0x24e   : > { %3221 = vmatpush1.bf16.msra.mxu1 %v4269_v62  ;;  %3181 = vmatprep.subr.bf16.mxu0 %v4274_v63 }
 0x24f   : > { %3222 = vmatprep.subr.bf16.mxu1 %v4277_v0 }
 0x251   : > { %3182 = vmatpush1.bf16.msra.mxu0 %v4272_v1 }
 0x252   : > { %3223 = vmatpush1.bf16.msra.mxu1 %v4275_v2  ;;  %3233 = vmatprep.subr.bf16.mxu0 %v4282_v3 }
 0x253   : > { %3274 = vmatprep.subr.bf16.mxu1 %v4308_v4 }
 0x254   : > { %3184 = vmatmul.mubr.bf16.vlgmr.msra.gmra.mrb[8].mxu0 %v3635_v6 }
 0x255   : > { %3225 = vmatmul.mubr.bf16.vlgmr.msra.gmra.mrb[8].mxu1 %v3637_v8  ;;  %3234 = vmatpush1.bf16.msra.mxu0 %v4280_v10 }
 0x256   : > { %3275 = vmatpush1.bf16.msra.mxu1 %v4306_v11  ;;  %3235 = vmatprep.subr.bf16.mxu0 %v4287_v12 }
 0x257   : > { %3276 = vmatprep.subr.bf16.mxu1 %v4314_v13  ;;  %3306 = vmatprep.mubr.bf16.mxu1 %v4534_v17 }
 0x258   : > { %3265 = vmatprep.mubr.bf16.mxu0 %v3640_v5 }
 0x259   : > { %3236 = vmatpush1.bf16.msra.mxu0 %v4285_v7 }
 0x25a   : > { %3277 = vmatpush1.bf16.msra.mxu1 %v4312_v14  ;;  %3237 = vmatprep.subr.bf16.mxu0 %v4290_v15 }
 0x25b   : > { %3278 = vmatprep.subr.bf16.mxu1 %v4320_v16 }
 0x25d   : > { %3238 = vmatpush1.bf16.msra.mxu0 %v4288_v18 }
 0x25e   : > { %3279 = vmatpush1.bf16.msra.mxu1 %v4318_v19  ;;  %3239 = vmatprep.subr.bf16.mxu0 %v4293_v20 }
 0x25f   : > { %3280 = vmatprep.subr.bf16.mxu1 %v4326_v21 }
 0x261   : > { %3240 = vmatpush1.bf16.msra.mxu0 %v4291_v22 }
 0x262   : > { %3281 = vmatpush1.bf16.msra.mxu1 %v4324_v23  ;;  %3241 = vmatprep.subr.bf16.mxu0 %v4296_v24 }
 0x263   : > { %3282 = vmatprep.subr.bf16.mxu1 %v4332_v25 }
 0x265   : > { %3242 = vmatpush1.bf16.msra.mxu0 %v4294_v26 }
 0x266   : > { %3283 = vmatpush1.bf16.msra.mxu1 %v4330_v27  ;;  %3243 = vmatprep.subr.bf16.mxu0 %v4299_v28 }
 0x267   : > { %3284 = vmatprep.subr.bf16.mxu1 %v4338_v29 }
 0x269   : > { %3244 = vmatpush1.bf16.msra.mxu0 %v4297_v30 }
 0x26a   : > { %3285 = vmatpush1.bf16.msra.mxu1 %v4336_v31  ;;  %3245 = vmatprep.subr.bf16.mxu0 %v4302_v32 }
 0x26b   : > { %3286 = vmatprep.subr.bf16.mxu1 %v4344_v33 }
 0x26d   : > { %3246 = vmatpush1.bf16.msra.mxu0 %v4300_v34 }
 0x26e   : > { %3287 = vmatpush1.bf16.msra.mxu1 %v4342_v35  ;;  %3247 = vmatprep.subr.bf16.mxu0 %v4305_v36  ;;  %v1484_v35 = vld [vmem:[#allocation2] sm:$0xff] }
 0x26f   : > { %3288 = vmatprep.subr.bf16.mxu1 %v4350_v37 }
 0x271   : > { %3248 = vmatpush1.bf16.msra.mxu0 %v4303_v38 }
 0x272   : > { %3289 = vmatpush1.bf16.msra.mxu1 %v4348_v39  ;;  %3249 = vmatprep.subr.bf16.mxu0 %v4311_v40  ;;  %v1485_v39 = vld [vmem:[#allocation2 + $0x8] sm:$0xff] }
 0x275   : > { %3307 = vmatmul.mubr.bf16.vlgmr.msra.gmra.mrb[12].mxu1 %v4356_v41  ;;  %3250 = vmatpush1.bf16.msra.mxu0 %v4309_v42 }
 0x276   : > { %3251 = vmatprep.subr.bf16.mxu0 %v4317_v43 }
 0x279   : > { %3252 = vmatpush1.bf16.msra.mxu0 %v4315_v44  ;;  %v3327_v44 = vlaneseq (!%p3882_p3) }
 0x27a   : > { %3253 = vmatprep.subr.bf16.mxu0 %v4323_v45 }
 0x27b   : > { %v3328_v45 = vshrl.u32 (!%p3882_p3), %v3327_v44, 7 }
 0x27d   : > { %3254 = vmatpush1.bf16.msra.mxu0 %v4321_v46  ;;  %v3325_v46 = vld [vmem:[%s1361_s18] sm:$0x3] (!%p3882_p3) }
 0x27e   : > { %3255 = vmatprep.subr.bf16.mxu0 %v4329_v47  ;;  %v3339_v47 = vld [vmem:[%s1370_s10] sm:$0x3] (!%p3882_p3) }
 0x281   : > { %3256 = vmatpush1.bf16.msra.mxu0 %v4327_v48  ;;  %v3329_v48 = vsub.s32 (!%p3882_p3), 0, %v3328_v45 }
 0x282   : > { %3257 = vmatprep.subr.bf16.mxu0 %v4335_v49  ;;  %v3333_v49 = vsub.s32 (!%p3882_p3), 1, %v3328_v45 }
 0x285   : > { %3258 = vmatpush1.bf16.msra.mxu0 %v4333_v50 }
 0x286   : > { %3259 = vmatprep.subr.bf16.mxu0 %v4341_v51 }
 0x289   : > { %3260 = vmatpush1.bf16.msra.mxu0 %v4339_v52  ;;  %v3330_v52 = vrot.slane (!%p3882_p3), %v3325_v46, %v3329_v48 }
 0x28a   : > { %3261 = vmatprep.subr.bf16.mxu0 %v4347_v53  ;;  %v3334_v53 = vrot.slane (!%p3882_p3), %v3325_v46, %v3333_v49 }
 0x28d   : > { %3262 = vmatpush1.bf16.msra.mxu0 %v4345_v54  ;;  %v3344_v54 = vrot.slane (!%p3882_p3), %v3339_v47, %v3329_v48 }
 0x28e   : > { %3263 = vmatprep.subr.bf16.mxu0 %v4353_v55  ;;  %v3348_v55 = vrot.slane (!%p3882_p3), %v3339_v47, %v3333_v49 }
 0x291   : > { %3264 = vmatpush1.bf16.msra.mxu0 %v4351_v56  ;;  %v3358_v56 = vld [vmem:[%s1379_s3] sm:$0x3] (!%p3882_p3) }
 0x294   : > { %3266 = vmatmul.mubr.bf16.vlgmr.msra.gmra.mrb[12].mxu0 %v3639_v57 }
 0x2a7   : > { %v3021_v58 = vpop.f32.mrb[0].mxu0 }
 0x2a8   : > { %v3062_v59 = vpop.f32.mrb[0].mxu1  ;;  %v3023_v61 = vpop.f32.mrb[1].mxu0 }
 0x2a9   : > { %v3063_v60 = vadd.f32 %v3062_v59, %v3021_v58  ;;  %v3064_v62 = vpop.f32.mrb[1].mxu1  ;;  %v3025_v0 = vpop.f32.mrb[2].mxu0 }
 0x2aa   : > { %v3065_v63 = vadd.f32 %v3064_v62, %v3023_v61  ;;  %v3066_v1 = vpop.f32.mrb[2].mxu1  ;;  %v3026_v2 = vpop.f32.mrb[3].mxu0  ;;  %v3363_v61 = vrot.slane (!%p3882_p3), %v3358_v56, %v3329_v48  ;;  %v3367_v62 = vrot.slane (!%p3882_p3), %v3358_v56, %v3333_v49 }
 0x2ab   : > { %v3067_v3 = vpop.f32.mrb[3].mxu1 }
 0x2e7   : > { %v3103_v4 = vpop.f32.mrb[4].mxu0 }
 0x2e8   : > { %v3144_v6 = vpop.f32.mrb[4].mxu1  ;;  %v3104_v8 = vadd.f32 %v3103_v4, %v3063_v60  ;;  %v3105_v10 = vpop.f32.mrb[5].mxu0  ;;  %v3357_v4 = vld [vmem:[#allocation3] sm:$0xff] (!%p3882_p3) }
 0x2e9   : > { %v3146_v11 = vpop.f32.mrb[5].mxu1  ;;  %v3106_v12 = vadd.f32 %v3105_v10, %v3065_v63  ;;  %v3107_v9 = vpop.f32.mrb[6].mxu0 }
 0x2ea   : > { %v3148_v13 = vpop.f32.mrb[6].mxu1  ;;  %v3145_v5 = vadd.f32 %v3144_v6, %v3104_v8  ;;  %v3108_v7 = vpop.f32.mrb[7].mxu0 }
 0x2eb   : > { %v3149_v14 = vpop.f32.mrb[7].mxu1  ;;  %v3147_v15 = vadd.f32 %v3146_v11, %v3106_v12 }
 0x327   : > { %v3185_v16 = vpop.f32.mrb[8].mxu0 }
 0x328   : > { %v3226_v17 = vpop.f32.mrb[8].mxu1  ;;  %v3186_v18 = vadd.f32 %v3185_v16, %v3145_v5  ;;  %v3187_v19 = vpop.f32.mrb[9].mxu0 }
 0x329   : > { %v3228_v20 = vpop.f32.mrb[9].mxu1  ;;  %v3188_v21 = vadd.f32 %v3187_v19, %v3147_v15  ;;  %v3189_v22 = vpop.f32.mrb[10].mxu0 }
 0x32a   : > { %v3230_v23 = vpop.f32.mrb[10].mxu1  ;;  %v3227_v24 = vadd.f32 %v3226_v17, %v3186_v18  ;;  %v3190_v25 = vpop.f32.mrb[11].mxu0 }
 0x32b   : > { %v3231_v26 = vpop.f32.mrb[11].mxu1  ;;  %v3229_v27 = vadd.f32 %v3228_v20, %v3188_v21 }
 0x348   : > { %v3308_v28 = vpop.f32.mrb[12].mxu1 }
 0x349   : > { %v3310_v29 = vpop.f32.mrb[13].mxu1 }
 0x34a   : > { %v3312_v30 = vpop.f32.mrb[14].mxu1 }
 0x34b   : > { %v3313_v31 = vpop.f32.mrb[15].mxu1 }
 0x367   : > { %v3267_v32 = vpop.f32.mrb[12].mxu0 }
 0x368   : > { %v3268_v33 = vadd.f32 %v3267_v32, %v3227_v24  ;;  %v3269_v34 = vpop.f32.mrb[13].mxu0 }
 0x369   : > { %v3270_v36 = vadd.f32 %v3269_v34, %v3229_v27  ;;  %v3271_v37 = vpop.f32.mrb[14].mxu0  ;;  %3322 = sbr.rel (%p3882_p3) target bundleno = 1042 (0x412), region = 106 }
 0x36a   : > { %v3309_v38 = vadd.f32 %v3308_v28, %v3268_v33  ;;  %v3272_v40 = vpop.f32.mrb[15].mxu0 }
 0x36b   : > { %v3311_v41 = vadd.f32 %v3310_v29, %v3270_v36 }
 0x36c   : > { %v3315_v42 = vadd.f32 %v3309_v38, %v1484_v35 }
 0x36d   : > { %v3316_v43 = vadd.f32 %v3311_v41, %v1485_v39 }
 0x36e   : > { %3317 = vst [vmem:[#allocation2] sm:$0xff] %v3315_v42 }
 0x36f   : > { %3318 = vst [vmem:[#allocation2 + $0x8] sm:$0xff] %v3316_v43 }
 0x375   : > { %v3323_v50 = vld [vmem:[#allocation2] sm:$0xff] }
 0x376   : > { %v3324_v51 = vld [vmem:[#allocation2 + $0x8] sm:$0xff]  ;;  %v3337_v57 = vmul.f32 %v3330_v52, %v3323_v50 }
 0x377   : > { %v3338_v58 = vmul.f32 %v3334_v53, %v3324_v51 }
 0x378   : > { %v3351_v59 = vadd.f32 %v3344_v54, %v3337_v57 }
 0x379   : > { %v3352_v60 = vadd.f32 %v3348_v55, %v3338_v58 }
 0x37a   : > { %v3353_v63 = vmax.f32 %v3351_v59, 0.0 }
 0x37b   : > { %v3354_v0 = vmax.f32 %v3352_v60, 0.0 }
 0x37c   : > { %3355 = vst [vmem:[%s5286_s24] sm:$0xff] %v3353_v63  ;;  %v3370_v1 = vmul.f32 %v3363_v61, %v3353_v63 }
 0x37d   : > { %v3371_v2 = vmul.f32 %v3367_v62, %v3354_v0  ;;  %3356 = vst [vmem:[%s5286_s24 + $0x8] sm:$0xff] %v3354_v0 }
 0x37f   : > { %v3372_v3 = vadd.f32 %v3371_v2, %v3370_v1 }
 0x381   : > { %3373 = vadd.xlane.f32.xlu0 %v3372_v3 }
 0x40e   : > { %v3374_v6 = vpop.xlane.xlu0 %3373 }
 0x40f   : > { %v3375_v8 = vadd.f32 %v3374_v6, %v3357_v4 }
 0x411   : > { %3377 = vst.msk [vmem:[#allocation3] sm:$0xff] %vm3376_vm1, %v3375_v8 }
 0x412 PF: > { %p3378_p5 = scmp.eq.s32.totalorder %s4515_s9, 3 }
 0x414   : > { %p3379_p8 = pnand %p3378_p5, %p3319_p4 }
 0x415   : > { %v3883_v11 = vld [vmem:[#allocation4] ss:$0 sm:$0xff] (!%p3379_p8)  ;;  %vm3393_vm2 = vcmask (!%p3379_p8), 7168  }
 0x416   : > { %3382 = sbr.rel (%p3379_p8) target bundleno = 1054 (0x41e), region = 110 }
 0x418   : > { %v3383_v10 = vld [vmem:[#allocation3] sm:$0xff] (!%p3379_p8) }
 0x419   : > { %v3391_v12 = vadd.f32 (!%p3379_p8), %v3883_v11, %v3383_v10 }
 0x41b   : > { %v3392_v9 = vmax.f32 (!%p3379_p8), %v3391_v12, 0.0 }
 0x41d   : > { %3394 = vst.msk [vmem:[%s5624_s7] sm:$0xff] %vm3393_vm2, %v3392_v9 }
 0x41e PF: > { %s26_s11 = sadd.s32 1, %s4527_s11   ;;  %s5647_s8 = sld [smem:[#allocation17_spill]] }
 0x41f   : > { %p23_p7 = scmp.ge.s32.totalorder %s26_s11, 34   ;;  %s5648_s9 = sld [smem:[#allocation13_spill]] }
 0x420   : > { %s5649_s1 = sld [smem:[#allocation14_spill]]  ;;  %s5650_s5 = sld [smem:[#allocation15_spill]] }
 0x421   : > { %s5651_s10 = sld [smem:[#allocation16_spill]]  ;;  %s5652_s26 = smov %s4495_s27 }
 0x422   : > { %s5653_s27 = smov %s4499_s28  ;;  %s5654_s28 = smov %s4664_s23 }
 0x423   : > { %s5655_s29 = smov %s4507_s30  ;;  %25 = sbr.rel (!%p23_p7) target bundleno = 11 (0xb), region = 185 }
 0x424   : > { %s5656_s30 = smov %s5647_s8 }
 0x425   : > { %s5657_s8 = smov %s5648_s9 }
 0x426   : > { %s5658_s9 = smov %s5649_s1 }
 0x42a   :  { %3439 = vsyncpa [#allocation7], 1 }
 0x42b   :  { %3441 = vsyncpa [#allocation7 + $0x1], 1 }
 0x42c   :  { %3442 = vsyncpa [#allocation9], 1 }
 0x42d   :  { %3444 = vsyncpa [#allocation9 + $0x1], 1 }

</bundles_post_ra>
